<compile_context>
chip_gen: v7x
topology: tpu7x:2x2x1
jax: 0.10.0
libtpu: 0.0.40
codegen_flags: <defaults>
</compile_context>

<pallas_src>
import jax
import jax.numpy as jnp
from jax import lax
from jax.experimental import pallas as pl
from jax.experimental.pallas import tpu as pltpu


# --------------------------------------------------------------------------- fused kernel
def _fused_text_detector_kernel(x_ref, w1_ref, w2_ref, g1_ref, b1_ref,
                                wt1_ref, bt1_ref, g2_ref, b2_ref,
                                wt2_ref, bt2_ref, o_ref, pad_ref):
    # x_ref : (N, H, W, C)  NHWC input, whole batch resident in VMEM
    # w1_ref: (9*C, C)      im2col-packed conv1 weights (bias=False)
    # w2_ref: (9*C, C2)     im2col-packed conv2 weights (bias=False)
    # g/b   : (1, C2)       BatchNorm gamma/beta
    # wt1_ref:(C2, 4*C2)    deconv1 weights, columns ordered (kh, kw, co)
    # bt1_ref:(1, 4*C2)     deconv1 bias tiled over the 4 taps
    # wt2_ref:(4*C2, 16)    deconv2 as block-diagonal matmul, columns = 4x4 sub-grid (ry, rx)
    # bt2_ref:(1, 16)
    # o_ref : (N, H, W, 16) packed output: o[n, y, x, ry*4+rx] = y4[n, 0, 4y+ry, 4x+rx]
    # pad_ref: VMEM scratch (H+2, W+2, C), shared padded image for both convs
    N, H, W, C = x_ref.shape
    C2 = w2_ref.shape[-1]
    HW = H * W
    f32 = jnp.float32
    eps = 1e-5

    # Zero the shared padded scratch ONCE; only the interior is overwritten below,
    # so the 1-pixel border stays zero for every conv of every image.
    pad_ref[...] = jnp.zeros_like(pad_ref)

    w1 = w1_ref[...]
    w2 = w2_ref[...]

    def conv3x3_im2col(w):
        # Read the 9 shifted taps straight from the padded ref (no value-slice copies)
        # and contract them in ONE MXU matmul with K = 9*C.
        cols = [pad_ref[pl.ds(dy, H), pl.ds(dx, W), :].reshape(HW, C)
                for dy in range(3) for dx in range(3)]
        patches = jnp.concatenate(cols, axis=-1)                       # (HW, 9*C)
        return jnp.dot(patches, w, preferred_element_type=f32)

    # ---- conv1 -> conv2 (whole batch, VMEM resident) -------------------------------
    y2s = []
    for n in range(N):
        pad_ref[pl.ds(1, H), pl.ds(1, W), :] = x_ref[n].astype(f32)
        y1 = conv3x3_im2col(w1)                                        # (HW, C)
        pad_ref[pl.ds(1, H), pl.ds(1, W), :] = y1.reshape(H, W, C)
        y2s.append(conv3x3_im2col(w2))                                 # (HW, C2)

    # ---- BatchNorm1 (training-mode batch stats, biased var, two-pass) ---------------
    cnt1 = float(N * HW)
    mean1 = sum(jnp.sum(y, axis=0, keepdims=True) for y in y2s) / cnt1           # (1, C2)
    var1 = sum(jnp.sum((y - mean1) ** 2, axis=0, keepdims=True) for y in y2s) / cnt1
    scale1 = g1_ref[...] * lax.rsqrt(var1 + eps)
    shift1 = b1_ref[...] - mean1 * scale1

    # ---- ReLU -> ConvTranspose1: all 4 taps in one matmul, kept tap-packed ----------
    wt1 = wt1_ref[...]                                                 # (C2, 4*C2)
    bt1 = bt1_ref[...]                                                 # (1, 4*C2)
    d1s = []
    for n in range(N):
        a1 = jnp.maximum(y2s[n] * scale1 + shift1, 0.0)                # (HW, C2)
        d1s.append(jnp.dot(a1, wt1, preferred_element_type=f32) + bt1)  # (HW, 4*C2)

    # ---- BatchNorm2 on the tap-packed layout (stats per channel co) -----------------
    cnt2 = float(N * 4 * HW)                                           # = N*(2H)*(2W)
    csum = sum(jnp.sum(d, axis=0, keepdims=True) for d in d1s)         # (1, 4*C2)
    mean2 = sum(csum[:, k * C2:(k + 1) * C2] for k in range(4)) / cnt2  # (1, C2)
    mean2c = jnp.concatenate([mean2] * 4, axis=-1)                     # (1, 4*C2)
    vsum = sum(jnp.sum((d - mean2c) ** 2, axis=0, keepdims=True) for d in d1s)
    var2 = sum(vsum[:, k * C2:(k + 1) * C2] for k in range(4)) / cnt2
    scale2 = g2_ref[...] * lax.rsqrt(var2 + eps)
    shift2 = b2_ref[...] - mean2 * scale2
    scale2c = jnp.concatenate([scale2] * 4, axis=-1)
    shift2c = jnp.concatenate([shift2] * 4, axis=-1)

    # ---- ReLU -> ConvTranspose2 as a single block-diagonal matmul -------------------
    wt2 = wt2_ref[...]                                                 # (4*C2, 16)
    bt2 = bt2_ref[...]                                                 # (1, 16)
    for n in range(N):
        a2 = jnp.maximum(d1s[n] * scale2c + shift2c, 0.0)              # (HW, 4*C2)
        o = jnp.dot(a2, wt2, preferred_element_type=f32) + bt2         # (HW, 16)
        o_ref[n] = o.reshape(H, W, 16).astype(o_ref.dtype)


# --------------------------------------------------------------------------- wrapper
def text_detector_forward(x_nchw, p):
    N, C, H, W = x_nchw.shape
    x = jnp.transpose(x_nchw, (0, 2, 3, 1))                            # NCHW -> NHWC (tiny)
    out_packed = pl.pallas_call(
        _fused_text_detector_kernel,
        out_shape=jax.ShapeDtypeStruct((N, H, W, 16), jnp.float32),
        scratch_shapes=[pltpu.VMEM((H + 2, W + 2, C), jnp.float32)],
    )(x, p["w1p"], p["w2p"], p["g1"], p["b1"], p["wt1p"], p["bt1p"],
      p["g2"], p["b2"], p["wt2big"], p["bt2p"])
    # Un-pack the 4x4 sub-grid: out[n, 0, 4y+ry, 4x+rx] = packed[n, y, x, ry*4+rx]
    out = out_packed.reshape(N, H, W, 4, 4).transpose(0, 1, 3, 2, 4)
    return out.reshape(N, 1, 4 * H, 4 * W)


def pack_params(w1, w2, g1, b1, wt1_pt, bt1, g2, b2, wt2_pt, bt2):
    """Repack PyTorch-layout weights for the fused kernel."""
    C = w1.shape[2]
    C2 = w2.shape[3]
    # ConvTranspose2d(C2, 1, 2, 2) folded into a block-diagonal (4*C2, 16) matrix whose
    # columns index the 4x4 output sub-grid (ry, rx) = (2*kh + kh2, 2*kw + kw2).
    wt2big = jnp.zeros((4 * C2, 16), jnp.float32)
    for ry in range(4):
        for rx in range(4):
            kh, kh2 = divmod(ry, 2)
            kw, kw2 = divmod(rx, 2)
            blk = kh * 2 + kw
            wt2big = wt2big.at[blk * C2:(blk + 1) * C2, ry * 4 + rx].set(wt2_pt[:, 0, kh2, kw2])
    return {
        "w1p": w1.reshape(9 * C, C),                                   # HWIO -> (9*C, C)
        "w2p": w2.reshape(9 * C, C2),
        "g1": g1.reshape(1, C2), "b1": b1.reshape(1, C2),
        "wt1p": jnp.transpose(wt1_pt, (0, 2, 3, 1)).reshape(C2, 4 * C2),  # (ci,(kh,kw,co))
        "bt1p": jnp.tile(bt1, 4).reshape(1, 4 * C2),
        "g2": g2.reshape(1, C2), "b2": b2.reshape(1, C2),
        "wt2big": wt2big,
        "bt2p": jnp.full((1, 16), bt2[0], jnp.float32),
    }


# --------------------------------------------------------------------------- pure-JAX reference
def reference_forward(x_nchw, w1, w2, g1, b1, wt1_pt, bt1, g2, b2, wt2_pt, bt2):
    x = jnp.transpose(x_nchw, (0, 2, 3, 1))
    dn = ("NHWC", "HWIO", "NHWC")
    hi = lax.Precision.HIGHEST
    y1 = lax.conv_general_dilated(x, w1, (1, 1), "SAME", dimension_numbers=dn, precision=hi)
    y2 = lax.conv_general_dilated(y1, w2, (1, 1), "SAME", dimension_numbers=dn, precision=hi)

    def bn_relu(y, g, b, eps=1e-5):
        m = jnp.mean(y, axis=(0, 1, 2))
        v = jnp.mean((y - m) ** 2, axis=(0, 1, 2))
        return jnp.maximum((y - m) * lax.rsqrt(v + eps) * g + b, 0.0)

    def deconv(a, w_pt, b):                                            # w_pt: (Cin, Cout, 2, 2)
        Nb, Hh, Ww = a.shape[:3]
        Co = w_pt.shape[1]
        r = jnp.einsum("nhwc,cdyx->nhwyxd", a, w_pt, precision=hi)
        r = r.transpose(0, 1, 3, 2, 4, 5).reshape(Nb, 2 * Hh, 2 * Ww, Co)
        return r + b

    a1 = bn_relu(y2, g1, b1)
    y3 = deconv(a1, wt1_pt, bt1)
    a2 = bn_relu(y3, g2, b2)
    y4 = deconv(a2, wt2_pt, bt2)
    return jnp.transpose(y4, (0, 3, 1, 2))


# --------------------------------------------------------------------------- main
if __name__ == "__main__":
    N, C, H, W = 2, 16, 16, 16          # inner_channels = 16, C // 4 = 4
    C2 = C // 4

    key = jax.random.PRNGKey(0)
    kx, k1, k2, k3, k4, k5, k6, k7, k8, k9, k10 = jax.random.split(key, 11)

    x = jax.random.normal(kx, (N, C, H, W), jnp.float32)

    w1 = jax.random.normal(k1, (3, 3, C, C), jnp.float32) * 0.1        # HWIO, bias=False
    w2 = jax.random.normal(k2, (3, 3, C, C2), jnp.float32) * 0.1       # HWIO, bias=False
    wt1_pt = jax.random.normal(k3, (C2, C2, 2, 2), jnp.float32) * 0.1  # (Cin, Cout, kH, kW)
    bt1 = jax.random.normal(k4, (C2,), jnp.float32) * 0.1
    wt2_pt = jax.random.normal(k5, (C2, 1, 2, 2), jnp.float32) * 0.1
    bt2 = jax.random.normal(k6, (1,), jnp.float32) * 0.1
    g1 = 1.0 + 0.1 * jax.random.normal(k7, (C2,), jnp.float32)
    b1 = 0.1 * jax.random.normal(k8, (C2,), jnp.float32)
    g2 = 1.0 + 0.1 * jax.random.normal(k9, (C2,), jnp.float32)
    b2 = 0.1 * jax.random.normal(k10, (C2,), jnp.float32)

    params = pack_params(w1, w2, g1, b1, wt1_pt, bt1, g2, b2, wt2_pt, bt2)

    fwd = jax.jit(lambda xx: text_detector_forward(xx, params))
    out = jax.block_until_ready(fwd(x))
    assert out.shape == (N, 1, 4 * H, 4 * W), out.shape

    ref = jax.block_until_ready(
        reference_forward(x, w1, w2, g1, b1, wt1_pt, bt1, g2, b2, wt2_pt, bt2))
    err = float(jnp.max(jnp.abs(out - ref)))
    assert jnp.allclose(out, ref, atol=2e-3, rtol=2e-3), err

    print("KERNEL_OK")
</pallas_src>

<mosaic_0001>
module attributes {stable_mosaic.version = 11 : i64} {
  func.func @_fused_text_detector_kernel(%arg0: memref<2x16x16x16xf32, #tpu.memory_space<vmem>>, %arg1: memref<144x16xf32, #tpu.memory_space<vmem>>, %arg2: memref<144x4xf32, #tpu.memory_space<vmem>>, %arg3: memref<1x4xf32, #tpu.memory_space<vmem>>, %arg4: memref<1x4xf32, #tpu.memory_space<vmem>>, %arg5: memref<4x16xf32, #tpu.memory_space<vmem>>, %arg6: memref<1x16xf32, #tpu.memory_space<vmem>>, %arg7: memref<1x4xf32, #tpu.memory_space<vmem>>, %arg8: memref<1x4xf32, #tpu.memory_space<vmem>>, %arg9: memref<16x16xf32, #tpu.memory_space<vmem>>, %arg10: memref<1x16xf32, #tpu.memory_space<vmem>>, %arg11: memref<2x16x16x16xf32, #tpu.memory_space<vmem>>, %arg12: memref<18x18x16xf32, #tpu.memory_space<vmem>>) attributes {dimension_semantics = [], scalar_prefetch = 0 : i64, scratch_operands = 1 : i64, tpu.core_type = #tpu.core_type<tc>} {
    %cst = arith.constant 0.000000e+00 : f32
    %0 = vector.broadcast %cst : f32 to vector<18x18x16xf32>
    %c0 = arith.constant 0 : index
    %c0_0 = arith.constant 0 : index
    %c0_1 = arith.constant 0 : index
    %1 = vector.load %arg12[%c0, %c0_0, %c0_1] : memref<18x18x16xf32, #tpu.memory_space<vmem>>, vector<18x18x16xf32>
    tpu.vector_store %arg12[%c0, %c0_0, %c0_1], %0 {strides = array<i32>} : memref<18x18x16xf32, #tpu.memory_space<vmem>>, vector<18x18x16xf32>,
    %c0_2 = arith.constant 0 : index
    %c0_3 = arith.constant 0 : index
    %2 = vector.load %arg1[%c0_2, %c0_3] : memref<144x16xf32, #tpu.memory_space<vmem>>, vector<144x16xf32>
    %c0_4 = arith.constant 0 : index
    %c0_5 = arith.constant 0 : index
    %3 = vector.load %arg2[%c0_4, %c0_5] : memref<144x4xf32, #tpu.memory_space<vmem>>, vector<144x4xf32>
    %c0_6 = arith.constant 0 : index
    %c0_7 = arith.constant 0 : index
    %c0_8 = arith.constant 0 : index
    %c0_9 = arith.constant 0 : index
    %4 = vector.load %arg0[%c0_6, %c0_7, %c0_8, %c0_9] : memref<2x16x16x16xf32, #tpu.memory_space<vmem>>, vector<1x16x16x16xf32>
    %5 = vector.shape_cast %4 : vector<1x16x16x16xf32> to vector<16x16x16xf32>
    %c1 = arith.constant 1 : index
    %c1_10 = arith.constant 1 : index
    %c0_11 = arith.constant 0 : index
    %6 = vector.load %arg12[%c1, %c1_10, %c0_11] : memref<18x18x16xf32, #tpu.memory_space<vmem>>, vector<16x16x16xf32>
    tpu.vector_store %arg12[%c1, %c1_10, %c0_11], %5 {strides = array<i32>} : memref<18x18x16xf32, #tpu.memory_space<vmem>>, vector<16x16x16xf32>,
    %c0_12 = arith.constant 0 : index
    %c0_13 = arith.constant 0 : index
    %c0_14 = arith.constant 0 : index
    %7 = vector.load %arg12[%c0_12, %c0_13, %c0_14] : memref<18x18x16xf32, #tpu.memory_space<vmem>>, vector<16x16x16xf32>
    %8 = vector.shape_cast %7 : vector<16x16x16xf32> to vector<256x16xf32>
    %c0_15 = arith.constant 0 : index
    %c1_16 = arith.constant 1 : index
    %c0_17 = arith.constant 0 : index
    %9 = vector.load %arg12[%c0_15, %c1_16, %c0_17] : memref<18x18x16xf32, #tpu.memory_space<vmem>>, vector<16x16x16xf32>
    %10 = vector.shape_cast %9 : vector<16x16x16xf32> to vector<256x16xf32>
    %c0_18 = arith.constant 0 : index
    %c2 = arith.constant 2 : index
    %c0_19 = arith.constant 0 : index
    %11 = vector.load %arg12[%c0_18, %c2, %c0_19] : memref<18x18x16xf32, #tpu.memory_space<vmem>>, vector<16x16x16xf32>
    %12 = vector.shape_cast %11 : vector<16x16x16xf32> to vector<256x16xf32>
    %c1_20 = arith.constant 1 : index
    %c0_21 = arith.constant 0 : index
    %c0_22 = arith.constant 0 : index
    %13 = vector.load %arg12[%c1_20, %c0_21, %c0_22] : memref<18x18x16xf32, #tpu.memory_space<vmem>>, vector<16x16x16xf32>
    %14 = vector.shape_cast %13 : vector<16x16x16xf32> to vector<256x16xf32>
    %c1_23 = arith.constant 1 : index
    %c1_24 = arith.constant 1 : index
    %c0_25 = arith.constant 0 : index
    %15 = vector.load %arg12[%c1_23, %c1_24, %c0_25] : memref<18x18x16xf32, #tpu.memory_space<vmem>>, vector<16x16x16xf32>
    %16 = vector.shape_cast %15 : vector<16x16x16xf32> to vector<256x16xf32>
    %c1_26 = arith.constant 1 : index
    %c2_27 = arith.constant 2 : index
    %c0_28 = arith.constant 0 : index
    %17 = vector.load %arg12[%c1_26, %c2_27, %c0_28] : memref<18x18x16xf32, #tpu.memory_space<vmem>>, vector<16x16x16xf32>
    %18 = vector.shape_cast %17 : vector<16x16x16xf32> to vector<256x16xf32>
    %c2_29 = arith.constant 2 : index
    %c0_30 = arith.constant 0 : index
    %c0_31 = arith.constant 0 : index
    %19 = vector.load %arg12[%c2_29, %c0_30, %c0_31] : memref<18x18x16xf32, #tpu.memory_space<vmem>>, vector<16x16x16xf32>
    %20 = vector.shape_cast %19 : vector<16x16x16xf32> to vector<256x16xf32>
    %c2_32 = arith.constant 2 : index
    %c1_33 = arith.constant 1 : index
    %c0_34 = arith.constant 0 : index
    %21 = vector.load %arg12[%c2_32, %c1_33, %c0_34] : memref<18x18x16xf32, #tpu.memory_space<vmem>>, vector<16x16x16xf32>
    %22 = vector.shape_cast %21 : vector<16x16x16xf32> to vector<256x16xf32>
    %c2_35 = arith.constant 2 : index
    %c2_36 = arith.constant 2 : index
    %c0_37 = arith.constant 0 : index
    %23 = vector.load %arg12[%c2_35, %c2_36, %c0_37] : memref<18x18x16xf32, #tpu.memory_space<vmem>>, vector<16x16x16xf32>
    %24 = vector.shape_cast %23 : vector<16x16x16xf32> to vector<256x16xf32>
    %25 = tpu.concatenate %8, %10, %12, %14, %16, %18, %20, %22, %24 in 1 : vector<256x16xf32>, vector<256x16xf32>, vector<256x16xf32>, vector<256x16xf32>, vector<256x16xf32>, vector<256x16xf32>, vector<256x16xf32>, vector<256x16xf32>, vector<256x16xf32> -> vector<256x144xf32>
    %cst_38 = arith.constant dense<0.000000e+00> : vector<256x16xf32>
    %26 = tpu.matmul %25, %2, %cst_38 {dimension_numbers = #tpu.dot_dimension_numbers<[1], [0], [0], [1], [0, 0, 1, 1], [], []>} : vector<256x144xf32>, vector<144x16xf32>, vector<256x16xf32> -> vector<256x16xf32>
    %27 = vector.shape_cast %26 : vector<256x16xf32> to vector<16x16x16xf32>
    %c1_39 = arith.constant 1 : index
    %c1_40 = arith.constant 1 : index
    %c0_41 = arith.constant 0 : index
    %28 = vector.load %arg12[%c1_39, %c1_40, %c0_41] : memref<18x18x16xf32, #tpu.memory_space<vmem>>, vector<16x16x16xf32>
    tpu.vector_store %arg12[%c1_39, %c1_40, %c0_41], %27 {strides = array<i32>} : memref<18x18x16xf32, #tpu.memory_space<vmem>>, vector<16x16x16xf32>,
    %c0_42 = arith.constant 0 : index
    %c0_43 = arith.constant 0 : index
    %c0_44 = arith.constant 0 : index
    %29 = vector.load %arg12[%c0_42, %c0_43, %c0_44] : memref<18x18x16xf32, #tpu.memory_space<vmem>>, vector<16x16x16xf32>
    %30 = vector.shape_cast %29 : vector<16x16x16xf32> to vector<256x16xf32>
    %c0_45 = arith.constant 0 : index
    %c1_46 = arith.constant 1 : index
    %c0_47 = arith.constant 0 : index
    %31 = vector.load %arg12[%c0_45, %c1_46, %c0_47] : memref<18x18x16xf32, #tpu.memory_space<vmem>>, vector<16x16x16xf32>
    %32 = vector.shape_cast %31 : vector<16x16x16xf32> to vector<256x16xf32>
    %c0_48 = arith.constant 0 : index
    %c2_49 = arith.constant 2 : index
    %c0_50 = arith.constant 0 : index
    %33 = vector.load %arg12[%c0_48, %c2_49, %c0_50] : memref<18x18x16xf32, #tpu.memory_space<vmem>>, vector<16x16x16xf32>
    %34 = vector.shape_cast %33 : vector<16x16x16xf32> to vector<256x16xf32>
    %c1_51 = arith.constant 1 : index
    %c0_52 = arith.constant 0 : index
    %c0_53 = arith.constant 0 : index
    %35 = vector.load %arg12[%c1_51, %c0_52, %c0_53] : memref<18x18x16xf32, #tpu.memory_space<vmem>>, vector<16x16x16xf32>
    %36 = vector.shape_cast %35 : vector<16x16x16xf32> to vector<256x16xf32>
    %c1_54 = arith.constant 1 : index
    %c1_55 = arith.constant 1 : index
    %c0_56 = arith.constant 0 : index
    %37 = vector.load %arg12[%c1_54, %c1_55, %c0_56] : memref<18x18x16xf32, #tpu.memory_space<vmem>>, vector<16x16x16xf32>
    %38 = vector.shape_cast %37 : vector<16x16x16xf32> to vector<256x16xf32>
    %c1_57 = arith.constant 1 : index
    %c2_58 = arith.constant 2 : index
    %c0_59 = arith.constant 0 : index
    %39 = vector.load %arg12[%c1_57, %c2_58, %c0_59] : memref<18x18x16xf32, #tpu.memory_space<vmem>>, vector<16x16x16xf32>
    %40 = vector.shape_cast %39 : vector<16x16x16xf32> to vector<256x16xf32>
    %c2_60 = arith.constant 2 : index
    %c0_61 = arith.constant 0 : index
    %c0_62 = arith.constant 0 : index
    %41 = vector.load %arg12[%c2_60, %c0_61, %c0_62] : memref<18x18x16xf32, #tpu.memory_space<vmem>>, vector<16x16x16xf32>
    %42 = vector.shape_cast %41 : vector<16x16x16xf32> to vector<256x16xf32>
    %c2_63 = arith.constant 2 : index
    %c1_64 = arith.constant 1 : index
    %c0_65 = arith.constant 0 : index
    %43 = vector.load %arg12[%c2_63, %c1_64, %c0_65] : memref<18x18x16xf32, #tpu.memory_space<vmem>>, vector<16x16x16xf32>
    %44 = vector.shape_cast %43 : vector<16x16x16xf32> to vector<256x16xf32>
    %c2_66 = arith.constant 2 : index
    %c2_67 = arith.constant 2 : index
    %c0_68 = arith.constant 0 : index
    %45 = vector.load %arg12[%c2_66, %c2_67, %c0_68] : memref<18x18x16xf32, #tpu.memory_space<vmem>>, vector<16x16x16xf32>
    %46 = vector.shape_cast %45 : vector<16x16x16xf32> to vector<256x16xf32>
    %47 = tpu.concatenate %30, %32, %34, %36, %38, %40, %42, %44, %46 in 1 : vector<256x16xf32>, vector<256x16xf32>, vector<256x16xf32>, vector<256x16xf32>, vector<256x16xf32>, vector<256x16xf32>, vector<256x16xf32>, vector<256x16xf32>, vector<256x16xf32> -> vector<256x144xf32>
    %cst_69 = arith.constant dense<0.000000e+00> : vector<256x4xf32>
    %48 = tpu.matmul %47, %3, %cst_69 {dimension_numbers = #tpu.dot_dimension_numbers<[1], [0], [0], [1], [0, 0, 1, 1], [], []>} : vector<256x144xf32>, vector<144x4xf32>, vector<256x4xf32> -> vector<256x4xf32>
    %c1_70 = arith.constant 1 : index
    %c0_71 = arith.constant 0 : index
    %c0_72 = arith.constant 0 : index
    %c0_73 = arith.constant 0 : index
    %49 = vector.load %arg0[%c1_70, %c0_71, %c0_72, %c0_73] : memref<2x16x16x16xf32, #tpu.memory_space<vmem>>, vector<1x16x16x16xf32>
    %50 = vector.shape_cast %49 : vector<1x16x16x16xf32> to vector<16x16x16xf32>
    %c1_74 = arith.constant 1 : index
    %c1_75 = arith.constant 1 : index
    %c0_76 = arith.constant 0 : index
    %51 = vector.load %arg12[%c1_74, %c1_75, %c0_76] : memref<18x18x16xf32, #tpu.memory_space<vmem>>, vector<16x16x16xf32>
    tpu.vector_store %arg12[%c1_74, %c1_75, %c0_76], %50 {strides = array<i32>} : memref<18x18x16xf32, #tpu.memory_space<vmem>>, vector<16x16x16xf32>,
    %c0_77 = arith.constant 0 : index
    %c0_78 = arith.constant 0 : index
    %c0_79 = arith.constant 0 : index
    %52 = vector.load %arg12[%c0_77, %c0_78, %c0_79] : memref<18x18x16xf32, #tpu.memory_space<vmem>>, vector<16x16x16xf32>
    %53 = vector.shape_cast %52 : vector<16x16x16xf32> to vector<256x16xf32>
    %c0_80 = arith.constant 0 : index
    %c1_81 = arith.constant 1 : index
    %c0_82 = arith.constant 0 : index
    %54 = vector.load %arg12[%c0_80, %c1_81, %c0_82] : memref<18x18x16xf32, #tpu.memory_space<vmem>>, vector<16x16x16xf32>
    %55 = vector.shape_cast %54 : vector<16x16x16xf32> to vector<256x16xf32>
    %c0_83 = arith.constant 0 : index
    %c2_84 = arith.constant 2 : index
    %c0_85 = arith.constant 0 : index
    %56 = vector.load %arg12[%c0_83, %c2_84, %c0_85] : memref<18x18x16xf32, #tpu.memory_space<vmem>>, vector<16x16x16xf32>
    %57 = vector.shape_cast %56 : vector<16x16x16xf32> to vector<256x16xf32>
    %c1_86 = arith.constant 1 : index
    %c0_87 = arith.constant 0 : index
    %c0_88 = arith.constant 0 : index
    %58 = vector.load %arg12[%c1_86, %c0_87, %c0_88] : memref<18x18x16xf32, #tpu.memory_space<vmem>>, vector<16x16x16xf32>
    %59 = vector.shape_cast %58 : vector<16x16x16xf32> to vector<256x16xf32>
    %c1_89 = arith.constant 1 : index
    %c1_90 = arith.constant 1 : index
    %c0_91 = arith.constant 0 : index
    %60 = vector.load %arg12[%c1_89, %c1_90, %c0_91] : memref<18x18x16xf32, #tpu.memory_space<vmem>>, vector<16x16x16xf32>
    %61 = vector.shape_cast %60 : vector<16x16x16xf32> to vector<256x16xf32>
    %c1_92 = arith.constant 1 : index
    %c2_93 = arith.constant 2 : index
    %c0_94 = arith.constant 0 : index
    %62 = vector.load %arg12[%c1_92, %c2_93, %c0_94] : memref<18x18x16xf32, #tpu.memory_space<vmem>>, vector<16x16x16xf32>
    %63 = vector.shape_cast %62 : vector<16x16x16xf32> to vector<256x16xf32>
    %c2_95 = arith.constant 2 : index
    %c0_96 = arith.constant 0 : index
    %c0_97 = arith.constant 0 : index
    %64 = vector.load %arg12[%c2_95, %c0_96, %c0_97] : memref<18x18x16xf32, #tpu.memory_space<vmem>>, vector<16x16x16xf32>
    %65 = vector.shape_cast %64 : vector<16x16x16xf32> to vector<256x16xf32>
    %c2_98 = arith.constant 2 : index
    %c1_99 = arith.constant 1 : index
    %c0_100 = arith.constant 0 : index
    %66 = vector.load %arg12[%c2_98, %c1_99, %c0_100] : memref<18x18x16xf32, #tpu.memory_space<vmem>>, vector<16x16x16xf32>
    %67 = vector.shape_cast %66 : vector<16x16x16xf32> to vector<256x16xf32>
    %c2_101 = arith.constant 2 : index
    %c2_102 = arith.constant 2 : index
    %c0_103 = arith.constant 0 : index
    %68 = vector.load %arg12[%c2_101, %c2_102, %c0_103] : memref<18x18x16xf32, #tpu.memory_space<vmem>>, vector<16x16x16xf32>
    %69 = vector.shape_cast %68 : vector<16x16x16xf32> to vector<256x16xf32>
    %70 = tpu.concatenate %53, %55, %57, %59, %61, %63, %65, %67, %69 in 1 : vector<256x16xf32>, vector<256x16xf32>, vector<256x16xf32>, vector<256x16xf32>, vector<256x16xf32>, vector<256x16xf32>, vector<256x16xf32>, vector<256x16xf32>, vector<256x16xf32> -> vector<256x144xf32>
    %cst_104 = arith.constant dense<0.000000e+00> : vector<256x16xf32>
    %71 = tpu.matmul %70, %2, %cst_104 {dimension_numbers = #tpu.dot_dimension_numbers<[1], [0], [0], [1], [0, 0, 1, 1], [], []>} : vector<256x144xf32>, vector<144x16xf32>, vector<256x16xf32> -> vector<256x16xf32>
    %72 = vector.shape_cast %71 : vector<256x16xf32> to vector<16x16x16xf32>
    %c1_105 = arith.constant 1 : index
    %c1_106 = arith.constant 1 : index
    %c0_107 = arith.constant 0 : index
    %73 = vector.load %arg12[%c1_105, %c1_106, %c0_107] : memref<18x18x16xf32, #tpu.memory_space<vmem>>, vector<16x16x16xf32>
    tpu.vector_store %arg12[%c1_105, %c1_106, %c0_107], %72 {strides = array<i32>} : memref<18x18x16xf32, #tpu.memory_space<vmem>>, vector<16x16x16xf32>,
    %c0_108 = arith.constant 0 : index
    %c0_109 = arith.constant 0 : index
    %c0_110 = arith.constant 0 : index
    %74 = vector.load %arg12[%c0_108, %c0_109, %c0_110] : memref<18x18x16xf32, #tpu.memory_space<vmem>>, vector<16x16x16xf32>
    %75 = vector.shape_cast %74 : vector<16x16x16xf32> to vector<256x16xf32>
    %c0_111 = arith.constant 0 : index
    %c1_112 = arith.constant 1 : index
    %c0_113 = arith.constant 0 : index
    %76 = vector.load %arg12[%c0_111, %c1_112, %c0_113] : memref<18x18x16xf32, #tpu.memory_space<vmem>>, vector<16x16x16xf32>
    %77 = vector.shape_cast %76 : vector<16x16x16xf32> to vector<256x16xf32>
    %c0_114 = arith.constant 0 : index
    %c2_115 = arith.constant 2 : index
    %c0_116 = arith.constant 0 : index
    %78 = vector.load %arg12[%c0_114, %c2_115, %c0_116] : memref<18x18x16xf32, #tpu.memory_space<vmem>>, vector<16x16x16xf32>
    %79 = vector.shape_cast %78 : vector<16x16x16xf32> to vector<256x16xf32>
    %c1_117 = arith.constant 1 : index
    %c0_118 = arith.constant 0 : index
    %c0_119 = arith.constant 0 : index
    %80 = vector.load %arg12[%c1_117, %c0_118, %c0_119] : memref<18x18x16xf32, #tpu.memory_space<vmem>>, vector<16x16x16xf32>
    %81 = vector.shape_cast %80 : vector<16x16x16xf32> to vector<256x16xf32>
    %c1_120 = arith.constant 1 : index
    %c1_121 = arith.constant 1 : index
    %c0_122 = arith.constant 0 : index
    %82 = vector.load %arg12[%c1_120, %c1_121, %c0_122] : memref<18x18x16xf32, #tpu.memory_space<vmem>>, vector<16x16x16xf32>
    %83 = vector.shape_cast %82 : vector<16x16x16xf32> to vector<256x16xf32>
    %c1_123 = arith.constant 1 : index
    %c2_124 = arith.constant 2 : index
    %c0_125 = arith.constant 0 : index
    %84 = vector.load %arg12[%c1_123, %c2_124, %c0_125] : memref<18x18x16xf32, #tpu.memory_space<vmem>>, vector<16x16x16xf32>
    %85 = vector.shape_cast %84 : vector<16x16x16xf32> to vector<256x16xf32>
    %c2_126 = arith.constant 2 : index
    %c0_127 = arith.constant 0 : index
    %c0_128 = arith.constant 0 : index
    %86 = vector.load %arg12[%c2_126, %c0_127, %c0_128] : memref<18x18x16xf32, #tpu.memory_space<vmem>>, vector<16x16x16xf32>
    %87 = vector.shape_cast %86 : vector<16x16x16xf32> to vector<256x16xf32>
    %c2_129 = arith.constant 2 : index
    %c1_130 = arith.constant 1 : index
    %c0_131 = arith.constant 0 : index
    %88 = vector.load %arg12[%c2_129, %c1_130, %c0_131] : memref<18x18x16xf32, #tpu.memory_space<vmem>>, vector<16x16x16xf32>
    %89 = vector.shape_cast %88 : vector<16x16x16xf32> to vector<256x16xf32>
    %c2_132 = arith.constant 2 : index
    %c2_133 = arith.constant 2 : index
    %c0_134 = arith.constant 0 : index
    %90 = vector.load %arg12[%c2_132, %c2_133, %c0_134] : memref<18x18x16xf32, #tpu.memory_space<vmem>>, vector<16x16x16xf32>
    %91 = vector.shape_cast %90 : vector<16x16x16xf32> to vector<256x16xf32>
    %92 = tpu.concatenate %75, %77, %79, %81, %83, %85, %87, %89, %91 in 1 : vector<256x16xf32>, vector<256x16xf32>, vector<256x16xf32>, vector<256x16xf32>, vector<256x16xf32>, vector<256x16xf32>, vector<256x16xf32>, vector<256x16xf32>, vector<256x16xf32> -> vector<256x144xf32>
    %cst_135 = arith.constant dense<0.000000e+00> : vector<256x4xf32>
    %93 = tpu.matmul %92, %3, %cst_135 {dimension_numbers = #tpu.dot_dimension_numbers<[1], [0], [0], [1], [0, 0, 1, 1], [], []>} : vector<256x144xf32>, vector<144x4xf32>, vector<256x4xf32> -> vector<256x4xf32>
    %cst_136 = arith.constant dense<0.000000e+00> : vector<4xf32>
    %94 = vector.multi_reduction <add>, %48, %cst_136 [0] : vector<256x4xf32> to vector<4xf32>
    %95 = vector.shape_cast %94 : vector<4xf32> to vector<1x4xf32>
    %cst_137 = arith.constant 0.000000e+00 : f32
    %96 = vector.broadcast %cst_137 : f32 to vector<1x4xf32>
    %97 = arith.addf %96, %95 : vector<1x4xf32>
    %cst_138 = arith.constant dense<0.000000e+00> : vector<4xf32>
    %98 = vector.multi_reduction <add>, %93, %cst_138 [0] : vector<256x4xf32> to vector<4xf32>
    %99 = vector.shape_cast %98 : vector<4xf32> to vector<1x4xf32>
    %100 = arith.addf %97, %99 : vector<1x4xf32>
    %cst_139 = arith.constant 5.120000e+02 : f32
    %101 = vector.broadcast %cst_139 : f32 to vector<1x4xf32>
    %102 = arith.divf %100, %101 : vector<1x4xf32>
    %103 = vector.broadcast %102 : vector<1x4xf32> to vector<256x4xf32>
    %104 = arith.subf %48, %103 : vector<256x4xf32>
    %105 = arith.mulf %104, %104 : vector<256x4xf32>
    %cst_140 = arith.constant dense<0.000000e+00> : vector<4xf32>
    %106 = vector.multi_reduction <add>, %105, %cst_140 [0] : vector<256x4xf32> to vector<4xf32>
    %107 = vector.shape_cast %106 : vector<4xf32> to vector<1x4xf32>
    %cst_141 = arith.constant 0.000000e+00 : f32
    %108 = vector.broadcast %cst_141 : f32 to vector<1x4xf32>
    %109 = arith.addf %108, %107 : vector<1x4xf32>
    %110 = vector.broadcast %102 : vector<1x4xf32> to vector<256x4xf32>
    %111 = arith.subf %93, %110 : vector<256x4xf32>
    %112 = arith.mulf %111, %111 : vector<256x4xf32>
    %cst_142 = arith.constant dense<0.000000e+00> : vector<4xf32>
    %113 = vector.multi_reduction <add>, %112, %cst_142 [0] : vector<256x4xf32> to vector<4xf32>
    %114 = vector.shape_cast %113 : vector<4xf32> to vector<1x4xf32>
    %115 = arith.addf %109, %114 : vector<1x4xf32>
    %cst_143 = arith.constant 5.120000e+02 : f32
    %116 = vector.broadcast %cst_143 : f32 to vector<1x4xf32>
    %117 = arith.divf %115, %116 : vector<1x4xf32>
    %c0_144 = arith.constant 0 : index
    %c0_145 = arith.constant 0 : index
    %118 = vector.load %arg3[%c0_144, %c0_145] : memref<1x4xf32, #tpu.memory_space<vmem>>, vector<1x4xf32>
    %cst_146 = arith.constant 9.99999974E-6 : f32
    %119 = vector.broadcast %cst_146 : f32 to vector<1x4xf32>
    %120 = arith.addf %117, %119 : vector<1x4xf32>
    %121 = math.rsqrt %120 : vector<1x4xf32>
    %122 = arith.mulf %118, %121 : vector<1x4xf32>
    %c0_147 = arith.constant 0 : index
    %c0_148 = arith.constant 0 : index
    %123 = vector.load %arg4[%c0_147, %c0_148] : memref<1x4xf32, #tpu.memory_space<vmem>>, vector<1x4xf32>
    %124 = arith.mulf %102, %122 : vector<1x4xf32>
    %125 = arith.subf %123, %124 : vector<1x4xf32>
    %c0_149 = arith.constant 0 : index
    %c0_150 = arith.constant 0 : index
    %126 = vector.load %arg5[%c0_149, %c0_150] : memref<4x16xf32, #tpu.memory_space<vmem>>, vector<4x16xf32>
    %c0_151 = arith.constant 0 : index
    %c0_152 = arith.constant 0 : index
    %127 = vector.load %arg6[%c0_151, %c0_152] : memref<1x16xf32, #tpu.memory_space<vmem>>, vector<1x16xf32>
    %128 = vector.broadcast %122 : vector<1x4xf32> to vector<256x4xf32>
    %129 = arith.mulf %48, %128 : vector<256x4xf32>
    %130 = vector.broadcast %125 : vector<1x4xf32> to vector<256x4xf32>
    %131 = arith.addf %129, %130 : vector<256x4xf32>
    %cst_153 = arith.constant 0.000000e+00 : f32
    %132 = vector.broadcast %cst_153 : f32 to vector<256x4xf32>
    %133 = arith.maximumf %131, %132 : vector<256x4xf32>
    %cst_154 = arith.constant dense<0.000000e+00> : vector<256x16xf32>
    %134 = tpu.matmul %133, %126, %cst_154 {dimension_numbers = #tpu.dot_dimension_numbers<[1], [0], [0], [1], [0, 0, 1, 1], [], []>} : vector<256x4xf32>, vector<4x16xf32>, vector<256x16xf32> -> vector<256x16xf32>
    %135 = vector.broadcast %127 : vector<1x16xf32> to vector<256x16xf32>
    %136 = arith.addf %134, %135 : vector<256x16xf32>
    %137 = vector.broadcast %122 : vector<1x4xf32> to vector<256x4xf32>
    %138 = arith.mulf %93, %137 : vector<256x4xf32>
    %139 = vector.broadcast %125 : vector<1x4xf32> to vector<256x4xf32>
    %140 = arith.addf %138, %139 : vector<256x4xf32>
    %cst_155 = arith.constant 0.000000e+00 : f32
    %141 = vector.broadcast %cst_155 : f32 to vector<256x4xf32>
    %142 = arith.maximumf %140, %141 : vector<256x4xf32>
    %cst_156 = arith.constant dense<0.000000e+00> : vector<256x16xf32>
    %143 = tpu.matmul %142, %126, %cst_156 {dimension_numbers = #tpu.dot_dimension_numbers<[1], [0], [0], [1], [0, 0, 1, 1], [], []>} : vector<256x4xf32>, vector<4x16xf32>, vector<256x16xf32> -> vector<256x16xf32>
    %144 = vector.broadcast %127 : vector<1x16xf32> to vector<256x16xf32>
    %145 = arith.addf %143, %144 : vector<256x16xf32>
    %cst_157 = arith.constant dense<0.000000e+00> : vector<16xf32>
    %146 = vector.multi_reduction <add>, %136, %cst_157 [0] : vector<256x16xf32> to vector<16xf32>
    %147 = vector.shape_cast %146 : vector<16xf32> to vector<1x16xf32>
    %cst_158 = arith.constant 0.000000e+00 : f32
    %148 = vector.broadcast %cst_158 : f32 to vector<1x16xf32>
    %149 = arith.addf %148, %147 : vector<1x16xf32>
    %cst_159 = arith.constant dense<0.000000e+00> : vector<16xf32>
    %150 = vector.multi_reduction <add>, %145, %cst_159 [0] : vector<256x16xf32> to vector<16xf32>
    %151 = vector.shape_cast %150 : vector<16xf32> to vector<1x16xf32>
    %152 = arith.addf %149, %151 : vector<1x16xf32>
    %153 = vector.extract_strided_slice %152 {offsets = [0, 0], sizes = [1, 4], strides = [1, 1]} : vector<1x16xf32> to vector<1x4xf32>
    %cst_160 = arith.constant 0.000000e+00 : f32
    %154 = vector.broadcast %cst_160 : f32 to vector<1x4xf32>
    %155 = arith.addf %154, %153 : vector<1x4xf32>
    %156 = vector.extract_strided_slice %152 {offsets = [0, 4], sizes = [1, 4], strides = [1, 1]} : vector<1x16xf32> to vector<1x4xf32>
    %157 = arith.addf %155, %156 : vector<1x4xf32>
    %158 = vector.extract_strided_slice %152 {offsets = [0, 8], sizes = [1, 4], strides = [1, 1]} : vector<1x16xf32> to vector<1x4xf32>
    %159 = arith.addf %157, %158 : vector<1x4xf32>
    %160 = vector.extract_strided_slice %152 {offsets = [0, 12], sizes = [1, 4], strides = [1, 1]} : vector<1x16xf32> to vector<1x4xf32>
    %161 = arith.addf %159, %160 : vector<1x4xf32>
    %cst_161 = arith.constant 2.048000e+03 : f32
    %162 = vector.broadcast %cst_161 : f32 to vector<1x4xf32>
    %163 = arith.divf %161, %162 : vector<1x4xf32>
    %164 = tpu.concatenate %163, %163, %163, %163 in 1 : vector<1x4xf32>, vector<1x4xf32>, vector<1x4xf32>, vector<1x4xf32> -> vector<1x16xf32>
    %165 = vector.broadcast %164 : vector<1x16xf32> to vector<256x16xf32>
    %166 = arith.subf %136, %165 : vector<256x16xf32>
    %167 = arith.mulf %166, %166 : vector<256x16xf32>
    %cst_162 = arith.constant dense<0.000000e+00> : vector<16xf32>
    %168 = vector.multi_reduction <add>, %167, %cst_162 [0] : vector<256x16xf32> to vector<16xf32>
    %169 = vector.shape_cast %168 : vector<16xf32> to vector<1x16xf32>
    %cst_163 = arith.constant 0.000000e+00 : f32
    %170 = vector.broadcast %cst_163 : f32 to vector<1x16xf32>
    %171 = arith.addf %170, %169 : vector<1x16xf32>
    %172 = vector.broadcast %164 : vector<1x16xf32> to vector<256x16xf32>
    %173 = arith.subf %145, %172 : vector<256x16xf32>
    %174 = arith.mulf %173, %173 : vector<256x16xf32>
    %cst_164 = arith.constant dense<0.000000e+00> : vector<16xf32>
    %175 = vector.multi_reduction <add>, %174, %cst_164 [0] : vector<256x16xf32> to vector<16xf32>
    %176 = vector.shape_cast %175 : vector<16xf32> to vector<1x16xf32>
    %177 = arith.addf %171, %176 : vector<1x16xf32>
    %178 = vector.extract_strided_slice %177 {offsets = [0, 0], sizes = [1, 4], strides = [1, 1]} : vector<1x16xf32> to vector<1x4xf32>
    %cst_165 = arith.constant 0.000000e+00 : f32
    %179 = vector.broadcast %cst_165 : f32 to vector<1x4xf32>
    %180 = arith.addf %179, %178 : vector<1x4xf32>
    %181 = vector.extract_strided_slice %177 {offsets = [0, 4], sizes = [1, 4], strides = [1, 1]} : vector<1x16xf32> to vector<1x4xf32>
    %182 = arith.addf %180, %181 : vector<1x4xf32>
    %183 = vector.extract_strided_slice %177 {offsets = [0, 8], sizes = [1, 4], strides = [1, 1]} : vector<1x16xf32> to vector<1x4xf32>
    %184 = arith.addf %182, %183 : vector<1x4xf32>
    %185 = vector.extract_strided_slice %177 {offsets = [0, 12], sizes = [1, 4], strides = [1, 1]} : vector<1x16xf32> to vector<1x4xf32>
    %186 = arith.addf %184, %185 : vector<1x4xf32>
    %cst_166 = arith.constant 2.048000e+03 : f32
    %187 = vector.broadcast %cst_166 : f32 to vector<1x4xf32>
    %188 = arith.divf %186, %187 : vector<1x4xf32>
    %c0_167 = arith.constant 0 : index
    %c0_168 = arith.constant 0 : index
    %189 = vector.load %arg7[%c0_167, %c0_168] : memref<1x4xf32, #tpu.memory_space<vmem>>, vector<1x4xf32>
    %cst_169 = arith.constant 9.99999974E-6 : f32
    %190 = vector.broadcast %cst_169 : f32 to vector<1x4xf32>
    %191 = arith.addf %188, %190 : vector<1x4xf32>
    %192 = math.rsqrt %191 : vector<1x4xf32>
    %193 = arith.mulf %189, %192 : vector<1x4xf32>
    %c0_170 = arith.constant 0 : index
    %c0_171 = arith.constant 0 : index
    %194 = vector.load %arg8[%c0_170, %c0_171] : memref<1x4xf32, #tpu.memory_space<vmem>>, vector<1x4xf32>
    %195 = arith.mulf %163, %193 : vector<1x4xf32>
    %196 = arith.subf %194, %195 : vector<1x4xf32>
    %197 = tpu.concatenate %193, %193, %193, %193 in 1 : vector<1x4xf32>, vector<1x4xf32>, vector<1x4xf32>, vector<1x4xf32> -> vector<1x16xf32>
    %198 = tpu.concatenate %196, %196, %196, %196 in 1 : vector<1x4xf32>, vector<1x4xf32>, vector<1x4xf32>, vector<1x4xf32> -> vector<1x16xf32>
    %c0_172 = arith.constant 0 : index
    %c0_173 = arith.constant 0 : index
    %199 = vector.load %arg9[%c0_172, %c0_173] : memref<16x16xf32, #tpu.memory_space<vmem>>, vector<16x16xf32>
    %c0_174 = arith.constant 0 : index
    %c0_175 = arith.constant 0 : index
    %200 = vector.load %arg10[%c0_174, %c0_175] : memref<1x16xf32, #tpu.memory_space<vmem>>, vector<1x16xf32>
    %201 = vector.broadcast %197 : vector<1x16xf32> to vector<256x16xf32>
    %202 = arith.mulf %136, %201 : vector<256x16xf32>
    %203 = vector.broadcast %198 : vector<1x16xf32> to vector<256x16xf32>
    %204 = arith.addf %202, %203 : vector<256x16xf32>
    %cst_176 = arith.constant 0.000000e+00 : f32
    %205 = vector.broadcast %cst_176 : f32 to vector<256x16xf32>
    %206 = arith.maximumf %204, %205 : vector<256x16xf32>
    %cst_177 = arith.constant dense<0.000000e+00> : vector<256x16xf32>
    %207 = tpu.matmul %206, %199, %cst_177 {dimension_numbers = #tpu.dot_dimension_numbers<[1], [0], [0], [1], [0, 0, 1, 1], [], []>} : vector<256x16xf32>, vector<16x16xf32>, vector<256x16xf32> -> vector<256x16xf32>
    %208 = vector.broadcast %200 : vector<1x16xf32> to vector<256x16xf32>
    %209 = arith.addf %207, %208 : vector<256x16xf32>
    %210 = vector.shape_cast %209 : vector<256x16xf32> to vector<16x16x16xf32>
    %c0_178 = arith.constant 0 : index
    %c0_179 = arith.constant 0 : index
    %c0_180 = arith.constant 0 : index
    %c0_181 = arith.constant 0 : index
    %211 = vector.load %arg11[%c0_178, %c0_179, %c0_180, %c0_181] : memref<2x16x16x16xf32, #tpu.memory_space<vmem>>, vector<1x16x16x16xf32>
    %212 = vector.shape_cast %211 : vector<1x16x16x16xf32> to vector<16x16x16xf32>
    %213 = vector.shape_cast %210 : vector<16x16x16xf32> to vector<1x16x16x16xf32>
    tpu.vector_store %arg11[%c0_178, %c0_179, %c0_180, %c0_181], %213 {strides = array<i32>} : memref<2x16x16x16xf32, #tpu.memory_space<vmem>>, vector<1x16x16x16xf32>,
    %214 = vector.broadcast %197 : vector<1x16xf32> to vector<256x16xf32>
    %215 = arith.mulf %145, %214 : vector<256x16xf32>
    %216 = vector.broadcast %198 : vector<1x16xf32> to vector<256x16xf32>
    %217 = arith.addf %215, %216 : vector<256x16xf32>
    %cst_182 = arith.constant 0.000000e+00 : f32
    %218 = vector.broadcast %cst_182 : f32 to vector<256x16xf32>
    %219 = arith.maximumf %217, %218 : vector<256x16xf32>
    %cst_183 = arith.constant dense<0.000000e+00> : vector<256x16xf32>
    %220 = tpu.matmul %219, %199, %cst_183 {dimension_numbers = #tpu.dot_dimension_numbers<[1], [0], [0], [1], [0, 0, 1, 1], [], []>} : vector<256x16xf32>, vector<16x16xf32>, vector<256x16xf32> -> vector<256x16xf32>
    %221 = vector.broadcast %200 : vector<1x16xf32> to vector<256x16xf32>
    %222 = arith.addf %220, %221 : vector<256x16xf32>
    %223 = vector.shape_cast %222 : vector<256x16xf32> to vector<16x16x16xf32>
    %c1_184 = arith.constant 1 : index
    %c0_185 = arith.constant 0 : index
    %c0_186 = arith.constant 0 : index
    %c0_187 = arith.constant 0 : index
    %224 = vector.load %arg11[%c1_184, %c0_185, %c0_186, %c0_187] : memref<2x16x16x16xf32, #tpu.memory_space<vmem>>, vector<1x16x16x16xf32>
    %225 = vector.shape_cast %224 : vector<1x16x16x16xf32> to vector<16x16x16xf32>
    %226 = vector.shape_cast %223 : vector<16x16x16xf32> to vector<1x16x16x16xf32>
    tpu.vector_store %arg11[%c1_184, %c0_185, %c0_186, %c0_187], %226 {strides = array<i32>} : memref<2x16x16x16xf32, #tpu.memory_space<vmem>>, vector<1x16x16x16xf32>,
    return
  }
}

</mosaic_0001>

<bundles_post_ra>
// kernel: _lambda_.1
= control target key start
LH: loop header
LB: loop body
LE: loop exit
PB: predicated region body
PF: predicated region fallthrough
CT: control target
= control target key end

     0   :  { %vm38_vm0 = vcmask 130048   ;;  %vm41_vm1 = vcmask 123904   ;;  %v12965_v0 = vmov 0.0   ;;  %v18205_v4 = vmov 0.0|0.0   ;;  %s12967_s21 = smov 16   ;;  %s12968_s22 = smov 48   ;;  %s18193_s0 = inlined_call_operand.vmem [shape: f32[2,16,16,16], index: 0, kind: input, shape index: {}]   ;;  %s18194_s1 = inlined_call_operand.vmem [shape: f32[144,16], index: 1, kind: input, shape index: {}]   ;;  %s18195_s2 = inlined_call_operand.vmem [shape: f32[144,4], index: 2, kind: input, shape index: {}]   ;;  %s18196_s5 = inlined_call_operand.vmem [shape: f32[4,16], index: 5, kind: input, shape index: {}]   ;;  %s18197_s3 = inlined_call_operand.vmem [shape: f32[1,4], index: 3, kind: input, shape index: {}]   ;;  %s18198_s4 = inlined_call_operand.vmem [shape: f32[1,4], index: 4, kind: input, shape index: {}]   ;;  %s18199_s6 = inlined_call_operand.vmem [shape: f32[1,16], index: 6, kind: input, shape index: {}]   ;;  %s18200_s9 = inlined_call_operand.vmem [shape: f32[16,16], index: 9, kind: input, shape index: {}]   ;;  %s18201_s7 = inlined_call_operand.vmem [shape: f32[1,4], index: 7, kind: input, shape index: {}]   ;;  %s18202_s8 = inlined_call_operand.vmem [shape: f32[1,4], index: 8, kind: input, shape index: {}]   ;;  %s18203_s10 = inlined_call_operand.vmem [shape: f32[1,16], index: 10, kind: input, shape index: {}]   ;;  %s18204_s11 = inlined_call_operand.vmem [shape: f32[2,16,16,16], index: 11, kind: output, shape index: {}]  }
   0x1   :  { %39 = vst.msk [vmem:[#allocation2] sm:$0xff] %vm38_vm0, %v12965_v0  ;;  %40 = vst.msk [vmem:[#allocation2 + $0x8] sm:$0xff] %vm38_vm0, %v12965_v0  ;;  %v130_v1 = vld [vmem:[%s18193_s0] sm:$0xff]  ;;  %v131_v2 = vld [vmem:[%s18193_s0 + $0x8] sm:$0xff]  ;;  %10605 = vmatprep.subr.bf16.mxu0 %v18205_v4  ;;  %10632 = vmatprep.subr.bf16.mxu1 %v18205_v4  ;;  %s12969_s23 = smov 32   ;;  %s12970_s24 = smov 64  }
   0x2   :  { %42 = vst.msk [vmem:[#allocation2 + $0x10] sm:$0x3] %vm41_vm1, %v12965_v0  ;;  %45 = vst.msk [vmem:[#allocation2 + $0x28] sm:$0x3] %vm41_vm1, %v12965_v0  ;;  %v132_v3 = vld [vmem:[%s18193_s0 + $0x10] sm:$0xff]  ;;  %v133_v5 = vld [vmem:[%s18193_s0 + $0x18] sm:$0xff] }
   0x3   :  { %43 = vst.msk [vmem:[#allocation2 + $0x18] sm:$0xff] %vm38_vm0, %v12965_v0  ;;  %44 = vst.msk [vmem:[#allocation2 + $0x20] sm:$0xff] %vm38_vm0, %v12965_v0  ;;  %v134_v6 = vld [vmem:[%s18193_s0 + $0x20] sm:$0xff]  ;;  %v135_v7 = vld [vmem:[%s18193_s0 + $0x28] sm:$0xff]  ;;  %s12971_s25 = smov 80   ;;  %s12972_s26 = smov 96  }
   0x4   :  { %46 = vst.msk [vmem:[#allocation2 + $0x30] sm:$0xff] %vm38_vm0, %v12965_v0  ;;  %47 = vst.msk [vmem:[#allocation2 + $0x38] sm:$0xff] %vm38_vm0, %v12965_v0  ;;  %v136_v8 = vld [vmem:[%s18193_s0 + $0x30] sm:$0xff]  ;;  %v137_v9 = vld [vmem:[%s18193_s0 + $0x38] sm:$0xff]  ;;  %s12973_s27 = smov 112   ;;  %vm1412_vm2 = vcmask 261120  }
   0x5   :  { %48 = vst.msk [vmem:[#allocation2 + $0x40] sm:$0x3] %vm41_vm1, %v12965_v0  ;;  %51 = vst.msk [vmem:[#allocation2 + $0x58] sm:$0x3] %vm41_vm1, %v12965_v0  ;;  %v138_v10 = vld [vmem:[%s18193_s0 + $0x40] sm:$0xff]  ;;  %v139_v11 = vld [vmem:[%s18193_s0 + $0x48] sm:$0xff] }
   0x6   :  { %49 = vst.msk [vmem:[#allocation2 + $0x48] sm:$0xff] %vm38_vm0, %v12965_v0  ;;  %50 = vst.msk [vmem:[#allocation2 + $0x50] sm:$0xff] %vm38_vm0, %v12965_v0  ;;  %v140_v12 = vld [vmem:[%s18193_s0 + $0x50] sm:$0xff]  ;;  %v141_v13 = vld [vmem:[%s18193_s0 + $0x58] sm:$0xff]  ;;  %vm1445_vm3 = vcmask 392192   ;;  %vm1478_vm4 = vcmask 523264  }
   0x7   :  { %52 = vst.msk [vmem:[#allocation2 + $0x60] sm:$0xff] %vm38_vm0, %v12965_v0  ;;  %53 = vst.msk [vmem:[#allocation2 + $0x68] sm:$0xff] %vm38_vm0, %v12965_v0  ;;  %v142_v14 = vld [vmem:[%s18193_s0 + $0x60] sm:$0xff]  ;;  %v143_v15 = vld [vmem:[%s18193_s0 + $0x68] sm:$0xff]  ;;  %vm1511_vm5 = vcmask 654336   ;;  %vm1544_vm6 = vcmask 785408  }
   0x8   :  { %54 = vst.msk [vmem:[#allocation2 + $0x70] sm:$0x3] %vm41_vm1, %v12965_v0  ;;  %57 = vst.msk [vmem:[#allocation2 + $0x88] sm:$0x3] %vm41_vm1, %v12965_v0  ;;  %v94_v16 = vld [vmem:[%s18194_s1] sm:$0xff]  ;;  %v95_v17 = vld [vmem:[%s18194_s1 + $0x8] sm:$0xff] }
   0x9   :  { %55 = vst.msk [vmem:[#allocation2 + $0x78] sm:$0xff] %vm38_vm0, %v12965_v0  ;;  %56 = vst.msk [vmem:[#allocation2 + $0x80] sm:$0xff] %vm38_vm0, %v12965_v0  ;;  %v96_v18 = vld [vmem:[%s18194_s1 + $0x10] sm:$0xff]  ;;  %v97_v19 = vld [vmem:[%s18194_s1 + $0x18] sm:$0xff]  ;;  %v13164_v20 = vpack.c.bf16 %v95_v17, %v94_v16  ;;  %vm1577_vm7 = vcmask 916480   ;;  %vm7247_vm8 = vcmask 31744  }
   0xa   :  { %58 = vst.msk [vmem:[#allocation2 + $0x90] sm:$0xff] %vm38_vm0, %v12965_v0  ;;  %59 = vst.msk [vmem:[#allocation2 + $0x98] sm:$0xff] %vm38_vm0, %v12965_v0  ;;  %v144_v21 = vld [vmem:[%s18193_s0 + $0x70] sm:$0xff]  ;;  %v227_v22 = vld [vmem:[#allocation2 + $0x1] sm:$0xff]  ;;  %v13178_v30 = vpack.c.bf16 %v97_v19, %v96_v18  ;;  %vm7878_vm9 = vcmask 1043456   ;;  %s12979_s29 = smov 12  }
   0xb   :  { %60 = vst.msk [vmem:[#allocation2 + $0xa0] sm:$0x3] %vm41_vm1, %v12965_v0  ;;  %63 = vst.msk [vmem:[#allocation2 + $0xb8] sm:$0x3] %vm41_vm1, %v12965_v0  ;;  %v228_v23 = vld [vmem:[#allocation2 + $0x9] sm:$0xff]  ;;  %v98_v25 = vld [vmem:[%s18194_s1 + $0x20] sm:$0xff]  ;;  %10607 = vmatpush1.bf16.msra.mxu0 %v13164_v20 }
   0xc   :  { %61 = vst.msk [vmem:[#allocation2 + $0xa8] sm:$0xff] %vm38_vm0, %v12965_v0  ;;  %62 = vst.msk [vmem:[#allocation2 + $0xb0] sm:$0xff] %vm38_vm0, %v12965_v0  ;;  %v259_v24 = vld [vmem:[#allocation2 + $0x2] sm:$0xff]  ;;  %v10736_v26 = vpack.i.bf16 %v228_v23, %v227_v22  ;;  %v260_v29 = vld [vmem:[#allocation2 + $0xa] sm:$0xff]  ;;  %10608 = vmatprep.subr.bf16.mxu0 %v18205_v4  ;;  %vm8691_vm10 = vcmask 64512   ;;  %vm8693_vm11 = vcmask 97280  }
   0xd   :  { %64 = vst.msk [vmem:[#allocation2 + $0xc0] sm:$0xff] %vm38_vm0, %v12965_v0  ;;  %65 = vst.msk [vmem:[#allocation2 + $0xc8] sm:$0xff] %vm38_vm0, %v12965_v0  ;;  %v99_v34 = vld [vmem:[%s18194_s1 + $0x28] sm:$0xff]  ;;  %v10741_v35 = vpack.i.bf16 %v260_v29, %v259_v24  ;;  %v145_v48 = vld [vmem:[%s18193_s0 + $0x78] sm:$0xff] }
   0xe   :  { %66 = vst.msk [vmem:[#allocation2 + $0xd0] sm:$0x3] %vm41_vm1, %v12965_v0  ;;  %69 = vst.msk [vmem:[#allocation2 + $0xe8] sm:$0x3] %vm41_vm1, %v12965_v0  ;;  %10737 = vrot.lane.b32.xlu0 %v10736_v26, %s12967_s21  ;;  %v13193_v42 = vpack.c.bf16 %v99_v34, %v98_v25  ;;  %v100_v49 = vld [vmem:[%s18194_s1 + $0x30] sm:$0xff]  ;;  %v101_v50 = vld [vmem:[%s18194_s1 + $0x38] sm:$0xff] }
   0xf   :  { %67 = vst.msk [vmem:[#allocation2 + $0xd8] sm:$0xff] %vm38_vm0, %v12965_v0  ;;  %68 = vst.msk [vmem:[#allocation2 + $0xe0] sm:$0xff] %vm38_vm0, %v12965_v0  ;;  %10610 = vmatpush1.bf16.msra.mxu0 %v13178_v30  ;;  %v13219_v52 = vpack.c.bf16 %v101_v50, %v100_v49  ;;  %v102_v53 = vld [vmem:[%s18194_s1 + $0x40] sm:$0xff]  ;;  %v103_v54 = vld [vmem:[%s18194_s1 + $0x48] sm:$0xff] }
  0x10   :  { %70 = vst.msk [vmem:[#allocation2 + $0xf0] sm:$0xff] %vm38_vm0, %v12965_v0  ;;  %71 = vst.msk [vmem:[#allocation2 + $0xf8] sm:$0xff] %vm38_vm0, %v12965_v0  ;;  %10611 = vmatprep.subr.bf16.mxu0 %v18205_v4  ;;  %v13231_v56 = vpack.c.bf16 %v103_v54, %v102_v53  ;;  %v146_v57 = vld [vmem:[%s18193_s0 + $0x80] sm:$0xff]  ;;  %v147_v58 = vld [vmem:[%s18193_s0 + $0x88] sm:$0xff] }
  0x11   :  { %72 = vst.msk [vmem:[#allocation2 + $0x100] sm:$0x3] %vm41_vm1, %v12965_v0  ;;  %75 = vst.msk [vmem:[#allocation2 + $0x118] sm:$0x3] %vm41_vm1, %v12965_v0  ;;  %v104_v61 = vld [vmem:[%s18194_s1 + $0x50] sm:$0xff]  ;;  %v105_v62 = vld [vmem:[%s18194_s1 + $0x58] sm:$0xff] }
  0x12   :  { %73 = vst.msk [vmem:[#allocation2 + $0x108] sm:$0xff] %vm38_vm0, %v12965_v0  ;;  %74 = vst.msk [vmem:[#allocation2 + $0x110] sm:$0xff] %vm38_vm0, %v12965_v0  ;;  %10742 = vrot.lane.b32.xlu0 %v10741_v35, %s12969_s23  ;;  %v110_v19 = vld [vmem:[%s18194_s1 + $0x80] sm:$0xff] }
  0x13   :  { %76 = vst.msk [vmem:[#allocation2 + $0x120] sm:$0xff] %vm38_vm0, %v12965_v0  ;;  %77 = vst.msk [vmem:[#allocation2 + $0x128] sm:$0xff] %vm38_vm0, %v12965_v0  ;;  %10613 = vmatpush1.bf16.msra.mxu0 %v13193_v42 }
  0x14   :  { %78 = vst.msk [vmem:[#allocation2 + $0x130] sm:$0x3] %vm41_vm1, %v12965_v0  ;;  %81 = vst.msk [vmem:[#allocation2 + $0x148] sm:$0x3] %vm41_vm1, %v12965_v0  ;;  %10614 = vmatprep.subr.bf16.mxu0 %v18205_v4 }
  0x15   :  { %79 = vst.msk [vmem:[#allocation2 + $0x138] sm:$0xff] %vm38_vm0, %v12965_v0  ;;  %80 = vst.msk [vmem:[#allocation2 + $0x140] sm:$0xff] %vm38_vm0, %v12965_v0 }
  0x16   :  { %82 = vst.msk [vmem:[#allocation2 + $0x150] sm:$0xff] %vm38_vm0, %v12965_v0  ;;  %83 = vst.msk [vmem:[#allocation2 + $0x158] sm:$0xff] %vm38_vm0, %v12965_v0 }
  0x17   :  { %84 = vst.msk [vmem:[#allocation2 + $0x160] sm:$0x3] %vm41_vm1, %v12965_v0  ;;  %87 = vst.msk [vmem:[#allocation2 + $0x178] sm:$0x3] %vm41_vm1, %v12965_v0  ;;  %10616 = vmatpush1.bf16.msra.mxu0 %v13219_v52 }
  0x18   :  { %85 = vst.msk [vmem:[#allocation2 + $0x168] sm:$0xff] %vm38_vm0, %v12965_v0  ;;  %86 = vst.msk [vmem:[#allocation2 + $0x170] sm:$0xff] %vm38_vm0, %v12965_v0  ;;  %10617 = vmatprep.subr.bf16.mxu0 %v18205_v4 }
  0x19   :  { %88 = vst.msk [vmem:[#allocation2 + $0x180] sm:$0xff] %vm38_vm0, %v12965_v0  ;;  %89 = vst.msk [vmem:[#allocation2 + $0x188] sm:$0xff] %vm38_vm0, %v12965_v0 }
  0x1a   :  { %90 = vst.msk [vmem:[#allocation2 + $0x190] sm:$0x3] %vm41_vm1, %v12965_v0  ;;  %93 = vst.msk [vmem:[#allocation2 + $0x1a8] sm:$0x3] %vm41_vm1, %v12965_v0 }
  0x1b   :  { %91 = vst.msk [vmem:[#allocation2 + $0x198] sm:$0xff] %vm38_vm0, %v12965_v0  ;;  %92 = vst.msk [vmem:[#allocation2 + $0x1a0] sm:$0xff] %vm38_vm0, %v12965_v0  ;;  %10619 = vmatpush1.bf16.msra.mxu0 %v13231_v56 }
  0x1c   :  { %163 = vst.msk [vmem:[#allocation2 + $0x19] sm:$0xff] %vm38_vm0, %v130_v1  ;;  %164 = vst.msk [vmem:[#allocation2 + $0x21] sm:$0xff] %vm38_vm0, %v131_v2  ;;  %v148_v1 = vld [vmem:[%s18193_s0 + $0x90] sm:$0xff]  ;;  %v149_v2 = vld [vmem:[%s18193_s0 + $0x98] sm:$0xff]  ;;  %10620 = vmatprep.subr.bf16.mxu0 %v18205_v4 }
  0x1d   :  { %165 = vst.msk [vmem:[#allocation2 + $0x31] sm:$0xff] %vm38_vm0, %v132_v3  ;;  %166 = vst.msk [vmem:[#allocation2 + $0x39] sm:$0xff] %vm38_vm0, %v133_v5  ;;  %v150_v3 = vld [vmem:[%s18193_s0 + $0xa0] sm:$0xff]  ;;  %v151_v5 = vld [vmem:[%s18193_s0 + $0xa8] sm:$0xff] }
  0x1e   :  { %167 = vst.msk [vmem:[#allocation2 + $0x49] sm:$0xff] %vm38_vm0, %v134_v6  ;;  %168 = vst.msk [vmem:[#allocation2 + $0x51] sm:$0xff] %vm38_vm0, %v135_v7  ;;  %v13269_v7 = vpack.c.bf16 %v105_v62, %v104_v61  ;;  %v158_v62 = vld [vmem:[%s18193_s0 + $0xe0] sm:$0xff] }
  0x1f   :  { %169 = vst.msk [vmem:[#allocation2 + $0x61] sm:$0xff] %vm38_vm0, %v136_v8  ;;  %170 = vst.msk [vmem:[#allocation2 + $0x69] sm:$0xff] %vm38_vm0, %v137_v9  ;;  %v106_v8 = vld [vmem:[%s18194_s1 + $0x60] sm:$0xff] }
  0x20   :  { %171 = vst.msk [vmem:[#allocation2 + $0x79] sm:$0xff] %vm38_vm0, %v138_v10  ;;  %172 = vst.msk [vmem:[#allocation2 + $0x81] sm:$0xff] %vm38_vm0, %v139_v11  ;;  %v107_v10 = vld [vmem:[%s18194_s1 + $0x68] sm:$0xff]  ;;  %v152_v11 = vld [vmem:[%s18193_s0 + $0xb0] sm:$0xff]  ;;  %10622 = vmatpush1.bf16.msra.mxu0 %v13269_v7 }
  0x21   :  { %173 = vst.msk [vmem:[#allocation2 + $0x91] sm:$0xff] %vm38_vm0, %v140_v12  ;;  %174 = vst.msk [vmem:[#allocation2 + $0x99] sm:$0xff] %vm38_vm0, %v141_v13  ;;  %v153_v12 = vld [vmem:[%s18193_s0 + $0xb8] sm:$0xff]  ;;  %v13292_v13 = vpack.c.bf16 %v107_v10, %v106_v8  ;;  %10623 = vmatprep.subr.bf16.mxu0 %v18205_v4 }
  0x22   :  { %175 = vst.msk [vmem:[#allocation2 + $0xa9] sm:$0xff] %vm38_vm0, %v142_v14  ;;  %176 = vst.msk [vmem:[#allocation2 + $0xb1] sm:$0xff] %vm38_vm0, %v143_v15  ;;  %v108_v14 = vld [vmem:[%s18194_s1 + $0x70] sm:$0xff]  ;;  %v109_v15 = vld [vmem:[%s18194_s1 + $0x78] sm:$0xff] }
  0x23   :  { %177 = vst.msk [vmem:[#allocation2 + $0xc1] sm:$0xff] %vm38_vm0, %v144_v21  ;;  %v13173_v27 = vld [vmem:[#allocation2 + $0x18] sm:$0xff]  ;;  %v13175_v28 = vld [vmem:[#allocation2 + $0x20] sm:$0xff]  ;;  %178 = vst.msk [vmem:[#allocation2 + $0xc9] sm:$0xff] %vm38_vm0, %v145_v48  ;;  %v13306_v17 = vpack.c.bf16 %v109_v15, %v108_v14 }
  0x24   :  { %v10746_v31 = vpack.i.bf16 %v13175_v28, %v13173_v27  ;;  %v323_v32 = vld [vmem:[#allocation2 + $0x19] sm:$0xff]  ;;  %v324_v33 = vld [vmem:[#allocation2 + $0x21] sm:$0xff]  ;;  %v13188_v40 = vld [vmem:[#allocation2 + $0x30] sm:$0xff]  ;;  %179 = vst.msk [vmem:[#allocation2 + $0xd9] sm:$0xff] %vm38_vm0, %v146_v57  ;;  %10625 = vmatpush1.bf16.msra.mxu0 %v13292_v13 }
  0x25   :  { %v10751_v36 = vpack.i.bf16 %v324_v33, %v323_v32  ;;  %v355_v37 = vld [vmem:[#allocation2 + $0x1a] sm:$0xff]  ;;  %v356_v38 = vld [vmem:[#allocation2 + $0x22] sm:$0xff]  ;;  %v357_v39 = vld [vmem:[#allocation2 + $0x32] sm:$0xff]  ;;  %180 = vst.msk [vmem:[#allocation2 + $0xe1] sm:$0xff] %vm38_vm0, %v147_v58  ;;  %10626 = vmatprep.subr.bf16.mxu0 %v18205_v4 }
  0x26   :  { %10747 = vrot.lane.b32.xlu1 %v10746_v31, %s12968_s22  ;;  %v13190_v41 = vld [vmem:[#allocation2 + $0x38] sm:$0xff]  ;;  %9943 = vmatprep.mubr.msk.f32.mxu0 %vm38_vm0, %v357_v39  ;;  %v10756_v43 = vpack.i.bf16 %v356_v38, %v355_v37  ;;  %v13228_v55 = vld [vmem:[#allocation2 + $0x48] sm:$0xff]  ;;  %v13241_v60 = vld [vmem:[#allocation2 + $0x50] sm:$0xff]  ;;  %181 = vst.msk [vmem:[#allocation2 + $0xf1] sm:$0xff] %vm38_vm0, %v148_v1 }
  0x27   :  { %v10761_v44 = vpack.i.bf16 %v13190_v41, %v13188_v40  ;;  %v420_v45 = vld [vmem:[#allocation2 + $0x31] sm:$0xff]  ;;  %v421_v46 = vld [vmem:[#allocation2 + $0x39] sm:$0xff]  ;;  %v422_v63 = vld [vmem:[#allocation2 + $0x49] sm:$0xff]  ;;  %v10796_v6 = vpack.i.bf16 %v13241_v60, %v13228_v55  ;;  %182 = vst.msk [vmem:[#allocation2 + $0xf9] sm:$0xff] %vm38_vm0, %v149_v2 }
  0x28   :  { %10757 = vrot.lane.b32.xlu0 %v10756_v43, %s12971_s25  ;;  %v10766_v47 = vpack.i.bf16 %v421_v46, %v420_v45  ;;  %v13217_v51 = vld [vmem:[#allocation2 + $0x3a] sm:$0xff]  ;;  %v423_v0 = vld [vmem:[#allocation2 + $0x51] sm:$0xff]  ;;  %183 = vst.msk [vmem:[#allocation2 + $0x109] sm:$0xff] %vm38_vm0, %v150_v3  ;;  %184 = vst.msk [vmem:[#allocation2 + $0x111] sm:$0xff] %vm38_vm0, %v151_v5  ;;  %10628 = vmatpush1.bf16.msra.mxu0 %v13306_v17 }
  0x29   :  { %v10791_v59 = vpack.i.bf16 %v13217_v51, %v357_v39  ;;  %v10801_v9 = vpack.i.bf16 %v423_v0, %v422_v63  ;;  %185 = vst.msk [vmem:[#allocation2 + $0x121] sm:$0xff] %vm38_vm0, %v152_v11  ;;  %186 = vst.msk [vmem:[#allocation2 + $0x129] sm:$0xff] %vm38_vm0, %v153_v12  ;;  %v13303_v16 = vld [vmem:[#allocation2 + $0x4a] sm:$0xff]  ;;  %v13309_v18 = vld [vmem:[#allocation2 + $0x52] sm:$0xff]  ;;  %10629 = vmatprep.subr.bf16.mxu0 %v18205_v4 }
  0x2a   :  { %10752 = vrot.lane.b32.xlu1 %v10751_v36, %s12970_s24  ;;  %v111_v21 = vld [vmem:[%s18194_s1 + $0x88] sm:$0xff]  ;;  %v392_v22 = vld [vmem:[#allocation2 + $0x60] sm:$0xff]  ;;  %v10826_v24 = vpack.i.bf16 %v13309_v18, %v13303_v16  ;;  %v394_v38 = vld [vmem:[#allocation2 + $0x78] sm:$0xff]  ;;  %191 = vst.msk [vmem:[#allocation2 + $0x169] sm:$0xff] %vm38_vm0, %v158_v62 }
  0x2b   :  { %v393_v23 = vld [vmem:[#allocation2 + $0x68] sm:$0xff]  ;;  %v13322_v25 = vpack.c.bf16 %v111_v21, %v110_v19  ;;  %v154_v32 = vld [vmem:[%s18193_s0 + $0xc0] sm:$0xff]  ;;  %v157_v48 = vld [vmem:[%s18193_s0 + $0xd8] sm:$0xff] }
  0x2c   :  { %10767 = vrot.lane.b32.xlu0 %v10766_v47, %s12973_s27  ;;  %v10831_v26 = vpack.i.bf16 %v393_v23, %v392_v22  ;;  %v424_v29 = vld [vmem:[#allocation2 + $0x61] sm:$0xff]  ;;  %v425_v31 = vld [vmem:[#allocation2 + $0x69] sm:$0xff]  ;;  %187 = vst.msk [vmem:[#allocation2 + $0x139] sm:$0xff] %vm38_vm0, %v154_v32  ;;  %190 = vst.msk [vmem:[#allocation2 + $0x159] sm:$0xff] %vm38_vm0, %v157_v48 }
  0x2d   :  { %v155_v33 = vld [vmem:[%s18193_s0 + $0xc8] sm:$0xff]  ;;  %v10836_v34 = vpack.i.bf16 %v425_v31, %v424_v29  ;;  %10631 = vmatpush1.bf16.msra.mxu0 %v13322_v25  ;;  %v395_v39 = vld [vmem:[#allocation2 + $0x80] sm:$0xff]  ;;  %v396_v53 = vld [vmem:[#allocation2 + $0x90] sm:$0xff] }
  0x2e   :  { %10762 = vrot.lane.b32.xlu1 %v10761_v44, %s12972_s26  ;;  %188 = vst.msk [vmem:[#allocation2 + $0x141] sm:$0xff] %vm38_vm0, %v155_v33  ;;  %10659 = vmatprep.subr.bf16.mxu0 %v18205_v4  ;;  %v13340_v35 = vld [vmem:[#allocation2 + $0x62] sm:$0xff]  ;;  %v10866_v45 = vpack.i.bf16 %v395_v39, %v394_v38  ;;  %v13362_v49 = vld [vmem:[#allocation2 + $0x7a] sm:$0xff]  ;;  %v13382_v1 = vld [vmem:[#allocation2 + $0x92] sm:$0xff] }
  0x2f   :  { %v13364_v50 = vld [vmem:[#allocation2 + $0x82] sm:$0xff]  ;;  %v397_v54 = vld [vmem:[#allocation2 + $0x98] sm:$0xff]  ;;  %v160_v12 = vld [vmem:[%s18193_s0 + $0xf0] sm:$0xff] }
  0x30   :  { %10777 = vrot.lane.b32.xlu0 %v10756_v43, %s12969_s23  ;;  %v426_v43 = vld [vmem:[#allocation2 + $0x79] sm:$0xff]  ;;  %v10896_v57 = vpack.i.bf16 %v13364_v50, %v13362_v49  ;;  %v10901_v58 = vpack.i.bf16 %v397_v54, %v396_v53  ;;  %v159_v63 = vld [vmem:[%s18193_s0 + $0xe8] sm:$0xff]  ;;  %193 = vst.msk [vmem:[#allocation2 + $0x181] sm:$0xff] %vm38_vm0, %v160_v12  ;;  %v404_v53 = vld [vmem:[#allocation2 + $0xf0] sm:$0xff] }
  0x31   :  { %v429_v61 = vld [vmem:[#allocation2 + $0x99] sm:$0xff]  ;;  %192 = vst.msk [vmem:[#allocation2 + $0x171] sm:$0xff] %vm38_vm0, %v159_v63  ;;  %v398_v5 = vld [vmem:[#allocation2 + $0xa8] sm:$0xff]  ;;  %v436_v62 = vld [vmem:[#allocation2 + $0xf1] sm:$0xff] }
  0x32   :  { %10772 = vrot.lane.b32.xlu1 %v10751_v36, %s12967_s21  ;;  %v13342_v36 = vld [vmem:[#allocation2 + $0x6a] sm:$0xff]  ;;  %v366_v2 = vld [vmem:[#allocation2 + $0x9a] sm:$0xff]  ;;  %v368_v19 = vld [vmem:[#allocation2 + $0xb2] sm:$0xff] }
  0x33   :  { %v10861_v37 = vpack.i.bf16 %v13342_v36, %v13340_v35  ;;  %v10931_v3 = vpack.i.bf16 %v366_v2, %v13382_v1  ;;  %v430_v8 = vld [vmem:[#allocation2 + $0xa9] sm:$0xff]  ;;  %v161_v14 = vld [vmem:[%s18193_s0 + $0xf8] sm:$0xff]  ;;  %v400_v21 = vld [vmem:[#allocation2 + $0xc0] sm:$0xff] }
  0x34   :  { %10787 = vrot.lane.b32.xlu0 %v10766_v47, %s12970_s24  ;;  %194 = vst.msk [vmem:[#allocation2 + $0x189] sm:$0xff] %vm38_vm0, %v161_v14  ;;  %v367_v15 = vld [vmem:[#allocation2 + $0xaa] sm:$0xff]  ;;  %v369_v32 = vld [vmem:[#allocation2 + $0xc2] sm:$0xff]  ;;  %v434_v39 = vld [vmem:[#allocation2 + $0xd9] sm:$0xff] }
  0x35   :  { %v401_v22 = vld [vmem:[#allocation2 + $0xc8] sm:$0xff]  ;;  %v10966_v23 = vpack.i.bf16 %v368_v19, %v367_v15  ;;  %v403_v38 = vld [vmem:[#allocation2 + $0xe0] sm:$0xff]  ;;  %v405_v54 = vld [vmem:[#allocation2 + $0xf8] sm:$0xff] }
  0x36   :  { %10782 = vrot.lane.b32.xlu1 %v10761_v44, %s12968_s22  ;;  %v427_v44 = vld [vmem:[#allocation2 + $0x81] sm:$0xff]  ;;  %v433_v29 = vld [vmem:[#allocation2 + $0xc9] sm:$0xff]  ;;  %v437_v63 = vld [vmem:[#allocation2 + $0xf9] sm:$0xff] }
  0x37   :  { %v10871_v46 = vpack.i.bf16 %v427_v44, %v426_v43  ;;  %v370_v33 = vld [vmem:[#allocation2 + $0xca] sm:$0xff]  ;;  %v435_v43 = vld [vmem:[#allocation2 + $0xe1] sm:$0xff] }
  0x38   :  { %10797 = vrot.lane.b32.xlu0 %v10796_v6, %s12972_s26  ;;  %v195_v2 = vld [vmem:[#allocation2] sm:$0xff] }
  0x3a   :  { %10792 = vrot.lane.b32.xlu1 %v10791_v59, %s12971_s25 }
  0x3c   :  { %10807 = vrot.lane.b32.xlu0 %v10766_v47, %s12967_s21  ;;  %v156_v47 = vld [vmem:[%s18193_s0 + $0xd0] sm:$0xff] }
  0x3d   :  { %189 = vst.msk [vmem:[#allocation2 + $0x151] sm:$0xff] %vm38_vm0, %v156_v47  ;;  %v372_v47 = vld [vmem:[#allocation2 + $0xe2] sm:$0xff] }
  0x3e   :  { %10802 = vrot.lane.b32.xlu1 %v10801_v9, %s12973_s27 }
  0x40   :  { %10817 = vrot.lane.b32.xlu0 %v10796_v6, %s12968_s22  ;;  %v399_v6 = vld [vmem:[#allocation2 + $0xb0] sm:$0xff] }
  0x41   :  { %v10936_v10 = vpack.i.bf16 %v399_v6, %v398_v5 }
  0x42   :  { %10812 = vrot.lane.b32.xlu1 %v10791_v59, %s12969_s23  ;;  %v428_v59 = vld [vmem:[#allocation2 + $0x91] sm:$0xff] }
  0x43   :  { %v10906_v0 = vpack.i.bf16 %v429_v61, %v428_v59 }
  0x44   :  { %10827 = vrot.lane.b32.xlu0 %v10826_v24, %s12971_s25 }
  0x46   :  { %10822 = vrot.lane.b32.xlu1 %v10801_v9, %s12970_s24 }
  0x48   :  { %10837 = vrot.lane.b32.xlu0 %v10836_v34, %s12973_s27 }
  0x4a   :  { %10832 = vrot.lane.b32.xlu1 %v10831_v26, %s12972_s26 }
  0x4c   :  { %10847 = vrot.lane.b32.xlu0 %v10826_v24, %s12969_s23  ;;  %v10971_v24 = vpack.i.bf16 %v401_v22, %v400_v21 }
  0x4e   :  { %10842 = vrot.lane.b32.xlu1 %v10801_v9, %s12967_s21  ;;  %v431_v9 = vld [vmem:[#allocation2 + $0xb1] sm:$0xff] }
  0x4f   :  { %v10941_v11 = vpack.i.bf16 %v431_v9, %v430_v8 }
  0x50   :  { %10857 = vrot.lane.b32.xlu0 %v10836_v34, %s12970_s24 }
  0x52   :  { %10852 = vrot.lane.b32.xlu1 %v10831_v26, %s12968_s22  ;;  %v432_v26 = vld [vmem:[#allocation2 + $0xc1] sm:$0xff] }
  0x53   :  { %v10976_v31 = vpack.i.bf16 %v433_v29, %v432_v26 }
  0x54   :  { %10867 = vrot.lane.b32.xlu0 %v10866_v45, %s12972_s26 }
  0x56   :  { %10862 = vrot.lane.b32.xlu1 %v10861_v37, %s12971_s25 }
  0x58   :  { %10877 = vrot.lane.b32.xlu0 %v10836_v34, %s12967_s21  ;;  %v11001_v34 = vpack.i.bf16 %v370_v33, %v369_v32 }
  0x5a   :  { %10872 = vrot.lane.b32.xlu1 %v10871_v46, %s12973_s27 }
  0x5c   :  { %10887 = vrot.lane.b32.xlu0 %v10866_v45, %s12968_s22  ;;  %v11011_v45 = vpack.i.bf16 %v435_v43, %v434_v39 }
  0x5e   :  { %10882 = vrot.lane.b32.xlu1 %v10861_v37, %s12969_s23  ;;  %v402_v37 = vld [vmem:[#allocation2 + $0xd8] sm:$0xff] }
  0x5f   :  { %v11006_v44 = vpack.i.bf16 %v403_v38, %v402_v37 }
  0x60   :  { %10897 = vrot.lane.b32.xlu0 %v10896_v57, %s12971_s25 }
  0x62   :  { %10892 = vrot.lane.b32.xlu1 %v10871_v46, %s12970_s24 }
  0x64   :  { %10907 = vrot.lane.b32.xlu0 %v10906_v0, %s12973_s27 }
  0x66   :  { %10902 = vrot.lane.b32.xlu1 %v10901_v58, %s12972_s26 }
  0x68   :  { %10917 = vrot.lane.b32.xlu0 %v10896_v57, %s12969_s23 }
  0x6a   :  { %10912 = vrot.lane.b32.xlu1 %v10871_v46, %s12967_s21  ;;  %v371_v46 = vld [vmem:[#allocation2 + $0xda] sm:$0xff] }
  0x6b   :  { %v11036_v61 = vpack.i.bf16 %v372_v47, %v371_v46  ;;  %v374_v46 = vld [vmem:[#allocation2 + $0xfa] sm:$0xff] }
  0x6c   :  { %10927 = vrot.lane.b32.xlu0 %v10906_v0, %s12970_s24 }
  0x6e   :  { %10922 = vrot.lane.b32.xlu1 %v10901_v58, %s12968_s22 }
  0x70   :  { %10937 = vrot.lane.b32.xlu0 %v10936_v10, %s12972_s26 }
  0x72   :  { %10932 = vrot.lane.b32.xlu1 %v10931_v3, %s12971_s25 }
  0x74   :  { %10947 = vrot.lane.b32.xlu0 %v10906_v0, %s12967_s21  ;;  %v196_v0 = vld [vmem:[#allocation2 + $0x8] sm:$0xff] }
  0x76   :  { %10942 = vrot.lane.b32.xlu1 %v10941_v11, %s12973_s27 }
  0x78   :  { %10957 = vrot.lane.b32.xlu0 %v10936_v10, %s12968_s22  ;;  %v13417_v10 = vpack.i.bf16 %v437_v63, %v436_v62 }
  0x7a   :  { %10952 = vrot.lane.b32.xlu1 %v10931_v3, %s12969_s23  ;;  %v11041_v3 = vpack.i.bf16 %v405_v54, %v404_v53 }
  0x7c   :  { %10967 = vrot.lane.b32.xlu0 %v10966_v23, %s12971_s25 }
  0x7e   :  { %10962 = vrot.lane.b32.xlu1 %v10941_v11, %s12970_s24 }
  0x80   :  { %10977 = vrot.lane.b32.xlu0 %v10976_v31, %s12973_s27  ;;  %v10738_v48 = vpop.permute.xlu0 %10737 }
  0x81   :  { %v10740_v58 = vunpack.i.h.bf16 %v10738_v48  ;;  %v10739_v59 = vunpack.i.l.bf16 %v10738_v48 }
  0x82   :  { %10972 = vrot.lane.b32.xlu1 %v10971_v24, %s12972_s26 }
  0x83   :  { %v1380_v12 = vsel %vm38_vm0, %v195_v2, %v10739_v59  ;;  %v407_v2 = vld [vmem:[#allocation2 + $0x110] sm:$0xff] }
  0x84   :  { %10987 = vrot.lane.b32.xlu0 %v10966_v23, %s12969_s23  ;;  %v10743_v5 = vpop.permute.xlu0 %10742 }
  0x85   :  { %v10745_v6 = vunpack.i.h.bf16 %v10743_v5  ;;  %v10744_v8 = vunpack.i.l.bf16 %v10743_v5 }
  0x86   :  { %10982 = vrot.lane.b32.xlu1 %v10941_v11, %s12967_s21  ;;  %v1381_v11 = vsel %vm38_vm0, %v196_v0, %v10740_v58  ;;  %v406_v0 = vld [vmem:[#allocation2 + $0x108] sm:$0xff] }
  0x87   :  { %v1413_v21 = vsel %vm1412_vm2, %v1380_v12, %v10744_v8  ;;  %v1414_v22 = vsel %vm1412_vm2, %v1381_v11, %v10745_v6 }
  0x88   :  { %10997 = vrot.lane.b32.xlu0 %v10976_v31, %s12970_s24 }
  0x8a   :  { %10992 = vrot.lane.b32.xlu1 %v10971_v24, %s12968_s22 }
  0x8c   :  { %11007 = vrot.lane.b32.xlu0 %v11006_v44, %s12972_s26 }
  0x8e   :  { %11002 = vrot.lane.b32.xlu1 %v11001_v34, %s12971_s25 }
  0x90   :  { %11017 = vrot.lane.b32.xlu0 %v10976_v31, %s12967_s21 }
  0x92   :  { %11012 = vrot.lane.b32.xlu1 %v11011_v45, %s12973_s27 }
  0x94   :  { %11027 = vrot.lane.b32.xlu0 %v11006_v44, %s12968_s22  ;;  %v13433_v44 = vld [vmem:[#allocation2 + $0xf2] sm:$0xff] }
  0x95   :  { %v11071_v63 = vpack.i.bf16 %v374_v46, %v13433_v44 }
  0x96   :  { %11022 = vrot.lane.b32.xlu1 %v11001_v34, %s12969_s23 }
  0x98   :  { %v10748_v57 = vpop.permute.xlu1 %10747  ;;  %11037 = vrot.lane.b32.xlu0 %v11036_v61, %s12971_s25 }
  0x99   :  { %v10749_v14 = vunpack.i.l.bf16 %v10748_v57  ;;  %v10750_v19 = vunpack.i.h.bf16 %v10748_v57 }
  0x9a   :  { %11032 = vrot.lane.b32.xlu1 %v11011_v45, %s12970_s24  ;;  %v10758_v26 = vpop.permute.xlu0 %10757 }
  0x9b   :  { %v1446_v24 = vsel %vm1445_vm3, %v1413_v21, %v10749_v14  ;;  %v1447_v29 = vsel %vm1445_vm3, %v1414_v22, %v10750_v19  ;;  %v10759_v32 = vunpack.i.l.bf16 %v10758_v26  ;;  %v10760_v37 = vunpack.i.h.bf16 %v10758_v26 }
  0x9c   :  { %v10753_v9 = vpop.permute.xlu1 %10752  ;;  %11047 = vrot.lane.b32.xlu0 %v13417_v10, %s12973_s27 }
  0x9d   :  { %v10754_v15 = vunpack.i.l.bf16 %v10753_v9  ;;  %v10755_v23 = vunpack.i.h.bf16 %v10753_v9  ;;  %v439_v9 = vld [vmem:[#allocation2 + $0x111] sm:$0xff] }
  0x9e   :  { %11042 = vrot.lane.b32.xlu1 %v11041_v3, %s12972_s26  ;;  %v10768_v43 = vpop.permute.xlu0 %10767 }
  0x9f   :  { %v1479_v31 = vsel %vm1478_vm4, %v1446_v24, %v10754_v15  ;;  %v1480_v39 = vsel %vm1478_vm4, %v1447_v29, %v10755_v23  ;;  %v10769_v47 = vunpack.i.l.bf16 %v10768_v43  ;;  %v10770_v59 = vunpack.i.h.bf16 %v10768_v43 }
  0xa0   :  { %v10763_v33 = vpop.permute.xlu1 %10762  ;;  %v1512_v38 = vsel %vm1511_vm5, %v1479_v31, %v10759_v32  ;;  %11057 = vrot.lane.b32.xlu0 %v11036_v61, %s12969_s23  ;;  %v438_v61 = vld [vmem:[#allocation2 + $0x109] sm:$0xff] }
  0xa1   :  { %v10764_v34 = vunpack.i.l.bf16 %v10763_v33  ;;  %v10765_v53 = vunpack.i.h.bf16 %v10763_v33 }
  0xa2   :  { %11052 = vrot.lane.b32.xlu1 %v11011_v45, %s12967_s21  ;;  %v1513_v45 = vsel %vm1511_vm5, %v1480_v39, %v10760_v37  ;;  %v10778_v8 = vpop.permute.xlu0 %10777 }
  0xa3   :  { %v1545_v58 = vsel %vm1544_vm6, %v1512_v38, %v10764_v34  ;;  %v10780_v11 = vunpack.i.h.bf16 %v10778_v8  ;;  %v10779_v12 = vunpack.i.l.bf16 %v10778_v8  ;;  %v1546_v19 = vsel %vm1544_vm6, %v1513_v45, %v10765_v53  ;;  %v13477_v53 = vld [vmem:[#allocation2 + $0x10a] sm:$0xff] }
  0xa4   :  { %v10773_v48 = vpop.permute.xlu1 %10772  ;;  %v1578_v62 = vsel %vm1577_vm7, %v1545_v58, %v10769_v47  ;;  %11067 = vrot.lane.b32.xlu0 %v13417_v10, %s12970_s24  ;;  %v1579_v22 = vsel %vm1577_vm7, %v1546_v19, %v10770_v59  ;;  %v408_v59 = vld [vmem:[#allocation2 + $0x120] sm:$0xff] }
  0xa5   :  { %v10775_v54 = vunpack.i.h.bf16 %v10773_v48  ;;  %v10774_v57 = vunpack.i.l.bf16 %v10773_v48  ;;  %1771 = vmatmul.mubr.f32.vlgmr.msra.gmra.mrb[0].mxu0 %v1578_v62  ;;  %v409_v62 = vld [vmem:[#allocation2 + $0x128] sm:$0xff] }
  0xa6   :  { %11062 = vrot.lane.b32.xlu1 %v11041_v3, %s12968_s22  ;;  %9944 = vmatprep.mubr.msk.f32.mxu0 %vm38_vm0, %v13217_v51  ;;  %v13456_v51 = vpack.i.bf16 %v439_v9, %v438_v61  ;;  %v10788_v24 = vpop.permute.xlu0 %10787  ;;  %v11111_v9 = vpack.i.bf16 %v409_v62, %v408_v59 }
  0xa7   :  { %v1382_v5 = vsel %vm38_vm0, %v13173_v27, %v10774_v57  ;;  %v1383_v6 = vsel %vm38_vm0, %v13175_v28, %v10775_v54  ;;  %10661 = vmatpush1.bf16.msra.mxu0 %v13164_v20  ;;  %v11076_v27 = vpack.i.bf16 %v407_v2, %v406_v0  ;;  %v10790_v26 = vunpack.i.h.bf16 %v10788_v24  ;;  %v13479_v54 = vld [vmem:[#allocation2 + $0x112] sm:$0xff] }
  0xa8   :  { %v10783_v14 = vpop.permute.xlu1 %10782  ;;  %10662 = vmatprep.subr.bf16.mxu0 %v18205_v4  ;;  %v1415_v28 = vsel %vm1412_vm2, %v1382_v5, %v10779_v12  ;;  %v1416_v21 = vsel %vm1412_vm2, %v1383_v6, %v10780_v11  ;;  %v10789_v29 = vunpack.i.l.bf16 %v10788_v24  ;;  %v11106_v6 = vpack.i.bf16 %v13479_v54, %v13477_v53  ;;  %v440_v11 = vld [vmem:[#allocation2 + $0x121] sm:$0xff]  ;;  %v441_v12 = vld [vmem:[#allocation2 + $0x129] sm:$0xff] }
  0xa9   :  { %v10785_v3 = vunpack.i.h.bf16 %v10783_v14  ;;  %v10784_v15 = vunpack.i.l.bf16 %v10783_v14  ;;  %1776 = vmatmul.mubr.f32.gmra.mrb[2].mxu0 %v1579_v22  ;;  %11077 = vrot.lane.b32.xlu0 %v11076_v27, %s12972_s26 }
  0xaa   :  { %11072 = vrot.lane.b32.xlu1 %v11071_v63, %s12971_s25  ;;  %9945 = vmatprep.mubr.msk.f32.mxu0 %vm38_vm0, %v13303_v16  ;;  %v10798_v38 = vpop.permute.xlu0 %10797 }
  0xab   :  { %v1448_v20 = vsel %vm1445_vm3, %v1415_v28, %v10784_v15  ;;  %v1449_v23 = vsel %vm1445_vm3, %v1416_v21, %v10785_v3  ;;  %10664 = vmatpush1.bf16.msra.mxu0 %v13178_v30  ;;  %v10800_v43 = vunpack.i.h.bf16 %v10798_v38  ;;  %v10799_v16 = vunpack.i.l.bf16 %v10798_v38  ;;  %v13519_v38 = vld [vmem:[#allocation2 + $0x122] sm:$0xff] }
  0xac   :  { %v10793_v31 = vpop.permute.xlu1 %10792  ;;  %10665 = vmatprep.subr.bf16.mxu0 %v18205_v4  ;;  %v1481_v34 = vsel %vm1478_vm4, %v1448_v20, %v10789_v29  ;;  %v1482_v37 = vsel %vm1478_vm4, %v1449_v23, %v10790_v26  ;;  %v13500_v21 = vpack.i.bf16 %v441_v12, %v440_v11 }
  0xad   :  { %v10795_v32 = vunpack.i.h.bf16 %v10793_v31  ;;  %v10794_v33 = vunpack.i.l.bf16 %v10793_v31  ;;  %11087 = vrot.lane.b32.xlu0 %v13417_v10, %s12967_s21 }
  0xae   :  { %11082 = vrot.lane.b32.xlu1 %v13456_v51, %s12973_s27 }
  0xaf   :  { %v1514_v39 = vsel %vm1511_vm5, %v1481_v34, %v10794_v33  ;;  %10667 = vmatpush1.bf16.msra.mxu0 %v13193_v42  ;;  %v1515_v47 = vsel %vm1511_vm5, %v1482_v37, %v10795_v32  ;;  %v10808_v42 = vpop.permute.xlu0 %10807 }
  0xb0   :  { %v10803_v46 = vpop.permute.xlu1 %10802  ;;  %10668 = vmatprep.subr.bf16.mxu0 %v18205_v4  ;;  %v1547_v48 = vsel %vm1544_vm6, %v1514_v39, %v10799_v16  ;;  %v1548_v45 = vsel %vm1544_vm6, %v1515_v47, %v10800_v43  ;;  %v10810_v10 = vunpack.i.h.bf16 %v10808_v42  ;;  %v10809_v0 = vunpack.i.l.bf16 %v10808_v42  ;;  %v13521_v39 = vld [vmem:[#allocation2 + $0x12a] sm:$0xff] }
  0xb1   :  { %v10804_v30 = vunpack.i.l.bf16 %v10803_v46  ;;  %v10805_v57 = vunpack.i.h.bf16 %v10803_v46  ;;  %11097 = vrot.lane.b32.xlu0 %v11076_v27, %s12968_s22 }
  0xb2   :  { %11092 = vrot.lane.b32.xlu1 %v11071_v63, %s12969_s23  ;;  %v1385_v8 = vsel %vm38_vm0, %v13190_v41, %v10810_v10  ;;  %v1384_v61 = vsel %vm38_vm0, %v13188_v40, %v10809_v0  ;;  %v443_v10 = vld [vmem:[#allocation2 + $0x141] sm:$0xff] }
  0xb3   :  { %v1580_v58 = vsel %vm1577_vm7, %v1547_v48, %v10804_v30  ;;  %10670 = vmatpush1.bf16.msra.mxu0 %v13219_v52  ;;  %v10818_v15 = vpop.permute.xlu0 %10817  ;;  %v11141_v48 = vpack.i.bf16 %v13521_v39, %v13519_v38 }
  0xb4   :  { %1781 = vmatmul.mubr.f32.gmra.mrb[4].mxu0 %v1580_v58  ;;  %v10813_v2 = vpop.permute.xlu1 %10812  ;;  %10671 = vmatprep.subr.bf16.mxu0 %v18205_v4  ;;  %v10820_v41 = vunpack.i.h.bf16 %v10818_v15  ;;  %v10819_v40 = vunpack.i.l.bf16 %v10818_v15  ;;  %v411_v58 = vld [vmem:[#allocation2 + $0x140] sm:$0xff] }
  0xb5   :  { %9946 = vmatprep.mubr.msk.f32.mxu0 %vm38_vm0, %v13309_v18  ;;  %v10815_v63 = vunpack.i.h.bf16 %v10813_v2  ;;  %v10814_v5 = vunpack.i.l.bf16 %v10813_v2  ;;  %v1581_v18 = vsel %vm1577_vm7, %v1548_v45, %v10805_v57  ;;  %11107 = vrot.lane.b32.xlu0 %v11106_v6, %s12971_s25  ;;  %v410_v57 = vld [vmem:[#allocation2 + $0x138] sm:$0xff] }
  0xb6   :  { %11102 = vrot.lane.b32.xlu1 %v13456_v51, %s12970_s24  ;;  %v442_v45 = vld [vmem:[#allocation2 + $0x139] sm:$0xff] }
  0xb7   :  { %v1418_v14 = vsel %vm1412_vm2, %v1385_v8, %v10815_v63  ;;  %v1417_v3 = vsel %vm1412_vm2, %v1384_v61, %v10814_v5  ;;  %10673 = vmatpush1.bf16.msra.mxu0 %v13231_v56  ;;  %v10828_v24 = vpop.permute.xlu0 %10827  ;;  %v13544_v61 = vpack.i.bf16 %v443_v10, %v442_v45 }
  0xb8   :  { %1786 = vmatmul.mubr.f32.gmra.mrb[6].mxu0 %v1581_v18  ;;  %v10823_v19 = vpop.permute.xlu1 %10822  ;;  %v1450_v52 = vsel %vm1445_vm3, %v1417_v3, %v10819_v40  ;;  %v1451_v22 = vsel %vm1445_vm3, %v1418_v14, %v10820_v41  ;;  %10674 = vmatprep.subr.bf16.mxu0 %v18205_v4  ;;  %v10830_v26 = vunpack.i.h.bf16 %v10828_v24  ;;  %v10829_v29 = vunpack.i.l.bf16 %v10828_v24 }
  0xb9   :  { %v10825_v27 = vunpack.i.h.bf16 %v10823_v19  ;;  %v10824_v28 = vunpack.i.l.bf16 %v10823_v19  ;;  %9947 = vmatprep.mubr.msk.f32.mxu0 %vm38_vm0, %v13340_v35  ;;  %11117 = vrot.lane.b32.xlu0 %v13500_v21, %s12973_s27 }
  0xba   :  { %11112 = vrot.lane.b32.xlu1 %v11111_v9, %s12972_s26 }
  0xbb   :  { %v1483_v20 = vsel %vm1478_vm4, %v1450_v52, %v10824_v28  ;;  %v1484_v23 = vsel %vm1478_vm4, %v1451_v22, %v10825_v27  ;;  %10676 = vmatpush1.bf16.msra.mxu0 %v13269_v7  ;;  %v10838_v34 = vpop.permute.xlu0 %10837 }
  0xbc   :  { %v10833_v31 = vpop.permute.xlu1 %10832  ;;  %v1516_v56 = vsel %vm1511_vm5, %v1483_v20, %v10829_v29  ;;  %v1517_v33 = vsel %vm1511_vm5, %v1484_v23, %v10830_v26  ;;  %10677 = vmatprep.subr.bf16.mxu0 %v18205_v4  ;;  %v10840_v43 = vunpack.i.h.bf16 %v10838_v34  ;;  %v10839_v16 = vunpack.i.l.bf16 %v10838_v34  ;;  %v203_v23 = vld [vmem:[#allocation2 + $0x60] sm:$0xff] }
  0xbd   :  { %v10835_v35 = vunpack.i.h.bf16 %v10833_v31  ;;  %v10834_v32 = vunpack.i.l.bf16 %v10833_v31  ;;  %11127 = vrot.lane.b32.xlu0 %v11106_v6, %s12969_s23  ;;  %v13564_v26 = vld [vmem:[#allocation2 + $0x13a] sm:$0xff]  ;;  %v204_v31 = vld [vmem:[#allocation2 + $0x68] sm:$0xff] }
  0xbe   :  { %11122 = vrot.lane.b32.xlu1 %v13456_v51, %s12967_s21 }
  0xbf   :  { %v1549_v37 = vsel %vm1544_vm6, %v1516_v56, %v10834_v32  ;;  %v1550_v47 = vsel %vm1544_vm6, %v1517_v33, %v10835_v35  ;;  %10679 = vmatpush1.bf16.msra.mxu0 %v13292_v13  ;;  %v10848_v62 = vpop.permute.xlu0 %10847  ;;  %v13570_v56 = vld [vmem:[#allocation2 + $0x150] sm:$0xff] }
  0xc0   :  { %v10843_v46 = vpop.permute.xlu1 %10842  ;;  %v1582_v7 = vsel %vm1577_vm7, %v1549_v37, %v10839_v16  ;;  %10680 = vmatprep.subr.bf16.mxu0 %v18205_v4  ;;  %v10850_v0 = vunpack.i.h.bf16 %v10848_v62  ;;  %v10849_v2 = vunpack.i.l.bf16 %v10848_v62  ;;  %v1583_v13 = vsel %vm1577_vm7, %v1550_v47, %v10840_v43 }
  0xc1   :  { %v10845_v51 = vunpack.i.h.bf16 %v10843_v46  ;;  %v10844_v30 = vunpack.i.l.bf16 %v10843_v46  ;;  %1791 = vmatmul.mubr.f32.gmra.mrb[8].mxu0 %v1582_v7  ;;  %11137 = vrot.lane.b32.xlu0 %v13500_v21, %s12970_s24 }
  0xc2   :  { %11132 = vrot.lane.b32.xlu1 %v11111_v9, %s12968_s22  ;;  %9948 = vmatprep.mubr.msk.f32.mxu0 %vm38_vm0, %v13342_v36 }
  0xc3   :  { %v1387_v42 = vsel %vm38_vm0, %v13241_v60, %v10845_v51  ;;  %v1386_v59 = vsel %vm38_vm0, %v13228_v55, %v10844_v30  ;;  %v11146_v55 = vpack.i.bf16 %v411_v58, %v410_v57  ;;  %10682 = vmatpush1.bf16.msra.mxu0 %v13306_v17  ;;  %v10858_v11 = vpop.permute.xlu0 %10857  ;;  %v445_v57 = vld [vmem:[#allocation2 + $0x159] sm:$0xff] }
  0xc4   :  { %v10853_v63 = vpop.permute.xlu1 %10852  ;;  %v1419_v6 = vsel %vm1412_vm2, %v1386_v59, %v10849_v2  ;;  %v1420_v8 = vsel %vm1412_vm2, %v1387_v42, %v10850_v0  ;;  %10683 = vmatprep.subr.bf16.mxu0 %v18205_v4  ;;  %v10860_v12 = vunpack.i.h.bf16 %v10858_v11  ;;  %v10859_v18 = vunpack.i.l.bf16 %v10858_v11 }
  0xc5   :  { %v10855_v60 = vunpack.i.h.bf16 %v10853_v63  ;;  %v10854_v5 = vunpack.i.l.bf16 %v10853_v63  ;;  %1796 = vmatmul.mubr.f32.gmra.mrb[10].mxu0 %v1583_v13  ;;  %11147 = vrot.lane.b32.xlu0 %v11146_v55, %s12972_s26 }
  0xc6   :  { %11142 = vrot.lane.b32.xlu1 %v11141_v48, %s12971_s25  ;;  %9949 = vmatprep.mubr.msk.f32.mxu0 %vm38_vm0, %v13362_v49 }
  0xc7   :  { %v1452_v36 = vsel %vm1445_vm3, %v1419_v6, %v10854_v5  ;;  %v1453_v9 = vsel %vm1445_vm3, %v1420_v8, %v10855_v60  ;;  %10685 = vmatpush1.bf16.msra.mxu0 %v13322_v25  ;;  %v10868_v40 = vpop.permute.xlu0 %10867  ;;  %v13566_v25 = vld [vmem:[#allocation2 + $0x142] sm:$0xff] }
  0xc8   :  { %v10863_v14 = vpop.permute.xlu1 %10862  ;;  %v1485_v17 = vsel %vm1478_vm4, %v1452_v36, %v10859_v18  ;;  %v1486_v41 = vsel %vm1478_vm4, %v1453_v9, %v10860_v12  ;;  %v10870_v28 = vunpack.i.h.bf16 %v10868_v40  ;;  %v10869_v49 = vunpack.i.l.bf16 %v10868_v40  ;;  %v205_v40 = vld [vmem:[#allocation2 + $0x78] sm:$0xff] }
  0xc9   :  { %v10865_v3 = vunpack.i.h.bf16 %v10863_v14  ;;  %v10864_v15 = vunpack.i.l.bf16 %v10863_v14  ;;  %11157 = vrot.lane.b32.xlu0 %v13500_v21, %s12967_s21  ;;  %v13572_v21 = vld [vmem:[#allocation2 + $0x158] sm:$0xff]  ;;  %v11176_v46 = vpack.i.bf16 %v13566_v25, %v13564_v26 }
  0xca   :  { %11152 = vrot.lane.b32.xlu1 %v13544_v61, %s12973_s27  ;;  %v11181_v7 = vpack.i.bf16 %v13572_v21, %v13570_v56 }
  0xcb   :  { %v1518_v19 = vsel %vm1511_vm5, %v1485_v17, %v10864_v15  ;;  %v1519_v27 = vsel %vm1511_vm5, %v1486_v41, %v10865_v3  ;;  %v10878_v35 = vpop.permute.xlu0 %10877  ;;  %v13605_v3 = vld [vmem:[#allocation2 + $0x152] sm:$0xff]  ;;  %v13607_v15 = vld [vmem:[#allocation2 + $0x15a] sm:$0xff] }
  0xcc   :  { %v10873_v52 = vpop.permute.xlu1 %10872  ;;  %v1551_v24 = vsel %vm1544_vm6, %v1518_v19, %v10869_v49  ;;  %v1552_v29 = vsel %vm1544_vm6, %v1519_v27, %v10870_v28  ;;  %v10880_v33 = vunpack.i.h.bf16 %v10878_v35  ;;  %v10879_v34 = vunpack.i.l.bf16 %v10878_v35  ;;  %v206_v19 = vld [vmem:[#allocation2 + $0x80] sm:$0xff] }
  0xcd   :  { %v10875_v22 = vunpack.i.h.bf16 %v10873_v52  ;;  %v10874_v20 = vunpack.i.l.bf16 %v10873_v52  ;;  %11167 = vrot.lane.b32.xlu0 %v11146_v55, %s12968_s22  ;;  %v461_v49 = vld [vmem:[#allocation2 + $0x9a] sm:$0xff] }
  0xce   :  { %11162 = vrot.lane.b32.xlu1 %v11141_v48, %s12969_s23  ;;  %v1389_v30 = vsel %vm38_vm0, %v204_v31, %v10880_v33  ;;  %v1388_v47 = vsel %vm38_vm0, %v203_v23, %v10879_v34  ;;  %v444_v48 = vld [vmem:[#allocation2 + $0x151] sm:$0xff]  ;;  %v13615_v23 = vld [vmem:[#allocation2 + $0x168] sm:$0xff] }
  0xcf   :  { %v1584_v32 = vsel %vm1577_vm7, %v1551_v24, %v10874_v20  ;;  %v1585_v51 = vsel %vm1577_vm7, %v1552_v29, %v10875_v22  ;;  %v10888_v59 = vpop.permute.xlu0 %10887  ;;  %v13589_v2 = vpack.i.bf16 %v445_v57, %v444_v48  ;;  %v11211_v20 = vpack.i.bf16 %v13607_v15, %v13605_v3  ;;  %v13617_v24 = vld [vmem:[#allocation2 + $0x170] sm:$0xff] }
  0xd0   :  { %v10883_v37 = vpop.permute.xlu1 %10882  ;;  %1801 = vmatmul.mubr.f32.gmra.mrb[12].mxu0 %v1584_v32  ;;  %v10889_v62 = vunpack.i.l.bf16 %v10888_v59  ;;  %v446_v32 = vld [vmem:[#allocation2 + $0x169] sm:$0xff]  ;;  %v447_v33 = vld [vmem:[#allocation2 + $0x171] sm:$0xff] }
  0xd1   :  { %v10885_v43 = vunpack.i.h.bf16 %v10883_v37  ;;  %v10884_v16 = vunpack.i.l.bf16 %v10883_v37  ;;  %9950 = vmatprep.mubr.msk.f32.mxu0 %vm38_vm0, %v13364_v50  ;;  %v10890_v50 = vunpack.i.h.bf16 %v10888_v59  ;;  %11177 = vrot.lane.b32.xlu0 %v11176_v46, %s12971_s25  ;;  %v13630_v57 = vpack.i.bf16 %v447_v33, %v446_v32 }
  0xd2   :  { %11172 = vrot.lane.b32.xlu1 %v13544_v61, %s12970_s24 }
  0xd3   :  { %v1422_v58 = vsel %vm1412_vm2, %v1389_v30, %v10885_v43  ;;  %v1421_v42 = vsel %vm1412_vm2, %v1388_v47, %v10884_v16  ;;  %v10898_v55 = vpop.permute.xlu0 %10897  ;;  %v11216_v30 = vpack.i.bf16 %v13617_v24, %v13615_v23  ;;  %v462_v47 = vld [vmem:[#allocation2 + $0xaa] sm:$0xff] }
  0xd4   :  { %v10893_v45 = vpop.permute.xlu1 %10892  ;;  %1806 = vmatmul.mubr.f32.gmra.mrb[14].mxu0 %v1585_v51  ;;  %v1454_v63 = vsel %vm1445_vm3, %v1421_v42, %v10889_v62  ;;  %v1455_v13 = vsel %vm1445_vm3, %v1422_v58, %v10890_v50  ;;  %v10900_v6 = vunpack.i.h.bf16 %v10898_v55  ;;  %v10899_v8 = vunpack.i.l.bf16 %v10898_v55 }
  0xd5   :  { %v10895_v10 = vunpack.i.h.bf16 %v10893_v45  ;;  %v10894_v0 = vunpack.i.l.bf16 %v10893_v45  ;;  %9951 = vmatprep.mubr.msk.f32.mxu0 %vm38_vm0, %v13382_v1  ;;  %11187 = vrot.lane.b32.xlu0 %v13589_v2, %s12973_s27 }
  0xd6   :  { %11182 = vrot.lane.b32.xlu1 %v11181_v7, %s12972_s26 }
  0xd7   :  { %v1487_v60 = vsel %vm1478_vm4, %v1454_v63, %v10894_v0  ;;  %v1488_v5 = vsel %vm1478_vm4, %v1455_v13, %v10895_v10  ;;  %v10908_v18 = vpop.permute.xlu0 %10907 }
  0xd8   :  { %v10903_v36 = vpop.permute.xlu1 %10902  ;;  %v1520_v1 = vsel %vm1511_vm5, %v1487_v60, %v10899_v8  ;;  %v1521_v12 = vsel %vm1511_vm5, %v1488_v5, %v10900_v6  ;;  %v10910_v17 = vunpack.i.h.bf16 %v10908_v18  ;;  %v10909_v41 = vunpack.i.l.bf16 %v10908_v18  ;;  %v13646_v18 = vld [vmem:[#allocation2 + $0x16a] sm:$0xff] }
  0xd9   :  { %v10905_v9 = vunpack.i.h.bf16 %v10903_v36  ;;  %v10904_v11 = vunpack.i.l.bf16 %v10903_v36  ;;  %11197 = vrot.lane.b32.xlu0 %v11176_v46, %s12969_s23 }
  0xda   :  { %11192 = vrot.lane.b32.xlu1 %v13544_v61, %s12967_s21 }
  0xdb   :  { %v1553_v14 = vsel %vm1544_vm6, %v1520_v1, %v10904_v11  ;;  %v1554_v52 = vsel %vm1544_vm6, %v1521_v12, %v10905_v9  ;;  %v10918_v35 = vpop.permute.xlu0 %10917  ;;  %v207_v1 = vld [vmem:[#allocation2 + $0x90] sm:$0xff] }
  0xdc   :  { %v10913_v27 = vpop.permute.xlu1 %10912  ;;  %v1586_v22 = vsel %vm1577_vm7, %v1553_v14, %v10909_v41  ;;  %v10920_v34 = vunpack.i.h.bf16 %v10918_v35  ;;  %v10919_v37 = vunpack.i.l.bf16 %v10918_v35  ;;  %v1587_v16 = vsel %vm1577_vm7, %v1554_v52, %v10910_v17  ;;  %v13648_v14 = vld [vmem:[#allocation2 + $0x172] sm:$0xff] }
  0xdd   :  { %v10915_v28 = vunpack.i.h.bf16 %v10913_v27  ;;  %v10914_v61 = vunpack.i.l.bf16 %v10913_v27  ;;  %1811 = vmatmul.mubr.f32.gmra.mrb[16].mxu0 %v1586_v22  ;;  %11207 = vrot.lane.b32.xlu0 %v13589_v2, %s12970_s24  ;;  %v463_v17 = vld [vmem:[#allocation2 + $0xb2] sm:$0xff] }
  0xde   :  { %11202 = vrot.lane.b32.xlu1 %v11181_v7, %s12968_s22  ;;  %9952 = vmatprep.mubr.msk.f32.mxu0 %vm38_vm0, %v461_v49 }
  0xdf   :  { %v1391_v29 = vsel %vm38_vm0, %v206_v19, %v10915_v28  ;;  %v1390_v31 = vsel %vm38_vm0, %v205_v40, %v10914_v61  ;;  %v10928_v59 = vpop.permute.xlu0 %10927  ;;  %v208_v40 = vld [vmem:[#allocation2 + $0x98] sm:$0xff]  ;;  %v416_v28 = vld [vmem:[#allocation2 + $0x180] sm:$0xff] }
  0xe0   :  { %v10923_v43 = vpop.permute.xlu1 %10922  ;;  %v1423_v7 = vsel %vm1412_vm2, %v1390_v31, %v10919_v37  ;;  %v1424_v48 = vsel %vm1412_vm2, %v1391_v29, %v10920_v34  ;;  %v10930_v50 = vunpack.i.h.bf16 %v10928_v59  ;;  %v10929_v62 = vunpack.i.l.bf16 %v10928_v59  ;;  %v448_v34 = vld [vmem:[#allocation2 + $0x181] sm:$0xff]  ;;  %v449_v37 = vld [vmem:[#allocation2 + $0x189] sm:$0xff] }
  0xe1   :  { %v10925_v46 = vunpack.i.h.bf16 %v10923_v43  ;;  %v10924_v51 = vunpack.i.l.bf16 %v10923_v43  ;;  %1816 = vmatmul.mubr.f32.gmra.mrb[18].mxu0 %v1587_v16  ;;  %11217 = vrot.lane.b32.xlu0 %v11216_v30, %s12972_s26  ;;  %v11246_v29 = vpack.i.bf16 %v13648_v14, %v13646_v18  ;;  %v464_v43 = vld [vmem:[#allocation2 + $0xc2] sm:$0xff] }
  0xe2   :  { %11212 = vrot.lane.b32.xlu1 %v11211_v20, %s12971_s25  ;;  %9953 = vmatprep.mubr.msk.f32.mxu0 %vm38_vm0, %v462_v47 }
  0xe3   :  { %v1456_v58 = vsel %vm1445_vm3, %v1423_v7, %v10924_v51  ;;  %v1457_v42 = vsel %vm1445_vm3, %v1424_v48, %v10925_v46  ;;  %v10938_v60 = vpop.permute.xlu0 %10937 }
  0xe4   :  { %v10933_v45 = vpop.permute.xlu1 %10932  ;;  %v1489_v63 = vsel %vm1478_vm4, %v1456_v58, %v10929_v62  ;;  %v1490_v13 = vsel %vm1478_vm4, %v1457_v42, %v10930_v50  ;;  %v10940_v6 = vunpack.i.h.bf16 %v10938_v60  ;;  %v10939_v8 = vunpack.i.l.bf16 %v10938_v60 }
  0xe5   :  { %v10935_v10 = vunpack.i.h.bf16 %v10933_v45  ;;  %v10934_v0 = vunpack.i.l.bf16 %v10933_v45  ;;  %11227 = vrot.lane.b32.xlu0 %v13589_v2, %s12967_s21  ;;  %v417_v2 = vld [vmem:[#allocation2 + $0x188] sm:$0xff]  ;;  %v11256_v42 = vpack.i.bf16 %v449_v37, %v448_v34 }
  0xe6   :  { %11222 = vrot.lane.b32.xlu1 %v13630_v57, %s12973_s27  ;;  %v11251_v33 = vpack.i.bf16 %v417_v2, %v416_v28 }
  0xe7   :  { %v1522_v5 = vsel %vm1511_vm5, %v1489_v63, %v10934_v0  ;;  %v1523_v55 = vsel %vm1511_vm5, %v1490_v13, %v10935_v10  ;;  %v10948_v19 = vpop.permute.xlu0 %10947 }
  0xe8   :  { %v10943_v36 = vpop.permute.xlu1 %10942  ;;  %v1555_v12 = vsel %vm1544_vm6, %v1522_v5, %v10939_v8  ;;  %v1556_v41 = vsel %vm1544_vm6, %v1523_v55, %v10940_v6  ;;  %v10950_v61 = vunpack.i.h.bf16 %v10948_v19  ;;  %v10949_v49 = vunpack.i.l.bf16 %v10948_v19 }
  0xe9   :  { %v10945_v9 = vunpack.i.h.bf16 %v10943_v36  ;;  %v10944_v11 = vunpack.i.l.bf16 %v10943_v36  ;;  %11237 = vrot.lane.b32.xlu0 %v11216_v30, %s12968_s22 }
  0xea   :  { %11232 = vrot.lane.b32.xlu1 %v11211_v20, %s12969_s23  ;;  %v1393_v35 = vsel %vm38_vm0, %v208_v40, %v10950_v61  ;;  %v1392_v32 = vsel %vm38_vm0, %v207_v1, %v10949_v49  ;;  %v418_v49 = vld [vmem:[#allocation2 + $0x198] sm:$0xff] }
  0xeb   :  { %v1588_v27 = vsel %vm1577_vm7, %v1555_v12, %v10944_v11  ;;  %v1589_v31 = vsel %vm1577_vm7, %v1556_v41, %v10945_v9  ;;  %v10958_v51 = vpop.permute.xlu0 %10957  ;;  %v13676_v9 = vld [vmem:[#allocation2 + $0x182] sm:$0xff]  ;;  %v13678_v11 = vld [vmem:[#allocation2 + $0x18a] sm:$0xff] }
  0xec   :  { %v10953_v52 = vpop.permute.xlu1 %10952  ;;  %1821 = vmatmul.mubr.f32.gmra.mrb[20].mxu0 %v1588_v27  ;;  %v10960_v30 = vunpack.i.h.bf16 %v10958_v51  ;;  %v10959_v47 = vunpack.i.l.bf16 %v10958_v51  ;;  %v210_v41 = vld [vmem:[#allocation2 + $0xb0] sm:$0xff]  ;;  %v11281_v61 = vpack.i.bf16 %v13678_v11, %v13676_v9  ;;  %v466_v51 = vld [vmem:[#allocation2 + $0xda] sm:$0xff] }
  0xed   :  { %v10955_v22 = vunpack.i.h.bf16 %v10953_v52  ;;  %v10954_v20 = vunpack.i.l.bf16 %v10953_v52  ;;  %9954 = vmatprep.mubr.msk.f32.mxu0 %vm38_vm0, %v463_v17  ;;  %11247 = vrot.lane.b32.xlu0 %v11246_v29, %s12971_s25  ;;  %v209_v17 = vld [vmem:[#allocation2 + $0xa8] sm:$0xff]  ;;  %v419_v52 = vld [vmem:[#allocation2 + $0x1a0] sm:$0xff] }
  0xee   :  { %11242 = vrot.lane.b32.xlu1 %v13630_v57, %s12970_s24 }
  0xef   :  { %v1426_v16 = vsel %vm1412_vm2, %v1393_v35, %v10955_v22  ;;  %v1425_v46 = vsel %vm1412_vm2, %v1392_v32, %v10954_v20  ;;  %v10968_v10 = vpop.permute.xlu0 %10967  ;;  %v450_v35 = vld [vmem:[#allocation2 + $0x199] sm:$0xff] }
  0xf0   :  { %v10963_v7 = vpop.permute.xlu1 %10962  ;;  %1826 = vmatmul.mubr.f32.gmra.mrb[22].mxu0 %v1589_v31  ;;  %v1458_v59 = vsel %vm1445_vm3, %v1425_v46, %v10959_v47  ;;  %v1459_v50 = vsel %vm1445_vm3, %v1426_v16, %v10960_v30  ;;  %v10970_v0 = vunpack.i.h.bf16 %v10968_v10  ;;  %v10969_v63 = vunpack.i.l.bf16 %v10968_v10  ;;  %v3822_v10 = vld [vmem:[#allocation2 + $0xa] sm:$0xff] }
  0xf1   :  { %v10965_v48 = vunpack.i.h.bf16 %v10963_v7  ;;  %v10964_v58 = vunpack.i.l.bf16 %v10963_v7  ;;  %9955 = vmatprep.mubr.msk.f32.mxu0 %vm38_vm0, %v464_v43  ;;  %11257 = vrot.lane.b32.xlu0 %v11256_v42, %s12973_s27  ;;  %v11286_v46 = vpack.i.bf16 %v419_v52, %v418_v49  ;;  %v212_v49 = vld [vmem:[#allocation2 + $0xc8] sm:$0xff] }
  0xf2   :  { %11252 = vrot.lane.b32.xlu1 %v11251_v33, %s12972_s26 }
  0xf3   :  { %v1491_v62 = vsel %vm1478_vm4, %v1458_v59, %v10964_v58  ;;  %v1492_v45 = vsel %vm1478_vm4, %v1459_v50, %v10965_v48  ;;  %v10978_v8 = vpop.permute.xlu0 %10977  ;;  %v3789_v48 = vld [vmem:[#allocation2 + $0x1] sm:$0xff]  ;;  %v3790_v58 = vld [vmem:[#allocation2 + $0x9] sm:$0xff] }
  0xf4   :  { %v10973_v13 = vpop.permute.xlu1 %10972  ;;  %v1524_v55 = vsel %vm1511_vm5, %v1491_v62, %v10969_v63  ;;  %v1525_v6 = vsel %vm1511_vm5, %v1492_v45, %v10970_v0  ;;  %v10980_v1 = vunpack.i.h.bf16 %v10978_v8  ;;  %v10979_v12 = vunpack.i.l.bf16 %v10978_v8  ;;  %v3821_v45 = vld [vmem:[#allocation2 + $0x2] sm:$0xff] }
  0xf5   :  { %v10975_v60 = vunpack.i.h.bf16 %v10973_v13  ;;  %v10974_v5 = vunpack.i.l.bf16 %v10973_v13  ;;  %11267 = vrot.lane.b32.xlu0 %v11246_v29, %s12969_s23  ;;  %v451_v29 = vld [vmem:[#allocation2 + $0x1a1] sm:$0xff]  ;;  %v11301_v8 = vpack.i.bf16 %v3822_v10, %v3821_v45 }
  0xf6   :  { %11262 = vrot.lane.b32.xlu1 %v13630_v57, %s12967_s21  ;;  %v465_v57 = vld [vmem:[#allocation2 + $0xca] sm:$0xff]  ;;  %v11291_v7 = vpack.i.bf16 %v451_v29, %v450_v35 }
  0xf7   :  { %v1557_v36 = vsel %vm1544_vm6, %v1524_v55, %v10974_v5  ;;  %v1558_v28 = vsel %vm1544_vm6, %v1525_v6, %v10975_v60  ;;  %v10988_v31 = vpop.permute.xlu0 %10987  ;;  %v11296_v5 = vpack.i.bf16 %v3790_v58, %v3789_v48 }
  0xf8   :  { %v10983_v40 = vpop.permute.xlu1 %10982  ;;  %v1590_v2 = vsel %vm1577_vm7, %v1557_v36, %v10979_v12  ;;  %v10990_v32 = vunpack.i.h.bf16 %v10988_v31  ;;  %v10989_v34 = vunpack.i.l.bf16 %v10988_v31 }
  0xf9   :  { %v10985_v19 = vunpack.i.h.bf16 %v10983_v40  ;;  %v10984_v27 = vunpack.i.l.bf16 %v10983_v40  ;;  %1831 = vmatmul.mubr.f32.gmra.mrb[24].mxu0 %v1590_v2  ;;  %11277 = vrot.lane.b32.xlu0 %v11256_v42, %s12970_s24 }
  0xfa   :  { %11272 = vrot.lane.b32.xlu1 %v11251_v33, %s12968_s22  ;;  %9956 = vmatprep.mubr.msk.f32.mxu0 %vm38_vm0, %v465_v57  ;;  %v1591_v33 = vsel %vm1577_vm7, %v1558_v28, %v10980_v1  ;;  %v467_v28 = vld [vmem:[#allocation2 + $0xe2] sm:$0xff] }
  0xfb   :  { %v1395_v22 = vsel %vm38_vm0, %v210_v41, %v10985_v19  ;;  %v1394_v20 = vsel %vm38_vm0, %v209_v17, %v10984_v27  ;;  %v10998_v62 = vpop.permute.xlu0 %10997 }
  0xfc   :  { %v10993_v37 = vpop.permute.xlu1 %10992  ;;  %v1427_v30 = vsel %vm1412_vm2, %v1394_v20, %v10989_v34  ;;  %v1428_v47 = vsel %vm1412_vm2, %v1395_v22, %v10990_v32  ;;  %v11000_v42 = vunpack.i.h.bf16 %v10998_v62  ;;  %v10999_v0 = vunpack.i.l.bf16 %v10998_v62 }
  0xfd   :  { %v10995_v43 = vunpack.i.h.bf16 %v10993_v37  ;;  %v10994_v16 = vunpack.i.l.bf16 %v10993_v37  ;;  %1836 = vmatmul.mubr.f32.gmra.mrb[26].mxu0 %v1591_v33  ;;  %11287 = vrot.lane.b32.xlu0 %v11286_v46, %s12972_s26 }
  0xfe   :  { %11282 = vrot.lane.b32.xlu1 %v11281_v61, %s12971_s25  ;;  %9957 = vmatprep.mubr.msk.f32.mxu0 %vm38_vm0, %v466_v51  ;;  %v211_v61 = vld [vmem:[#allocation2 + $0xc0] sm:$0xff] }
  0xff   :  { %v1460_v59 = vsel %vm1445_vm3, %v1427_v30, %v10994_v16  ;;  %v1461_v50 = vsel %vm1445_vm3, %v1428_v47, %v10995_v43  ;;  %v11008_v36 = vpop.permute.xlu0 %11007 }
 0x100   :  { %v11003_v63 = vpop.permute.xlu1 %11002  ;;  %v1493_v55 = vsel %vm1478_vm4, %v1460_v59, %v10999_v0  ;;  %v1494_v6 = vsel %vm1478_vm4, %v1461_v50, %v11000_v42  ;;  %v11010_v17 = vunpack.i.h.bf16 %v11008_v36  ;;  %v11009_v41 = vunpack.i.l.bf16 %v11008_v36 }
 0x101   :  { %v11005_v13 = vunpack.i.h.bf16 %v11003_v63  ;;  %v11004_v60 = vunpack.i.l.bf16 %v11003_v63  ;;  %11297 = vrot.lane.b32.xlu0 %v11296_v5, %s12967_s21 }
 0x102   :  { %11292 = vrot.lane.b32.xlu1 %v11291_v7, %s12973_s27 }
 0x103   :  { %v1526_v1 = vsel %vm1511_vm5, %v1493_v55, %v11004_v60  ;;  %v1527_v12 = vsel %vm1511_vm5, %v1494_v6, %v11005_v13  ;;  %v11018_v52 = vpop.permute.xlu0 %11017 }
 0x104   :  { %v11013_v40 = vpop.permute.xlu1 %11012  ;;  %v1559_v57 = vsel %vm1544_vm6, %v1526_v1, %v11009_v41  ;;  %v1560_v2 = vsel %vm1544_vm6, %v1527_v12, %v11010_v17  ;;  %v11020_v20 = vunpack.i.h.bf16 %v11018_v52  ;;  %v11019_v31 = vunpack.i.l.bf16 %v11018_v52  ;;  %v214_v1 = vld [vmem:[#allocation2 + $0xe0] sm:$0xff] }
 0x105   :  { %v11015_v19 = vunpack.i.h.bf16 %v11013_v40  ;;  %v11014_v27 = vunpack.i.l.bf16 %v11013_v40  ;;  %11307 = vrot.lane.b32.xlu0 %v11286_v46, %s12972_s26  ;;  %v469_v40 = vld [vmem:[#allocation2 + $0xfa] sm:$0xff] }
 0x106   :  { %11302 = vrot.lane.b32.xlu1 %v11301_v8, %s12969_s23  ;;  %v1397_v37 = vsel %vm38_vm0, %v212_v49, %v11020_v20  ;;  %v1396_v33 = vsel %vm38_vm0, %v211_v61, %v11019_v31 }
 0x107   :  { %v1592_v22 = vsel %vm1577_vm7, %v1559_v57, %v11014_v27  ;;  %v1593_v34 = vsel %vm1577_vm7, %v1560_v2, %v11015_v19  ;;  %v11028_v51 = vpop.permute.xlu0 %11027 }
 0x108   :  { %v11023_v35 = vpop.permute.xlu1 %11022  ;;  %1841 = vmatmul.mubr.f32.gmra.mrb[28].mxu0 %v1592_v22  ;;  %v11030_v30 = vunpack.i.h.bf16 %v11028_v51  ;;  %v11029_v47 = vunpack.i.l.bf16 %v11028_v51 }
 0x109   :  { %v11025_v29 = vunpack.i.h.bf16 %v11023_v35  ;;  %v11024_v32 = vunpack.i.l.bf16 %v11023_v35  ;;  %9958 = vmatprep.mubr.msk.f32.mxu0 %vm38_vm0, %v467_v28  ;;  %11317 = vrot.lane.b32.xlu0 %v11296_v5, %s12967_s21 }
 0x10a   :  { %11312 = vrot.lane.b32.xlu1 %v11291_v7, %s12973_s27 }
 0x10b   :  { %v1430_v43 = vsel %vm1412_vm2, %v1397_v37, %v11025_v29  ;;  %v1429_v16 = vsel %vm1412_vm2, %v1396_v33, %v11024_v32  ;;  %v11038_v45 = vpop.permute.xlu0 %11037 }
 0x10c   :  { %v11033_v48 = vpop.permute.xlu1 %11032  ;;  %1846 = vmatmul.mubr.f32.gmra.mrb[30].mxu0 %v1593_v34  ;;  %v1462_v46 = vsel %vm1445_vm3, %v1429_v16, %v11029_v47  ;;  %v1463_v7 = vsel %vm1445_vm3, %v1430_v43, %v11030_v30  ;;  %v11040_v10 = vunpack.i.h.bf16 %v11038_v45  ;;  %v11039_v42 = vunpack.i.l.bf16 %v11038_v45 }
 0x10d   :  { %v11035_v58 = vunpack.i.h.bf16 %v11033_v48  ;;  %v11034_v59 = vunpack.i.l.bf16 %v11033_v48  ;;  %9959 = vmatprep.mubr.msk.f32.mxu0 %vm38_vm0, %v13433_v44 }
 0x10e   :  { %11322 = vrot.lane.b32.xlu1 %v11301_v8, %s12969_s23  ;;  %v213_v8 = vld [vmem:[#allocation2 + $0xd8] sm:$0xff] }
 0x10f   :  { %v1495_v50 = vsel %vm1478_vm4, %v1462_v46, %v11034_v59  ;;  %v1496_v62 = vsel %vm1478_vm4, %v1463_v7, %v11035_v58  ;;  %v11048_v5 = vpop.permute.xlu0 %11047 }
 0x110   :  { %v11043_v0 = vpop.permute.xlu1 %11042  ;;  %v1528_v44 = vsel %vm1511_vm5, %v1495_v50, %v11039_v42  ;;  %v1529_v60 = vsel %vm1511_vm5, %v1496_v62, %v11040_v10  ;;  %v11050_v6 = vunpack.i.h.bf16 %v11048_v5  ;;  %v11049_v36 = vunpack.i.l.bf16 %v11048_v5 }
 0x111   :  { %v11045_v63 = vunpack.i.h.bf16 %v11043_v0  ;;  %v11044_v13 = vunpack.i.l.bf16 %v11043_v0  ;;  %v215_v0 = vld [vmem:[#allocation2 + $0xf0] sm:$0xff] }
 0x113   :  { %v1561_v55 = vsel %vm1544_vm6, %v1528_v44, %v11044_v13  ;;  %v1562_v19 = vsel %vm1544_vm6, %v1529_v60, %v11045_v63  ;;  %v11058_v2 = vpop.permute.xlu0 %11057  ;;  %v216_v63 = vld [vmem:[#allocation2 + $0xf8] sm:$0xff] }
 0x114   :  { %v11053_v12 = vpop.permute.xlu1 %11052  ;;  %v1594_v27 = vsel %vm1577_vm7, %v1561_v55, %v11049_v36  ;;  %v11060_v61 = vunpack.i.h.bf16 %v11058_v2  ;;  %v11059_v49 = vunpack.i.l.bf16 %v11058_v2  ;;  %v1595_v22 = vsel %vm1577_vm7, %v1562_v19, %v11050_v6 }
 0x115   :  { %v11055_v17 = vunpack.i.h.bf16 %v11053_v12  ;;  %v11054_v41 = vunpack.i.l.bf16 %v11053_v12  ;;  %1851 = vmatmul.mubr.f32.gmra.mrb[32].mxu0 %v1594_v27 }
 0x116   :  { %9960 = vmatprep.mubr.msk.f32.mxu0 %vm38_vm0, %v469_v40 }
 0x117   :  { %v1399_v57 = vsel %vm38_vm0, %v214_v1, %v11055_v17  ;;  %v1398_v28 = vsel %vm38_vm0, %v213_v8, %v11054_v41  ;;  %v11068_v37 = vpop.permute.xlu0 %11067 }
 0x118   :  { %v11063_v52 = vpop.permute.xlu1 %11062  ;;  %v1431_v35 = vsel %vm1412_vm2, %v1398_v28, %v11059_v49  ;;  %v1432_v29 = vsel %vm1412_vm2, %v1399_v57, %v11060_v61  ;;  %v11070_v33 = vunpack.i.h.bf16 %v11068_v37  ;;  %v11069_v43 = vunpack.i.l.bf16 %v11068_v37 }
 0x119   :  { %v11065_v20 = vunpack.i.h.bf16 %v11063_v52  ;;  %v11064_v31 = vunpack.i.l.bf16 %v11063_v52  ;;  %1856 = vmatmul.mubr.f32.gmra.mrb[34].mxu0 %v1595_v22 }
 0x11a   :  { %9961 = vmatprep.mubr.msk.f32.mxu0 %vm38_vm0, %v13477_v53 }
 0x11b   :  { %v1464_v32 = vsel %vm1445_vm3, %v1431_v35, %v11064_v31  ;;  %v1465_v34 = vsel %vm1445_vm3, %v1432_v29, %v11065_v20  ;;  %v11078_v58 = vpop.permute.xlu0 %11077 }
 0x11c   :  { %v11073_v16 = vpop.permute.xlu1 %11072  ;;  %v1497_v47 = vsel %vm1478_vm4, %v1464_v32, %v11069_v43  ;;  %v1498_v48 = vsel %vm1478_vm4, %v1465_v34, %v11070_v33  ;;  %v11080_v7 = vunpack.i.h.bf16 %v11078_v58  ;;  %v11079_v50 = vunpack.i.l.bf16 %v11078_v58 }
 0x11d   :  { %v11075_v51 = vunpack.i.h.bf16 %v11073_v16  ;;  %v11074_v30 = vunpack.i.l.bf16 %v11073_v16 }
 0x11f   :  { %v1530_v59 = vsel %vm1511_vm5, %v1497_v47, %v11074_v30  ;;  %v1531_v46 = vsel %vm1511_vm5, %v1498_v48, %v11075_v51  ;;  %v11088_v13 = vpop.permute.xlu0 %11087  ;;  %v217_v51 = vld [vmem:[#allocation2 + $0x108] sm:$0xff]  ;;  %v218_v30 = vld [vmem:[#allocation2 + $0x110] sm:$0xff] }
 0x120   :  { %v11083_v62 = vpop.permute.xlu1 %11082  ;;  %v1563_v42 = vsel %vm1544_vm6, %v1530_v59, %v11079_v50  ;;  %v1564_v53 = vsel %vm1544_vm6, %v1531_v46, %v11080_v7  ;;  %v11090_v60 = vunpack.i.h.bf16 %v11088_v13  ;;  %v11089_v5 = vunpack.i.l.bf16 %v11088_v13 }
 0x121   :  { %v11085_v45 = vunpack.i.h.bf16 %v11083_v62  ;;  %v11084_v10 = vunpack.i.l.bf16 %v11083_v62 }
 0x122   :  { %v1401_v1 = vsel %vm38_vm0, %v216_v63, %v11090_v60  ;;  %v1400_v12 = vsel %vm38_vm0, %v215_v0, %v11089_v5 }
 0x123   :  { %v1596_v44 = vsel %vm1577_vm7, %v1563_v42, %v11084_v10  ;;  %v1597_v8 = vsel %vm1577_vm7, %v1564_v53, %v11085_v45  ;;  %v11098_v40 = vpop.permute.xlu0 %11097 }
 0x124   :  { %v11093_v55 = vpop.permute.xlu1 %11092  ;;  %1861 = vmatmul.mubr.f32.gmra.mrb[36].mxu0 %v1596_v44  ;;  %v11100_v19 = vunpack.i.h.bf16 %v11098_v40  ;;  %v11099_v27 = vunpack.i.l.bf16 %v11098_v40 }
 0x125   :  { %v11095_v6 = vunpack.i.h.bf16 %v11093_v55  ;;  %v11094_v36 = vunpack.i.l.bf16 %v11093_v55  ;;  %9962 = vmatprep.mubr.msk.f32.mxu0 %vm38_vm0, %v13479_v54 }
 0x127   :  { %v1434_v17 = vsel %vm1412_vm2, %v1401_v1, %v11095_v6  ;;  %v1433_v41 = vsel %vm1412_vm2, %v1400_v12, %v11094_v36  ;;  %v11108_v22 = vpop.permute.xlu0 %11107 }
 0x128   :  { %v11103_v57 = vpop.permute.xlu1 %11102  ;;  %1866 = vmatmul.mubr.f32.gmra.mrb[38].mxu0 %v1597_v8  ;;  %v1466_v54 = vsel %vm1445_vm3, %v1433_v41, %v11099_v27  ;;  %v1467_v61 = vsel %vm1445_vm3, %v1434_v17, %v11100_v19  ;;  %v11110_v20 = vunpack.i.h.bf16 %v11108_v22  ;;  %v11109_v31 = vunpack.i.l.bf16 %v11108_v22 }
 0x129   :  { %v11105_v28 = vunpack.i.h.bf16 %v11103_v57  ;;  %v11104_v2 = vunpack.i.l.bf16 %v11103_v57  ;;  %9963 = vmatprep.mubr.msk.f32.mxu0 %vm38_vm0, %v13519_v38 }
 0x12b   :  { %v1499_v49 = vsel %vm1478_vm4, %v1466_v54, %v11104_v2  ;;  %v1500_v52 = vsel %vm1478_vm4, %v1467_v61, %v11105_v28  ;;  %v11118_v33 = vpop.permute.xlu0 %11117 }
 0x12c   :  { %v11113_v35 = vpop.permute.xlu1 %11112  ;;  %v1532_v34 = vsel %vm1511_vm5, %v1499_v49, %v11109_v31  ;;  %v1533_v37 = vsel %vm1511_vm5, %v1500_v52, %v11110_v20  ;;  %v11120_v43 = vunpack.i.h.bf16 %v11118_v33  ;;  %v11119_v16 = vunpack.i.l.bf16 %v11118_v33  ;;  %v219_v49 = vld [vmem:[#allocation2 + $0x120] sm:$0xff]  ;;  %v220_v52 = vld [vmem:[#allocation2 + $0x128] sm:$0xff] }
 0x12d   :  { %v11115_v29 = vunpack.i.h.bf16 %v11113_v35  ;;  %v11114_v32 = vunpack.i.l.bf16 %v11113_v35 }
 0x12f   :  { %v1565_v38 = vsel %vm1544_vm6, %v1532_v34, %v11114_v32  ;;  %v1566_v59 = vsel %vm1544_vm6, %v1533_v37, %v11115_v29  ;;  %v11128_v62 = vpop.permute.xlu0 %11127 }
 0x130   :  { %v11123_v47 = vpop.permute.xlu1 %11122  ;;  %v1598_v46 = vsel %vm1577_vm7, %v1565_v38, %v11119_v16  ;;  %v11130_v45 = vunpack.i.h.bf16 %v11128_v62  ;;  %v11129_v10 = vunpack.i.l.bf16 %v11128_v62  ;;  %v1599_v53 = vsel %vm1577_vm7, %v1566_v59, %v11120_v43 }
 0x131   :  { %v11125_v48 = vunpack.i.h.bf16 %v11123_v47  ;;  %v11124_v58 = vunpack.i.l.bf16 %v11123_v47  ;;  %1871 = vmatmul.mubr.f32.gmra.mrb[40].mxu0 %v1598_v46 }
 0x132   :  { %9964 = vmatprep.mubr.msk.f32.mxu0 %vm38_vm0, %v13521_v39 }
 0x133   :  { %v1403_v7 = vsel %vm38_vm0, %v218_v30, %v11125_v48  ;;  %v1402_v50 = vsel %vm38_vm0, %v217_v51, %v11124_v58  ;;  %v11138_v55 = vpop.permute.xlu0 %11137 }
 0x134   :  { %v11133_v42 = vpop.permute.xlu1 %11132  ;;  %v1435_v13 = vsel %vm1412_vm2, %v1402_v50, %v11129_v10  ;;  %v1436_v44 = vsel %vm1412_vm2, %v1403_v7, %v11130_v45  ;;  %v11140_v6 = vunpack.i.h.bf16 %v11138_v55  ;;  %v11139_v36 = vunpack.i.l.bf16 %v11138_v55  ;;  %v221_v55 = vld [vmem:[#allocation2 + $0x138] sm:$0xff] }
 0x135   :  { %v11135_v0 = vunpack.i.h.bf16 %v11133_v42  ;;  %v11134_v63 = vunpack.i.l.bf16 %v11133_v42  ;;  %1876 = vmatmul.mubr.f32.gmra.mrb[42].mxu0 %v1599_v53 }
 0x136   :  { %9965 = vmatprep.mubr.msk.f32.mxu0 %vm38_vm0, %v13564_v26 }
 0x137   :  { %v1468_v60 = vsel %vm1445_vm3, %v1435_v13, %v11134_v63  ;;  %v1469_v5 = vsel %vm1445_vm3, %v1436_v44, %v11135_v0  ;;  %v11148_v41 = vpop.permute.xlu0 %11147 }
 0x138   :  { %v11143_v8 = vpop.permute.xlu1 %11142  ;;  %v1501_v12 = vsel %vm1478_vm4, %v1468_v60, %v11139_v36  ;;  %v1502_v17 = vsel %vm1478_vm4, %v1469_v5, %v11140_v6  ;;  %v11150_v27 = vunpack.i.h.bf16 %v11148_v41  ;;  %v11149_v57 = vunpack.i.l.bf16 %v11148_v41  ;;  %v222_v6 = vld [vmem:[#allocation2 + $0x140] sm:$0xff] }
 0x139   :  { %v11145_v39 = vunpack.i.h.bf16 %v11143_v8  ;;  %v11144_v1 = vunpack.i.l.bf16 %v11143_v8 }
 0x13b   :  { %v1534_v40 = vsel %vm1511_vm5, %v1501_v12, %v11144_v1  ;;  %v1535_v19 = vsel %vm1511_vm5, %v1502_v17, %v11145_v39  ;;  %v11158_v22 = vpop.permute.xlu0 %11157 }
 0x13c   :  { %v11153_v28 = vpop.permute.xlu1 %11152  ;;  %v1567_v61 = vsel %vm1544_vm6, %v1534_v40, %v11149_v57  ;;  %v1568_v26 = vsel %vm1544_vm6, %v1535_v19, %v11150_v27  ;;  %v11160_v31 = vunpack.i.h.bf16 %v11158_v22  ;;  %v11159_v35 = vunpack.i.l.bf16 %v11158_v22 }
 0x13d   :  { %v11155_v2 = vunpack.i.h.bf16 %v11153_v28  ;;  %v11154_v54 = vunpack.i.l.bf16 %v11153_v28 }
 0x13e   :  { %v1405_v33 = vsel %vm38_vm0, %v220_v52, %v11160_v31  ;;  %v1404_v38 = vsel %vm38_vm0, %v219_v49, %v11159_v35 }
 0x13f   :  { %v1600_v20 = vsel %vm1577_vm7, %v1567_v61, %v11154_v54  ;;  %v1601_v37 = vsel %vm1577_vm7, %v1568_v26, %v11155_v2  ;;  %v11168_v51 = vpop.permute.xlu0 %11167 }
 0x140   :  { %v11163_v29 = vpop.permute.xlu1 %11162  ;;  %1881 = vmatmul.mubr.f32.gmra.mrb[44].mxu0 %v1600_v20  ;;  %v11170_v30 = vunpack.i.h.bf16 %v11168_v51  ;;  %v11169_v47 = vunpack.i.l.bf16 %v11168_v51 }
 0x141   :  { %v11165_v32 = vunpack.i.h.bf16 %v11163_v29  ;;  %v11164_v34 = vunpack.i.l.bf16 %v11163_v29  ;;  %9966 = vmatprep.mubr.msk.f32.mxu0 %vm38_vm0, %v13566_v25 }
 0x143   :  { %v1438_v43 = vsel %vm1412_vm2, %v1405_v33, %v11165_v32  ;;  %v1437_v16 = vsel %vm1412_vm2, %v1404_v38, %v11164_v34  ;;  %v11178_v62 = vpop.permute.xlu0 %11177 }
 0x144   :  { %v11173_v48 = vpop.permute.xlu1 %11172  ;;  %1886 = vmatmul.mubr.f32.gmra.mrb[46].mxu0 %v1601_v37  ;;  %v1470_v25 = vsel %vm1445_vm3, %v1437_v16, %v11169_v47  ;;  %v1471_v46 = vsel %vm1445_vm3, %v1438_v43, %v11170_v30  ;;  %v11180_v45 = vunpack.i.h.bf16 %v11178_v62  ;;  %v11179_v10 = vunpack.i.l.bf16 %v11178_v62 }
 0x145   :  { %v11175_v58 = vunpack.i.h.bf16 %v11173_v48  ;;  %v11174_v59 = vunpack.i.l.bf16 %v11173_v48  ;;  %9967 = vmatprep.mubr.msk.f32.mxu0 %vm38_vm0, %v13605_v3 }
 0x147   :  { %v1503_v7 = vsel %vm1478_vm4, %v1470_v25, %v11174_v59  ;;  %v1504_v50 = vsel %vm1478_vm4, %v1471_v46, %v11175_v58  ;;  %v11188_v44 = vpop.permute.xlu0 %11187 }
 0x148   :  { %v11183_v42 = vpop.permute.xlu1 %11182  ;;  %v1536_v63 = vsel %vm1511_vm5, %v1503_v7, %v11179_v10  ;;  %v1537_v13 = vsel %vm1511_vm5, %v1504_v50, %v11180_v45  ;;  %v11190_v60 = vunpack.i.h.bf16 %v11188_v44  ;;  %v11189_v5 = vunpack.i.l.bf16 %v11188_v44 }
 0x149   :  { %v11185_v53 = vunpack.i.h.bf16 %v11183_v42  ;;  %v11184_v0 = vunpack.i.l.bf16 %v11183_v42 }
 0x14b   :  { %v1569_v3 = vsel %vm1544_vm6, %v1536_v63, %v11184_v0  ;;  %v1570_v1 = vsel %vm1544_vm6, %v1537_v13, %v11185_v53  ;;  %v11198_v40 = vpop.permute.xlu0 %11197 }
 0x14c   :  { %v11193_v36 = vpop.permute.xlu1 %11192  ;;  %v1602_v12 = vsel %vm1577_vm7, %v1569_v3, %v11189_v5  ;;  %v11200_v19 = vunpack.i.h.bf16 %v11198_v40  ;;  %v11199_v27 = vunpack.i.l.bf16 %v11198_v40  ;;  %v1603_v28 = vsel %vm1577_vm7, %v1570_v1, %v11190_v60 }
 0x14d   :  { %v11195_v8 = vunpack.i.h.bf16 %v11193_v36  ;;  %v11194_v39 = vunpack.i.l.bf16 %v11193_v36  ;;  %1891 = vmatmul.mubr.f32.gmra.mrb[48].mxu0 %v1602_v12 }
 0x14e   :  { %9968 = vmatprep.mubr.msk.f32.mxu0 %vm38_vm0, %v13607_v15 }
 0x14f   :  { %v1407_v17 = vsel %vm38_vm0, %v222_v6, %v11195_v8  ;;  %v1406_v41 = vsel %vm38_vm0, %v221_v55, %v11194_v39  ;;  %v11208_v22 = vpop.permute.xlu0 %11207 }
 0x150   :  { %v11203_v57 = vpop.permute.xlu1 %11202  ;;  %v1439_v61 = vsel %vm1412_vm2, %v1406_v41, %v11199_v27  ;;  %v1440_v26 = vsel %vm1412_vm2, %v1407_v17, %v11200_v19  ;;  %v11210_v20 = vunpack.i.h.bf16 %v11208_v22  ;;  %v11209_v31 = vunpack.i.l.bf16 %v11208_v22 }
 0x151   :  { %v11205_v2 = vunpack.i.h.bf16 %v11203_v57  ;;  %v11204_v54 = vunpack.i.l.bf16 %v11203_v57  ;;  %1896 = vmatmul.mubr.f32.gmra.mrb[50].mxu0 %v1603_v28 }
 0x152   :  { %9969 = vmatprep.mubr.msk.f32.mxu0 %vm38_vm0, %v13646_v18 }
 0x153   :  { %v1472_v49 = vsel %vm1445_vm3, %v1439_v61, %v11204_v54  ;;  %v1473_v52 = vsel %vm1445_vm3, %v1440_v26, %v11205_v2  ;;  %v11218_v37 = vpop.permute.xlu0 %11217 }
 0x154   :  { %v11213_v35 = vpop.permute.xlu1 %11212  ;;  %v1505_v32 = vsel %vm1478_vm4, %v1472_v49, %v11209_v31  ;;  %v1506_v34 = vsel %vm1478_vm4, %v1473_v52, %v11210_v20  ;;  %v11220_v43 = vunpack.i.h.bf16 %v11218_v37  ;;  %v11219_v16 = vunpack.i.l.bf16 %v11218_v37 }
 0x155   :  { %v11215_v15 = vunpack.i.h.bf16 %v11213_v35  ;;  %v11214_v29 = vunpack.i.l.bf16 %v11213_v35 }
 0x157   :  { %v1538_v33 = vsel %vm1511_vm5, %v1505_v32, %v11214_v29  ;;  %v1539_v38 = vsel %vm1511_vm5, %v1506_v34, %v11215_v15  ;;  %v11228_v58 = vpop.permute.xlu0 %11227  ;;  %v482_v32 = vld [vmem:[#allocation2 + $0x19a] sm:$0xff] }
 0x158   :  { %v11223_v51 = vpop.permute.xlu1 %11222  ;;  %v1571_v48 = vsel %vm1544_vm6, %v1538_v33, %v11219_v16  ;;  %v1572_v18 = vsel %vm1544_vm6, %v1539_v38, %v11220_v43  ;;  %v11230_v25 = vunpack.i.h.bf16 %v11228_v58  ;;  %v11229_v46 = vunpack.i.l.bf16 %v11228_v58 }
 0x159   :  { %v11225_v30 = vunpack.i.h.bf16 %v11223_v51  ;;  %v11224_v47 = vunpack.i.l.bf16 %v11223_v51 }
 0x15a   :  { %v1409_v10 = vsel %vm38_vm0, %v13572_v21, %v11230_v25  ;;  %v1408_v42 = vsel %vm38_vm0, %v13570_v56, %v11229_v46 }
 0x15b   :  { %v1604_v59 = vsel %vm1577_vm7, %v1571_v48, %v11224_v47  ;;  %v1605_v45 = vsel %vm1577_vm7, %v1572_v18, %v11225_v30  ;;  %v11238_v63 = vpop.permute.xlu0 %11237  ;;  %v112_v48 = vld [vmem:[%s18195_s2] sm:$0xff]  ;;  %v113_v18 = vld [vmem:[%s18195_s2 + $0x8] sm:$0xff] }
 0x15c   :  { %v11233_v7 = vpop.permute.xlu1 %11232  ;;  %1901 = vmatmul.mubr.f32.gmra.mrb[52].mxu0 %v1604_v59  ;;  %v11240_v13 = vunpack.i.h.bf16 %v11238_v63  ;;  %v11239_v44 = vunpack.i.l.bf16 %v11238_v63  ;;  %v13860_v46 = vpack.c.bf16 %v113_v18, %v112_v48  ;;  %v114_v63 = vld [vmem:[%s18195_s2 + $0x10] sm:$0xff]  ;;  %v127_v18 = vld [vmem:[%s18195_s2 + $0x78] sm:$0xff] }
 0x15d   :  { %v11235_v50 = vunpack.i.h.bf16 %v11233_v7  ;;  %v11234_v62 = vunpack.i.l.bf16 %v11233_v7  ;;  %9970 = vmatprep.mubr.msk.f32.mxu0 %vm38_vm0, %v13648_v14  ;;  %v126_v48 = vld [vmem:[%s18195_s2 + $0x70] sm:$0xff] }
 0x15e   :  { %10634 = vmatpush1.bf16.msra.mxu1 %v13860_v46 }
 0x15f   :  { %v1442_v53 = vsel %vm1412_vm2, %v1409_v10, %v11235_v50  ;;  %v1441_v0 = vsel %vm1412_vm2, %v1408_v42, %v11234_v62  ;;  %v11248_v6 = vpop.permute.xlu0 %11247  ;;  %10635 = vmatprep.subr.bf16.mxu1 %v18205_v4 }
 0x160   :  { %v11243_v3 = vpop.permute.xlu1 %11242  ;;  %1906 = vmatmul.mubr.f32.gmra.mrb[54].mxu0 %v1605_v45  ;;  %v1474_v14 = vsel %vm1445_vm3, %v1441_v0, %v11239_v44  ;;  %v1475_v21 = vsel %vm1445_vm3, %v1442_v53, %v11240_v13  ;;  %v11250_v36 = vunpack.i.h.bf16 %v11248_v6  ;;  %v11249_v8 = vunpack.i.l.bf16 %v11248_v6  ;;  %v483_v53 = vld [vmem:[#allocation2 + $0x1a2] sm:$0xff]  ;;  %v115_v13 = vld [vmem:[%s18195_s2 + $0x18] sm:$0xff] }
 0x161   :  { %v11245_v60 = vunpack.i.h.bf16 %v11243_v3  ;;  %v11244_v5 = vunpack.i.l.bf16 %v11243_v3  ;;  %9971 = vmatprep.mubr.msk.f32.mxu0 %vm38_vm0, %v13676_v9  ;;  %v13873_v3 = vpack.c.bf16 %v115_v13, %v114_v63 }
 0x163   :  { %v1507_v56 = vsel %vm1478_vm4, %v1474_v14, %v11244_v5  ;;  %v1508_v55 = vsel %vm1478_vm4, %v1475_v21, %v11245_v60  ;;  %v11258_v40 = vpop.permute.xlu0 %11257  ;;  %10637 = vmatpush1.bf16.msra.mxu1 %v13873_v3  ;;  %v116_v14 = vld [vmem:[%s18195_s2 + $0x20] sm:$0xff]  ;;  %v117_v21 = vld [vmem:[%s18195_s2 + $0x28] sm:$0xff] }
 0x164   :  { %v11253_v39 = vpop.permute.xlu1 %11252  ;;  %v1540_v17 = vsel %vm1511_vm5, %v1507_v56, %v11249_v8  ;;  %v1541_v41 = vsel %vm1511_vm5, %v1508_v55, %v11250_v36  ;;  %v11260_v19 = vunpack.i.h.bf16 %v11258_v40  ;;  %v11259_v27 = vunpack.i.l.bf16 %v11258_v40  ;;  %10638 = vmatprep.subr.bf16.mxu1 %v18205_v4  ;;  %v118_v36 = vld [vmem:[%s18195_s2 + $0x30] sm:$0xff]  ;;  %v119_v8 = vld [vmem:[%s18195_s2 + $0x38] sm:$0xff] }
 0x165   :  { %v11255_v1 = vunpack.i.h.bf16 %v11253_v39  ;;  %v11254_v12 = vunpack.i.l.bf16 %v11253_v39  ;;  %v13886_v55 = vpack.c.bf16 %v117_v21, %v116_v14 }
 0x167   :  { %v1573_v9 = vsel %vm1544_vm6, %v1540_v17, %v11254_v12  ;;  %v1574_v54 = vsel %vm1544_vm6, %v1541_v41, %v11255_v1  ;;  %v11268_v52 = vpop.permute.xlu0 %11267  ;;  %10640 = vmatpush1.bf16.msra.mxu1 %v13886_v55  ;;  %v13897_v1 = vpack.c.bf16 %v119_v8, %v118_v36  ;;  %v120_v12 = vld [vmem:[%s18195_s2 + $0x40] sm:$0xff]  ;;  %v121_v17 = vld [vmem:[%s18195_s2 + $0x48] sm:$0xff] }
 0x168   :  { %v11263_v57 = vpop.permute.xlu1 %11262  ;;  %v1606_v61 = vsel %vm1577_vm7, %v1573_v9, %v11259_v27  ;;  %v11270_v22 = vunpack.i.h.bf16 %v11268_v52  ;;  %v11269_v20 = vunpack.i.l.bf16 %v11268_v52  ;;  %v1607_v35 = vsel %vm1577_vm7, %v1574_v54, %v11260_v19  ;;  %10641 = vmatprep.subr.bf16.mxu1 %v18205_v4  ;;  %v10007_v41 = vld [vmem:[%s18193_s0 + $0x100] sm:$0xff]  ;;  %v10008_v27 = vld [vmem:[%s18193_s0 + $0x108] sm:$0xff]  ;;  %v122_v52 = vld [vmem:[%s18195_s2 + $0x50] sm:$0xff] }
 0x169   :  { %v11265_v28 = vunpack.i.h.bf16 %v11263_v57  ;;  %v11264_v2 = vunpack.i.l.bf16 %v11263_v57  ;;  %1911 = vmatmul.mubr.f32.gmra.mrb[56].mxu0 %v1606_v61  ;;  %v13910_v40 = vpack.c.bf16 %v121_v17, %v120_v12 }
 0x16a   :  { %9972 = vmatprep.mubr.msk.f32.mxu0 %vm38_vm0, %v13678_v11 }
 0x16b   :  { %v1411_v26 = vsel %vm38_vm0, %v13617_v24, %v11265_v28  ;;  %v1410_v49 = vsel %vm38_vm0, %v13615_v23, %v11264_v2  ;;  %v11278_v33 = vpop.permute.xlu0 %11277  ;;  %10643 = vmatpush1.bf16.msra.mxu1 %v13897_v1 }
 0x16c   :  { %v11273_v31 = vpop.permute.xlu1 %11272  ;;  %v1443_v34 = vsel %vm1412_vm2, %v1410_v49, %v11269_v20  ;;  %v1444_v24 = vsel %vm1412_vm2, %v1411_v26, %v11270_v22  ;;  %v11280_v38 = vunpack.i.h.bf16 %v11278_v33  ;;  %v11279_v43 = vunpack.i.l.bf16 %v11278_v33  ;;  %10644 = vmatprep.subr.bf16.mxu1 %v18205_v4  ;;  %v123_v22 = vld [vmem:[%s18195_s2 + $0x58] sm:$0xff] }
 0x16d   :  { %v11275_v15 = vunpack.i.h.bf16 %v11273_v31  ;;  %v11274_v29 = vunpack.i.l.bf16 %v11273_v31  ;;  %1916 = vmatmul.mubr.f32.gmra.mrb[58].mxu0 %v1607_v35  ;;  %v13932_v31 = vpack.c.bf16 %v123_v22, %v122_v52  ;;  %v124_v35 = vld [vmem:[%s18195_s2 + $0x60] sm:$0xff] }
 0x16e   :  { %9973 = vmatprep.mubr.msk.f32.mxu0 %vm38_vm0, %v482_v32 }
 0x16f   :  { %v1476_v37 = vsel %vm1445_vm3, %v1443_v34, %v11274_v29  ;;  %v1477_v23 = vsel %vm1445_vm3, %v1444_v24, %v11275_v15  ;;  %v11288_v58 = vpop.permute.xlu0 %11287  ;;  %10646 = vmatpush1.bf16.msra.mxu1 %v13910_v40  ;;  %v125_v15 = vld [vmem:[%s18195_s2 + $0x68] sm:$0xff] }
 0x170   :  { %v11283_v16 = vpop.permute.xlu1 %11282  ;;  %v1509_v30 = vsel %vm1478_vm4, %v1476_v37, %v11279_v43  ;;  %v1510_v47 = vsel %vm1478_vm4, %v1477_v23, %v11280_v38  ;;  %v11290_v7 = vunpack.i.h.bf16 %v11288_v58  ;;  %v11289_v50 = vunpack.i.l.bf16 %v11288_v58  ;;  %10647 = vmatprep.subr.bf16.mxu1 %v18205_v4 }
 0x171   :  { %v11285_v11 = vunpack.i.h.bf16 %v11283_v16  ;;  %v11284_v51 = vunpack.i.l.bf16 %v11283_v16  ;;  %v13944_v34 = vpack.c.bf16 %v125_v15, %v124_v35  ;;  %v10009_v16 = vld [vmem:[%s18193_s0 + $0x110] sm:$0xff] }
 0x173   :  { %v1542_v59 = vsel %vm1511_vm5, %v1509_v30, %v11284_v51  ;;  %v1543_v25 = vsel %vm1511_vm5, %v1510_v47, %v11285_v11  ;;  %10649 = vmatpush1.bf16.msra.mxu1 %v13932_v31  ;;  %v10010_v11 = vld [vmem:[%s18193_s0 + $0x118] sm:$0xff] }
 0x174   :  { %v11293_v62 = vpop.permute.xlu1 %11292  ;;  %v1575_v42 = vsel %vm1544_vm6, %v1542_v59, %v11289_v50  ;;  %v1576_v0 = vsel %vm1544_vm6, %v1543_v25, %v11290_v7  ;;  %10650 = vmatprep.subr.bf16.mxu1 %v18205_v4  ;;  %v13967_v59 = vpack.c.bf16 %v127_v18, %v126_v48  ;;  %v128_v25 = vld [vmem:[%s18195_s2 + $0x80] sm:$0xff]  ;;  %v129_v7 = vld [vmem:[%s18195_s2 + $0x88] sm:$0xff]  ;;  %s12978_s2 = smov 4  }
 0x175   :  { %v11295_v45 = vunpack.i.h.bf16 %v11293_v62  ;;  %v11294_v10 = vunpack.i.l.bf16 %v11293_v62 }
 0x177   :  { %v1608_v44 = vsel %vm1577_vm7, %v1575_v42, %v11294_v10  ;;  %v1609_v60 = vsel %vm1577_vm7, %v1576_v0, %v11295_v45  ;;  %10652 = vmatpush1.bf16.msra.mxu1 %v13944_v34 }
 0x178   :  { %1921 = vmatmul.mubr.f32.gmra.mrb[60].mxu0 %v1608_v44  ;;  %v1772_v5 = vpop.f32.mrb[0].mxu0  ;;  %10653 = vmatprep.subr.bf16.mxu1 %v18205_v4 }
 0x179   :  { %9974 = vmatprep.mubr.msk.f32.mxu0 %vm38_vm0, %v483_v53  ;;  %1931 = vst.msk [vmem:[#allocation2 + $0x19] sm:$0xff] %vm38_vm0, %v1772_v5  ;;  %v1774_v56 = vpop.f32.mrb[1].mxu0  ;;  %v13982_v53 = vpack.c.bf16 %v129_v7, %v128_v25 }
 0x17b   :  { %10655 = vmatpush1.bf16.msra.mxu1 %v13967_v59 }
 0x17c   :  { %1926 = vmatmul.mubr.f32.gmra.mrb[62].mxu0 %v1609_v60  ;;  %v1777_v6 = vpop.f32.mrb[2].mxu0  ;;  %10656 = vmatprep.subr.bf16.mxu1 %v18205_v4 }
 0x17d   :  { %1932 = vst.msk [vmem:[#allocation2 + $0x21] sm:$0xff] %vm38_vm0, %v1777_v6  ;;  %v1779_v39 = vpop.f32.mrb[3].mxu0  ;;  %v10011_v6 = vld [vmem:[%s18193_s0 + $0x120] sm:$0xff] }
 0x17e   :  { %v10012_v39 = vld [vmem:[%s18193_s0 + $0x128] sm:$0xff] }
 0x17f   :  { %10658 = vmatpush1.bf16.msra.mxu1 %v13982_v53 }
 0x180   :  { %v13912_v9 = vld [vmem:[#allocation2 + $0x18] sm:$0xff]  ;;  %10686 = vmatprep.subr.bf16.mxu1 %v18205_v4 }
 0x181   :  { %v2091_v19 = vld [vmem:[#allocation2 + $0x19] sm:$0xff] }
 0x184   :  { %v13917_v57 = vld [vmem:[#allocation2 + $0x20] sm:$0xff] }
 0x185   :  { %v2092_v28 = vld [vmem:[#allocation2 + $0x21] sm:$0xff]  ;;  %v11326_v26 = vpack.i.bf16 %v13917_v57, %v13912_v9 }
 0x186   :  { %v2123_v2 = vld [vmem:[#allocation2 + $0x1a] sm:$0xff]  ;;  %v11331_v61 = vpack.i.bf16 %v2092_v28, %v2091_v19  ;;  %v2124_v49 = vld [vmem:[#allocation2 + $0x22] sm:$0xff] }
 0x187   :  { %v1782_v54 = vpop.f32.mrb[4].mxu0  ;;  %3725 = vst.msk [vmem:[#allocation2 + $0x19] sm:$0xff] %vm38_vm0, %v10007_v41  ;;  %3726 = vst.msk [vmem:[#allocation2 + $0x21] sm:$0xff] %vm38_vm0, %v10008_v27  ;;  %11327 = vrot.lane.b32.xlu0 %v11326_v26, %s12968_s22  ;;  %v11336_v32 = vpack.i.bf16 %v2124_v49, %v2123_v2 }
 0x188   :  { %1933 = vst.msk [vmem:[#allocation2 + $0x31] sm:$0xff] %vm38_vm0, %v1782_v54  ;;  %v1784_v20 = vpop.f32.mrb[5].mxu0  ;;  %11332 = vrot.lane.b32.xlu1 %v11331_v61, %s12970_s24 }
 0x18b   :  { %v1787_v29 = vpop.f32.mrb[6].mxu0  ;;  %11337 = vrot.lane.b32.xlu0 %v11336_v32, %s12971_s25 }
 0x18c   :  { %1934 = vst.msk [vmem:[#allocation2 + $0x39] sm:$0xff] %vm38_vm0, %v1787_v29  ;;  %v1789_v24 = vpop.f32.mrb[7].mxu0  ;;  %11342 = vrot.lane.b32.xlu1 %v11331_v61, %s12967_s21 }
 0x18d   :  { %v10013_v24 = vld [vmem:[%s18193_s0 + $0x130] sm:$0xff] }
 0x18e   :  { %v3885_v37 = vld [vmem:[#allocation2 + $0x19] sm:$0xff]  ;;  %v3886_v33 = vld [vmem:[#allocation2 + $0x21] sm:$0xff] }
 0x18f   :  { %v3853_v23 = vld [vmem:[#allocation2 + $0x18] sm:$0xff]  ;;  %v3854_v38 = vld [vmem:[#allocation2 + $0x20] sm:$0xff]  ;;  %v11356_v43 = vpack.i.bf16 %v3886_v33, %v3885_v37  ;;  %11347 = vrot.lane.b32.xlu0 %v11336_v32, %s12969_s23  ;;  %v13958_v51 = vld [vmem:[#allocation2 + $0x30] sm:$0xff] }
 0x190   :  { %18362 = vst [vmem:[#allocation3_spill] sm:$0xff] %v13958_v51  ;;  %v11351_v30 = vpack.i.bf16 %v3854_v38, %v3853_v23  ;;  %v3917_v47 = vld [vmem:[#allocation2 + $0x1a] sm:$0xff]  ;;  %v3918_v58 = vld [vmem:[#allocation2 + $0x22] sm:$0xff]  ;;  %v2187_v45 = vld [vmem:[#allocation2 + $0x31] sm:$0xff] }
 0x191   :  { %11357 = vrot.lane.b32.xlu1 %v11356_v43, %s12970_s24  ;;  %v11361_v0 = vpack.i.bf16 %v3918_v58, %v3917_v47  ;;  %v10014_v33 = vld [vmem:[%s18193_s0 + $0x138] sm:$0xff] }
 0x193   :  { %v13975_v50 = vld [vmem:[#allocation2 + $0x38] sm:$0xff]  ;;  %11352 = vrot.lane.b32.xlu0 %v11351_v30, %s12968_s22 }
 0x194   :  { %18363 = vst [vmem:[#allocation4_spill] sm:$0xff] %v13975_v50  ;;  %v2219_v62 = vld [vmem:[#allocation2 + $0x32] sm:$0xff]  ;;  %v13977_v10 = vld [vmem:[#allocation2 + $0x3a] sm:$0xff]  ;;  %v1792_v63 = vpop.f32.mrb[8].mxu0  ;;  %v11376_v44 = vpack.i.bf16 %v13975_v50, %v13958_v51 }
 0x195   :  { %9975 = vmatprep.mubr.msk.f32.mxu1 %vm38_vm0, %v2219_v62  ;;  %v2188_v42 = vld [vmem:[#allocation2 + $0x39] sm:$0xff]  ;;  %3727 = vst.msk [vmem:[#allocation2 + $0x31] sm:$0xff] %vm38_vm0, %v10009_v16  ;;  %11367 = vrot.lane.b32.xlu1 %v11356_v43, %s12967_s21  ;;  %1935 = vst.msk [vmem:[#allocation2 + $0x49] sm:$0xff] %vm38_vm0, %v1792_v63  ;;  %v1794_v13 = vpop.f32.mrb[9].mxu0  ;;  %v11396_v21 = vpack.i.bf16 %v13977_v10, %v2219_v62  ;;  %v10025_v51 = vld [vmem:[%s18193_s0 + $0x190] sm:$0xff] }
 0x196   :  { %3728 = vst.msk [vmem:[#allocation2 + $0x39] sm:$0xff] %vm38_vm0, %v10010_v11  ;;  %v11381_v14 = vpack.i.bf16 %v2188_v42, %v2187_v45  ;;  %v10015_v63 = vld [vmem:[%s18193_s0 + $0x140] sm:$0xff] }
 0x197   :  { %11362 = vrot.lane.b32.xlu0 %v11361_v0, %s12971_s25 }
 0x198   :  { %v1797_v60 = vpop.f32.mrb[10].mxu0 }
 0x199   :  { %11377 = vrot.lane.b32.xlu1 %v11376_v44, %s12972_s26  ;;  %1936 = vst.msk [vmem:[#allocation2 + $0x51] sm:$0xff] %vm38_vm0, %v1797_v60  ;;  %v1799_v5 = vpop.f32.mrb[11].mxu0  ;;  %v10016_v60 = vld [vmem:[%s18193_s0 + $0x148] sm:$0xff] }
 0x19b   :  { %11372 = vrot.lane.b32.xlu0 %v11361_v0, %s12969_s23 }
 0x19c   :  { %v2001_v56 = vld [vmem:[#allocation2 + $0x49] sm:$0xff]  ;;  %v3981_v49 = vld [vmem:[#allocation2 + $0x31] sm:$0xff] }
 0x19d   :  { %11387 = vrot.lane.b32.xlu1 %v11376_v44, %s12968_s22  ;;  %v3949_v36 = vld [vmem:[#allocation2 + $0x30] sm:$0xff]  ;;  %v3950_v8 = vld [vmem:[#allocation2 + $0x38] sm:$0xff]  ;;  %v14007_v12 = vld [vmem:[#allocation2 + $0x48] sm:$0xff] }
 0x19e   :  { %18364 = vst [vmem:[#allocation5_spill] sm:$0xff] %v14007_v12  ;;  %v4013_v2 = vld [vmem:[#allocation2 + $0x32] sm:$0xff]  ;;  %v11411_v26 = vpack.i.bf16 %v3950_v8, %v3949_v36  ;;  %v3920_v29 = vld [vmem:[#allocation2 + $0x3a] sm:$0xff] }
 0x19f   :  { %11382 = vrot.lane.b32.xlu0 %v11381_v14, %s12973_s27  ;;  %10039 = vmatprep.mubr.msk.f32.mxu0 %vm38_vm0, %v4013_v2  ;;  %v3982_v52 = vld [vmem:[#allocation2 + $0x39] sm:$0xff] }
 0x1a0   :  { %v2190_v17 = vld [vmem:[#allocation2 + $0x51] sm:$0xff]  ;;  %v11416_v35 = vpack.i.bf16 %v3982_v52, %v3981_v49 }
 0x1a1   :  { %11397 = vrot.lane.b32.xlu1 %v11396_v21, %s12971_s25  ;;  %v14009_v41 = vld [vmem:[#allocation2 + $0x4a] sm:$0xff]  ;;  %v14011_v27 = vld [vmem:[#allocation2 + $0x52] sm:$0xff]  ;;  %v14015_v54 = vpack.i.bf16 %v2190_v17, %v2001_v56 }
 0x1a2   :  { %v14013_v28 = vld [vmem:[#allocation2 + $0x50] sm:$0xff] }
 0x1a3   :  { %v1802_v19 = vpop.f32.mrb[12].mxu0  ;;  %18365 = vst [vmem:[#allocation6_spill] sm:$0xff] %v14013_v28  ;;  %3729 = vst.msk [vmem:[#allocation2 + $0x49] sm:$0xff] %vm38_vm0, %v10011_v6  ;;  %11392 = vrot.lane.b32.xlu0 %v11381_v14, %s12970_s24  ;;  %v3919_v15 = vld [vmem:[#allocation2 + $0x32] sm:$0xff]  ;;  %v11446_v58 = vpack.i.bf16 %v14013_v28, %v14007_v12 }
 0x1a4   :  { %1937 = vst.msk [vmem:[#allocation2 + $0x61] sm:$0xff] %vm38_vm0, %v1802_v19  ;;  %v1804_v61 = vpop.f32.mrb[13].mxu0  ;;  %3730 = vst.msk [vmem:[#allocation2 + $0x51] sm:$0xff] %vm38_vm0, %v10012_v39  ;;  %v11431_v23 = vpack.i.bf16 %v3920_v29, %v3919_v15 }
 0x1a5   :  { %11407 = vrot.lane.b32.xlu1 %v11396_v21, %s12969_s23 }
 0x1a7   :  { %v1807_v22 = vpop.f32.mrb[14].mxu0  ;;  %11402 = vrot.lane.b32.xlu0 %v11381_v14, %s12967_s21 }
 0x1a8   :  { %1938 = vst.msk [vmem:[#allocation2 + $0x69] sm:$0xff] %vm38_vm0, %v1807_v22  ;;  %v1809_v20 = vpop.f32.mrb[15].mxu0 }
 0x1a9   :  { %11412 = vrot.lane.b32.xlu1 %v11411_v26, %s12972_s26  ;;  %v10017_v20 = vld [vmem:[%s18193_s0 + $0x150] sm:$0xff] }
 0x1aa   :  { %v3951_v7 = vld [vmem:[#allocation2 + $0x48] sm:$0xff] }
 0x1ab   :  { %11417 = vrot.lane.b32.xlu0 %v11416_v35, %s12973_s27  ;;  %v2003_v32 = vld [vmem:[#allocation2 + $0x61] sm:$0xff]  ;;  %v3952_v62 = vld [vmem:[#allocation2 + $0x50] sm:$0xff] }
 0x1ac   :  { %v14031_v37 = vld [vmem:[#allocation2 + $0x60] sm:$0xff]  ;;  %v3983_v45 = vld [vmem:[#allocation2 + $0x49] sm:$0xff]  ;;  %v3984_v42 = vld [vmem:[#allocation2 + $0x51] sm:$0xff]  ;;  %v11466_v44 = vpack.i.bf16 %v3952_v62, %v3951_v7 }
 0x1ad   :  { %11422 = vrot.lane.b32.xlu1 %v11411_v26, %s12968_s22  ;;  %v11471_v56 = vpack.i.bf16 %v3984_v42, %v3983_v45  ;;  %v3921_v17 = vld [vmem:[#allocation2 + $0x4a] sm:$0xff]  ;;  %v3922_v19 = vld [vmem:[#allocation2 + $0x52] sm:$0xff] }
 0x1ae   :  { %v11486_v26 = vpack.i.bf16 %v3922_v19, %v3921_v17  ;;  %v10020_v19 = vld [vmem:[%s18193_s0 + $0x168] sm:$0xff] }
 0x1af   :  { %v14036_v38 = vld [vmem:[#allocation2 + $0x68] sm:$0xff]  ;;  %11427 = vrot.lane.b32.xlu0 %v11416_v35, %s12970_s24 }
 0x1b0   :  { %v2004_v43 = vld [vmem:[#allocation2 + $0x69] sm:$0xff]  ;;  %v1812_v47 = vpop.f32.mrb[16].mxu0 }
 0x1b1   :  { %v14038_v16 = vld [vmem:[#allocation2 + $0x62] sm:$0xff]  ;;  %v14040_v11 = vld [vmem:[#allocation2 + $0x6a] sm:$0xff]  ;;  %v14043_v30 = vpack.i.bf16 %v2004_v43, %v2003_v32  ;;  %11432 = vrot.lane.b32.xlu1 %v11431_v23, %s12971_s25  ;;  %1939 = vst.msk [vmem:[#allocation2 + $0x79] sm:$0xff] %vm38_vm0, %v1812_v47  ;;  %v1814_v48 = vpop.f32.mrb[17].mxu0 }
 0x1b2   :  { %3731 = vst.msk [vmem:[#allocation2 + $0x61] sm:$0xff] %vm38_vm0, %v10013_v24  ;;  %3732 = vst.msk [vmem:[#allocation2 + $0x69] sm:$0xff] %vm38_vm0, %v10014_v33 }
 0x1b3   :  { %11437 = vrot.lane.b32.xlu0 %v11416_v35, %s12967_s21  ;;  %v10018_v35 = vld [vmem:[%s18193_s0 + $0x158] sm:$0xff] }
 0x1b4   :  { %v1817_v18 = vpop.f32.mrb[18].mxu0 }
 0x1b5   :  { %11442 = vrot.lane.b32.xlu1 %v11431_v23, %s12969_s23  ;;  %1940 = vst.msk [vmem:[#allocation2 + $0x81] sm:$0xff] %vm38_vm0, %v1817_v18  ;;  %v1819_v25 = vpop.f32.mrb[19].mxu0 }
 0x1b7   :  { %11447 = vrot.lane.b32.xlu0 %v11446_v58, %s12972_s26 }
 0x1b8   :  { %v2005_v0 = vld [vmem:[#allocation2 + $0x79] sm:$0xff] }
 0x1b9   :  { %11452 = vrot.lane.b32.xlu1 %v14015_v54, %s12973_s27  ;;  %v14061_v13 = vld [vmem:[#allocation2 + $0x78] sm:$0xff]  ;;  %v3953_v49 = vld [vmem:[#allocation2 + $0x60] sm:$0xff]  ;;  %v3954_v52 = vld [vmem:[#allocation2 + $0x68] sm:$0xff] }
 0x1ba   :  { %v11501_v29 = vpack.i.bf16 %v3954_v52, %v3953_v49  ;;  %v3985_v32 = vld [vmem:[#allocation2 + $0x61] sm:$0xff]  ;;  %v3986_v24 = vld [vmem:[#allocation2 + $0x69] sm:$0xff] }
 0x1bb   :  { %11457 = vrot.lane.b32.xlu0 %v11446_v58, %s12968_s22  ;;  %v11506_v18 = vpack.i.bf16 %v3986_v24, %v3985_v32  ;;  %v3923_v25 = vld [vmem:[#allocation2 + $0x62] sm:$0xff]  ;;  %v3924_v7 = vld [vmem:[#allocation2 + $0x6a] sm:$0xff] }
 0x1bc   :  { %v14068_v5 = vld [vmem:[#allocation2 + $0x80] sm:$0xff]  ;;  %v11521_v45 = vpack.i.bf16 %v3924_v7, %v3923_v25 }
 0x1bd   :  { %11462 = vrot.lane.b32.xlu1 %v14015_v54, %s12970_s24  ;;  %v2006_v14 = vld [vmem:[#allocation2 + $0x81] sm:$0xff] }
 0x1be   :  { %v14070_v21 = vld [vmem:[#allocation2 + $0x7a] sm:$0xff]  ;;  %v14072_v6 = vld [vmem:[#allocation2 + $0x82] sm:$0xff]  ;;  %v14075_v8 = vpack.i.bf16 %v2006_v14, %v2005_v0 }
 0x1bf   :  { %18366 = vst [vmem:[#allocation7_spill] sm:$0xff] %v14072_v6  ;;  %v1822_v36 = vpop.f32.mrb[20].mxu0  ;;  %3733 = vst.msk [vmem:[#allocation2 + $0x79] sm:$0xff] %vm38_vm0, %v10015_v63  ;;  %11467 = vrot.lane.b32.xlu0 %v11466_v44, %s12972_s26 }
 0x1c0   :  { %1941 = vst.msk [vmem:[#allocation2 + $0x91] sm:$0xff] %vm38_vm0, %v1822_v36  ;;  %v1824_v39 = vpop.f32.mrb[21].mxu0  ;;  %3734 = vst.msk [vmem:[#allocation2 + $0x81] sm:$0xff] %vm38_vm0, %v10016_v60  ;;  %v10019_v36 = vld [vmem:[%s18193_s0 + $0x160] sm:$0xff] }
 0x1c1   :  { %11472 = vrot.lane.b32.xlu1 %v11471_v56, %s12973_s27 }
 0x1c3   :  { %v1827_v2 = vpop.f32.mrb[22].mxu0  ;;  %11477 = vrot.lane.b32.xlu0 %v11466_v44, %s12968_s22 }
 0x1c4   :  { %1942 = vst.msk [vmem:[#allocation2 + $0x99] sm:$0xff] %vm38_vm0, %v1827_v2  ;;  %v1829_v61 = vpop.f32.mrb[23].mxu0 }
 0x1c5   :  { %11482 = vrot.lane.b32.xlu1 %v11471_v56, %s12970_s24 }
 0x1c6   :  { %v3955_v63 = vld [vmem:[#allocation2 + $0x78] sm:$0xff] }
 0x1c7   :  { %11487 = vrot.lane.b32.xlu0 %v11486_v26, %s12971_s25  ;;  %v2007_v22 = vld [vmem:[#allocation2 + $0x91] sm:$0xff]  ;;  %v3956_v44 = vld [vmem:[#allocation2 + $0x80] sm:$0xff] }
 0x1c8   :  { %v14092_v15 = vld [vmem:[#allocation2 + $0x90] sm:$0xff]  ;;  %v3987_v60 = vld [vmem:[#allocation2 + $0x79] sm:$0xff]  ;;  %v3988_v14 = vld [vmem:[#allocation2 + $0x81] sm:$0xff]  ;;  %v11536_v17 = vpack.i.bf16 %v3956_v44, %v3955_v63 }
 0x1c9   :  { %11492 = vrot.lane.b32.xlu1 %v11471_v56, %s12967_s21  ;;  %18367 = vst [vmem:[#allocation8_spill] sm:$0xff] %v14092_v15  ;;  %v11541_v49 = vpack.i.bf16 %v3988_v14, %v3987_v60  ;;  %v3926_v32 = vld [vmem:[#allocation2 + $0x82] sm:$0xff] }
 0x1cb   :  { %v14094_v23 = vld [vmem:[#allocation2 + $0x98] sm:$0xff]  ;;  %11497 = vrot.lane.b32.xlu0 %v11486_v26, %s12969_s23 }
 0x1cc   :  { %18368 = vst [vmem:[#allocation9_spill] sm:$0xff] %v14094_v23  ;;  %v2008_v33 = vld [vmem:[#allocation2 + $0x99] sm:$0xff]  ;;  %v1832_v58 = vpop.f32.mrb[24].mxu0 }
 0x1cd   :  { %v14096_v43 = vld [vmem:[#allocation2 + $0x92] sm:$0xff]  ;;  %v14098_v47 = vld [vmem:[#allocation2 + $0x9a] sm:$0xff]  ;;  %v14101_v48 = vpack.i.bf16 %v2008_v33, %v2007_v22  ;;  %11502 = vrot.lane.b32.xlu1 %v11501_v29, %s12972_s26  ;;  %1943 = vst.msk [vmem:[#allocation2 + $0xa9] sm:$0xff] %vm38_vm0, %v1832_v58  ;;  %v1834_v62 = vpop.f32.mrb[25].mxu0 }
 0x1ce   :  { %18369 = vst [vmem:[#allocation10_spill] sm:$0xff] %v14096_v43  ;;  %18370 = vst [vmem:[#allocation11_spill] sm:$0xff] %v14098_v47  ;;  %v10021_v62 = vld [vmem:[%s18193_s0 + $0x170] sm:$0xff] }
 0x1cf   :  { %3735 = vst.msk [vmem:[#allocation2 + $0x91] sm:$0xff] %vm38_vm0, %v10017_v20  ;;  %18371 = vst [vmem:[#allocation12_spill] sm:$0xff] %v14101_v48  ;;  %11507 = vrot.lane.b32.xlu0 %v11506_v18, %s12973_s27 }
 0x1d0   :  { %3736 = vst.msk [vmem:[#allocation2 + $0x99] sm:$0xff] %vm38_vm0, %v10018_v35  ;;  %v1837_v42 = vpop.f32.mrb[26].mxu0 }
 0x1d1   :  { %11512 = vrot.lane.b32.xlu1 %v11501_v29, %s12968_s22  ;;  %1944 = vst.msk [vmem:[#allocation2 + $0xb1] sm:$0xff] %vm38_vm0, %v1837_v42  ;;  %v1839_v0 = vpop.f32.mrb[27].mxu0  ;;  %v3925_v29 = vld [vmem:[#allocation2 + $0x7a] sm:$0xff] }
 0x1d3   :  { %11517 = vrot.lane.b32.xlu0 %v11506_v18, %s12970_s24 }
 0x1d4   :  { %v2009_v56 = vld [vmem:[#allocation2 + $0xa9] sm:$0xff] }
 0x1d5   :  { %11522 = vrot.lane.b32.xlu1 %v11521_v45, %s12971_s25  ;;  %v14116_v39 = vld [vmem:[#allocation2 + $0xa8] sm:$0xff] }
 0x1d6   :  { %18372 = vst [vmem:[#allocation13_spill] sm:$0xff] %v14116_v39  ;;  %v3957_v58 = vld [vmem:[#allocation2 + $0x90] sm:$0xff] }
 0x1d7   :  { %11527 = vrot.lane.b32.xlu0 %v11506_v18, %s12967_s21  ;;  %v11556_v18 = vpack.i.bf16 %v3926_v32, %v3925_v29  ;;  %v3958_v25 = vld [vmem:[#allocation2 + $0x98] sm:$0xff] }
 0x1d8   :  { %v14122_v2 = vld [vmem:[#allocation2 + $0xb0] sm:$0xff]  ;;  %v11571_v0 = vpack.i.bf16 %v3958_v25, %v3957_v58  ;;  %v3990_v44 = vld [vmem:[#allocation2 + $0x99] sm:$0xff] }
 0x1d9   :  { %11532 = vrot.lane.b32.xlu1 %v11521_v45, %s12969_s23  ;;  %18373 = vst [vmem:[#allocation14_spill] sm:$0xff] %v14122_v2  ;;  %v2010_v61 = vld [vmem:[#allocation2 + $0xb1] sm:$0xff]  ;;  %v3928_v29 = vld [vmem:[#allocation2 + $0x9a] sm:$0xff] }
 0x1da   :  { %v14124_v26 = vld [vmem:[#allocation2 + $0xaa] sm:$0xff]  ;;  %v14126_v52 = vld [vmem:[#allocation2 + $0xb2] sm:$0xff]  ;;  %v14129_v20 = vpack.i.bf16 %v2010_v61, %v2009_v56 }
 0x1db   :  { %18374 = vst [vmem:[#allocation15_spill] sm:$0xff] %v14124_v26  ;;  %18375 = vst [vmem:[#allocation16_spill] sm:$0xff] %v14126_v52  ;;  %v1842_v22 = vpop.f32.mrb[28].mxu0  ;;  %11537 = vrot.lane.b32.xlu0 %v11536_v17, %s12972_s26  ;;  %v10022_v45 = vld [vmem:[%s18193_s0 + $0x178] sm:$0xff] }
 0x1dc   :  { %3737 = vst.msk [vmem:[#allocation2 + $0xa9] sm:$0xff] %vm38_vm0, %v10019_v36  ;;  %18376 = vst [vmem:[#allocation17_spill] sm:$0xff] %v14129_v20  ;;  %v1844_v35 = vpop.f32.mrb[29].mxu0  ;;  %v3989_v63 = vld [vmem:[#allocation2 + $0x91] sm:$0xff] }
 0x1dd   :  { %1945 = vst.msk [vmem:[#allocation2 + $0xc1] sm:$0xff] %vm38_vm0, %v1842_v22  ;;  %3738 = vst.msk [vmem:[#allocation2 + $0xb1] sm:$0xff] %vm38_vm0, %v10020_v19  ;;  %11542 = vrot.lane.b32.xlu1 %v11541_v49, %s12973_s27  ;;  %v11576_v61 = vpack.i.bf16 %v3990_v44, %v3989_v63  ;;  %v3927_v35 = vld [vmem:[#allocation2 + $0x92] sm:$0xff] }
 0x1df   :  { %v1847_v24 = vpop.f32.mrb[30].mxu0  ;;  %11547 = vrot.lane.b32.xlu0 %v11536_v17, %s12968_s22  ;;  %v14154_v17 = vpop.permute.xlu0 %11297 }
 0x1e0   :  { %1946 = vst.msk [vmem:[#allocation2 + $0xc9] sm:$0xff] %vm38_vm0, %v1847_v24  ;;  %v1849_v33 = vpop.f32.mrb[31].mxu0  ;;  %v11591_v24 = vpack.i.bf16 %v3928_v29, %v3927_v35 }
 0x1e1   :  { %11552 = vrot.lane.b32.xlu1 %v11541_v49, %s12970_s24 }
 0x1e3   :  { %11557 = vrot.lane.b32.xlu0 %v11556_v18, %s12971_s25  ;;  %v14167_v33 = vpop.permute.xlu0 %11307 }
 0x1e4   :  { %v2011_v7 = vld [vmem:[#allocation2 + $0xc1] sm:$0xff]  ;;  %18382 = vst [vmem:[#allocation23_spill] sm:$0xff] %v14167_v33  ;;  %v3992_v63 = vld [vmem:[#allocation2 + $0xb1] sm:$0xff] }
 0x1e5   :  { %11562 = vrot.lane.b32.xlu1 %v11541_v49, %s12967_s21  ;;  %v14146_v42 = vld [vmem:[#allocation2 + $0xc0] sm:$0xff]  ;;  %v14160_v49 = vpop.permute.xlu1 %11302 }
 0x1e6   :  { %18377 = vst [vmem:[#allocation18_spill] sm:$0xff] %v14146_v42 }
 0x1e7   :  { %v14148_v60 = vld [vmem:[#allocation2 + $0xc8] sm:$0xff]  ;;  %11567 = vrot.lane.b32.xlu0 %v11556_v18, %s12969_s23 }
 0x1e8   :  { %18378 = vst [vmem:[#allocation19_spill] sm:$0xff] %v14148_v60  ;;  %v2012_v14 = vld [vmem:[#allocation2 + $0xc9] sm:$0xff]  ;;  %v1852_v22 = vpop.f32.mrb[32].mxu0 }
 0x1e9   :  { %v14150_v56 = vld [vmem:[#allocation2 + $0xc2] sm:$0xff]  ;;  %v14152_v36 = vld [vmem:[#allocation2 + $0xca] sm:$0xff]  ;;  %v14157_v19 = vpack.i.bf16 %v2012_v14, %v2011_v7  ;;  %11572 = vrot.lane.b32.xlu1 %v11571_v0, %s12972_s26  ;;  %1947 = vst.msk [vmem:[#allocation2 + $0xd9] sm:$0xff] %vm38_vm0, %v1852_v22  ;;  %v1854_v32 = vpop.f32.mrb[33].mxu0  ;;  %v14169_v58 = vpop.permute.xlu1 %11312 }
 0x1ea   :  { %18379 = vst [vmem:[#allocation20_spill] sm:$0xff] %v14150_v56  ;;  %18380 = vst [vmem:[#allocation21_spill] sm:$0xff] %v14152_v36  ;;  %v3959_v7 = vld [vmem:[#allocation2 + $0xa8] sm:$0xff]  ;;  %v14180_v22 = vpop.permute.xlu0 %11317 }
 0x1eb   :  { %3739 = vst.msk [vmem:[#allocation2 + $0xc1] sm:$0xff] %vm38_vm0, %v10021_v62  ;;  %18381 = vst [vmem:[#allocation22_spill] sm:$0xff] %v14157_v19  ;;  %11577 = vrot.lane.b32.xlu0 %v11576_v61, %s12973_s27  ;;  %v3960_v62 = vld [vmem:[#allocation2 + $0xb0] sm:$0xff]  ;;  %v10024_v32 = vld [vmem:[%s18193_s0 + $0x188] sm:$0xff] }
 0x1ec   :  { %3740 = vst.msk [vmem:[#allocation2 + $0xc9] sm:$0xff] %vm38_vm0, %v10022_v45  ;;  %v1857_v18 = vpop.f32.mrb[34].mxu0  ;;  %18383 = vst [vmem:[#allocation24_spill] sm:$0xff] %v14169_v58  ;;  %v3991_v45 = vld [vmem:[#allocation2 + $0xa9] sm:$0xff]  ;;  %v11606_v29 = vpack.i.bf16 %v3960_v62, %v3959_v7  ;;  %v3930_v62 = vld [vmem:[#allocation2 + $0xb2] sm:$0xff] }
 0x1ed   :  { %11582 = vrot.lane.b32.xlu1 %v11571_v0, %s12968_s22  ;;  %1948 = vst.msk [vmem:[#allocation2 + $0xe1] sm:$0xff] %vm38_vm0, %v1857_v18  ;;  %v1859_v25 = vpop.f32.mrb[35].mxu0  ;;  %v10023_v0 = vld [vmem:[%s18193_s0 + $0x180] sm:$0xff]  ;;  %v14182_v35 = vpop.permute.xlu1 %11322  ;;  %v11611_v28 = vpack.i.bf16 %v3992_v63, %v3991_v45 }
 0x1ef   :  { %11587 = vrot.lane.b32.xlu0 %v11576_v61, %s12970_s24 }
 0x1f0   :  { %v2013_v44 = vld [vmem:[#allocation2 + $0xd9] sm:$0xff] }
 0x1f1   :  { %11592 = vrot.lane.b32.xlu1 %v11591_v24, %s12971_s25  ;;  %v14178_v14 = vld [vmem:[#allocation2 + $0xd8] sm:$0xff] }
 0x1f2   :  { %18384 = vst [vmem:[#allocation25_spill] sm:$0xff] %v14178_v14 }
 0x1f3   :  { %11597 = vrot.lane.b32.xlu0 %v11576_v61, %s12967_s21  ;;  %v3932_v56 = vld [vmem:[#allocation2 + $0xca] sm:$0xff] }
 0x1f4   :  { %v14188_v18 = vld [vmem:[#allocation2 + $0xe0] sm:$0xff] }
 0x1f5   :  { %11602 = vrot.lane.b32.xlu1 %v11591_v24, %s12969_s23  ;;  %18385 = vst [vmem:[#allocation26_spill] sm:$0xff] %v14188_v18  ;;  %v2014_v25 = vld [vmem:[#allocation2 + $0xe1] sm:$0xff]  ;;  %v3929_v24 = vld [vmem:[#allocation2 + $0xaa] sm:$0xff] }
 0x1f6   :  { %v14190_v4 = vld [vmem:[#allocation2 + $0xda] sm:$0xff]  ;;  %v14192_v61 = vld [vmem:[#allocation2 + $0xe2] sm:$0xff]  ;;  %v14195_v58 = vpack.i.bf16 %v2014_v25, %v2013_v44  ;;  %v11626_v44 = vpack.i.bf16 %v3930_v62, %v3929_v24 }
 0x1f7   :  { %18386 = vst [vmem:[#allocation27_spill] sm:$0xff] %v14190_v4  ;;  %18387 = vst [vmem:[#allocation28_spill] sm:$0xff] %v14192_v61  ;;  %v1862_v12 = vpop.f32.mrb[36].mxu0  ;;  %11607 = vrot.lane.b32.xlu0 %v11606_v29, %s12972_s26  ;;  %v3961_v25 = vld [vmem:[#allocation2 + $0xc0] sm:$0xff]  ;;  %v10026_v61 = vld [vmem:[%s18193_s0 + $0x198] sm:$0xff] }
 0x1f8   :  { %3741 = vst.msk [vmem:[#allocation2 + $0xd9] sm:$0xff] %vm38_vm0, %v10023_v0  ;;  %18388 = vst [vmem:[#allocation29_spill] sm:$0xff] %v14195_v58  ;;  %v1864_v7 = vpop.f32.mrb[37].mxu0  ;;  %v3993_v62 = vld [vmem:[#allocation2 + $0xc1] sm:$0xff] }
 0x1f9   :  { %1949 = vst.msk [vmem:[#allocation2 + $0xf1] sm:$0xff] %vm38_vm0, %v1862_v12  ;;  %3742 = vst.msk [vmem:[#allocation2 + $0xe1] sm:$0xff] %vm38_vm0, %v10024_v32  ;;  %11612 = vrot.lane.b32.xlu1 %v11611_v28, %s12973_s27  ;;  %v14203_v45 = vpop.permute.xlu0 %11327  ;;  %v3962_v7 = vld [vmem:[#allocation2 + $0xc8] sm:$0xff] }
 0x1fa   :  { %v14201_v50 = vpop.permute.xlu1 %11332  ;;  %v11641_v24 = vpack.i.bf16 %v3962_v7, %v3961_v25  ;;  %v11330_v26 = vunpack.i.h.bf16 %v14203_v45 }
 0x1fb   :  { %v1867_v63 = vpop.f32.mrb[38].mxu0  ;;  %11617 = vrot.lane.b32.xlu0 %v11606_v29, %s12968_s22 }
 0x1fc   :  { %1950 = vst.msk [vmem:[#allocation2 + $0xf9] sm:$0xff] %vm38_vm0, %v1867_v63  ;;  %v1869_v12 = vpop.f32.mrb[39].mxu0  ;;  %v3994_v63 = vld [vmem:[#allocation2 + $0xc9] sm:$0xff] }
 0x1fd   :  { %11622 = vrot.lane.b32.xlu1 %v11611_v28, %s12970_s24  ;;  %v14208_v0 = vpop.permute.xlu0 %11337  ;;  %v11646_v25 = vpack.i.bf16 %v3994_v63, %v3993_v62 }
 0x1fe   :  { %v14210_v32 = vpop.permute.xlu1 %11342  ;;  %v11339_v2 = vunpack.i.l.bf16 %v14208_v0 }
 0x1ff   :  { %11627 = vrot.lane.b32.xlu0 %v11626_v44, %s12971_s25 }
 0x200   :  { %v2015_v29 = vld [vmem:[#allocation2 + $0xf1] sm:$0xff]  ;;  %v3996_v42 = vld [vmem:[#allocation2 + $0xe1] sm:$0xff] }
 0x201   :  { %11632 = vrot.lane.b32.xlu1 %v11611_v28, %s12967_s21  ;;  %v14217_v12 = vpop.permute.xlu0 %11347  ;;  %v14219_v33 = vld [vmem:[#allocation2 + $0xf0] sm:$0xff] }
 0x202   :  { %18389 = vst [vmem:[#allocation30_spill] sm:$0xff] %v14219_v33 }
 0x203   :  { %v14224_v4 = vpop.permute.xlu1 %11357  ;;  %v14226_v58 = vld [vmem:[#allocation2 + $0xf8] sm:$0xff]  ;;  %11637 = vrot.lane.b32.xlu0 %v11626_v44, %s12969_s23  ;;  %v11319_v44 = vunpack.i.l.bf16 %v14180_v22 }
 0x204   :  { %18390 = vst [vmem:[#allocation31_spill] sm:$0xff] %v14226_v58  ;;  %v2016_v18 = vld [vmem:[#allocation2 + $0xf9] sm:$0xff]  ;;  %v1872_v33 = vpop.f32.mrb[40].mxu0  ;;  %v3931_v58 = vld [vmem:[#allocation2 + $0xc2] sm:$0xff] }
 0x205   :  { %v14228_v14 = vld [vmem:[#allocation2 + $0xf2] sm:$0xff]  ;;  %v14231_v28 = vld [vmem:[#allocation2 + $0xfa] sm:$0xff]  ;;  %v14234_v7 = vpack.i.bf16 %v2016_v18, %v2015_v29  ;;  %11642 = vrot.lane.b32.xlu1 %v11641_v24, %s12972_s26  ;;  %v14238_v36 = vpop.permute.xlu0 %11352  ;;  %1951 = vst.msk [vmem:[#allocation2 + $0x109] sm:$0xff] %vm38_vm0, %v1872_v33 }
 0x206   :  { %18391 = vst [vmem:[#allocation32_spill] sm:$0xff] %v14228_v14  ;;  %18392 = vst [vmem:[#allocation33_spill] sm:$0xff] %v14231_v28  ;;  %v1874_v14 = vpop.f32.mrb[41].mxu0  ;;  %v14246_v29 = vld [vmem:[#allocation2] sm:$0xff] }
 0x207   :  { %3743 = vst.msk [vmem:[#allocation2 + $0xf1] sm:$0xff] %vm38_vm0, %v10025_v51  ;;  %18393 = vst [vmem:[#allocation34_spill] sm:$0xff] %v14234_v7  ;;  %v14242_v28 = vpop.permute.xlu1 %11367  ;;  %11647 = vrot.lane.b32.xlu0 %v11646_v25, %s12973_s27  ;;  %v11661_v51 = vpack.i.bf16 %v3932_v56, %v3931_v58  ;;  %v11320_v14 = vunpack.i.h.bf16 %v14180_v22  ;;  %v3147_v63 = vsel %vm38_vm0, %v14246_v29, %v11319_v44  ;;  %v11329_v7 = vunpack.i.l.bf16 %v14203_v45  ;;  %v3963_v56 = vld [vmem:[#allocation2 + $0xd8] sm:$0xff]  ;;  %v3964_v58 = vld [vmem:[#allocation2 + $0xe0] sm:$0xff] }
 0x208   :  { %3744 = vst.msk [vmem:[#allocation2 + $0xf9] sm:$0xff] %vm38_vm0, %v10026_v61  ;;  %v1877_v18 = vpop.f32.mrb[42].mxu0  ;;  %v11324_v61 = vunpack.i.l.bf16 %v14182_v35  ;;  %v11334_v22 = vunpack.i.l.bf16 %v14201_v50  ;;  %v3995_v44 = vld [vmem:[#allocation2 + $0xd9] sm:$0xff]  ;;  %v10028_v45 = vld [vmem:[%s18193_s0 + $0x1a8] sm:$0xff] }
 0x209   :  { %11652 = vrot.lane.b32.xlu1 %v11641_v24, %s12968_s22  ;;  %v14249_v62 = vpop.permute.xlu0 %11362  ;;  %1952 = vst.msk [vmem:[#allocation2 + $0x111] sm:$0xff] %vm38_vm0, %v1877_v18  ;;  %v1879_v33 = vpop.f32.mrb[43].mxu0  ;;  %v14260_v24 = vld [vmem:[#allocation2 + $0x8] sm:$0xff]  ;;  %v11325_v18 = vunpack.i.h.bf16 %v14182_v35  ;;  %v14290_v23 = vpack.i.bf16 %v3996_v42, %v3995_v44 }
 0x20a   :  { %v3179_v33 = vsel %vm1412_vm2, %v3147_v63, %v11324_v61  ;;  %v3148_v52 = vsel %vm38_vm0, %v14260_v24, %v11320_v14  ;;  %v10027_v61 = vld [vmem:[%s18193_s0 + $0x1a0] sm:$0xff]  ;;  %v11676_v14 = vpack.i.bf16 %v3964_v58, %v3963_v56 }
 0x20b   :  { %v14256_v19 = vpop.permute.xlu1 %11377  ;;  %11657 = vrot.lane.b32.xlu0 %v11646_v25, %s12970_s24  ;;  %v3211_v20 = vsel %vm1445_vm3, %v3179_v33, %v11329_v7  ;;  %v11299_v7 = vunpack.i.l.bf16 %v14154_v17 }
 0x20c   :  { %v2017_v35 = vld [vmem:[#allocation2 + $0x109] sm:$0xff]  ;;  %v11379_v63 = vunpack.i.l.bf16 %v14256_v19  ;;  %v3243_v15 = vsel %vm1478_vm4, %v3211_v20, %v11334_v22  ;;  %v11380_v20 = vunpack.i.h.bf16 %v14256_v19 }
 0x20d   :  { %11662 = vrot.lane.b32.xlu1 %v11661_v51, %s12971_s25  ;;  %v14265_v60 = vpop.permute.xlu0 %11372  ;;  %v14279_v47 = vld [vmem:[#allocation2 + $0x108] sm:$0xff] }
 0x20e   :  { %18394 = vst [vmem:[#allocation35_spill] sm:$0xff] %v14279_v47  ;;  %v11335_v47 = vunpack.i.h.bf16 %v14201_v50  ;;  %v3934_v22 = vld [vmem:[#allocation2 + $0xe2] sm:$0xff] }
 0x20f   :  { %v14272_v39 = vpop.permute.xlu1 %11387  ;;  %11667 = vrot.lane.b32.xlu0 %v11646_v25, %s12967_s21  ;;  %v3180_v25 = vsel %vm1412_vm2, %v3148_v52, %v11325_v18  ;;  %v3275_v52 = vsel %vm1511_vm5, %v3243_v15, %v11339_v2  ;;  %v11300_v15 = vunpack.i.h.bf16 %v14154_v17 }
 0x210   :  { %v14286_v33 = vld [vmem:[#allocation2 + $0x110] sm:$0xff] }
 0x211   :  { %11672 = vrot.lane.b32.xlu1 %v11661_v51, %s12969_s23  ;;  %18395 = vst [vmem:[#allocation36_spill] sm:$0xff] %v14286_v33  ;;  %v2018_v43 = vld [vmem:[#allocation2 + $0x111] sm:$0xff]  ;;  %v11383_v56 = vpop.permute.xlu0 %11382  ;;  %v3212_v33 = vsel %vm1445_vm3, %v3180_v25, %v11330_v26 }
 0x212   :  { %v14288_v48 = vld [vmem:[#allocation2 + $0x10a] sm:$0xff]  ;;  %v14294_v58 = vld [vmem:[#allocation2 + $0x112] sm:$0xff]  ;;  %v14298_v51 = vpack.i.bf16 %v2018_v43, %v2017_v35  ;;  %v11384_v42 = vunpack.i.l.bf16 %v11383_v56  ;;  %v3307_v43 = vsel %vm1544_vm6, %v3275_v52, %v11379_v63  ;;  %v11385_v18 = vunpack.i.h.bf16 %v11383_v56 }
 0x213   :  { %18396 = vst [vmem:[#allocation37_spill] sm:$0xff] %v14288_v48  ;;  %18397 = vst [vmem:[#allocation38_spill] sm:$0xff] %v14294_v58  ;;  %v1882_v6 = vpop.f32.mrb[44].mxu0  ;;  %v11340_v48 = vunpack.i.h.bf16 %v14208_v0  ;;  %v14302_v44 = vpop.permute.xlu1 %11397  ;;  %11677 = vrot.lane.b32.xlu0 %v11676_v14, %s12972_s26  ;;  %v3933_v0 = vld [vmem:[#allocation2 + $0xda] sm:$0xff]  ;;  %v3244_v19 = vsel %vm1478_vm4, %v3212_v33, %v11335_v47  ;;  %v11354_v63 = vunpack.i.l.bf16 %v14238_v36 }
 0x214   :  { %3745 = vst.msk [vmem:[#allocation2 + $0x109] sm:$0xff] %vm38_vm0, %v10027_v61  ;;  %1953 = vst.msk [vmem:[#allocation2 + $0x121] sm:$0xff] %vm38_vm0, %v1882_v6  ;;  %v1884_v50 = vpop.f32.mrb[45].mxu0  ;;  %v3339_v26 = vsel %vm1577_vm7, %v3307_v43, %v11384_v42  ;;  %v11304_v6 = vunpack.i.l.bf16 %v14160_v49  ;;  %v4941_v61 = vsel %vm38_vm0, %v14246_v29, %v11299_v7  ;;  %v11696_v33 = vpack.i.bf16 %v3934_v22, %v3933_v0  ;;  %v3965_v42 = vld [vmem:[#allocation2 + $0xf0] sm:$0xff]  ;;  %v3966_v52 = vld [vmem:[#allocation2 + $0xf8] sm:$0xff] }
 0x215   :  { %3746 = vst.msk [vmem:[#allocation2 + $0x111] sm:$0xff] %vm38_vm0, %v10028_v45  ;;  %11682 = vrot.lane.b32.xlu1 %v14290_v23, %s12973_s27  ;;  %3532 = vmatmul.mubr.f32.vlgmr.msra.gmra.mrb[0].mxu1 %v3339_v26  ;;  %v14315_v2 = vpop.permute.xlu0 %11392  ;;  %v3276_v17 = vsel %vm1511_vm5, %v3244_v19, %v11340_v48  ;;  %v18398_v29 = vmov 0.0|0.0   ;;  %v11305_v7 = vunpack.i.h.bf16 %v14160_v49  ;;  %v4942_v48 = vsel %vm38_vm0, %v14260_v24, %v11300_v15  ;;  %v10030_v26 = vld [vmem:[%s18193_s0 + $0x1b8] sm:$0xff] }
 0x216   :  { %9976 = vmatprep.mubr.msk.f32.mxu1 %vm38_vm0, %v13977_v10  ;;  %10688 = vmatpush1.bf16.msra.mxu1 %v13860_v46  ;;  %v3308_v47 = vsel %vm1544_vm6, %v3276_v17, %v11380_v20  ;;  %v4973_v56 = vsel %vm1412_vm2, %v4941_v61, %v11304_v6  ;;  %v11355_v46 = vunpack.i.h.bf16 %v14238_v36  ;;  %v11364_v49 = vunpack.i.l.bf16 %v14249_v62  ;;  %v3997_v15 = vld [vmem:[#allocation2 + $0xf1] sm:$0xff]  ;;  %v3998_v6 = vld [vmem:[#allocation2 + $0xf9] sm:$0xff] }
 0x217   :  { %v1887_v35 = vpop.f32.mrb[46].mxu0  ;;  %v14321_v45 = vpop.permute.xlu1 %11407  ;;  %11687 = vrot.lane.b32.xlu0 %v11676_v14, %s12968_s22  ;;  %10689 = vmatprep.subr.bf16.mxu1 %v18398_v29  ;;  %v3340_v10 = vsel %vm1577_vm7, %v3308_v47, %v11385_v18  ;;  %v5005_v50 = vsel %vm1445_vm3, %v4973_v56, %v11354_v63  ;;  %v11359_v24 = vunpack.i.l.bf16 %v14224_v4  ;;  %v10029_v18 = vld [vmem:[%s18193_s0 + $0x1b0] sm:$0xff]  ;;  %v4974_v0 = vsel %vm1412_vm2, %v4942_v48, %v11305_v7 }
 0x218   :  { %1954 = vst.msk [vmem:[#allocation2 + $0x129] sm:$0xff] %vm38_vm0, %v1887_v35  ;;  %v1889_v25 = vpop.f32.mrb[47].mxu0  ;;  %v11711_v22 = vpack.i.bf16 %v3966_v52, %v3965_v42  ;;  %v5006_v19 = vsel %vm1445_vm3, %v4974_v0, %v11355_v46  ;;  %v11365_v47 = vunpack.i.h.bf16 %v14249_v62  ;;  %v11360_v46 = vunpack.i.h.bf16 %v14224_v4 }
 0x219   :  { %11692 = vrot.lane.b32.xlu1 %v14290_v23, %s12970_s24  ;;  %3537 = vmatmul.mubr.f32.gmra.mrb[2].mxu1 %v3340_v10  ;;  %v14339_v14 = vpop.permute.xlu0 %11402  ;;  %v5037_v35 = vsel %vm1478_vm4, %v5005_v50, %v11359_v24  ;;  %v14379_v52 = vpack.i.bf16 %v3998_v6, %v3997_v15  ;;  %v4014_v50 = vld [vmem:[#allocation2 + $0x3a] sm:$0xff]  ;;  %v11344_v4 = vunpack.i.l.bf16 %v14210_v32  ;;  %v11349_v0 = vunpack.i.l.bf16 %v14217_v12 }
 0x21a   :  { %9977 = vmatprep.mubr.msk.f32.mxu1 %vm38_vm0, %v14009_v41  ;;  %10691 = vmatpush1.bf16.msra.mxu1 %v13873_v3  ;;  %v5069_v7 = vsel %vm1511_vm5, %v5037_v35, %v11364_v49  ;;  %v11350_v35 = vunpack.i.h.bf16 %v14217_v12 }
 0x21b   :  { %v11413_v20 = vpop.permute.xlu1 %11412  ;;  %11697 = vrot.lane.b32.xlu0 %v11696_v33, %s12971_s25  ;;  %v2019_v36 = vld [vmem:[#allocation2 + $0x121] sm:$0xff]  ;;  %10692 = vmatprep.subr.bf16.mxu1 %v18398_v29 }
 0x21c   :  { %v11414_v43 = vunpack.i.l.bf16 %v11413_v20  ;;  %v14358_v3 = vld [vmem:[#allocation2 + $0x120] sm:$0xff]  ;;  %v11415_v42 = vunpack.i.h.bf16 %v11413_v20 }
 0x21d   :  { %11702 = vrot.lane.b32.xlu1 %v14290_v23, %s12967_s21  ;;  %18399 = vst [vmem:[#allocation39_spill] sm:$0xff] %v14358_v3  ;;  %v11418_v61 = vpop.permute.xlu0 %11417 }
 0x21e   :  { %v11419_v23 = vunpack.i.l.bf16 %v11418_v61  ;;  %10694 = vmatpush1.bf16.msra.mxu1 %v13886_v55  ;;  %v5101_v62 = vsel %vm1544_vm6, %v5069_v7, %v11414_v43  ;;  %v11420_v49 = vunpack.i.h.bf16 %v11418_v61  ;;  %v3935_v43 = vld [vmem:[#allocation2 + $0xf2] sm:$0xff]  ;;  %v11394_v7 = vunpack.i.l.bf16 %v14315_v2 }
 0x21f   :  { %v14362_v63 = vld [vmem:[#allocation2 + $0x128] sm:$0xff]  ;;  %v14368_v10 = vpop.permute.xlu1 %11422  ;;  %11707 = vrot.lane.b32.xlu0 %v11696_v33, %s12969_s23  ;;  %10695 = vmatprep.subr.bf16.mxu1 %v18398_v29  ;;  %v5038_v33 = vsel %vm1478_vm4, %v5006_v19, %v11360_v46  ;;  %v11389_v19 = vunpack.i.l.bf16 %v14272_v39  ;;  %v11369_v46 = vunpack.i.l.bf16 %v14242_v28 }
 0x220   :  { %18400 = vst [vmem:[#allocation40_spill] sm:$0xff] %v14362_v63  ;;  %v2020_v17 = vld [vmem:[#allocation2 + $0x129] sm:$0xff]  ;;  %v5133_v24 = vsel %vm1577_vm7, %v5101_v62, %v11419_v23  ;;  %v1892_v55 = vpop.f32.mrb[48].mxu0  ;;  %v5070_v6 = vsel %vm1511_vm5, %v5038_v33, %v11365_v47  ;;  %v3149_v23 = vsel %vm38_vm0, %v13912_v9, %v11344_v4 }
 0x221   :  { %v14364_v25 = vld [vmem:[#allocation2 + $0x122] sm:$0xff]  ;;  %v14370_v48 = vld [vmem:[#allocation2 + $0x12a] sm:$0xff]  ;;  %v14373_v56 = vpack.i.bf16 %v2020_v17, %v2019_v36  ;;  %11712 = vrot.lane.b32.xlu1 %v11711_v22, %s12972_s26  ;;  %5326 = vmatmul.mubr.f32.vlgmr.msra.gmra.mrb[64].mxu0 %v5133_v24  ;;  %v14386_v20 = vpop.permute.xlu0 %11427  ;;  %v3936_v36 = vld [vmem:[#allocation2 + $0xfa] sm:$0xff]  ;;  %1955 = vst.msk [vmem:[#allocation2 + $0x139] sm:$0xff] %vm38_vm0, %v1892_v55  ;;  %v5102_v61 = vsel %vm1544_vm6, %v5070_v6, %v11415_v42  ;;  %v11390_v17 = vunpack.i.h.bf16 %v14272_v39  ;;  %v11395_v42 = vunpack.i.h.bf16 %v14315_v2 }
 0x222   :  { %3747 = vst.msk [vmem:[#allocation2 + $0x121] sm:$0xff] %vm38_vm0, %v10029_v18  ;;  %3748 = vst.msk [vmem:[#allocation2 + $0x129] sm:$0xff] %vm38_vm0, %v10030_v26  ;;  %v1894_v18 = vpop.f32.mrb[49].mxu0  ;;  %v11345_v26 = vunpack.i.h.bf16 %v14210_v32  ;;  %10040 = vmatprep.mubr.msk.f32.mxu0 %vm38_vm0, %v4014_v50  ;;  %10697 = vmatpush1.bf16.msra.mxu1 %v13897_v1  ;;  %v4015_v32 = vld [vmem:[#allocation2 + $0x4a] sm:$0xff]  ;;  %v5134_v1 = vsel %vm1577_vm7, %v5102_v61, %v11420_v49  ;;  %v11731_v47 = vpack.i.bf16 %v3936_v36, %v3935_v43  ;;  %v3759_v49 = vld [vmem:[#allocation2 + $0x18] sm:$0xff] }
 0x223   :  { %v14392_v15 = vpop.permute.xlu1 %11432  ;;  %11717 = vrot.lane.b32.xlu0 %v14379_v52, %s12973_s27  ;;  %10698 = vmatprep.subr.bf16.mxu1 %v18398_v29  ;;  %v3181_v50 = vsel %vm1412_vm2, %v3149_v23, %v11349_v0  ;;  %v3967_v33 = vld [vmem:[#allocation2 + $0x108] sm:$0xff]  ;;  %v3968_v43 = vld [vmem:[#allocation2 + $0x110] sm:$0xff]  ;;  %v11375_v36 = vunpack.i.h.bf16 %v14265_v60  ;;  %v11399_v18 = vunpack.i.l.bf16 %v14302_v44  ;;  %v11424_v23 = vunpack.i.l.bf16 %v14368_v10 }
 0x224   :  { %v1897_v12 = vpop.f32.mrb[50].mxu0  ;;  %v3213_v2 = vsel %vm1445_vm3, %v3181_v50, %v11389_v19  ;;  %v3999_v6 = vld [vmem:[#allocation2 + $0x109] sm:$0xff]  ;;  %v11400_v19 = vunpack.i.h.bf16 %v14302_v44 }
 0x225   :  { %11722 = vrot.lane.b32.xlu1 %v11711_v22, %s12968_s22  ;;  %5331 = vmatmul.mubr.f32.gmra.mrb[66].mxu0 %v5134_v1  ;;  %v14411_v62 = vpop.permute.xlu0 %11437  ;;  %1956 = vst.msk [vmem:[#allocation2 + $0x141] sm:$0xff] %vm38_vm0, %v1897_v12  ;;  %v1899_v39 = vpop.f32.mrb[51].mxu0  ;;  %v3150_v22 = vsel %vm38_vm0, %v13917_v57, %v11345_v26  ;;  %v11370_v57 = vunpack.i.h.bf16 %v14242_v28  ;;  %v3245_v4 = vsel %vm1478_vm4, %v3213_v2, %v11394_v7  ;;  %v11374_v28 = vunpack.i.l.bf16 %v14265_v60  ;;  %v10031_v1 = vld [vmem:[%s18193_s0 + $0x1c0] sm:$0xff] }
 0x226   :  { %10041 = vmatprep.mubr.msk.f32.mxu0 %vm38_vm0, %v4015_v32  ;;  %10700 = vmatpush1.bf16.msra.mxu1 %v13910_v40  ;;  %v3182_v9 = vsel %vm1412_vm2, %v3150_v22, %v11350_v35  ;;  %v4943_v40 = vsel %vm38_vm0, %v3759_v49, %v11369_v46  ;;  %v4000_v35 = vld [vmem:[#allocation2 + $0x111] sm:$0xff]  ;;  %v3760_v12 = vld [vmem:[#allocation2 + $0x20] sm:$0xff]  ;;  %v3277_v44 = vsel %vm1511_vm5, %v3245_v4, %v11399_v18  ;;  %v10032_v39 = vld [vmem:[%s18193_s0 + $0x1c8] sm:$0xff] }
 0x227   :  { %v14417_v24 = vpop.permute.xlu1 %11442  ;;  %11727 = vrot.lane.b32.xlu0 %v14379_v52, %s12970_s24  ;;  %10701 = vmatprep.subr.bf16.mxu1 %v18398_v29  ;;  %v3214_v55 = vsel %vm1445_vm3, %v3182_v9, %v11390_v17  ;;  %v14457_v9 = vpack.i.bf16 %v4000_v35, %v3999_v6  ;;  %v11430_v6 = vunpack.i.h.bf16 %v14386_v20 }
 0x228   :  { %v3246_v26 = vsel %vm1478_vm4, %v3214_v55, %v11395_v42  ;;  %v2021_v7 = vld [vmem:[#allocation2 + $0x139] sm:$0xff]  ;;  %v11746_v42 = vpack.i.bf16 %v3968_v43, %v3967_v33  ;;  %v11425_v55 = vunpack.i.h.bf16 %v14368_v10 }
 0x229   :  { %11732 = vrot.lane.b32.xlu1 %v11731_v47, %s12971_s25  ;;  %v11448_v0 = vpop.permute.xlu0 %11447  ;;  %v14443_v60 = vld [vmem:[#allocation2 + $0x138] sm:$0xff]  ;;  %v3278_v2 = vsel %vm1511_vm5, %v3246_v26, %v11400_v19  ;;  %v4944_v19 = vsel %vm38_vm0, %v3760_v12, %v11370_v57 }
 0x22a   :  { %v11450_v32 = vunpack.i.h.bf16 %v11448_v0  ;;  %v11449_v17 = vunpack.i.l.bf16 %v11448_v0  ;;  %10703 = vmatpush1.bf16.msra.mxu1 %v13932_v31  ;;  %v11429_v31 = vunpack.i.l.bf16 %v14386_v20  ;;  %v4976_v20 = vsel %vm1412_vm2, %v4944_v19, %v11375_v36 }
 0x22b   :  { %v11453_v61 = vpop.permute.xlu1 %11452  ;;  %11737 = vrot.lane.b32.xlu0 %v14379_v52, %s12967_s21  ;;  %10704 = vmatprep.subr.bf16.mxu1 %v18398_v29  ;;  %v5008_v57 = vsel %vm1445_vm3, %v4976_v20, %v11425_v55  ;;  %v4016_v55 = vld [vmem:[#allocation2 + $0x52] sm:$0xff] }
 0x22c   :  { %v11454_v46 = vunpack.i.l.bf16 %v11453_v61  ;;  %v14452_v22 = vld [vmem:[#allocation2 + $0x140] sm:$0xff]  ;;  %v3309_v52 = vsel %vm1544_vm6, %v3277_v44, %v11449_v17  ;;  %v11455_v4 = vunpack.i.h.bf16 %v11453_v61  ;;  %v4975_v17 = vsel %vm1412_vm2, %v4943_v40, %v11374_v28  ;;  %v3937_v28 = vld [vmem:[#allocation2 + $0x10a] sm:$0xff] }
 0x22d   :  { %11742 = vrot.lane.b32.xlu1 %v11731_v47, %s12969_s23  ;;  %v2022_v50 = vld [vmem:[#allocation2 + $0x141] sm:$0xff]  ;;  %v14461_v33 = vpop.permute.xlu0 %11457  ;;  %v3310_v10 = vsel %vm1544_vm6, %v3278_v2, %v11450_v32  ;;  %v5007_v61 = vsel %vm1445_vm3, %v4975_v17, %v11424_v23  ;;  %v3938_v32 = vld [vmem:[#allocation2 + $0x112] sm:$0xff]  ;;  %v5040_v36 = vsel %vm1478_vm4, %v5008_v57, %v11430_v6  ;;  %v4002_v57 = vld [vmem:[#allocation2 + $0x129] sm:$0xff] }
 0x22e   :  { %v14454_v49 = vld [vmem:[#allocation2 + $0x13a] sm:$0xff]  ;;  %v14463_v43 = vld [vmem:[#allocation2 + $0x142] sm:$0xff]  ;;  %v3341_v47 = vsel %vm1577_vm7, %v3309_v52, %v11454_v46  ;;  %v14467_v0 = vpack.i.bf16 %v2022_v50, %v2021_v7  ;;  %v11434_v7 = vunpack.i.l.bf16 %v14392_v15  ;;  %v5039_v40 = vsel %vm1478_vm4, %v5007_v61, %v11429_v31  ;;  %10706 = vmatpush1.bf16.msra.mxu1 %v13944_v34  ;;  %v10033_v20 = vld [vmem:[%s18193_s0 + $0x1d0] sm:$0xff] }
 0x22f   :  { %v1902_v18 = vpop.f32.mrb[52].mxu0  ;;  %3749 = vst.msk [vmem:[#allocation2 + $0x139] sm:$0xff] %vm38_vm0, %v10031_v1  ;;  %v14471_v35 = vpop.permute.xlu1 %11462  ;;  %3542 = vmatmul.mubr.f32.gmra.mrb[4].mxu1 %v3341_v47  ;;  %3750 = vst.msk [vmem:[#allocation2 + $0x141] sm:$0xff] %vm38_vm0, %v10032_v39  ;;  %11747 = vrot.lane.b32.xlu0 %v11746_v42, %s12972_s26  ;;  %v11435_v1 = vunpack.i.h.bf16 %v14392_v15  ;;  %v3342_v23 = vsel %vm1577_vm7, %v3310_v10, %v11455_v4  ;;  %v11766_v52 = vpack.i.bf16 %v3938_v32, %v3937_v28  ;;  %v3969_v6 = vld [vmem:[#allocation2 + $0x120] sm:$0xff] }
 0x230   :  { %1957 = vst.msk [vmem:[#allocation2 + $0x151] sm:$0xff] %vm38_vm0, %v1902_v18  ;;  %v1904_v26 = vpop.f32.mrb[53].mxu0  ;;  %9978 = vmatprep.mubr.msk.f32.mxu1 %vm38_vm0, %v14011_v27  ;;  %10707 = vmatprep.subr.bf16.mxu1 %v18398_v29  ;;  %v5071_v15 = vsel %vm1511_vm5, %v5039_v40, %v11434_v7  ;;  %v11439_v10 = vunpack.i.l.bf16 %v14411_v62  ;;  %v4001_v32 = vld [vmem:[#allocation2 + $0x121] sm:$0xff] }
 0x231   :  { %11752 = vrot.lane.b32.xlu1 %v14457_v9, %s12973_s27  ;;  %v11468_v12 = vpop.permute.xlu0 %11467  ;;  %v5072_v17 = vsel %vm1511_vm5, %v5040_v36, %v11435_v1  ;;  %v3761_v26 = vld [vmem:[#allocation2 + $0x30] sm:$0xff]  ;;  %v11444_v1 = vunpack.i.l.bf16 %v14417_v24 }
 0x232   :  { %v11470_v39 = vunpack.i.h.bf16 %v11468_v12  ;;  %v11469_v31 = vunpack.i.l.bf16 %v11468_v12  ;;  %10709 = vmatpush1.bf16.msra.mxu1 %v13967_v59  ;;  %v4017_v59 = vld [vmem:[#allocation2 + $0x62] sm:$0xff] }
 0x233   :  { %v1907_v46 = vpop.f32.mrb[54].mxu0  ;;  %v11473_v44 = vpop.permute.xlu1 %11472  ;;  %3547 = vmatmul.mubr.f32.gmra.mrb[6].mxu1 %v3342_v23  ;;  %11757 = vrot.lane.b32.xlu0 %v11746_v42, %s12968_s22  ;;  %v3970_v42 = vld [vmem:[#allocation2 + $0x128] sm:$0xff] }
 0x234   :  { %1958 = vst.msk [vmem:[#allocation2 + $0x159] sm:$0xff] %vm38_vm0, %v1907_v46  ;;  %v1909_v50 = vpop.f32.mrb[55].mxu0  ;;  %v11474_v34 = vunpack.i.l.bf16 %v11473_v44  ;;  %9979 = vmatprep.mubr.msk.f32.mxu1 %vm38_vm0, %v14038_v16  ;;  %v5103_v2 = vsel %vm1544_vm6, %v5071_v15, %v11469_v31  ;;  %v11475_v4 = vunpack.i.h.bf16 %v11473_v44  ;;  %10710 = vmatprep.subr.bf16.mxu1 %v18398_v29  ;;  %v5104_v61 = vsel %vm1544_vm6, %v5072_v17, %v11470_v39  ;;  %v10034_v29 = vld [vmem:[%s18193_s0 + $0x1d8] sm:$0xff] }
 0x235   :  { %11762 = vrot.lane.b32.xlu1 %v14457_v9, %s12970_s24  ;;  %v14501_v47 = vpop.permute.xlu0 %11477  ;;  %v11781_v28 = vpack.i.bf16 %v3970_v42, %v3969_v6  ;;  %v4945_v39 = vsel %vm38_vm0, %v3761_v26, %v11439_v10  ;;  %v3762_v15 = vld [vmem:[#allocation2 + $0x38] sm:$0xff]  ;;  %v3939_v6 = vld [vmem:[#allocation2 + $0x122] sm:$0xff]  ;;  %v3940_v42 = vld [vmem:[#allocation2 + $0x12a] sm:$0xff] }
 0x236   :  { %v5135_v18 = vsel %vm1577_vm7, %v5103_v2, %v11474_v34  ;;  %10712 = vmatpush1.bf16.msra.mxu1 %v13982_v53  ;;  %v5136_v23 = vsel %vm1577_vm7, %v5104_v61, %v11475_v4  ;;  %v11479_v31 = vunpack.i.l.bf16 %v14501_v47  ;;  %v11786_v2 = vpack.i.bf16 %v4002_v57, %v4001_v32 }
 0x237   :  { %v14507_v19 = vpop.permute.xlu1 %11482  ;;  %5336 = vmatmul.mubr.f32.gmra.mrb[68].mxu0 %v5135_v18  ;;  %11767 = vrot.lane.b32.xlu0 %v11766_v52, %s12971_s25  ;;  %v2023_v7 = vld [vmem:[#allocation2 + $0x151] sm:$0xff]  ;;  %v4977_v18 = vsel %vm1412_vm2, %v4945_v39, %v11444_v1  ;;  %v11480_v26 = vunpack.i.h.bf16 %v14501_v47 }
 0x238   :  { %10042 = vmatprep.mubr.msk.f32.mxu0 %vm38_vm0, %v4016_v55  ;;  %v14520_v40 = vld [vmem:[#allocation2 + $0x150] sm:$0xff]  ;;  %v11445_v55 = vunpack.i.h.bf16 %v14417_v24  ;;  %v11484_v4 = vunpack.i.l.bf16 %v14507_v19  ;;  %v5009_v61 = vsel %vm1445_vm3, %v4977_v18, %v11479_v31  ;;  %v11485_v32 = vunpack.i.h.bf16 %v14507_v19 }
 0x239   :  { %11772 = vrot.lane.b32.xlu1 %v14457_v9, %s12967_s21  ;;  %v14524_v12 = vpop.permute.xlu0 %11487  ;;  %v11440_v9 = vunpack.i.h.bf16 %v14411_v62 }
 0x23b   :  { %v14527_v46 = vld [vmem:[#allocation2 + $0x158] sm:$0xff]  ;;  %v14534_v50 = vpop.permute.xlu1 %11492  ;;  %5341 = vmatmul.mubr.f32.gmra.mrb[70].mxu0 %v5136_v23  ;;  %11777 = vrot.lane.b32.xlu0 %v11766_v52, %s12969_s23  ;;  %v4946_v10 = vsel %vm38_vm0, %v3762_v15, %v11440_v9  ;;  %v5041_v23 = vsel %vm1478_vm4, %v5009_v61, %v11484_v4  ;;  %v11490_v9 = vunpack.i.h.bf16 %v14524_v12  ;;  %v3763_v4 = vld [vmem:[#allocation2 + $0x48] sm:$0xff] }
 0x23c   :  { %v2024_v36 = vld [vmem:[#allocation2 + $0x159] sm:$0xff]  ;;  %10043 = vmatprep.mubr.msk.f32.mxu0 %vm38_vm0, %v4017_v59  ;;  %v1912_v62 = vpop.f32.mrb[56].mxu0  ;;  %v11489_v59 = vunpack.i.l.bf16 %v14524_v12  ;;  %v4978_v57 = vsel %vm1412_vm2, %v4946_v10, %v11445_v55  ;;  %v11494_v15 = vunpack.i.l.bf16 %v14534_v50  ;;  %v4018_v55 = vld [vmem:[#allocation2 + $0x6a] sm:$0xff] }
 0x23d   :  { %v14529_v44 = vld [vmem:[#allocation2 + $0x152] sm:$0xff]  ;;  %v14536_v53 = vld [vmem:[#allocation2 + $0x15a] sm:$0xff]  ;;  %v14539_v34 = vpack.i.bf16 %v2024_v36, %v2023_v7  ;;  %11782 = vrot.lane.b32.xlu1 %v11781_v28, %s12972_s26  ;;  %v14548_v17 = vpop.permute.xlu0 %11497  ;;  %1959 = vst.msk [vmem:[#allocation2 + $0x169] sm:$0xff] %vm38_vm0, %v1912_v62  ;;  %v1914_v52 = vpop.f32.mrb[57].mxu0  ;;  %v5010_v36 = vsel %vm1445_vm3, %v4978_v57, %v11480_v26 }
 0x23e   :  { %18401 = vst [vmem:[#allocation41_spill] sm:$0xff] %v14529_v44  ;;  %18402 = vst [vmem:[#allocation42_spill] sm:$0xff] %v14536_v53  ;;  %v3971_v12 = vld [vmem:[#allocation2 + $0x138] sm:$0xff]  ;;  %v11495_v52 = vunpack.i.h.bf16 %v14534_v50  ;;  %v5042_v26 = vsel %vm1478_vm4, %v5010_v36, %v11485_v32  ;;  %v10035_v50 = vld [vmem:[%s18193_s0 + $0x1e0] sm:$0xff] }
 0x23f   :  { %3751 = vst.msk [vmem:[#allocation2 + $0x151] sm:$0xff] %vm38_vm0, %v10033_v20  ;;  %3752 = vst.msk [vmem:[#allocation2 + $0x159] sm:$0xff] %vm38_vm0, %v10034_v29  ;;  %v11503_v24 = vpop.permute.xlu1 %11502  ;;  %11787 = vrot.lane.b32.xlu0 %v11786_v2, %s12973_s27  ;;  %v11801_v20 = vpack.i.bf16 %v3940_v42, %v3939_v6  ;;  %v3972_v42 = vld [vmem:[#allocation2 + $0x140] sm:$0xff]  ;;  %v4026_v53 = vld [vmem:[#allocation2 + $0xca] sm:$0xff] }
 0x240   :  { %v11504_v7 = vunpack.i.l.bf16 %v11503_v24  ;;  %v1917_v29 = vpop.f32.mrb[58].mxu0  ;;  %v11505_v19 = vunpack.i.h.bf16 %v11503_v24  ;;  %v4003_v61 = vld [vmem:[#allocation2 + $0x139] sm:$0xff]  ;;  %v3764_v24 = vld [vmem:[#allocation2 + $0x50] sm:$0xff] }
 0x241   :  { %11792 = vrot.lane.b32.xlu1 %v11781_v28, %s12968_s22  ;;  %v11508_v1 = vpop.permute.xlu0 %11507  ;;  %1960 = vst.msk [vmem:[#allocation2 + $0x171] sm:$0xff] %vm38_vm0, %v1917_v29  ;;  %v1919_v47 = vpop.f32.mrb[59].mxu0  ;;  %v5073_v28 = vsel %vm1511_vm5, %v5041_v23, %v11489_v59  ;;  %v4004_v59 = vld [vmem:[#allocation2 + $0x141] sm:$0xff]  ;;  %v4947_v23 = vsel %vm38_vm0, %v3763_v4, %v11494_v15 }
 0x242   :  { %v11509_v39 = vunpack.i.l.bf16 %v11508_v1  ;;  %v5105_v62 = vsel %vm1544_vm6, %v5073_v28, %v11504_v7  ;;  %v11510_v18 = vunpack.i.h.bf16 %v11508_v1  ;;  %v11499_v7 = vunpack.i.l.bf16 %v14548_v17  ;;  %v4019_v28 = vld [vmem:[#allocation2 + $0x7a] sm:$0xff] }
 0x243   :  { %v14563_v31 = vpop.permute.xlu1 %11512  ;;  %11797 = vrot.lane.b32.xlu0 %v11786_v2, %s12970_s24  ;;  %v5074_v1 = vsel %vm1511_vm5, %v5042_v26, %v11490_v9  ;;  %v10036_v9 = vld [vmem:[%s18193_s0 + $0x1e8] sm:$0xff]  ;;  %v11821_v26 = vpack.i.bf16 %v4004_v59, %v4003_v61 }
 0x244   :  { %v5137_v6 = vsel %vm1577_vm7, %v5105_v62, %v11509_v39  ;;  %v2025_v57 = vld [vmem:[#allocation2 + $0x169] sm:$0xff]  ;;  %v11514_v32 = vunpack.i.l.bf16 %v14563_v31  ;;  %v5106_v36 = vsel %vm1544_vm6, %v5074_v1, %v11505_v19  ;;  %v11816_v39 = vpack.i.bf16 %v3972_v42, %v3971_v12 }
 0x245   :  { %11802 = vrot.lane.b32.xlu1 %v11801_v20, %s12971_s25  ;;  %5346 = vmatmul.mubr.f32.gmra.mrb[72].mxu0 %v5137_v6  ;;  %v11518_v10 = vpop.permute.xlu0 %11517  ;;  %v14584_v47 = vld [vmem:[#allocation2 + $0x168] sm:$0xff]  ;;  %v11500_v62 = vunpack.i.h.bf16 %v14548_v17  ;;  %v5138_v15 = vsel %vm1577_vm7, %v5106_v36, %v11510_v18  ;;  %v4948_v19 = vsel %vm38_vm0, %v3764_v24, %v11495_v52  ;;  %v11515_v12 = vunpack.i.h.bf16 %v14563_v31 }
 0x246   :  { %10044 = vmatprep.mubr.msk.f32.mxu0 %vm38_vm0, %v4018_v55  ;;  %18403 = vst [vmem:[#allocation43_spill] sm:$0xff] %v14584_v47  ;;  %v11519_v55 = vunpack.i.l.bf16 %v11518_v10  ;;  %v4979_v18 = vsel %vm1412_vm2, %v4947_v23, %v11499_v7  ;;  %v11520_v36 = vunpack.i.h.bf16 %v11518_v10  ;;  %v3941_v10 = vld [vmem:[#allocation2 + $0x13a] sm:$0xff]  ;;  %v3942_v7 = vld [vmem:[#allocation2 + $0x142] sm:$0xff] }
 0x247   :  { %v14574_v29 = vpop.permute.xlu1 %11522  ;;  %11807 = vrot.lane.b32.xlu0 %v11786_v2, %s12967_s21  ;;  %v5011_v52 = vsel %vm1445_vm3, %v4979_v18, %v11514_v32  ;;  %v4980_v59 = vsel %vm1412_vm2, %v4948_v19, %v11500_v62 }
 0x248   :  { %v14593_v4 = vld [vmem:[#allocation2 + $0x170] sm:$0xff]  ;;  %v11524_v61 = vunpack.i.l.bf16 %v14574_v29  ;;  %v5043_v24 = vsel %vm1478_vm4, %v5011_v52, %v11519_v55 }
 0x249   :  { %11812 = vrot.lane.b32.xlu1 %v11801_v20, %s12969_s23  ;;  %18404 = vst [vmem:[#allocation44_spill] sm:$0xff] %v14593_v4  ;;  %v2026_v2 = vld [vmem:[#allocation2 + $0x171] sm:$0xff]  ;;  %5351 = vmatmul.mubr.f32.gmra.mrb[74].mxu0 %v5138_v15  ;;  %v14599_v42 = vpop.permute.xlu0 %11527 }
 0x24a   :  { %v14595_v6 = vld [vmem:[#allocation2 + $0x16a] sm:$0xff]  ;;  %v14601_v1 = vld [vmem:[#allocation2 + $0x172] sm:$0xff]  ;;  %v14604_v20 = vpack.i.bf16 %v2026_v2, %v2025_v57  ;;  %10045 = vmatprep.mubr.msk.f32.mxu0 %vm38_vm0, %v4019_v28  ;;  %v5012_v57 = vsel %vm1445_vm3, %v4980_v59, %v11515_v12  ;;  %v5075_v55 = vsel %vm1511_vm5, %v5043_v24, %v11524_v61  ;;  %v4020_v12 = vld [vmem:[#allocation2 + $0x82] sm:$0xff] }
 0x24b   :  { %18405 = vst [vmem:[#allocation45_spill] sm:$0xff] %v14595_v6  ;;  %18406 = vst [vmem:[#allocation46_spill] sm:$0xff] %v14601_v1  ;;  %v1922_v17 = vpop.f32.mrb[60].mxu0  ;;  %v14607_v4 = vpop.permute.xlu1 %11532  ;;  %11817 = vrot.lane.b32.xlu0 %v11816_v39, %s12972_s26  ;;  %v5044_v32 = vsel %vm1478_vm4, %v5012_v57, %v11520_v36  ;;  %v3973_v59 = vld [vmem:[#allocation2 + $0x150] sm:$0xff]  ;;  %v3974_v57 = vld [vmem:[#allocation2 + $0x158] sm:$0xff] }
 0x24c   :  { %3753 = vst.msk [vmem:[#allocation2 + $0x169] sm:$0xff] %vm38_vm0, %v10035_v50  ;;  %18407 = vst [vmem:[#allocation47_spill] sm:$0xff] %v14604_v20  ;;  %v1924_v31 = vpop.f32.mrb[61].mxu0  ;;  %v11525_v50 = vunpack.i.h.bf16 %v14574_v29  ;;  %v4021_v24 = vld [vmem:[#allocation2 + $0x92] sm:$0xff]  ;;  %v4023_v6 = vld [vmem:[#allocation2 + $0xaa] sm:$0xff] }
 0x24d   :  { %1961 = vst.msk [vmem:[#allocation2 + $0x181] sm:$0xff] %vm38_vm0, %v1922_v17  ;;  %3754 = vst.msk [vmem:[#allocation2 + $0x171] sm:$0xff] %vm38_vm0, %v10036_v9  ;;  %11822 = vrot.lane.b32.xlu1 %v11821_v26, %s12973_s27  ;;  %v11538_v23 = vpop.permute.xlu0 %11537  ;;  %v11836_v17 = vpack.i.bf16 %v3942_v7, %v3941_v10  ;;  %v10037_v7 = vld [vmem:[%s18193_s0 + $0x1f0] sm:$0xff] }
 0x24e   :  { %v11540_v15 = vunpack.i.h.bf16 %v11538_v23  ;;  %v11539_v2 = vunpack.i.l.bf16 %v11538_v23  ;;  %v5076_v52 = vsel %vm1511_vm5, %v5044_v32, %v11525_v50  ;;  %v11529_v23 = vunpack.i.l.bf16 %v14599_v42  ;;  %v10038_v50 = vld [vmem:[%s18193_s0 + $0x1f8] sm:$0xff] }
 0x24f   :  { %v1927_v28 = vpop.f32.mrb[62].mxu0  ;;  %v11543_v9 = vpop.permute.xlu1 %11542  ;;  %11827 = vrot.lane.b32.xlu0 %v11816_v39, %s12968_s22 }
 0x250   :  { %1962 = vst.msk [vmem:[#allocation2 + $0x189] sm:$0xff] %vm38_vm0, %v1927_v28  ;;  %v1929_v62 = vpop.f32.mrb[63].mxu0  ;;  %v11544_v19 = vunpack.i.l.bf16 %v11543_v9  ;;  %v5107_v29 = vsel %vm1544_vm6, %v5075_v55, %v11539_v2  ;;  %v11545_v18 = vunpack.i.h.bf16 %v11543_v9  ;;  %v3765_v28 = vld [vmem:[#allocation2 + $0x60] sm:$0xff]  ;;  %v5108_v61 = vsel %vm1544_vm6, %v5076_v52, %v11540_v15  ;;  %v4005_v15 = vld [vmem:[#allocation2 + $0x151] sm:$0xff] }
 0x251   :  { %11832 = vrot.lane.b32.xlu1 %v11821_v26, %s12970_s24  ;;  %v11548_v31 = vpop.permute.xlu0 %11547  ;;  %v11851_v9 = vpack.i.bf16 %v3974_v57, %v3973_v59  ;;  %v4006_v2 = vld [vmem:[#allocation2 + $0x159] sm:$0xff]  ;;  %v11534_v62 = vunpack.i.l.bf16 %v14607_v4  ;;  %v11530_v52 = vunpack.i.h.bf16 %v14599_v42  ;;  %v11535_v42 = vunpack.i.h.bf16 %v14607_v4 }
 0x252   :  { %v5139_v36 = vsel %vm1577_vm7, %v5107_v29, %v11544_v19  ;;  %v5140_v55 = vsel %vm1577_vm7, %v5108_v61, %v11545_v18  ;;  %v11549_v1 = vunpack.i.l.bf16 %v11548_v31  ;;  %v3766_v18 = vld [vmem:[#allocation2 + $0x68] sm:$0xff]  ;;  %v11856_v61 = vpack.i.bf16 %v4006_v2, %v4005_v15 }
 0x253   :  { %v14629_v39 = vpop.permute.xlu1 %11552  ;;  %5356 = vmatmul.mubr.f32.gmra.mrb[76].mxu0 %v5139_v36  ;;  %11837 = vrot.lane.b32.xlu0 %v11836_v17, %s12971_s25  ;;  %v11550_v15 = vunpack.i.h.bf16 %v11548_v31 }
 0x254   :  { %10046 = vmatprep.mubr.msk.f32.mxu0 %vm38_vm0, %v4020_v12  ;;  %v2121_v10 = vld [vmem:[#allocation2 + $0x181] sm:$0xff] }
 0x255   :  { %11842 = vrot.lane.b32.xlu1 %v11821_v26, %s12967_s21  ;;  %v14641_v32 = vld [vmem:[#allocation2 + $0x180] sm:$0xff]  ;;  %v14644_v19 = vpop.permute.xlu0 %11557  ;;  %v4949_v26 = vsel %vm38_vm0, %v3765_v28, %v11529_v23  ;;  %v11554_v23 = vunpack.i.l.bf16 %v14629_v39 }
 0x256   :  { %18408 = vst [vmem:[#allocation48_spill] sm:$0xff] %v14641_v32  ;;  %v4981_v28 = vsel %vm1412_vm2, %v4949_v26, %v11534_v62  ;;  %v11555_v62 = vunpack.i.h.bf16 %v14629_v39 }
 0x257   :  { %v14647_v29 = vld [vmem:[#allocation2 + $0x188] sm:$0xff]  ;;  %v14653_v32 = vpop.permute.xlu1 %11562  ;;  %5361 = vmatmul.mubr.f32.gmra.mrb[78].mxu0 %v5140_v55  ;;  %11847 = vrot.lane.b32.xlu0 %v11836_v17, %s12969_s23  ;;  %v4950_v17 = vsel %vm38_vm0, %v3766_v18, %v11530_v52 }
 0x258   :  { %18409 = vst [vmem:[#allocation49_spill] sm:$0xff] %v14647_v29  ;;  %v2122_v12 = vld [vmem:[#allocation2 + $0x189] sm:$0xff]  ;;  %10047 = vmatprep.mubr.msk.f32.mxu0 %vm38_vm0, %v4021_v24  ;;  %v5013_v24 = vsel %vm1445_vm3, %v4981_v28, %v11549_v1  ;;  %v4982_v26 = vsel %vm1412_vm2, %v4950_v17, %v11535_v42  ;;  %v11560_v1 = vunpack.i.h.bf16 %v14644_v19  ;;  %v3767_v42 = vld [vmem:[#allocation2 + $0x78] sm:$0xff]  ;;  %v3768_v29 = vld [vmem:[#allocation2 + $0x80] sm:$0xff] }
 0x259   :  { %v14649_v36 = vld [vmem:[#allocation2 + $0x182] sm:$0xff]  ;;  %v14655_v59 = vld [vmem:[#allocation2 + $0x18a] sm:$0xff]  ;;  %v14658_v57 = vpack.i.bf16 %v2122_v12, %v2121_v10  ;;  %11852 = vrot.lane.b32.xlu1 %v11851_v9, %s12972_s26  ;;  %v14667_v55 = vpop.permute.xlu0 %11567  ;;  %v14669_v10 = vld [vmem:[#allocation2 + $0x152] sm:$0xff]  ;;  %v5045_v52 = vsel %vm1478_vm4, %v5013_v24, %v11554_v23  ;;  %v5014_v31 = vsel %vm1445_vm3, %v4982_v26, %v11550_v15  ;;  %v11565_v24 = vunpack.i.h.bf16 %v14653_v32 }
 0x25a   :  { %18410 = vst [vmem:[#allocation50_spill] sm:$0xff] %v14649_v36  ;;  %18411 = vst [vmem:[#allocation51_spill] sm:$0xff] %v14655_v59  ;;  %v3975_v15 = vld [vmem:[#allocation2 + $0x168] sm:$0xff]  ;;  %v5046_v26 = vsel %vm1478_vm4, %v5014_v31, %v11555_v62  ;;  %v11570_v62 = vunpack.i.h.bf16 %v14667_v55 }
 0x25b   :  { %3755 = vst.msk [vmem:[#allocation2 + $0x181] sm:$0xff] %vm38_vm0, %v10037_v7  ;;  %18412 = vst [vmem:[#allocation52_spill] sm:$0xff] %v14658_v57  ;;  %v3944_v7 = vld [vmem:[#allocation2 + $0x15a] sm:$0xff]  ;;  %v11573_v2 = vpop.permute.xlu1 %11572  ;;  %11857 = vrot.lane.b32.xlu0 %v11856_v61, %s12973_s27  ;;  %v11564_v57 = vunpack.i.l.bf16 %v14653_v32 }
 0x25c   :  { %3756 = vst.msk [vmem:[#allocation2 + $0x189] sm:$0xff] %vm38_vm0, %v10038_v50  ;;  %v11559_v50 = vunpack.i.l.bf16 %v14644_v19  ;;  %v11574_v12 = vunpack.i.l.bf16 %v11573_v2  ;;  %v11871_v4 = vpack.i.bf16 %v3944_v7, %v14669_v10  ;;  %v4022_v7 = vld [vmem:[#allocation2 + $0x9a] sm:$0xff]  ;;  %v3976_v19 = vld [vmem:[#allocation2 + $0x170] sm:$0xff] }
 0x25d   :  { %11862 = vrot.lane.b32.xlu1 %v11851_v9, %s12968_s22  ;;  %v11578_v59 = vpop.permute.xlu0 %11577  ;;  %v11575_v9 = vunpack.i.h.bf16 %v11573_v2  ;;  %v4007_v2 = vld [vmem:[#allocation2 + $0x169] sm:$0xff] }
 0x25e   :  { %v11579_v18 = vunpack.i.l.bf16 %v11578_v59  ;;  %v5077_v36 = vsel %vm1511_vm5, %v5045_v52, %v11559_v50  ;;  %v11580_v17 = vunpack.i.h.bf16 %v11578_v59  ;;  %v4008_v52 = vld [vmem:[#allocation2 + $0x171] sm:$0xff]  ;;  %v5078_v59 = vsel %vm1511_vm5, %v5046_v26, %v11560_v1 }
 0x25f   :  { %v11583_v28 = vpop.permute.xlu1 %11582  ;;  %11867 = vrot.lane.b32.xlu0 %v11856_v61, %s12970_s24  ;;  %v5109_v39 = vsel %vm1544_vm6, %v5077_v36, %v11574_v12  ;;  %v11569_v36 = vunpack.i.l.bf16 %v14667_v55  ;;  %v5110_v32 = vsel %vm1544_vm6, %v5078_v59, %v11575_v9  ;;  %v11891_v47 = vpack.i.bf16 %v4008_v52, %v4007_v2 }
 0x260   :  { %v5141_v23 = vsel %vm1577_vm7, %v5109_v39, %v11579_v18  ;;  %v4951_v18 = vsel %vm38_vm0, %v3767_v42, %v11564_v57  ;;  %v11584_v39 = vunpack.i.l.bf16 %v11583_v28  ;;  %v5142_v20 = vsel %vm1577_vm7, %v5110_v32, %v11580_v17 }
 0x261   :  { %11872 = vrot.lane.b32.xlu1 %v11871_v4, %s12971_s25  ;;  %5366 = vmatmul.mubr.f32.gmra.mrb[80].mxu0 %v5141_v23  ;;  %v11588_v50 = vpop.permute.xlu0 %11587  ;;  %v11886_v23 = vpack.i.bf16 %v3976_v19, %v3975_v15  ;;  %v11585_v1 = vunpack.i.h.bf16 %v11583_v28  ;;  %v14713_v28 = vld [vmem:[#allocation2 + $0x172] sm:$0xff] }
 0x262   :  { %10048 = vmatprep.mubr.msk.f32.mxu0 %vm38_vm0, %v4022_v7  ;;  %v11589_v31 = vunpack.i.l.bf16 %v11588_v50  ;;  %v4952_v7 = vsel %vm38_vm0, %v3768_v29, %v11565_v24  ;;  %v11590_v42 = vunpack.i.h.bf16 %v11588_v50 }
 0x263   :  { %v11593_v12 = vpop.permute.xlu1 %11592  ;;  %11877 = vrot.lane.b32.xlu0 %v11856_v61, %s12967_s21  ;;  %v4983_v61 = vsel %vm1412_vm2, %v4951_v18, %v11569_v36 }
 0x264   :  { %v5015_v55 = vsel %vm1445_vm3, %v4983_v61, %v11584_v39  ;;  %v11594_v15 = vunpack.i.l.bf16 %v11593_v12  ;;  %v11595_v19 = vunpack.i.h.bf16 %v11593_v12  ;;  %v4024_v39 = vld [vmem:[#allocation2 + $0xb2] sm:$0xff] }
 0x265   :  { %11882 = vrot.lane.b32.xlu1 %v11871_v4, %s12969_s23  ;;  %5371 = vmatmul.mubr.f32.gmra.mrb[82].mxu0 %v5142_v20  ;;  %v14700_v57 = vpop.permute.xlu0 %11597  ;;  %v4984_v4 = vsel %vm1412_vm2, %v4952_v7, %v11570_v62  ;;  %v5047_v29 = vsel %vm1478_vm4, %v5015_v55, %v11589_v31  ;;  %v14711_v20 = vld [vmem:[#allocation2 + $0x16a] sm:$0xff]  ;;  %v3977_v7 = vld [vmem:[#allocation2 + $0x180] sm:$0xff] }
 0x266   :  { %10049 = vmatprep.mubr.msk.f32.mxu0 %vm38_vm0, %v4023_v6  ;;  %v5016_v17 = vsel %vm1445_vm3, %v4984_v4, %v11585_v1  ;;  %v5079_v36 = vsel %vm1511_vm5, %v5047_v29, %v11594_v15  ;;  %v11906_v59 = vpack.i.bf16 %v14713_v28, %v14711_v20  ;;  %v3978_v1 = vld [vmem:[#allocation2 + $0x188] sm:$0xff]  ;;  %v3769_v55 = vld [vmem:[#allocation2 + $0x90] sm:$0xff] }
 0x267   :  { %v14703_v9 = vpop.permute.xlu1 %11602  ;;  %11887 = vrot.lane.b32.xlu0 %v11886_v23, %s12972_s26  ;;  %v5048_v6 = vsel %vm1478_vm4, %v5016_v17, %v11590_v42  ;;  %v11921_v15 = vpack.i.bf16 %v3978_v1, %v3977_v7  ;;  %v4009_v4 = vld [vmem:[#allocation2 + $0x181] sm:$0xff]  ;;  %v4010_v29 = vld [vmem:[#allocation2 + $0x189] sm:$0xff] }
 0x268   :  { %v5080_v31 = vsel %vm1511_vm5, %v5048_v6, %v11595_v19  ;;  %v4025_v17 = vld [vmem:[#allocation2 + $0xc2] sm:$0xff]  ;;  %v11604_v19 = vunpack.i.l.bf16 %v14703_v9 }
 0x269   :  { %11892 = vrot.lane.b32.xlu1 %v11891_v47, %s12973_s27  ;;  %v11608_v24 = vpop.permute.xlu0 %11607 }
 0x26a   :  { %v11610_v26 = vunpack.i.h.bf16 %v11608_v24  ;;  %v11609_v2 = vunpack.i.l.bf16 %v11608_v24 }
 0x26b   :  { %v11613_v50 = vpop.permute.xlu1 %11612  ;;  %11897 = vrot.lane.b32.xlu0 %v11886_v23, %s12968_s22  ;;  %v11599_v23 = vunpack.i.l.bf16 %v14700_v57 }
 0x26c   :  { %v11614_v52 = vunpack.i.l.bf16 %v11613_v50  ;;  %v5111_v18 = vsel %vm1544_vm6, %v5079_v36, %v11609_v2  ;;  %v11615_v12 = vunpack.i.h.bf16 %v11613_v50  ;;  %v5112_v42 = vsel %vm1544_vm6, %v5080_v31, %v11610_v26  ;;  %v3770_v36 = vld [vmem:[#allocation2 + $0x98] sm:$0xff]  ;;  %v14746_v31 = vld [vmem:[#allocation2 + $0x18a] sm:$0xff] }
 0x26d   :  { %11902 = vrot.lane.b32.xlu1 %v11891_v47, %s12970_s24  ;;  %v11618_v32 = vpop.permute.xlu0 %11617  ;;  %v11600_v50 = vunpack.i.h.bf16 %v14700_v57  ;;  %v4953_v26 = vsel %vm38_vm0, %v3769_v55, %v11599_v23 }
 0x26e   :  { %v5143_v62 = vsel %vm1577_vm7, %v5111_v18, %v11614_v52  ;;  %v5144_v6 = vsel %vm1577_vm7, %v5112_v42, %v11615_v12  ;;  %v11619_v2 = vunpack.i.l.bf16 %v11618_v32  ;;  %v11605_v18 = vunpack.i.h.bf16 %v14703_v9 }
 0x26f   :  { %v14726_v61 = vpop.permute.xlu1 %11622  ;;  %5376 = vmatmul.mubr.f32.gmra.mrb[84].mxu0 %v5143_v62  ;;  %11907 = vrot.lane.b32.xlu0 %v11906_v59, %s12971_s25  ;;  %v4985_v12 = vsel %vm1412_vm2, %v4953_v26, %v11604_v19  ;;  %v14744_v62 = vld [vmem:[#allocation2 + $0x182] sm:$0xff]  ;;  %v4954_v7 = vsel %vm38_vm0, %v3770_v36, %v11600_v50 }
 0x270   :  { %10050 = vmatprep.mubr.msk.f32.mxu0 %vm38_vm0, %v4024_v39  ;;  %v11624_v39 = vunpack.i.l.bf16 %v14726_v61  ;;  %v5017_v1 = vsel %vm1445_vm3, %v4985_v12, %v11619_v2  ;;  %v11946_v9 = vpack.i.bf16 %v14746_v31, %v14744_v62 }
 0x271   :  { %11912 = vrot.lane.b32.xlu1 %v11891_v47, %s12967_s21  ;;  %v11628_v24 = vpop.permute.xlu0 %11627  ;;  %v11926_v47 = vpack.i.bf16 %v4010_v29, %v4009_v4  ;;  %v11625_v4 = vunpack.i.h.bf16 %v14726_v61  ;;  %v4986_v29 = vsel %vm1412_vm2, %v4954_v7, %v11605_v18  ;;  %v3771_v61 = vld [vmem:[#allocation2 + $0xa8] sm:$0xff]  ;;  %v11941_v7 = vpack.i.bf16 %v14011_v27, %v14009_v41  ;;  %v4027_v27 = vld [vmem:[#allocation2 + $0xda] sm:$0xff] }
 0x272   :  { %v11629_v23 = vunpack.i.l.bf16 %v11628_v24  ;;  %v5049_v19 = vsel %vm1478_vm4, %v5017_v1, %v11624_v39  ;;  %v3772_v1 = vld [vmem:[#allocation2 + $0xb0] sm:$0xff] }
 0x273   :  { %v11633_v52 = vpop.permute.xlu1 %11632  ;;  %5381 = vmatmul.mubr.f32.gmra.mrb[86].mxu0 %v5144_v6  ;;  %11917 = vrot.lane.b32.xlu0 %v11906_v59, %s12969_s23  ;;  %v11620_v59 = vunpack.i.h.bf16 %v11618_v32  ;;  %v11630_v6 = vunpack.i.h.bf16 %v11628_v24 }
 0x274   :  { %10051 = vmatprep.mubr.msk.f32.mxu0 %vm38_vm0, %v4025_v17  ;;  %v5081_v2 = vsel %vm1511_vm5, %v5049_v19, %v11629_v23  ;;  %v11634_v36 = vunpack.i.l.bf16 %v11633_v52  ;;  %v11635_v39 = vunpack.i.h.bf16 %v11633_v52 }
 0x275   :  { %11922 = vrot.lane.b32.xlu1 %v11921_v15, %s12972_s26  ;;  %v14742_v57 = vpop.permute.xlu0 %11637  ;;  %v5018_v32 = vsel %vm1445_vm3, %v4986_v29, %v11620_v59 }
 0x276   :  { %v5050_v59 = vsel %vm1478_vm4, %v5018_v32, %v11625_v4  ;;  %v4955_v52 = vsel %vm38_vm0, %v3771_v61, %v11634_v36  ;;  %v11640_v4 = vunpack.i.h.bf16 %v14742_v57  ;;  %v4956_v19 = vsel %vm38_vm0, %v3772_v1, %v11635_v39 }
 0x277   :  { %v11643_v42 = vpop.permute.xlu1 %11642  ;;  %11927 = vrot.lane.b32.xlu0 %v11926_v47, %s12973_s27 }
 0x278   :  { %v11644_v55 = vunpack.i.l.bf16 %v11643_v42  ;;  %v11645_v12 = vunpack.i.h.bf16 %v11643_v42  ;;  %v11951_v42 = vpack.i.bf16 %v14036_v38, %v14031_v37 }
 0x279   :  { %11932 = vrot.lane.b32.xlu1 %v11921_v15, %s12968_s22  ;;  %v11648_v17 = vpop.permute.xlu0 %11647 }
 0x27a   :  { %v11649_v50 = vunpack.i.l.bf16 %v11648_v17  ;;  %v5113_v15 = vsel %vm1544_vm6, %v5081_v2, %v11644_v55  ;;  %v11650_v44 = vunpack.i.h.bf16 %v11648_v17  ;;  %v5082_v55 = vsel %vm1511_vm5, %v5050_v59, %v11630_v6 }
 0x27b   :  { %v11653_v26 = vpop.permute.xlu1 %11652  ;;  %11937 = vrot.lane.b32.xlu0 %v11926_v47, %s12970_s24  ;;  %v11639_v47 = vunpack.i.l.bf16 %v14742_v57  ;;  %v5114_v41 = vsel %vm1544_vm6, %v5082_v55, %v11645_v12 }
 0x27c   :  { %v5145_v18 = vsel %vm1577_vm7, %v5113_v15, %v11649_v50  ;;  %v5146_v17 = vsel %vm1577_vm7, %v5114_v41, %v11650_v44  ;;  %v4988_v44 = vsel %vm1412_vm2, %v4956_v19, %v11640_v4 }
 0x27d   :  { %11947 = vrot.lane.b32.xlu1 %v11946_v9, %s12971_s25  ;;  %5386 = vmatmul.mubr.f32.gmra.mrb[88].mxu0 %v5145_v18  ;;  %v11658_v24 = vpop.permute.xlu0 %11657  ;;  %v11654_v9 = vunpack.i.l.bf16 %v11653_v26  ;;  %v4987_v6 = vsel %vm1412_vm2, %v4955_v52, %v11639_v47  ;;  %v4028_v52 = vld [vmem:[#allocation2 + $0xe2] sm:$0xff] }
 0x27e   :  { %10052 = vmatprep.mubr.msk.f32.mxu0 %vm38_vm0, %v4026_v53  ;;  %v11659_v29 = vunpack.i.l.bf16 %v11658_v24  ;;  %v11655_v53 = vunpack.i.h.bf16 %v11653_v26  ;;  %v11660_v50 = vunpack.i.h.bf16 %v11658_v24 }
 0x27f   :  { %v11663_v23 = vpop.permute.xlu1 %11662  ;;  %11942 = vrot.lane.b32.xlu0 %v11941_v7, %s12971_s25  ;;  %v5019_v36 = vsel %vm1445_vm3, %v4987_v6, %v11654_v9 }
 0x280   :  { %v11664_v57 = vunpack.i.l.bf16 %v11663_v23  ;;  %v5051_v12 = vsel %vm1478_vm4, %v5019_v36, %v11659_v29  ;;  %v5020_v26 = vsel %vm1445_vm3, %v4988_v44, %v11655_v53  ;;  %v11665_v15 = vunpack.i.h.bf16 %v11663_v23 }
 0x281   :  { %11952 = vrot.lane.b32.xlu1 %v11951_v42, %s12972_s26  ;;  %5391 = vmatmul.mubr.f32.gmra.mrb[90].mxu0 %v5146_v17  ;;  %v11668_v32 = vpop.permute.xlu0 %11667  ;;  %v5052_v18 = vsel %vm1478_vm4, %v5020_v26, %v11660_v50  ;;  %v11981_v29 = vpack.i.bf16 %v14040_v11, %v14038_v16  ;;  %v3773_v17 = vld [vmem:[#allocation2 + $0xc0] sm:$0xff]  ;;  %v11986_v50 = vpack.i.bf16 %v14068_v5, %v14061_v13 }
 0x282   :  { %10053 = vmatprep.mubr.msk.f32.mxu0 %vm38_vm0, %v4027_v27  ;;  %v5083_v47 = vsel %vm1511_vm5, %v5051_v12, %v11664_v57  ;;  %v5084_v41 = vsel %vm1511_vm5, %v5052_v18, %v11665_v15  ;;  %v11669_v27 = vunpack.i.l.bf16 %v11668_v32  ;;  %v11670_v16 = vunpack.i.h.bf16 %v11668_v32  ;;  %v3774_v12 = vld [vmem:[#allocation2 + $0xc8] sm:$0xff] }
 0x283   :  { %v14779_v2 = vpop.permute.xlu1 %11672  ;;  %11957 = vrot.lane.b32.xlu0 %v14043_v30, %s12973_s27 }
 0x284   :  { %v11674_v19 = vunpack.i.l.bf16 %v14779_v2  ;;  %v4957_v36 = vsel %vm38_vm0, %v3773_v17, %v11669_v27  ;;  %v11675_v26 = vunpack.i.h.bf16 %v14779_v2  ;;  %v4958_v32 = vsel %vm38_vm0, %v3774_v12, %v11670_v16 }
 0x285   :  { %11962 = vrot.lane.b32.xlu1 %v14015_v54, %s12967_s21  ;;  %v11678_v61 = vpop.permute.xlu0 %11677 }
 0x286   :  { %v11680_v24 = vunpack.i.h.bf16 %v11678_v61  ;;  %v11679_v59 = vunpack.i.l.bf16 %v11678_v61  ;;  %v4989_v61 = vsel %vm1412_vm2, %v4957_v36, %v11674_v19  ;;  %v4990_v2 = vsel %vm1412_vm2, %v4958_v32, %v11675_v26  ;;  %v18413_v36 = vld [vmem:[#allocation7_spill] sm:$0xff]  ;;  %v3776_v26 = vld [vmem:[#allocation2 + $0xe0] sm:$0xff] }
 0x287   :  { %v11683_v39 = vpop.permute.xlu1 %11682  ;;  %11967 = vrot.lane.b32.xlu0 %v11941_v7, %s12969_s23  ;;  %v18415_v32 = vld [vmem:[#allocation9_spill] sm:$0xff] }
 0x288   :  { %v11684_v1 = vunpack.i.l.bf16 %v11683_v39  ;;  %v5115_v55 = vsel %vm1544_vm6, %v5083_v47, %v11679_v59  ;;  %v11685_v54 = vunpack.i.h.bf16 %v11683_v39  ;;  %v5116_v7 = vsel %vm1544_vm6, %v5084_v41, %v11680_v24 }
 0x289   :  { %11972 = vrot.lane.b32.xlu1 %v11951_v42, %s12968_s22  ;;  %v11688_v9 = vpop.permute.xlu0 %11687  ;;  %v4029_v42 = vld [vmem:[#allocation2 + $0xf2] sm:$0xff] }
 0x28a   :  { %v5147_v23 = vsel %vm1577_vm7, %v5115_v55, %v11684_v1  ;;  %v5148_v6 = vsel %vm1577_vm7, %v5116_v7, %v11685_v54  ;;  %v11689_v57 = vunpack.i.l.bf16 %v11688_v9  ;;  %v11690_v39 = vunpack.i.h.bf16 %v11688_v9 }
 0x28b   :  { %v11693_v4 = vpop.permute.xlu1 %11692  ;;  %5396 = vmatmul.mubr.f32.gmra.mrb[92].mxu0 %v5147_v23  ;;  %11977 = vrot.lane.b32.xlu0 %v14043_v30, %s12970_s24 }
 0x28c   :  { %10054 = vmatprep.mubr.msk.f32.mxu0 %vm38_vm0, %v4028_v52  ;;  %v11694_v15 = vunpack.i.l.bf16 %v11693_v4  ;;  %v5021_v24 = vsel %vm1445_vm3, %v4989_v61, %v11689_v57  ;;  %v11695_v55 = vunpack.i.h.bf16 %v11693_v4  ;;  %v5022_v23 = vsel %vm1445_vm3, %v4990_v2, %v11690_v39  ;;  %v3775_v4 = vld [vmem:[#allocation2 + $0xd8] sm:$0xff] }
 0x28d   :  { %11982 = vrot.lane.b32.xlu1 %v11981_v29, %s12971_s25  ;;  %v11698_v53 = vpop.permute.xlu0 %11697  ;;  %v12016_v57 = vpack.i.bf16 %v18413_v36, %v14070_v21  ;;  %v18414_v61 = vld [vmem:[#allocation8_spill] sm:$0xff] }
 0x28e   :  { %v11699_v59 = vunpack.i.l.bf16 %v11698_v53  ;;  %v5053_v54 = vsel %vm1478_vm4, %v5021_v24, %v11694_v15  ;;  %v11700_v41 = vunpack.i.h.bf16 %v11698_v53  ;;  %v5054_v12 = vsel %vm1478_vm4, %v5022_v23, %v11695_v55 }
 0x28f   :  { %v11703_v44 = vpop.permute.xlu1 %11702  ;;  %5401 = vmatmul.mubr.f32.gmra.mrb[94].mxu0 %v5148_v6  ;;  %11987 = vrot.lane.b32.xlu0 %v11986_v50, %s12972_s26  ;;  %v12021_v39 = vpack.i.bf16 %v18415_v32, %v18414_v61 }
 0x290   :  { %10055 = vmatprep.mubr.msk.f32.mxu0 %vm38_vm0, %v4029_v42  ;;  %v5085_v7 = vsel %vm1511_vm5, %v5053_v54, %v11699_v59  ;;  %v11704_v17 = vunpack.i.l.bf16 %v11703_v44  ;;  %v11705_v16 = vunpack.i.h.bf16 %v11703_v44  ;;  %v5086_v24 = vsel %vm1511_vm5, %v5054_v12, %v11700_v41 }
 0x291   :  { %11992 = vrot.lane.b32.xlu1 %v14075_v8, %s12973_s27  ;;  %v11708_v18 = vpop.permute.xlu0 %11707 }
 0x292   :  { %v4959_v59 = vsel %vm38_vm0, %v3775_v4, %v11704_v17  ;;  %v11710_v2 = vunpack.i.h.bf16 %v11708_v18  ;;  %v4960_v54 = vsel %vm38_vm0, %v3776_v26, %v11705_v16 }
 0x293   :  { %v11713_v1 = vpop.permute.xlu1 %11712  ;;  %11997 = vrot.lane.b32.xlu0 %v14043_v30, %s12967_s21 }
 0x294   :  { %v11714_v47 = vunpack.i.l.bf16 %v11713_v1  ;;  %v11715_v42 = vunpack.i.h.bf16 %v11713_v1 }
 0x295   :  { %12002 = vrot.lane.b32.xlu1 %v11981_v29, %s12969_s23  ;;  %v11718_v52 = vpop.permute.xlu0 %11717  ;;  %v4030_v29 = vld [vmem:[#allocation2 + $0xfa] sm:$0xff] }
 0x296   :  { %v11719_v9 = vunpack.i.l.bf16 %v11718_v52  ;;  %v5117_v30 = vsel %vm1544_vm6, %v5085_v7, %v11714_v47  ;;  %v11720_v19 = vunpack.i.h.bf16 %v11718_v52  ;;  %v5118_v1 = vsel %vm1544_vm6, %v5086_v24, %v11715_v42  ;;  %v4031_v47 = vld [vmem:[#allocation2 + $0x10a] sm:$0xff] }
 0x297   :  { %v11723_v27 = vpop.permute.xlu1 %11722  ;;  %12007 = vrot.lane.b32.xlu0 %v11986_v50, %s12968_s22  ;;  %v11709_v50 = vunpack.i.l.bf16 %v11708_v18 }
 0x298   :  { %v5149_v6 = vsel %vm1577_vm7, %v5117_v30, %v11719_v9  ;;  %v11724_v44 = vunpack.i.l.bf16 %v11723_v27  ;;  %v5150_v52 = vsel %vm1577_vm7, %v5118_v1, %v11720_v19  ;;  %v11725_v23 = vunpack.i.h.bf16 %v11723_v27  ;;  %v18416_v30 = vld [vmem:[#allocation12_spill] sm:$0xff] }
 0x299   :  { %12012 = vrot.lane.b32.xlu1 %v14075_v8, %s12970_s24  ;;  %5406 = vmatmul.mubr.f32.gmra.mrb[96].mxu0 %v5149_v6  ;;  %v11728_v53 = vpop.permute.xlu0 %11727  ;;  %v4991_v41 = vsel %vm1412_vm2, %v4959_v59, %v11709_v50 }
 0x29a   :  { %10056 = vmatprep.mubr.msk.f32.mxu0 %vm38_vm0, %v4030_v29  ;;  %v11729_v55 = vunpack.i.l.bf16 %v11728_v53  ;;  %v11730_v7 = vunpack.i.h.bf16 %v11728_v53  ;;  %v5023_v42 = vsel %vm1445_vm3, %v4991_v41, %v11724_v44  ;;  %v4992_v29 = vsel %vm1412_vm2, %v4960_v54, %v11710_v2  ;;  %v4032_v44 = vld [vmem:[#allocation2 + $0x112] sm:$0xff] }
 0x29b   :  { %v11733_v15 = vpop.permute.xlu1 %11732  ;;  %12017 = vrot.lane.b32.xlu0 %v12016_v57, %s12971_s25  ;;  %v5024_v27 = vsel %vm1445_vm3, %v4992_v29, %v11725_v23  ;;  %v18418_v54 = vld [vmem:[#allocation11_spill] sm:$0xff]  ;;  %v18419_v29 = vld [vmem:[#allocation13_spill] sm:$0xff] }
 0x29c   :  { %v11734_v18 = vunpack.i.l.bf16 %v11733_v15  ;;  %v5055_v4 = vsel %vm1478_vm4, %v5023_v42, %v11729_v55  ;;  %v11735_v19 = vunpack.i.h.bf16 %v11733_v15  ;;  %v5056_v16 = vsel %vm1478_vm4, %v5024_v27, %v11730_v7  ;;  %v3777_v41 = vld [vmem:[#allocation2 + $0xf0] sm:$0xff] }
 0x29d   :  { %12022 = vrot.lane.b32.xlu1 %v12021_v39, %s12972_s26  ;;  %5411 = vmatmul.mubr.f32.gmra.mrb[98].mxu0 %v5150_v52  ;;  %v11738_v9 = vpop.permute.xlu0 %11737  ;;  %v18417_v52 = vld [vmem:[#allocation10_spill] sm:$0xff] }
 0x29e   :  { %10057 = vmatprep.mubr.msk.f32.mxu0 %vm38_vm0, %v4031_v47  ;;  %v5087_v24 = vsel %vm1511_vm5, %v5055_v4, %v11734_v18  ;;  %v5088_v47 = vsel %vm1511_vm5, %v5056_v16, %v11735_v19  ;;  %v11739_v2 = vunpack.i.l.bf16 %v11738_v9  ;;  %v12051_v23 = vpack.i.bf16 %v18418_v54, %v18417_v52  ;;  %v18420_v4 = vld [vmem:[#allocation14_spill] sm:$0xff] }
 0x29f   :  { %v14843_v17 = vpop.permute.xlu1 %11742  ;;  %12027 = vrot.lane.b32.xlu0 %v18416_v30, %s12973_s27  ;;  %v12056_v27 = vpack.i.bf16 %v18420_v4, %v18419_v29  ;;  %v11740_v19 = vunpack.i.h.bf16 %v11738_v9 }
 0x2a0   :  { %v11744_v7 = vunpack.i.l.bf16 %v14843_v17 }
 0x2a1   :  { %12032 = vrot.lane.b32.xlu1 %v14075_v8, %s12967_s21  ;;  %v11748_v6 = vpop.permute.xlu0 %11747 }
 0x2a2   :  { %v11750_v12 = vunpack.i.h.bf16 %v11748_v6  ;;  %v11749_v26 = vunpack.i.l.bf16 %v11748_v6  ;;  %v4961_v6 = vsel %vm38_vm0, %v3777_v41, %v11739_v2 }
 0x2a3   :  { %v11753_v53 = vpop.permute.xlu1 %11752  ;;  %12037 = vrot.lane.b32.xlu0 %v12016_v57, %s12969_s23 }
 0x2a4   :  { %v11754_v50 = vunpack.i.l.bf16 %v11753_v53  ;;  %v5119_v59 = vsel %vm1544_vm6, %v5087_v24, %v11749_v26  ;;  %v11755_v8 = vunpack.i.h.bf16 %v11753_v53  ;;  %v5120_v57 = vsel %vm1544_vm6, %v5088_v47, %v11750_v12  ;;  %v3778_v12 = vld [vmem:[#allocation2 + $0xf8] sm:$0xff]  ;;  %v18421_v26 = vld [vmem:[#allocation17_spill] sm:$0xff] }
 0x2a5   :  { %12042 = vrot.lane.b32.xlu1 %v12021_v39, %s12968_s22  ;;  %v11758_v1 = vpop.permute.xlu0 %11757  ;;  %v4033_v39 = vld [vmem:[#allocation2 + $0x122] sm:$0xff]  ;;  %v4962_v9 = vsel %vm38_vm0, %v3778_v12, %v11740_v19 }
 0x2a6   :  { %v5151_v15 = vsel %vm1577_vm7, %v5119_v59, %v11754_v50  ;;  %v5152_v18 = vsel %vm1577_vm7, %v5120_v57, %v11755_v8  ;;  %v11759_v16 = vunpack.i.l.bf16 %v11758_v1  ;;  %v11745_v50 = vunpack.i.h.bf16 %v14843_v17 }
 0x2a7   :  { %v11763_v55 = vpop.permute.xlu1 %11762  ;;  %5416 = vmatmul.mubr.f32.gmra.mrb[100].mxu0 %v5151_v15  ;;  %12047 = vrot.lane.b32.xlu0 %v18416_v30, %s12970_s24  ;;  %v4993_v59 = vsel %vm1412_vm2, %v4961_v6, %v11744_v7  ;;  %v11760_v8 = vunpack.i.h.bf16 %v11758_v1 }
 0x2a8   :  { %10058 = vmatprep.mubr.msk.f32.mxu0 %vm38_vm0, %v4032_v44  ;;  %v11764_v24 = vunpack.i.l.bf16 %v11763_v55  ;;  %v5025_v15 = vsel %vm1445_vm3, %v4993_v59, %v11759_v16  ;;  %v11765_v41 = vunpack.i.h.bf16 %v11763_v55  ;;  %v4994_v17 = vsel %vm1412_vm2, %v4962_v9, %v11745_v50  ;;  %v3779_v55 = vld [vmem:[#allocation2 + $0x108] sm:$0xff]  ;;  %v18422_v9 = vld [vmem:[#allocation15_spill] sm:$0xff] }
 0x2a9   :  { %12052 = vrot.lane.b32.xlu1 %v12051_v23, %s12971_s25  ;;  %v11768_v42 = vpop.permute.xlu0 %11767 }
 0x2aa   :  { %v11769_v47 = vunpack.i.l.bf16 %v11768_v42  ;;  %v5057_v7 = vsel %vm1478_vm4, %v5025_v15, %v11764_v24  ;;  %v11770_v19 = vunpack.i.h.bf16 %v11768_v42 }
 0x2ab   :  { %v11773_v53 = vpop.permute.xlu1 %11772  ;;  %5421 = vmatmul.mubr.f32.gmra.mrb[102].mxu0 %v5152_v18  ;;  %12057 = vrot.lane.b32.xlu0 %v12056_v27, %s12972_s26  ;;  %v5026_v18 = vsel %vm1445_vm3, %v4994_v17, %v11760_v8  ;;  %v18423_v8 = vld [vmem:[#allocation16_spill] sm:$0xff] }
 0x2ac   :  { %10059 = vmatprep.mubr.msk.f32.mxu0 %vm38_vm0, %v4033_v39  ;;  %v5089_v16 = vsel %vm1511_vm5, %v5057_v7, %v11769_v47  ;;  %v11774_v12 = vunpack.i.l.bf16 %v11773_v53  ;;  %v11775_v24 = vunpack.i.h.bf16 %v11773_v53  ;;  %v12086_v15 = vpack.i.bf16 %v18423_v8, %v18422_v9  ;;  %v18425_v7 = vld [vmem:[#allocation19_spill] sm:$0xff] }
 0x2ad   :  { %12062 = vrot.lane.b32.xlu1 %v18421_v26, %s12973_s27  ;;  %v11778_v44 = vpop.permute.xlu0 %11777  ;;  %v5058_v47 = vsel %vm1478_vm4, %v5026_v18, %v11765_v41 }
 0x2ae   :  { %v11780_v29 = vunpack.i.h.bf16 %v11778_v44 }
 0x2af   :  { %v11783_v2 = vpop.permute.xlu1 %11782  ;;  %12067 = vrot.lane.b32.xlu0 %v18416_v30, %s12967_s21 }
 0x2b0   :  { %v11784_v57 = vunpack.i.l.bf16 %v11783_v2  ;;  %v11785_v59 = vunpack.i.h.bf16 %v11783_v2  ;;  %v3780_v2 = vld [vmem:[#allocation2 + $0x110] sm:$0xff] }
 0x2b1   :  { %12072 = vrot.lane.b32.xlu1 %v12051_v23, %s12969_s23  ;;  %v11788_v39 = vpop.permute.xlu0 %11787  ;;  %v4034_v23 = vld [vmem:[#allocation2 + $0x12a] sm:$0xff] }
 0x2b2   :  { %v11789_v1 = vunpack.i.l.bf16 %v11788_v39  ;;  %v5121_v30 = vsel %vm1544_vm6, %v5089_v16, %v11784_v57  ;;  %v11790_v4 = vunpack.i.h.bf16 %v11788_v39  ;;  %v18424_v57 = vld [vmem:[#allocation18_spill] sm:$0xff]  ;;  %v5090_v39 = vsel %vm1511_vm5, %v5058_v47, %v11770_v19 }
 0x2b3   :  { %v11793_v6 = vpop.permute.xlu1 %11792  ;;  %12077 = vrot.lane.b32.xlu0 %v12056_v27, %s12968_s22  ;;  %v11779_v27 = vunpack.i.l.bf16 %v11778_v44  ;;  %v12091_v16 = vpack.i.bf16 %v18425_v7, %v18424_v57  ;;  %v4964_v7 = vsel %vm38_vm0, %v3780_v2, %v11775_v24  ;;  %v18426_v44 = vld [vmem:[#allocation22_spill] sm:$0xff] }
 0x2b4   :  { %v5153_v50 = vsel %vm1577_vm7, %v5121_v30, %v11789_v1  ;;  %v4963_v1 = vsel %vm38_vm0, %v3779_v55, %v11774_v12  ;;  %v11794_v53 = vunpack.i.l.bf16 %v11793_v6  ;;  %v5122_v30 = vsel %vm1544_vm6, %v5090_v39, %v11785_v59 }
 0x2b5   :  { %12082 = vrot.lane.b32.xlu1 %v18421_v26, %s12970_s24  ;;  %5426 = vmatmul.mubr.f32.gmra.mrb[104].mxu0 %v5153_v50  ;;  %v11798_v42 = vpop.permute.xlu0 %11797  ;;  %v4035_v50 = vld [vmem:[#allocation2 + $0x13a] sm:$0xff]  ;;  %v5154_v18 = vsel %vm1577_vm7, %v5122_v30, %v11790_v4  ;;  %v11795_v57 = vunpack.i.h.bf16 %v11793_v6  ;;  %v4995_v19 = vsel %vm1412_vm2, %v4963_v1, %v11779_v27  ;;  %v4996_v39 = vsel %vm1412_vm2, %v4964_v7, %v11780_v29  ;;  %v4036_v7 = vld [vmem:[#allocation2 + $0x142] sm:$0xff] }
 0x2b6   :  { %10060 = vmatprep.mubr.msk.f32.mxu0 %vm38_vm0, %v4034_v23  ;;  %v11799_v41 = vunpack.i.l.bf16 %v11798_v42  ;;  %v11800_v12 = vunpack.i.h.bf16 %v11798_v42  ;;  %v5027_v59 = vsel %vm1445_vm3, %v4995_v19, %v11794_v53 }
 0x2b7   :  { %v11803_v17 = vpop.permute.xlu1 %11802  ;;  %12087 = vrot.lane.b32.xlu0 %v12086_v15, %s12971_s25  ;;  %v5028_v6 = vsel %vm1445_vm3, %v4996_v39, %v11795_v57 }
 0x2b8   :  { %v11804_v47 = vunpack.i.l.bf16 %v11803_v17  ;;  %v5059_v4 = vsel %vm1478_vm4, %v5027_v59, %v11799_v41  ;;  %v11805_v24 = vunpack.i.h.bf16 %v11803_v17  ;;  %v5060_v2 = vsel %vm1478_vm4, %v5028_v6, %v11800_v12  ;;  %v18427_v12 = vld [vmem:[#allocation20_spill] sm:$0xff]  ;;  %v18428_v59 = vld [vmem:[#allocation21_spill] sm:$0xff] }
 0x2b9   :  { %12092 = vrot.lane.b32.xlu1 %v12091_v16, %s12972_s26  ;;  %5431 = vmatmul.mubr.f32.gmra.mrb[106].mxu0 %v5154_v18  ;;  %v11808_v23 = vpop.permute.xlu0 %11807  ;;  %v12121_v39 = vpack.i.bf16 %v18428_v59, %v18427_v12 }
 0x2ba   :  { %10061 = vmatprep.mubr.msk.f32.mxu0 %vm38_vm0, %v4035_v50  ;;  %v5091_v50 = vsel %vm1511_vm5, %v5059_v4, %v11804_v47  ;;  %v5092_v57 = vsel %vm1511_vm5, %v5060_v2, %v11805_v24  ;;  %v11809_v18 = vunpack.i.l.bf16 %v11808_v23  ;;  %v3781_v47 = vld [vmem:[#allocation2 + $0x120] sm:$0xff] }
 0x2bb   :  { %v11813_v55 = vpop.permute.xlu1 %11812  ;;  %12097 = vrot.lane.b32.xlu0 %v18426_v44, %s12973_s27  ;;  %v18429_v24 = vld [vmem:[#allocation25_spill] sm:$0xff] }
 0x2bd   :  { %12102 = vrot.lane.b32.xlu1 %v18421_v26, %s12967_s21  ;;  %v11818_v42 = vpop.permute.xlu0 %11817 }
 0x2be   :  { %v11820_v1 = vunpack.i.h.bf16 %v11818_v42  ;;  %v11819_v53 = vunpack.i.l.bf16 %v11818_v42  ;;  %v18430_v42 = vld [vmem:[#allocation26_spill] sm:$0xff] }
 0x2bf   :  { %v11823_v27 = vpop.permute.xlu1 %11822  ;;  %12107 = vrot.lane.b32.xlu0 %v12086_v15, %s12969_s23  ;;  %v12126_v2 = vpack.i.bf16 %v18430_v42, %v18429_v24 }
 0x2c0   :  { %v11824_v30 = vunpack.i.l.bf16 %v11823_v27  ;;  %v5123_v29 = vsel %vm1544_vm6, %v5091_v50, %v11819_v53  ;;  %v11825_v26 = vunpack.i.h.bf16 %v11823_v27  ;;  %v5124_v15 = vsel %vm1544_vm6, %v5092_v57, %v11820_v1  ;;  %v3782_v50 = vld [vmem:[#allocation2 + $0x128] sm:$0xff] }
 0x2c1   :  { %12112 = vrot.lane.b32.xlu1 %v12091_v16, %s12968_s22  ;;  %v11828_v41 = vpop.permute.xlu0 %11827  ;;  %v11814_v16 = vunpack.i.l.bf16 %v11813_v55  ;;  %v11810_v27 = vunpack.i.h.bf16 %v11808_v23  ;;  %v4965_v53 = vsel %vm38_vm0, %v3781_v47, %v11809_v18 }
 0x2c2   :  { %v5155_v17 = vsel %vm1577_vm7, %v5123_v29, %v11824_v30  ;;  %v5156_v6 = vsel %vm1577_vm7, %v5124_v15, %v11825_v26  ;;  %v11829_v30 = vunpack.i.l.bf16 %v11828_v41  ;;  %v18431_v29 = vld [vmem:[#allocation29_spill] sm:$0xff]  ;;  %v11830_v18 = vunpack.i.h.bf16 %v11828_v41 }
 0x2c3   :  { %v11833_v19 = vpop.permute.xlu1 %11832  ;;  %5436 = vmatmul.mubr.f32.gmra.mrb[108].mxu0 %v5155_v17  ;;  %12117 = vrot.lane.b32.xlu0 %v18426_v44, %s12970_s24  ;;  %v4997_v17 = vsel %vm1412_vm2, %v4965_v53, %v11814_v16  ;;  %v4966_v23 = vsel %vm38_vm0, %v3782_v50, %v11810_v27 }
 0x2c4   :  { %10062 = vmatprep.mubr.msk.f32.mxu0 %vm38_vm0, %v4036_v7  ;;  %v11815_v7 = vunpack.i.h.bf16 %v11813_v55  ;;  %v11834_v26 = vunpack.i.l.bf16 %v11833_v19  ;;  %v5029_v15 = vsel %vm1445_vm3, %v4997_v17, %v11829_v30 }
 0x2c5   :  { %12122 = vrot.lane.b32.xlu1 %v12121_v39, %s12971_s25  ;;  %v11838_v4 = vpop.permute.xlu0 %11837 }
 0x2c6   :  { %v11839_v47 = vunpack.i.l.bf16 %v11838_v4  ;;  %v4998_v55 = vsel %vm1412_vm2, %v4966_v23, %v11815_v7  ;;  %v5061_v16 = vsel %vm1478_vm4, %v5029_v15, %v11834_v26  ;;  %v11840_v27 = vunpack.i.h.bf16 %v11838_v4  ;;  %v18432_v23 = vld [vmem:[#allocation27_spill] sm:$0xff] }
 0x2c7   :  { %v11843_v1 = vpop.permute.xlu1 %11842  ;;  %5441 = vmatmul.mubr.f32.gmra.mrb[110].mxu0 %v5156_v6  ;;  %12127 = vrot.lane.b32.xlu0 %v12126_v2, %s12972_s26  ;;  %v5030_v53 = vsel %vm1445_vm3, %v4998_v55, %v11830_v18  ;;  %v18433_v18 = vld [vmem:[#allocation28_spill] sm:$0xff] }
 0x2c8   :  { %10063 = vmatprep.mubr.msk.f32.mxu0 %vm38_vm0, %v14669_v10  ;;  %v11835_v10 = vunpack.i.h.bf16 %v11833_v19  ;;  %v5093_v30 = vsel %vm1511_vm5, %v5061_v16, %v11839_v47  ;;  %v11844_v17 = vunpack.i.l.bf16 %v11843_v1  ;;  %v3783_v19 = vld [vmem:[#allocation2 + $0x138] sm:$0xff]  ;;  %v11845_v26 = vunpack.i.h.bf16 %v11843_v1  ;;  %v18435_v16 = vld [vmem:[#allocation31_spill] sm:$0xff] }
 0x2c9   :  { %12132 = vrot.lane.b32.xlu1 %v18431_v29, %s12973_s27  ;;  %v11848_v57 = vpop.permute.xlu0 %11847  ;;  %v12156_v15 = vpack.i.bf16 %v18433_v18, %v18432_v23 }
 0x2ca   :  { %v5062_v47 = vsel %vm1478_vm4, %v5030_v53, %v11835_v10 }
 0x2cb   :  { %v11853_v6 = vpop.permute.xlu1 %11852  ;;  %12137 = vrot.lane.b32.xlu0 %v18426_v44, %s12967_s21 }
 0x2cc   :  { %v11854_v42 = vunpack.i.l.bf16 %v11853_v6  ;;  %v11855_v59 = vunpack.i.h.bf16 %v11853_v6  ;;  %v3784_v6 = vld [vmem:[#allocation2 + $0x140] sm:$0xff] }
 0x2cd   :  { %12142 = vrot.lane.b32.xlu1 %v12121_v39, %s12969_s23  ;;  %v11858_v24 = vpop.permute.xlu0 %11857  ;;  %v4038_v39 = vld [vmem:[#allocation2 + $0x15a] sm:$0xff]  ;;  %v4968_v53 = vsel %vm38_vm0, %v3784_v6, %v11845_v26 }
 0x2ce   :  { %v11859_v41 = vunpack.i.l.bf16 %v11858_v24  ;;  %v5125_v44 = vsel %vm1544_vm6, %v5093_v30, %v11854_v42  ;;  %v11860_v32 = vunpack.i.h.bf16 %v11858_v24  ;;  %v18434_v42 = vld [vmem:[#allocation30_spill] sm:$0xff]  ;;  %v5094_v24 = vsel %vm1511_vm5, %v5062_v47, %v11840_v27 }
 0x2cf   :  { %v11863_v50 = vpop.permute.xlu1 %11862  ;;  %12147 = vrot.lane.b32.xlu0 %v12126_v2, %s12968_s22  ;;  %v11849_v2 = vunpack.i.l.bf16 %v11848_v57  ;;  %v12161_v30 = vpack.i.bf16 %v18435_v16, %v18434_v42 }
 0x2d0   :  { %v5157_v7 = vsel %vm1577_vm7, %v5125_v44, %v11859_v41  ;;  %v4967_v41 = vsel %vm38_vm0, %v3783_v19, %v11844_v17  ;;  %v11864_v1 = vunpack.i.l.bf16 %v11863_v50  ;;  %v5126_v44 = vsel %vm1544_vm6, %v5094_v24, %v11855_v59  ;;  %v18436_v19 = vld [vmem:[#allocation34_spill] sm:$0xff] }
 0x2d1   :  { %12152 = vrot.lane.b32.xlu1 %v18431_v29, %s12970_s24  ;;  %5446 = vmatmul.mubr.f32.gmra.mrb[112].mxu0 %v5157_v7  ;;  %v11868_v4 = vpop.permute.xlu0 %11867  ;;  %v11850_v7 = vunpack.i.h.bf16 %v11848_v57  ;;  %v5158_v10 = vsel %vm1577_vm7, %v5126_v44, %v11860_v32  ;;  %v11865_v16 = vunpack.i.h.bf16 %v11863_v50  ;;  %v4999_v27 = vsel %vm1412_vm2, %v4967_v41, %v11849_v2 }
 0x2d2   :  { %10064 = vmatprep.mubr.msk.f32.mxu0 %vm38_vm0, %v4038_v39  ;;  %v11869_v18 = vunpack.i.l.bf16 %v11868_v4  ;;  %v11870_v47 = vunpack.i.h.bf16 %v11868_v4  ;;  %v5031_v59 = vsel %vm1445_vm3, %v4999_v27, %v11864_v1 }
 0x2d3   :  { %v11873_v55 = vpop.permute.xlu1 %11872  ;;  %12157 = vrot.lane.b32.xlu0 %v12156_v15, %s12971_s25  ;;  %v5000_v32 = vsel %vm1412_vm2, %v4968_v53, %v11850_v7  ;;  %v3785_v53 = vld [vmem:[#allocation2 + $0x150] sm:$0xff] }
 0x2d4   :  { %v11874_v57 = vunpack.i.l.bf16 %v11873_v55  ;;  %v5063_v50 = vsel %vm1478_vm4, %v5031_v59, %v11869_v18  ;;  %v5032_v26 = vsel %vm1445_vm3, %v5000_v32, %v11865_v16  ;;  %v11875_v4 = vunpack.i.h.bf16 %v11873_v55  ;;  %v18438_v59 = vld [vmem:[#allocation33_spill] sm:$0xff] }
 0x2d5   :  { %12162 = vrot.lane.b32.xlu1 %v12161_v30, %s12972_s26  ;;  %5451 = vmatmul.mubr.f32.gmra.mrb[114].mxu0 %v5158_v10  ;;  %v11878_v39 = vpop.permute.xlu0 %11877  ;;  %v5064_v2 = vsel %vm1478_vm4, %v5032_v26, %v11870_v47  ;;  %v18437_v47 = vld [vmem:[#allocation32_spill] sm:$0xff]  ;;  %v18439_v26 = vld [vmem:[#allocation35_spill] sm:$0xff] }
 0x2d6   :  { %10065 = vmatprep.mubr.msk.f32.mxu0 %vm38_vm0, %v14711_v20  ;;  %v5095_v44 = vsel %vm1511_vm5, %v5063_v50, %v11874_v57  ;;  %v11879_v7 = vunpack.i.l.bf16 %v11878_v39  ;;  %v5096_v16 = vsel %vm1511_vm5, %v5064_v2, %v11875_v4  ;;  %v11880_v50 = vunpack.i.h.bf16 %v11878_v39  ;;  %v18440_v4 = vld [vmem:[#allocation36_spill] sm:$0xff] }
 0x2d7   :  { %v14968_v17 = vpop.permute.xlu1 %11882  ;;  %12167 = vrot.lane.b32.xlu0 %v18436_v19, %s12973_s27  ;;  %v11405_v2 = vunpack.i.h.bf16 %v14339_v14  ;;  %v11409_v39 = vunpack.i.l.bf16 %v14321_v45 }
 0x2d8   :  { %v11884_v32 = vunpack.i.l.bf16 %v14968_v17 }
 0x2d9   :  { %12172 = vrot.lane.b32.xlu1 %v18431_v29, %s12967_s21  ;;  %v11888_v6 = vpop.permute.xlu0 %11887 }
 0x2da   :  { %v11890_v24 = vunpack.i.h.bf16 %v11888_v6  ;;  %v11889_v41 = vunpack.i.l.bf16 %v11888_v6  ;;  %v12196_v6 = vpack.i.bf16 %v18440_v4, %v18439_v26  ;;  %v11885_v4 = vunpack.i.h.bf16 %v14968_v17  ;;  %v3788_v17 = vld [vmem:[#allocation2 + $0x170] sm:$0xff] }
 0x2db   :  { %v11893_v20 = vpop.permute.xlu1 %11892  ;;  %12177 = vrot.lane.b32.xlu0 %v12156_v15, %s12969_s23  ;;  %v12191_v15 = vpack.i.bf16 %v18438_v59, %v18437_v47 }
 0x2dc   :  { %v11894_v1 = vunpack.i.l.bf16 %v11893_v20  ;;  %v5127_v18 = vsel %vm1544_vm6, %v5095_v44, %v11889_v41  ;;  %v11895_v29 = vunpack.i.h.bf16 %v11893_v20  ;;  %v5128_v57 = vsel %vm1544_vm6, %v5096_v16, %v11890_v24  ;;  %v3786_v20 = vld [vmem:[#allocation2 + $0x158] sm:$0xff]  ;;  %v18442_v16 = vld [vmem:[#allocation3_spill] sm:$0xff] }
 0x2dd   :  { %12182 = vrot.lane.b32.xlu1 %v12161_v30, %s12968_s22  ;;  %v11898_v10 = vpop.permute.xlu0 %11897  ;;  %v11404_v30 = vunpack.i.l.bf16 %v14339_v14  ;;  %v4969_v24 = vsel %vm38_vm0, %v3785_v53, %v11879_v7  ;;  %v18443_v14 = vld [vmem:[#allocation37_spill] sm:$0xff] }
 0x2de   :  { %v5159_v55 = vsel %vm1577_vm7, %v5127_v18, %v11894_v1  ;;  %v11899_v41 = vunpack.i.l.bf16 %v11898_v10  ;;  %v5160_v44 = vsel %vm1577_vm7, %v5128_v57, %v11895_v29  ;;  %v18441_v18 = vld [vmem:[#allocation23_spill] sm:$0xff]  ;;  %v15014_v7 = vpack.i.bf16 %v14294_v58, %v18443_v14 }
 0x2df   :  { %v14987_v27 = vpop.permute.xlu1 %11902  ;;  %5456 = vmatmul.mubr.f32.gmra.mrb[116].mxu0 %v5159_v55  ;;  %12187 = vrot.lane.b32.xlu0 %v18436_v19, %s12970_s24  ;;  %v3151_v42 = vsel %vm38_vm0, %v18442_v16, %v11404_v30  ;;  %v4970_v29 = vsel %vm38_vm0, %v3786_v20, %v11880_v50  ;;  %v5001_v57 = vsel %vm1412_vm2, %v4969_v24, %v11884_v32  ;;  %v18444_v30 = vld [vmem:[#allocation4_spill] sm:$0xff] }
 0x2e0   :  { %10066 = vmatprep.mubr.msk.f32.mxu0 %vm38_vm0, %v14713_v28  ;;  %v11904_v53 = vunpack.i.l.bf16 %v14987_v27  ;;  %v15024_v16 = vsel %vm38_vm0, %v18444_v30, %v11405_v2  ;;  %v3183_v50 = vsel %vm1412_vm2, %v3151_v42, %v11409_v39  ;;  %v11905_v24 = vunpack.i.h.bf16 %v14987_v27  ;;  %v3787_v30 = vld [vmem:[#allocation2 + $0x168] sm:$0xff] }
 0x2e1   :  { %12192 = vrot.lane.b32.xlu1 %v12191_v15, %s12971_s25  ;;  %v11908_v1 = vpop.permute.xlu0 %11907  ;;  %v5002_v2 = vsel %vm1412_vm2, %v4970_v29, %v11885_v4  ;;  %v11459_v42 = vunpack.i.l.bf16 %v14461_v33 }
 0x2e2   :  { %v11909_v55 = vunpack.i.l.bf16 %v11908_v1  ;;  %v11910_v39 = vunpack.i.h.bf16 %v11908_v1 }
 0x2e3   :  { %v11913_v28 = vpop.permute.xlu1 %11912  ;;  %5461 = vmatmul.mubr.f32.gmra.mrb[118].mxu0 %v5160_v44  ;;  %12197 = vrot.lane.b32.xlu0 %v12196_v6, %s12972_s26  ;;  %v11900_v44 = vunpack.i.h.bf16 %v11898_v10  ;;  %v15030_v10 = vpack.i.bf16 %v14362_v63, %v14358_v3 }
 0x2e4   :  { %10067 = vmatprep.mubr.msk.f32.mxu0 %vm38_vm0, %v14744_v62  ;;  %v5033_v62 = vsel %vm1445_vm3, %v5001_v57, %v11899_v41  ;;  %v11915_v20 = vunpack.i.h.bf16 %v11913_v28  ;;  %v11914_v58 = vunpack.i.l.bf16 %v11913_v28 }
 0x2e5   :  { %12202 = vrot.lane.b32.xlu1 %v14298_v51, %s12973_s27  ;;  %v11918_v26 = vpop.permute.xlu0 %11917  ;;  %v5034_v28 = vsel %vm1445_vm3, %v5002_v2, %v11900_v44  ;;  %v5065_v32 = vsel %vm1478_vm4, %v5033_v62, %v11904_v53  ;;  %v11464_v62 = vunpack.i.l.bf16 %v14471_v35 }
 0x2e6   :  { %v11920_v27 = vunpack.i.h.bf16 %v11918_v26  ;;  %v11919_v63 = vunpack.i.l.bf16 %v11918_v26  ;;  %v5097_v3 = vsel %vm1511_vm5, %v5065_v32, %v11909_v55  ;;  %v4972_v59 = vsel %vm38_vm0, %v3788_v17, %v11915_v20 }
 0x2e7   :  { %v11923_v14 = vpop.permute.xlu1 %11922  ;;  %12207 = vrot.lane.b32.xlu0 %v18436_v19, %s12967_s21  ;;  %v4971_v19 = vsel %vm38_vm0, %v3787_v30, %v11914_v58  ;;  %v5066_v26 = vsel %vm1478_vm4, %v5034_v28, %v11905_v24 }
 0x2e8   :  { %v11924_v41 = vunpack.i.l.bf16 %v11923_v14  ;;  %v15040_v57 = vpop.f32.mrb[0].mxu1  ;;  %v11925_v47 = vunpack.i.h.bf16 %v11923_v14  ;;  %v5098_v14 = vsel %vm1511_vm5, %v5066_v26, %v11910_v39  ;;  %v5003_v17 = vsel %vm1412_vm2, %v4971_v19, %v11919_v63 }
 0x2e9   :  { %12212 = vrot.lane.b32.xlu1 %v12191_v15, %s12969_s23  ;;  %v3535_v4 = vpop.f32.mrb[1].mxu1  ;;  %v11928_v29 = vpop.permute.xlu0 %11927 }
 0x2ea   :  { %v11929_v44 = vunpack.i.l.bf16 %v11928_v29  ;;  %v5129_v53 = vsel %vm1544_vm6, %v5097_v3, %v11924_v41  ;;  %v11930_v4 = vunpack.i.h.bf16 %v11928_v29  ;;  %v7248_v3 = vsel %vm7247_vm8, %v15040_v57, 0.0 }
 0x2eb   :  { %v11933_v1 = vpop.permute.xlu1 %11932  ;;  %12217 = vrot.lane.b32.xlu0 %v12196_v6, %s12968_s22  ;;  %v5004_v6 = vsel %vm1412_vm2, %v4972_v59, %v11920_v27  ;;  %v5130_v63 = vsel %vm1544_vm6, %v5098_v14, %v11925_v47  ;;  %v11310_v47 = vunpack.i.h.bf16 %v18441_v18 }
 0x2ec   :  { %v11935_v2 = vunpack.i.h.bf16 %v11933_v1  ;;  %v11934_v15 = vunpack.i.l.bf16 %v11933_v1  ;;  %v15052_v58 = vpop.f32.mrb[2].mxu1  ;;  %v5161_v55 = vsel %vm1577_vm7, %v5129_v53, %v11929_v44  ;;  %v4043_v44 = vld [vmem:[#allocation2 + $0x19a] sm:$0xff]  ;;  %v3215_v1 = vsel %vm1445_vm3, %v3183_v50, %v11459_v42 }
 0x2ed   :  { %12222 = vrot.lane.b32.xlu1 %v14298_v51, %s12970_s24  ;;  %v7249_v20 = vsel %vm7247_vm8, %v15052_v58, 0.0  ;;  %v3540_v32 = vpop.f32.mrb[3].mxu1  ;;  %5466 = vmatmul.mubr.f32.gmra.mrb[120].mxu0 %v5161_v55  ;;  %v11938_v24 = vpop.permute.xlu0 %11937 }
 0x2ee   :  { %v15062_v30 = vadd.f32 %v7249_v20, %v7248_v3  ;;  %v11940_v41 = vunpack.i.h.bf16 %v11938_v24  ;;  %v11939_v28 = vunpack.i.l.bf16 %v11938_v24  ;;  %10068 = vmatprep.mubr.msk.f32.mxu0 %vm38_vm0, %v14746_v31  ;;  %v5036_v59 = vsel %vm1445_vm3, %v5004_v6, %v11935_v2  ;;  %v18445_v2 = vld [vmem:[#allocation24_spill] sm:$0xff] }
 0x2ef   :  { %v11948_v29 = vpop.permute.xlu1 %11947  ;;  %v5035_v39 = vsel %vm1445_vm3, %v5003_v17, %v11934_v15  ;;  %12227 = vrot.lane.b32.xlu0 %v15014_v7, %s12971_s25  ;;  %v5162_v31 = vsel %vm1577_vm7, %v5130_v63, %v11930_v4  ;;  %v11314_v15 = vunpack.i.l.bf16 %v18445_v2  ;;  %v18446_v17 = vunpack.i.h.bf16 %v14321_v45 }
 0x2f0   :  { %v11950_v27 = vunpack.i.h.bf16 %v11948_v29  ;;  %v11949_v19 = vunpack.i.l.bf16 %v11948_v29  ;;  %v5067_v53 = vsel %vm1478_vm4, %v5035_v39, %v11939_v28  ;;  %v5068_v26 = vsel %vm1478_vm4, %v5036_v59, %v11940_v41  ;;  %v4044_v41 = vld [vmem:[#allocation2 + $0x1a2] sm:$0xff] }
 0x2f1   :  { %12232 = vrot.lane.b32.xlu1 %v15030_v10, %s12972_s26  ;;  %5471 = vmatmul.mubr.f32.gmra.mrb[122].mxu0 %v5162_v31  ;;  %v11943_v55 = vpop.permute.xlu0 %11942  ;;  %v3184_v50 = vsel %vm1412_vm2, %v15024_v16, %v18446_v17  ;;  %v18447_v3 = vunpack.i.l.bf16 %v18441_v18  ;;  %v11465_v32 = vunpack.i.h.bf16 %v14471_v35  ;;  %v3247_v16 = vsel %vm1478_vm4, %v3215_v1, %v11464_v62 }
 0x2f2   :  { %v5099_v14 = vsel %vm1511_vm5, %v5067_v53, %v11949_v19  ;;  %v11944_v42 = vunpack.i.l.bf16 %v11943_v55  ;;  %10069 = vmatprep.mubr.msk.f32.mxu0 %vm38_vm0, %v4043_v44  ;;  %v5100_v20 = vsel %vm1511_vm5, %v5068_v26, %v11950_v27  ;;  %v18448_v28 = vunpack.i.h.bf16 %v14461_v33 }
 0x2f3   :  { %v11953_v6 = vpop.permute.xlu1 %11952  ;;  %v5131_v4 = vsel %vm1544_vm6, %v5099_v14, %v18447_v3  ;;  %12237 = vrot.lane.b32.xlu0 %v14373_v56, %s12973_s27  ;;  %v11945_v18 = vunpack.i.h.bf16 %v11943_v55  ;;  %v5132_v27 = vsel %vm1544_vm6, %v5100_v20, %v11310_v47  ;;  %v11315_v62 = vunpack.i.h.bf16 %v18445_v2 }
 0x2f4   :  { %v11954_v24 = vunpack.i.l.bf16 %v11953_v6  ;;  %v5163_v45 = vsel %vm1577_vm7, %v5131_v4, %v11314_v15  ;;  %v3216_v29 = vsel %vm1445_vm3, %v3184_v50, %v18448_v28  ;;  %v5327_v63 = vpop.f32.mrb[64].mxu0  ;;  %v3279_v35 = vsel %vm1511_vm5, %v3247_v16, %v11944_v42 }
 0x2f5   :  { %12242 = vrot.lane.b32.xlu1 %v14298_v51, %s12967_s21  ;;  %5486 = vst.msk [vmem:[#allocation2 + $0x19] sm:$0xff] %vm38_vm0, %v5327_v63  ;;  %v11958_v59 = vpop.permute.xlu0 %11957  ;;  %v5329_v39 = vpop.f32.mrb[65].mxu0  ;;  %5476 = vmatmul.mubr.f32.gmra.mrb[124].mxu0 %v5163_v45  ;;  %v11955_v44 = vunpack.i.h.bf16 %v11953_v6  ;;  %v3248_v53 = vsel %vm1478_vm4, %v3216_v29, %v11465_v32  ;;  %v5164_v2 = vsel %vm1577_vm7, %v5132_v27, %v11315_v62  ;;  %v18449_v6 = vld [vmem:[#allocation5_spill] sm:$0xff]  ;;  %v18450_v45 = vld [vmem:[#allocation6_spill] sm:$0xff] }
 0x2f6   :  { %v11959_v19 = vunpack.i.l.bf16 %v11958_v59  ;;  %10070 = vmatprep.mubr.msk.f32.mxu0 %vm38_vm0, %v4044_v41  ;;  %v3311_v51 = vsel %vm1544_vm6, %v3279_v35, %v11954_v24  ;;  %v11960_v26 = vunpack.i.h.bf16 %v11958_v59  ;;  %v3280_v15 = vsel %vm1511_vm5, %v3248_v53, %v11945_v18 }
 0x2f7   :  { %v11963_v33 = vpop.permute.xlu1 %11962  ;;  %12247 = vrot.lane.b32.xlu0 %v15014_v7, %s12969_s23  ;;  %v3312_v20 = vsel %vm1544_vm6, %v3280_v15, %v11955_v44  ;;  %v12266_v28 = vpack.i.bf16 %v14452_v22, %v14443_v60 }
 0x2f8   :  { %v11964_v1 = vunpack.i.l.bf16 %v11963_v33  ;;  %v5332_v31 = vpop.f32.mrb[66].mxu0  ;;  %v3343_v47 = vsel %vm1577_vm7, %v3311_v51, %v11959_v19  ;;  %v11965_v55 = vunpack.i.h.bf16 %v11963_v33  ;;  %v3344_v24 = vsel %vm1577_vm7, %v3312_v20, %v11960_v26 }
 0x2f9   :  { %12252 = vrot.lane.b32.xlu1 %v15030_v10, %s12968_s22  ;;  %5487 = vst.msk [vmem:[#allocation2 + $0x21] sm:$0xff] %vm38_vm0, %v5332_v31  ;;  %v11968_v14 = vpop.permute.xlu0 %11967  ;;  %3552 = vmatmul.mubr.f32.gmra.mrb[8].mxu1 %v3343_v47  ;;  %v5334_v7 = vpop.f32.mrb[67].mxu0  ;;  %v12261_v10 = vpack.i.bf16 %v14370_v48, %v14364_v25 }
 0x2fa   :  { %5481 = vmatmul.mubr.f32.gmra.mrb[126].mxu0 %v5164_v2  ;;  %v11970_v17 = vunpack.i.h.bf16 %v11968_v14  ;;  %v11969_v50 = vunpack.i.l.bf16 %v11968_v14  ;;  %9980 = vmatprep.mubr.msk.f32.mxu1 %vm38_vm0, %v14040_v11  ;;  %v3153_v3 = vsel %vm38_vm0, %v18449_v6, %v11964_v1  ;;  %v3154_v11 = vsel %vm38_vm0, %v18450_v45, %v11965_v55 }
 0x2fb   :  { %v11973_v42 = vpop.permute.xlu1 %11972  ;;  %12257 = vrot.lane.b32.xlu0 %v14373_v56, %s12970_s24 }
 0x2fc   :  { %v11974_v4 = vunpack.i.l.bf16 %v11973_v42  ;;  %v3185_v32 = vsel %vm1412_vm2, %v3153_v3, %v11969_v50  ;;  %v11975_v41 = vunpack.i.h.bf16 %v11973_v42  ;;  %v3186_v29 = vsel %vm1412_vm2, %v3154_v11, %v11970_v17 }
 0x2fd   :  { %12262 = vrot.lane.b32.xlu1 %v12261_v10, %s12971_s25  ;;  %v11978_v16 = vpop.permute.xlu0 %11977  ;;  %3557 = vmatmul.mubr.f32.gmra.mrb[10].mxu1 %v3344_v24 }
 0x2fe   :  { %v11980_v18 = vunpack.i.h.bf16 %v11978_v16  ;;  %v11979_v63 = vunpack.i.l.bf16 %v11978_v16  ;;  %9981 = vmatprep.mubr.msk.f32.mxu1 %vm38_vm0, %v14070_v21  ;;  %v3217_v59 = vsel %vm1445_vm3, %v3185_v32, %v11974_v4  ;;  %v3218_v62 = vsel %vm1445_vm3, %v3186_v29, %v11975_v41 }
 0x2ff   :  { %v11983_v35 = vpop.permute.xlu1 %11982  ;;  %12267 = vrot.lane.b32.xlu0 %v12266_v28, %s12972_s26  ;;  %v12296_v16 = vpack.i.bf16 %v14463_v43, %v14454_v49 }
 0x300   :  { %v11984_v39 = vunpack.i.l.bf16 %v11983_v35  ;;  %v3249_v27 = vsel %vm1478_vm4, %v3217_v59, %v11979_v63  ;;  %v11985_v19 = vunpack.i.h.bf16 %v11983_v35  ;;  %v3250_v1 = vsel %vm1478_vm4, %v3218_v62, %v11980_v18 }
 0x301   :  { %12272 = vrot.lane.b32.xlu1 %v14467_v0, %s12973_s27  ;;  %v11988_v44 = vpop.permute.xlu0 %11987 }
 0x302   :  { %v15139_v33 = vpop.f32.mrb[4].mxu1  ;;  %v11990_v51 = vunpack.i.h.bf16 %v11988_v44  ;;  %v11989_v53 = vunpack.i.l.bf16 %v11988_v44  ;;  %v3281_v15 = vsel %vm1511_vm5, %v3249_v27, %v11984_v39  ;;  %v3282_v42 = vsel %vm1511_vm5, %v3250_v1, %v11985_v19 }
 0x303   :  { %v7251_v21 = vsel %vm7247_vm8, %v15139_v33, 0.0  ;;  %v11993_v26 = vpop.permute.xlu1 %11992  ;;  %v3545_v31 = vpop.f32.mrb[5].mxu1  ;;  %12277 = vrot.lane.b32.xlu0 %v14373_v56, %s12967_s21 }
 0x304   :  { %v7252_v47 = vadd.f32 %v7251_v21, %v15062_v30  ;;  %v11994_v2 = vunpack.i.l.bf16 %v11993_v26  ;;  %v3313_v55 = vsel %vm1544_vm6, %v3281_v15, %v11989_v53  ;;  %v11995_v14 = vunpack.i.h.bf16 %v11993_v26 }
 0x305   :  { %12282 = vrot.lane.b32.xlu1 %v12261_v10, %s12969_s23  ;;  %v11998_v17 = vpop.permute.xlu0 %11997  ;;  %v3314_v4 = vsel %vm1544_vm6, %v3282_v42, %v11990_v51 }
 0x306   :  { %v15150_v7 = vpop.f32.mrb[6].mxu1  ;;  %v3345_v50 = vsel %vm1577_vm7, %v3313_v55, %v11994_v2  ;;  %v11999_v6 = vunpack.i.l.bf16 %v11998_v17  ;;  %v12000_v32 = vunpack.i.h.bf16 %v11998_v17  ;;  %v3346_v41 = vsel %vm1577_vm7, %v3314_v4, %v11995_v14 }
 0x307   :  { %v7253_v30 = vsel %vm7247_vm8, %v15150_v7, 0.0  ;;  %v12003_v3 = vpop.permute.xlu1 %12002  ;;  %v3550_v56 = vpop.f32.mrb[7].mxu1  ;;  %3562 = vmatmul.mubr.f32.gmra.mrb[12].mxu1 %v3345_v50  ;;  %12287 = vrot.lane.b32.xlu0 %v12266_v28, %s12968_s22  ;;  %v12301_v28 = vpack.i.bf16 %v14527_v46, %v14520_v40 }
 0x308   :  { %v15157_v10 = vadd.f32 %v7253_v30, %v7252_v47  ;;  %v12004_v20 = vunpack.i.l.bf16 %v12003_v3  ;;  %9982 = vmatprep.mubr.msk.f32.mxu1 %vm38_vm0, %v18413_v36  ;;  %v3155_v24 = vsel %vm38_vm0, %v14031_v37, %v11999_v6  ;;  %v12005_v37 = vunpack.i.h.bf16 %v12003_v3 }
 0x309   :  { %12292 = vrot.lane.b32.xlu1 %v14467_v0, %s12970_s24  ;;  %v12008_v45 = vpop.permute.xlu0 %12007  ;;  %v3156_v59 = vsel %vm38_vm0, %v14036_v38, %v12000_v32 }
 0x30a   :  { %v5337_v11 = vpop.f32.mrb[68].mxu0  ;;  %v12009_v29 = vunpack.i.l.bf16 %v12008_v45  ;;  %v3187_v63 = vsel %vm1412_vm2, %v3155_v24, %v12004_v20  ;;  %v12010_v39 = vunpack.i.h.bf16 %v12008_v45  ;;  %v3188_v51 = vsel %vm1412_vm2, %v3156_v59, %v12005_v37  ;;  %v18451_v24 = vld [vmem:[#allocation41_spill] sm:$0xff]  ;;  %v18452_v45 = vld [vmem:[#allocation42_spill] sm:$0xff]  ;;  %v18454_v59 = vld [vmem:[#allocation44_spill] sm:$0xff] }
 0x30b   :  { %v12013_v18 = vpop.permute.xlu1 %12012  ;;  %5488 = vst.msk [vmem:[#allocation2 + $0x31] sm:$0xff] %vm38_vm0, %v5337_v11  ;;  %3567 = vmatmul.mubr.f32.gmra.mrb[14].mxu1 %v3346_v41  ;;  %v5339_v36 = vpop.f32.mrb[69].mxu0  ;;  %12297 = vrot.lane.b32.xlu0 %v12296_v16, %s12971_s25  ;;  %v12331_v11 = vpack.i.bf16 %v18452_v45, %v18451_v24 }
 0x30c   :  { %v12014_v35 = vunpack.i.l.bf16 %v12013_v18  ;;  %9983 = vmatprep.mubr.msk.f32.mxu1 %vm38_vm0, %v18417_v52  ;;  %v3219_v27 = vsel %vm1445_vm3, %v3187_v63, %v12009_v29  ;;  %v12015_v53 = vunpack.i.h.bf16 %v12013_v18  ;;  %v3220_v38 = vsel %vm1445_vm3, %v3188_v51, %v12010_v39  ;;  %v18455_v51 = vld [vmem:[#allocation47_spill] sm:$0xff] }
 0x30d   :  { %12302 = vrot.lane.b32.xlu1 %v12301_v28, %s12972_s26  ;;  %v12018_v62 = vpop.permute.xlu0 %12017 }
 0x30e   :  { %v5342_v19 = vpop.f32.mrb[70].mxu0  ;;  %v12019_v44 = vunpack.i.l.bf16 %v12018_v62  ;;  %v3251_v52 = vsel %vm1478_vm4, %v3219_v27, %v12014_v35  ;;  %v12020_v31 = vunpack.i.h.bf16 %v12018_v62  ;;  %v3252_v14 = vsel %vm1478_vm4, %v3220_v38, %v12015_v53  ;;  %v18453_v35 = vld [vmem:[#allocation43_spill] sm:$0xff] }
 0x30f   :  { %v12023_v1 = vpop.permute.xlu1 %12022  ;;  %5489 = vst.msk [vmem:[#allocation2 + $0x39] sm:$0xff] %vm38_vm0, %v5342_v19  ;;  %v5344_v21 = vpop.f32.mrb[71].mxu0  ;;  %12307 = vrot.lane.b32.xlu0 %v14539_v34, %s12973_s27  ;;  %v12336_v39 = vpack.i.bf16 %v18454_v59, %v18453_v35 }
 0x310   :  { %v12024_v26 = vunpack.i.l.bf16 %v12023_v1  ;;  %v3283_v47 = vsel %vm1511_vm5, %v3251_v52, %v12019_v44  ;;  %v12025_v17 = vunpack.i.h.bf16 %v12023_v1 }
 0x311   :  { %12312 = vrot.lane.b32.xlu1 %v14467_v0, %s12967_s21  ;;  %v12028_v2 = vpop.permute.xlu0 %12027  ;;  %v3284_v0 = vsel %vm1511_vm5, %v3252_v14, %v12020_v31 }
 0x312   :  { %v12029_v15 = vunpack.i.l.bf16 %v12028_v2  ;;  %v3315_v42 = vsel %vm1544_vm6, %v3283_v47, %v12024_v26  ;;  %v12030_v30 = vunpack.i.h.bf16 %v12028_v2  ;;  %v3316_v29 = vsel %vm1544_vm6, %v3284_v0, %v12025_v17 }
 0x313   :  { %v12033_v55 = vpop.permute.xlu1 %12032  ;;  %12317 = vrot.lane.b32.xlu0 %v12296_v16, %s12969_s23 }
 0x314   :  { %v12034_v50 = vunpack.i.l.bf16 %v12033_v55  ;;  %v3347_v6 = vsel %vm1577_vm7, %v3315_v42, %v12029_v15  ;;  %v12035_v3 = vunpack.i.h.bf16 %v12033_v55 }
 0x315   :  { %12322 = vrot.lane.b32.xlu1 %v12301_v28, %s12968_s22  ;;  %v12038_v56 = vpop.permute.xlu0 %12037  ;;  %3572 = vmatmul.mubr.f32.gmra.mrb[16].mxu1 %v3347_v6  ;;  %v3348_v28 = vsel %vm1577_vm7, %v3316_v29, %v12030_v30  ;;  %v18457_v29 = vld [vmem:[#allocation46_spill] sm:$0xff] }
 0x316   :  { %v12040_v4 = vunpack.i.h.bf16 %v12038_v56  ;;  %v12039_v20 = vunpack.i.l.bf16 %v12038_v56  ;;  %9984 = vmatprep.mubr.msk.f32.mxu1 %vm38_vm0, %v18418_v54  ;;  %v3157_v41 = vsel %vm38_vm0, %v14061_v13, %v12034_v50  ;;  %v3158_v54 = vsel %vm38_vm0, %v14068_v5, %v12035_v3 }
 0x317   :  { %v12043_v32 = vpop.permute.xlu1 %12042  ;;  %12327 = vrot.lane.b32.xlu0 %v14539_v34, %s12970_s24 }
 0x318   :  { %v12044_v16 = vunpack.i.l.bf16 %v12043_v32  ;;  %v3189_v18 = vsel %vm1412_vm2, %v3157_v41, %v12039_v20  ;;  %v5347_v36 = vpop.f32.mrb[72].mxu0  ;;  %v12045_v37 = vunpack.i.h.bf16 %v12043_v32  ;;  %v3190_v27 = vsel %vm1412_vm2, %v3158_v54, %v12040_v4  ;;  %v18458_v54 = vld [vmem:[#allocation48_spill] sm:$0xff] }
 0x319   :  { %12332 = vrot.lane.b32.xlu1 %v12331_v11, %s12971_s25  ;;  %5490 = vst.msk [vmem:[#allocation2 + $0x49] sm:$0xff] %vm38_vm0, %v5347_v36  ;;  %v12048_v13 = vpop.permute.xlu0 %12047  ;;  %3577 = vmatmul.mubr.f32.gmra.mrb[18].mxu1 %v3348_v28  ;;  %v5349_v63 = vpop.f32.mrb[73].mxu0 }
 0x31a   :  { %v12050_v62 = vunpack.i.h.bf16 %v12048_v13  ;;  %v12049_v19 = vunpack.i.l.bf16 %v12048_v13  ;;  %9985 = vmatprep.mubr.msk.f32.mxu1 %vm38_vm0, %v18422_v9  ;;  %v3221_v1 = vsel %vm1445_vm3, %v3189_v18, %v12044_v16  ;;  %v3222_v52 = vsel %vm1445_vm3, %v3190_v27, %v12045_v37  ;;  %v18456_v16 = vld [vmem:[#allocation45_spill] sm:$0xff] }
 0x31b   :  { %v12053_v44 = vpop.permute.xlu1 %12052  ;;  %12337 = vrot.lane.b32.xlu0 %v12336_v39, %s12972_s26  ;;  %v12366_v18 = vpack.i.bf16 %v18457_v29, %v18456_v16  ;;  %v18459_v37 = vld [vmem:[#allocation49_spill] sm:$0xff] }
 0x31c   :  { %v12054_v5 = vunpack.i.l.bf16 %v12053_v44  ;;  %v3253_v21 = vsel %vm1478_vm4, %v3221_v1, %v12049_v19  ;;  %v5352_v53 = vpop.f32.mrb[74].mxu0  ;;  %v12055_v26 = vunpack.i.h.bf16 %v12053_v44  ;;  %v3254_v9 = vsel %vm1478_vm4, %v3222_v52, %v12050_v62  ;;  %v18460_v27 = vld [vmem:[#allocation9_spill] sm:$0xff] }
 0x31d   :  { %12342 = vrot.lane.b32.xlu1 %v18455_v51, %s12973_s27  ;;  %5491 = vst.msk [vmem:[#allocation2 + $0x51] sm:$0xff] %vm38_vm0, %v5352_v53  ;;  %v12058_v38 = vpop.permute.xlu0 %12057  ;;  %v5354_v31 = vpop.f32.mrb[75].mxu0  ;;  %v12371_v13 = vpack.i.bf16 %v18459_v37, %v18458_v54  ;;  %v18464_v54 = vld [vmem:[#allocation51_spill] sm:$0xff] }
 0x31e   :  { %v12060_v47 = vunpack.i.h.bf16 %v12058_v38  ;;  %v12059_v2 = vunpack.i.l.bf16 %v12058_v38  ;;  %v3285_v14 = vsel %vm1511_vm5, %v3253_v21, %v12054_v5  ;;  %v3286_v6 = vsel %vm1511_vm5, %v3254_v9, %v12055_v26  ;;  %v18461_v9 = vld [vmem:[#allocation52_spill] sm:$0xff] }
 0x31f   :  { %v12063_v15 = vpop.permute.xlu1 %12062  ;;  %12347 = vrot.lane.b32.xlu0 %v14539_v34, %s12967_s21 }
 0x320   :  { %v12064_v55 = vunpack.i.l.bf16 %v12063_v15  ;;  %v3317_v17 = vsel %vm1544_vm6, %v3285_v14, %v12059_v2  ;;  %v12065_v50 = vunpack.i.h.bf16 %v12063_v15  ;;  %v3318_v56 = vsel %vm1544_vm6, %v3286_v6, %v12060_v47 }
 0x321   :  { %12352 = vrot.lane.b32.xlu1 %v12331_v11, %s12969_s23  ;;  %v12068_v42 = vpop.permute.xlu0 %12067 }
 0x322   :  { %v3349_v30 = vsel %vm1577_vm7, %v3317_v17, %v12064_v55  ;;  %v12069_v0 = vunpack.i.l.bf16 %v12068_v42  ;;  %v12070_v34 = vunpack.i.h.bf16 %v12068_v42  ;;  %v3350_v41 = vsel %vm1577_vm7, %v3318_v56, %v12065_v50  ;;  %v2185_v56 = vld [vmem:[#allocation2 + $0x198] sm:$0xff] }
 0x323   :  { %v12073_v3 = vpop.permute.xlu1 %12072  ;;  %3582 = vmatmul.mubr.f32.gmra.mrb[20].mxu1 %v3349_v30  ;;  %12357 = vrot.lane.b32.xlu0 %v12336_v39, %s12968_s22 }
 0x324   :  { %v12074_v4 = vunpack.i.l.bf16 %v12073_v3  ;;  %9986 = vmatprep.mubr.msk.f32.mxu1 %vm38_vm0, %v18423_v8  ;;  %v3159_v20 = vsel %vm38_vm0, %v18414_v61, %v12069_v0  ;;  %v12075_v61 = vunpack.i.h.bf16 %v12073_v3  ;;  %v3160_v62 = vsel %vm38_vm0, %v18460_v27, %v12070_v34 }
 0x325   :  { %12362 = vrot.lane.b32.xlu1 %v18455_v51, %s12970_s24  ;;  %v12078_v32 = vpop.permute.xlu0 %12077 }
 0x326   :  { %v5357_v11 = vpop.f32.mrb[76].mxu0  ;;  %v12079_v36 = vunpack.i.l.bf16 %v12078_v32  ;;  %v3191_v63 = vsel %vm1412_vm2, %v3159_v20, %v12074_v4  ;;  %v12080_v19 = vunpack.i.h.bf16 %v12078_v32  ;;  %v3192_v26 = vsel %vm1412_vm2, %v3160_v62, %v12075_v61  ;;  %v2186_v4 = vld [vmem:[#allocation2 + $0x1a0] sm:$0xff] }
 0x327   :  { %v12083_v28 = vpop.permute.xlu1 %12082  ;;  %5492 = vst.msk [vmem:[#allocation2 + $0x61] sm:$0xff] %vm38_vm0, %v5357_v11  ;;  %3587 = vmatmul.mubr.f32.gmra.mrb[22].mxu1 %v3350_v41  ;;  %v5359_v8 = vpop.f32.mrb[77].mxu0  ;;  %12367 = vrot.lane.b32.xlu0 %v12366_v18, %s12971_s25  ;;  %v2217_v32 = vld [vmem:[#allocation2 + $0x199] sm:$0xff]  ;;  %v2218_v11 = vld [vmem:[#allocation2 + $0x1a1] sm:$0xff]  ;;  %v12406_v27 = vpack.i.bf16 %v2186_v4, %v2185_v56 }
 0x328   :  { %v12084_v39 = vunpack.i.l.bf16 %v12083_v28  ;;  %9987 = vmatprep.mubr.msk.f32.mxu1 %vm38_vm0, %v18427_v12  ;;  %v3223_v44 = vsel %vm1445_vm3, %v3191_v63, %v12079_v36  ;;  %v12085_v38 = vunpack.i.h.bf16 %v12083_v28  ;;  %v3224_v47 = vsel %vm1445_vm3, %v3192_v26, %v12080_v19  ;;  %v18463_v8 = vld [vmem:[#allocation50_spill] sm:$0xff] }
 0x329   :  { %12372 = vrot.lane.b32.xlu1 %v12371_v13, %s12972_s26  ;;  %v12088_v1 = vpop.permute.xlu0 %12087  ;;  %v12401_v37 = vpack.i.bf16 %v18464_v54, %v18463_v8 }
 0x32a   :  { %v5362_v5 = vpop.f32.mrb[78].mxu0  ;;  %v12089_v21 = vunpack.i.l.bf16 %v12088_v1  ;;  %v3255_v12 = vsel %vm1478_vm4, %v3223_v44, %v12084_v39  ;;  %v12090_v2 = vunpack.i.h.bf16 %v12088_v1  ;;  %v3256_v50 = vsel %vm1478_vm4, %v3224_v47, %v12085_v38 }
 0x32b   :  { %v12093_v53 = vpop.permute.xlu1 %12092  ;;  %5493 = vst.msk [vmem:[#allocation2 + $0x69] sm:$0xff] %vm38_vm0, %v5362_v5  ;;  %v5364_v52 = vpop.f32.mrb[79].mxu0  ;;  %12377 = vrot.lane.b32.xlu0 %v18461_v9, %s12973_s27  ;;  %v12411_v1 = vpack.i.bf16 %v2218_v11, %v2217_v32  ;;  %v5550_v5 = vld [vmem:[#allocation2 + $0x1] sm:$0xff] }
 0x32c   :  { %v12094_v31 = vunpack.i.l.bf16 %v12093_v53  ;;  %v3287_v15 = vsel %vm1511_vm5, %v3255_v12, %v12089_v21  ;;  %v12095_v42 = vunpack.i.h.bf16 %v12093_v53  ;;  %v5551_v21 = vld [vmem:[#allocation2 + $0x9] sm:$0xff]  ;;  %v5615_v32 = vld [vmem:[#allocation2 + $0x20] sm:$0xff] }
 0x32d   :  { %12382 = vrot.lane.b32.xlu1 %v18455_v51, %s12967_s21  ;;  %v12098_v55 = vpop.permute.xlu0 %12097  ;;  %v3288_v51 = vsel %vm1511_vm5, %v3256_v50, %v12090_v2  ;;  %v18466_v53 = vld [vmem:[#allocation14_spill] sm:$0xff]  ;;  %v12416_v50 = vpack.i.bf16 %v5551_v21, %v5550_v5  ;;  %v5678_v5 = vld [vmem:[#allocation2 + $0x1a] sm:$0xff] }
 0x32e   :  { %v12099_v14 = vunpack.i.l.bf16 %v12098_v55  ;;  %v3319_v6 = vsel %vm1544_vm6, %v3287_v15, %v12094_v31  ;;  %v12100_v0 = vunpack.i.h.bf16 %v12098_v55  ;;  %v3320_v39 = vsel %vm1544_vm6, %v3288_v51, %v12095_v42  ;;  %v5582_v31 = vld [vmem:[#allocation2 + $0x2] sm:$0xff] }
 0x32f   :  { %v12103_v17 = vpop.permute.xlu1 %12102  ;;  %12387 = vrot.lane.b32.xlu0 %v12366_v18, %s12969_s23  ;;  %v18462_v18 = vld [vmem:[#allocation21_spill] sm:$0xff] }
 0x330   :  { %v12104_v30 = vunpack.i.l.bf16 %v12103_v17  ;;  %v3351_v3 = vsel %vm1577_vm7, %v3319_v6, %v12099_v14  ;;  %v12105_v34 = vunpack.i.h.bf16 %v12103_v17  ;;  %v3352_v44 = vsel %vm1577_vm7, %v3320_v39, %v12100_v0  ;;  %v5679_v21 = vld [vmem:[#allocation2 + $0x22] sm:$0xff] }
 0x331   :  { %12392 = vrot.lane.b32.xlu1 %v12371_v13, %s12968_s22  ;;  %v12108_v20 = vpop.permute.xlu0 %12107  ;;  %3592 = vmatmul.mubr.f32.gmra.mrb[24].mxu1 %v3351_v3  ;;  %v18465_v13 = vld [vmem:[#allocation13_spill] sm:$0xff] }
 0x332   :  { %v12110_v41 = vunpack.i.h.bf16 %v12108_v20  ;;  %v12109_v36 = vunpack.i.l.bf16 %v12108_v20  ;;  %9988 = vmatprep.mubr.msk.f32.mxu1 %vm38_vm0, %v18462_v18  ;;  %v3161_v61 = vsel %vm38_vm0, %v18465_v13, %v12104_v30  ;;  %v3162_v52 = vsel %vm38_vm0, %v18466_v53, %v12105_v34  ;;  %v5614_v18 = vld [vmem:[#allocation2 + $0x18] sm:$0xff] }
 0x333   :  { %v12113_v28 = vpop.permute.xlu1 %12112  ;;  %12397 = vrot.lane.b32.xlu0 %v18461_v9, %s12970_s24  ;;  %v5583_v9 = vld [vmem:[#allocation2 + $0xa] sm:$0xff]  ;;  %v12426_v39 = vpack.i.bf16 %v5615_v32, %v5614_v18 }
 0x334   :  { %v12114_v63 = vunpack.i.l.bf16 %v12113_v28  ;;  %v3193_v62 = vsel %vm1412_vm2, %v3161_v61, %v12109_v36  ;;  %v5367_v19 = vpop.f32.mrb[80].mxu0  ;;  %v12115_v26 = vunpack.i.h.bf16 %v12113_v28  ;;  %v3194_v47 = vsel %vm1412_vm2, %v3162_v52, %v12110_v41  ;;  %v5647_v36 = vld [vmem:[#allocation2 + $0x21] sm:$0xff]  ;;  %v18467_v52 = vld [vmem:[#allocation28_spill] sm:$0xff] }
 0x335   :  { %12402 = vrot.lane.b32.xlu1 %v12401_v37, %s12971_s25  ;;  %5494 = vst.msk [vmem:[#allocation2 + $0x79] sm:$0xff] %vm38_vm0, %v5367_v19  ;;  %v12118_v38 = vpop.permute.xlu0 %12117  ;;  %3597 = vmatmul.mubr.f32.gmra.mrb[26].mxu1 %v3352_v44  ;;  %v5369_v12 = vpop.f32.mrb[81].mxu0  ;;  %v12421_v6 = vpack.i.bf16 %v5583_v9, %v5582_v31 }
 0x336   :  { %v12120_v2 = vunpack.i.h.bf16 %v12118_v38  ;;  %v12119_v15 = vunpack.i.l.bf16 %v12118_v38  ;;  %9989 = vmatprep.mubr.msk.f32.mxu1 %vm38_vm0, %v18432_v23  ;;  %v3225_v14 = vsel %vm1445_vm3, %v3193_v62, %v12114_v63  ;;  %v3226_v0 = vsel %vm1445_vm3, %v3194_v47, %v12115_v26  ;;  %v5646_v63 = vld [vmem:[#allocation2 + $0x19] sm:$0xff]  ;;  %v18468_v38 = vld [vmem:[#allocation18_spill] sm:$0xff] }
 0x337   :  { %v12123_v55 = vpop.permute.xlu1 %12122  ;;  %12407 = vrot.lane.b32.xlu0 %v12406_v27, %s12972_s26  ;;  %v12431_v44 = vpack.i.bf16 %v5647_v36, %v5646_v63  ;;  %v5743_v36 = vld [vmem:[#allocation2 + $0x39] sm:$0xff] }
 0x338   :  { %v12124_v17 = vunpack.i.l.bf16 %v12123_v55  ;;  %v3257_v42 = vsel %vm1478_vm4, %v3225_v14, %v12119_v15  ;;  %v5372_v30 = vpop.f32.mrb[82].mxu0  ;;  %v12125_v3 = vunpack.i.h.bf16 %v12123_v55  ;;  %v3258_v23 = vsel %vm1478_vm4, %v3226_v0, %v12120_v2  ;;  %v18470_v0 = vld [vmem:[#allocation19_spill] sm:$0xff] }
 0x339   :  { %12412 = vrot.lane.b32.xlu1 %v12411_v1, %s12973_s27  ;;  %5495 = vst.msk [vmem:[#allocation2 + $0x81] sm:$0xff] %vm38_vm0, %v5372_v30  ;;  %v12128_v51 = vpop.permute.xlu0 %12127  ;;  %v5374_v56 = vpop.f32.mrb[83].mxu0  ;;  %v12436_v2 = vpack.i.bf16 %v5679_v21, %v5678_v5  ;;  %v18469_v30 = vld [vmem:[#allocation32_spill] sm:$0xff] }
 0x33a   :  { %v12130_v4 = vunpack.i.h.bf16 %v12128_v51  ;;  %v12129_v34 = vunpack.i.l.bf16 %v12128_v51  ;;  %v3289_v41 = vsel %vm1511_vm5, %v3257_v42, %v12124_v17  ;;  %v3290_v27 = vsel %vm1511_vm5, %v3258_v23, %v12125_v3 }
 0x33b   :  { %v12133_v20 = vpop.permute.xlu1 %12132  ;;  %12417 = vrot.lane.b32.xlu0 %v12416_v50, %s12967_s21 }
 0x33c   :  { %v12134_v11 = vunpack.i.l.bf16 %v12133_v20  ;;  %v3321_v28 = vsel %vm1544_vm6, %v3289_v41, %v12129_v34  ;;  %v12135_v37 = vunpack.i.h.bf16 %v12133_v20  ;;  %v3322_v1 = vsel %vm1544_vm6, %v3290_v27, %v12130_v4  ;;  %v5710_v34 = vld [vmem:[#allocation2 + $0x30] sm:$0xff] }
 0x33d   :  { %12422 = vrot.lane.b32.xlu1 %v12421_v6, %s12969_s23  ;;  %v12138_v13 = vpop.permute.xlu0 %12137  ;;  %v5711_v6 = vld [vmem:[#allocation2 + $0x38] sm:$0xff] }
 0x33e   :  { %v3353_v61 = vsel %vm1577_vm7, %v3321_v28, %v12134_v11  ;;  %v12139_v62 = vunpack.i.l.bf16 %v12138_v13  ;;  %v12140_v26 = vunpack.i.h.bf16 %v12138_v13  ;;  %v3354_v47 = vsel %vm1577_vm7, %v3322_v1, %v12135_v37 }
 0x33f   :  { %v12143_v19 = vpop.permute.xlu1 %12142  ;;  %3602 = vmatmul.mubr.f32.gmra.mrb[28].mxu1 %v3353_v61  ;;  %12427 = vrot.lane.b32.xlu0 %v12426_v39, %s12968_s22  ;;  %v12451_v41 = vpack.i.bf16 %v5711_v6, %v5710_v34  ;;  %v5742_v39 = vld [vmem:[#allocation2 + $0x31] sm:$0xff] }
 0x340   :  { %v12144_v53 = vunpack.i.l.bf16 %v12143_v19  ;;  %9990 = vmatprep.mubr.msk.f32.mxu1 %vm38_vm0, %v18467_v52  ;;  %v3163_v12 = vsel %vm38_vm0, %v18468_v38, %v12139_v62  ;;  %v12145_v17 = vunpack.i.h.bf16 %v12143_v19  ;;  %v3164_v3 = vsel %vm38_vm0, %v18470_v0, %v12140_v26  ;;  %v5680_v26 = vld [vmem:[#allocation2 + $0x32] sm:$0xff]  ;;  %v5681_v38 = vld [vmem:[#allocation2 + $0x3a] sm:$0xff] }
 0x341   :  { %12432 = vrot.lane.b32.xlu1 %v12431_v44, %s12970_s24  ;;  %v12148_v31 = vpop.permute.xlu0 %12147  ;;  %v12456_v19 = vpack.i.bf16 %v5743_v36, %v5742_v39 }
 0x342   :  { %v5377_v9 = vpop.f32.mrb[84].mxu0  ;;  %v12149_v15 = vunpack.i.l.bf16 %v12148_v31  ;;  %v3195_v50 = vsel %vm1412_vm2, %v3163_v12, %v12144_v53  ;;  %v12150_v51 = vunpack.i.h.bf16 %v12148_v31  ;;  %v3196_v28 = vsel %vm1412_vm2, %v3164_v3, %v12145_v17  ;;  %v18471_v17 = vld [vmem:[#allocation33_spill] sm:$0xff] }
 0x343   :  { %v12153_v55 = vpop.permute.xlu1 %12152  ;;  %5496 = vst.msk [vmem:[#allocation2 + $0x91] sm:$0xff] %vm38_vm0, %v5377_v9  ;;  %3607 = vmatmul.mubr.f32.gmra.mrb[30].mxu1 %v3354_v47  ;;  %v5379_v14 = vpop.f32.mrb[85].mxu0  ;;  %12437 = vrot.lane.b32.xlu0 %v12436_v2, %s12971_s25 }
 0x344   :  { %v12154_v42 = vunpack.i.l.bf16 %v12153_v55  ;;  %9991 = vmatprep.mubr.msk.f32.mxu1 %vm38_vm0, %v18469_v30  ;;  %v3227_v56 = vsel %vm1445_vm3, %v3195_v50, %v12149_v15  ;;  %v12155_v18 = vunpack.i.h.bf16 %v12153_v55  ;;  %v3228_v61 = vsel %vm1445_vm3, %v3196_v28, %v12150_v51 }
 0x345   :  { %12442 = vrot.lane.b32.xlu1 %v12431_v44, %s12967_s21  ;;  %v12158_v23 = vpop.permute.xlu0 %12157  ;;  %v12471_v50 = vpack.i.bf16 %v5681_v38, %v5680_v26 }
 0x346   :  { %v5382_v4 = vpop.f32.mrb[86].mxu0  ;;  %v12159_v20 = vunpack.i.l.bf16 %v12158_v23  ;;  %v3259_v37 = vsel %vm1478_vm4, %v3227_v56, %v12154_v42  ;;  %v12160_v63 = vunpack.i.h.bf16 %v12158_v23  ;;  %v3260_v5 = vsel %vm1478_vm4, %v3228_v61, %v12155_v18  ;;  %v18472_v42 = vld [vmem:[#allocation25_spill] sm:$0xff]  ;;  %v18473_v23 = vld [vmem:[#allocation26_spill] sm:$0xff] }
 0x347   :  { %v12163_v32 = vpop.permute.xlu1 %12162  ;;  %5497 = vst.msk [vmem:[#allocation2 + $0x99] sm:$0xff] %vm38_vm0, %v5382_v4  ;;  %v5384_v11 = vpop.f32.mrb[87].mxu0  ;;  %12447 = vrot.lane.b32.xlu0 %v12436_v2, %s12969_s23  ;;  %v18474_v18 = vld [vmem:[#allocation37_spill] sm:$0xff] }
 0x348   :  { %v12164_v13 = vunpack.i.l.bf16 %v12163_v32  ;;  %v3291_v27 = vsel %vm1511_vm5, %v3259_v37, %v12159_v20  ;;  %v12165_v21 = vunpack.i.h.bf16 %v12163_v32  ;;  %v3292_v9 = vsel %vm1511_vm5, %v3260_v5, %v12160_v63  ;;  %v5713_v37 = vld [vmem:[#allocation2 + $0x50] sm:$0xff] }
 0x349   :  { %12452 = vrot.lane.b32.xlu1 %v12451_v41, %s12972_s26  ;;  %v12168_v62 = vpop.permute.xlu0 %12167  ;;  %v5745_v63 = vld [vmem:[#allocation2 + $0x51] sm:$0xff] }
 0x34a   :  { %v12169_v44 = vunpack.i.l.bf16 %v12168_v62  ;;  %v3323_v52 = vsel %vm1544_vm6, %v3291_v27, %v12164_v13  ;;  %v12170_v12 = vunpack.i.h.bf16 %v12168_v62  ;;  %v3324_v0 = vsel %vm1544_vm6, %v3292_v9, %v12165_v21  ;;  %v5712_v62 = vld [vmem:[#allocation2 + $0x48] sm:$0xff] }
 0x34b   :  { %v12173_v1 = vpop.permute.xlu1 %12172  ;;  %12457 = vrot.lane.b32.xlu0 %v12456_v19, %s12973_s27 }
 0x34c   :  { %v12174_v53 = vunpack.i.l.bf16 %v12173_v1  ;;  %v3355_v31 = vsel %vm1577_vm7, %v3323_v52, %v12169_v44  ;;  %v12175_v47 = vunpack.i.h.bf16 %v12173_v1  ;;  %v3356_v56 = vsel %vm1577_vm7, %v3324_v0, %v12170_v12  ;;  %v5683_v0 = vld [vmem:[#allocation2 + $0x52] sm:$0xff] }
 0x34d   :  { %12462 = vrot.lane.b32.xlu1 %v12451_v41, %s12968_s22  ;;  %v12178_v2 = vpop.permute.xlu0 %12177  ;;  %3612 = vmatmul.mubr.f32.gmra.mrb[32].mxu1 %v3355_v31  ;;  %v12486_v52 = vpack.i.bf16 %v5713_v37, %v5712_v62 }
 0x34e   :  { %v12180_v15 = vunpack.i.h.bf16 %v12178_v2  ;;  %v12179_v55 = vunpack.i.l.bf16 %v12178_v2  ;;  %9992 = vmatprep.mubr.msk.f32.mxu1 %vm38_vm0, %v18471_v17  ;;  %v3165_v30 = vsel %vm38_vm0, %v18472_v42, %v12174_v53  ;;  %v3166_v4 = vsel %vm38_vm0, %v18473_v23, %v12175_v47  ;;  %v5744_v53 = vld [vmem:[#allocation2 + $0x49] sm:$0xff] }
 0x34f   :  { %v12183_v14 = vpop.permute.xlu1 %12182  ;;  %12467 = vrot.lane.b32.xlu0 %v12456_v19, %s12970_s24  ;;  %v12491_v31 = vpack.i.bf16 %v5745_v63, %v5744_v53  ;;  %v18476_v23 = vld [vmem:[#allocation30_spill] sm:$0xff]  ;;  %v18477_v63 = vld [vmem:[#allocation31_spill] sm:$0xff] }
 0x350   :  { %v12184_v6 = vunpack.i.l.bf16 %v12183_v14  ;;  %v3197_v3 = vsel %vm1412_vm2, %v3165_v30, %v12179_v55  ;;  %v5387_v51 = vpop.f32.mrb[88].mxu0  ;;  %v12185_v34 = vunpack.i.h.bf16 %v12183_v14  ;;  %v3198_v11 = vsel %vm1412_vm2, %v3166_v4, %v12180_v15 }
 0x351   :  { %12472 = vrot.lane.b32.xlu1 %v12471_v50, %s12971_s25  ;;  %5498 = vst.msk [vmem:[#allocation2 + $0xa9] sm:$0xff] %vm38_vm0, %v5387_v51  ;;  %v12188_v20 = vpop.permute.xlu0 %12187  ;;  %3617 = vmatmul.mubr.f32.gmra.mrb[34].mxu1 %v3356_v56  ;;  %v5389_v32 = vpop.f32.mrb[89].mxu0  ;;  %v18475_v51 = vld [vmem:[#allocation38_spill] sm:$0xff] }
 0x352   :  { %v12190_v41 = vunpack.i.h.bf16 %v12188_v20  ;;  %v12189_v36 = vunpack.i.l.bf16 %v12188_v20  ;;  %9993 = vmatprep.mubr.msk.f32.mxu1 %vm38_vm0, %v18474_v18  ;;  %v3229_v13 = vsel %vm1445_vm3, %v3197_v3, %v12184_v6  ;;  %v3230_v44 = vsel %vm1445_vm3, %v3198_v11, %v12185_v34  ;;  %v5682_v6 = vld [vmem:[#allocation2 + $0x4a] sm:$0xff] }
 0x353   :  { %v12193_v28 = vpop.permute.xlu1 %12192  ;;  %12477 = vrot.lane.b32.xlu0 %v12456_v19, %s12967_s21  ;;  %v12506_v11 = vpack.i.bf16 %v5683_v0, %v5682_v6 }
 0x354   :  { %v12194_v61 = vunpack.i.l.bf16 %v12193_v28  ;;  %v3261_v39 = vsel %vm1478_vm4, %v3229_v13, %v12189_v36  ;;  %v5392_v27 = vpop.f32.mrb[90].mxu0  ;;  %v12195_v1 = vunpack.i.h.bf16 %v12193_v28  ;;  %v3262_v26 = vsel %vm1478_vm4, %v3230_v44, %v12190_v41 }
 0x355   :  { %12482 = vrot.lane.b32.xlu1 %v12471_v50, %s12969_s23  ;;  %5499 = vst.msk [vmem:[#allocation2 + $0xb1] sm:$0xff] %vm38_vm0, %v5392_v27  ;;  %v12198_v5 = vpop.permute.xlu0 %12197  ;;  %v5394_v21 = vpop.f32.mrb[91].mxu0 }
 0x356   :  { %v12200_v38 = vunpack.i.h.bf16 %v12198_v5  ;;  %v12199_v19 = vunpack.i.l.bf16 %v12198_v5  ;;  %v3293_v47 = vsel %vm1511_vm5, %v3261_v39, %v12194_v61  ;;  %v3294_v17 = vsel %vm1511_vm5, %v3262_v26, %v12195_v1  ;;  %v5715_v61 = vld [vmem:[#allocation2 + $0x68] sm:$0xff]  ;;  %v5714_v5 = vld [vmem:[#allocation2 + $0x60] sm:$0xff] }
 0x357   :  { %v12203_v12 = vpop.permute.xlu1 %12202  ;;  %12487 = vrot.lane.b32.xlu0 %v12486_v52, %s12972_s26  ;;  %v5747_v26 = vld [vmem:[#allocation2 + $0x69] sm:$0xff] }
 0x358   :  { %v12204_v9 = vunpack.i.l.bf16 %v12203_v12  ;;  %v3325_v2 = vsel %vm1544_vm6, %v3293_v47, %v12199_v19  ;;  %v12205_v15 = vunpack.i.h.bf16 %v12203_v12  ;;  %v3326_v30 = vsel %vm1544_vm6, %v3294_v17, %v12200_v38 }
 0x359   :  { %12492 = vrot.lane.b32.xlu1 %v12491_v31, %s12973_s27  ;;  %v12208_v55 = vpop.permute.xlu0 %12207 }
 0x35a   :  { %v3357_v14 = vsel %vm1577_vm7, %v3325_v2, %v12204_v9  ;;  %v12209_v50 = vunpack.i.l.bf16 %v12208_v55  ;;  %v12210_v56 = vunpack.i.h.bf16 %v12208_v55  ;;  %v3358_v32 = vsel %vm1577_vm7, %v3326_v30, %v12205_v15  ;;  %v5746_v2 = vld [vmem:[#allocation2 + $0x61] sm:$0xff] }
 0x35b   :  { %v12213_v42 = vpop.permute.xlu1 %12212  ;;  %3622 = vmatmul.mubr.f32.gmra.mrb[36].mxu1 %v3357_v14  ;;  %12497 = vrot.lane.b32.xlu0 %v12486_v52, %s12968_s22  ;;  %v12526_v14 = vpack.i.bf16 %v5747_v26, %v5746_v2 }
 0x35c   :  { %v12214_v3 = vunpack.i.l.bf16 %v12213_v42  ;;  %9994 = vmatprep.mubr.msk.f32.mxu1 %vm38_vm0, %v18475_v51  ;;  %v3167_v4 = vsel %vm38_vm0, %v18476_v23, %v12209_v50  ;;  %v12215_v18 = vunpack.i.h.bf16 %v12213_v42  ;;  %v3168_v39 = vsel %vm38_vm0, %v18477_v63, %v12210_v56  ;;  %v5685_v51 = vld [vmem:[#allocation2 + $0x6a] sm:$0xff] }
 0x35d   :  { %12502 = vrot.lane.b32.xlu1 %v12491_v31, %s12970_s24  ;;  %v12218_v34 = vpop.permute.xlu0 %12217 }
 0x35e   :  { %v5397_v20 = vpop.f32.mrb[92].mxu0  ;;  %v12219_v41 = vunpack.i.l.bf16 %v12218_v34  ;;  %v3199_v37 = vsel %vm1412_vm2, %v3167_v4, %v12214_v3  ;;  %v12220_v27 = vunpack.i.h.bf16 %v12218_v34  ;;  %v3200_v38 = vsel %vm1412_vm2, %v3168_v39, %v12215_v18  ;;  %v5684_v3 = vld [vmem:[#allocation2 + $0x62] sm:$0xff] }
 0x35f   :  { %v12223_v36 = vpop.permute.xlu1 %12222  ;;  %5500 = vst.msk [vmem:[#allocation2 + $0xc1] sm:$0xff] %vm38_vm0, %v5397_v20  ;;  %3627 = vmatmul.mubr.f32.gmra.mrb[38].mxu1 %v3358_v32  ;;  %v5399_v28 = vpop.f32.mrb[93].mxu0  ;;  %12507 = vrot.lane.b32.xlu0 %v12506_v11, %s12971_s25 }
 0x360   :  { %v12224_v13 = vunpack.i.l.bf16 %v12223_v36  ;;  %9995 = vmatprep.mubr.msk.f32.mxu1 %vm38_vm0, %v14364_v25  ;;  %v3231_v62 = vsel %vm1445_vm3, %v3199_v37, %v12219_v41  ;;  %v12521_v25 = vpack.i.bf16 %v5715_v61, %v5714_v5  ;;  %v12225_v19 = vunpack.i.h.bf16 %v12223_v36  ;;  %v18478_v28 = vld [vmem:[#allocation35_spill] sm:$0xff] }
 0x361   :  { %12512 = vrot.lane.b32.xlu1 %v12491_v31, %s12967_s21  ;;  %v12228_v44 = vpop.permute.xlu0 %12227  ;;  %v3232_v31 = vsel %vm1445_vm3, %v3200_v38, %v12220_v27  ;;  %v12541_v36 = vpack.i.bf16 %v5685_v51, %v5684_v3  ;;  %v18479_v27 = vld [vmem:[#allocation36_spill] sm:$0xff] }
 0x362   :  { %v5402_v1 = vpop.f32.mrb[94].mxu0  ;;  %v12229_v21 = vunpack.i.l.bf16 %v12228_v44  ;;  %v3263_v12 = vsel %vm1478_vm4, %v3231_v62, %v12224_v13  ;;  %v12230_v47 = vunpack.i.h.bf16 %v12228_v44  ;;  %v3264_v42 = vsel %vm1478_vm4, %v3232_v31, %v12225_v19  ;;  %v5749_v19 = vld [vmem:[#allocation2 + $0x81] sm:$0xff]  ;;  %v5716_v31 = vld [vmem:[#allocation2 + $0x78] sm:$0xff] }
 0x363   :  { %v12233_v53 = vpop.permute.xlu1 %12232  ;;  %5501 = vst.msk [vmem:[#allocation2 + $0xc9] sm:$0xff] %vm38_vm0, %v5402_v1  ;;  %v5404_v52 = vpop.f32.mrb[95].mxu0  ;;  %12517 = vrot.lane.b32.xlu0 %v12506_v11, %s12969_s23 }
 0x364   :  { %v12234_v9 = vunpack.i.l.bf16 %v12233_v53  ;;  %v3295_v15 = vsel %vm1511_vm5, %v3263_v12, %v12229_v21  ;;  %v12235_v30 = vunpack.i.h.bf16 %v12233_v53  ;;  %v3296_v4 = vsel %vm1511_vm5, %v3264_v42, %v12230_v47 }
 0x365   :  { %12522 = vrot.lane.b32.xlu1 %v12521_v25, %s12972_s26  ;;  %v12238_v55 = vpop.permute.xlu0 %12237 }
 0x366   :  { %v12239_v17 = vunpack.i.l.bf16 %v12238_v55  ;;  %v3327_v0 = vsel %vm1544_vm6, %v3295_v15, %v12234_v9  ;;  %v12240_v56 = vunpack.i.h.bf16 %v12238_v55  ;;  %v3328_v13 = vsel %vm1544_vm6, %v3296_v4, %v12235_v30  ;;  %v5748_v55 = vld [vmem:[#allocation2 + $0x79] sm:$0xff] }
 0x367   :  { %v12243_v50 = vpop.permute.xlu1 %12242  ;;  %12527 = vrot.lane.b32.xlu0 %v12526_v14, %s12973_s27 }
 0x368   :  { %v12244_v6 = vunpack.i.l.bf16 %v12243_v50  ;;  %v3359_v23 = vsel %vm1577_vm7, %v3327_v0, %v12239_v17  ;;  %v12245_v34 = vunpack.i.h.bf16 %v12243_v50  ;;  %v3360_v39 = vsel %vm1577_vm7, %v3328_v13, %v12240_v56 }
 0x369   :  { %12532 = vrot.lane.b32.xlu1 %v12521_v25, %s12968_s22  ;;  %v12248_v20 = vpop.permute.xlu0 %12247  ;;  %3632 = vmatmul.mubr.f32.gmra.mrb[40].mxu1 %v3359_v23  ;;  %v5717_v25 = vld [vmem:[#allocation2 + $0x80] sm:$0xff] }
 0x36a   :  { %v12250_v32 = vunpack.i.h.bf16 %v12248_v20  ;;  %v12249_v11 = vunpack.i.l.bf16 %v12248_v20  ;;  %9996 = vmatprep.mubr.msk.f32.mxu1 %vm38_vm0, %v14370_v48  ;;  %v3169_v18 = vsel %vm38_vm0, %v18478_v28, %v12244_v6  ;;  %v3170_v62 = vsel %vm38_vm0, %v18479_v27, %v12245_v34 }
 0x36b   :  { %v12253_v41 = vpop.permute.xlu1 %12252  ;;  %12537 = vrot.lane.b32.xlu0 %v12526_v14, %s12970_s24  ;;  %v12556_v17 = vpack.i.bf16 %v5717_v25, %v5716_v31  ;;  %v12561_v6 = vpack.i.bf16 %v5749_v19, %v5748_v55 }
 0x36c   :  { %v12254_v37 = vunpack.i.l.bf16 %v12253_v41  ;;  %v3201_v61 = vsel %vm1412_vm2, %v3169_v18, %v12249_v11  ;;  %v5407_v63 = vpop.f32.mrb[96].mxu0  ;;  %v12255_v48 = vunpack.i.h.bf16 %v12253_v41  ;;  %v3202_v5 = vsel %vm1412_vm2, %v3170_v62, %v12250_v32  ;;  %v5686_v41 = vld [vmem:[#allocation2 + $0x7a] sm:$0xff] }
 0x36d   :  { %12542 = vrot.lane.b32.xlu1 %v12541_v36, %s12971_s25  ;;  %5502 = vst.msk [vmem:[#allocation2 + $0xd9] sm:$0xff] %vm38_vm0, %v5407_v63  ;;  %v12258_v44 = vpop.permute.xlu0 %12257  ;;  %3637 = vmatmul.mubr.f32.gmra.mrb[42].mxu1 %v3360_v39  ;;  %v5409_v1 = vpop.f32.mrb[97].mxu0 }
 0x36e   :  { %v12260_v21 = vunpack.i.h.bf16 %v12258_v44  ;;  %v12259_v53 = vunpack.i.l.bf16 %v12258_v44  ;;  %9997 = vmatprep.mubr.msk.f32.mxu1 %vm38_vm0, %v14454_v49  ;;  %v3233_v26 = vsel %vm1445_vm3, %v3201_v61, %v12254_v37  ;;  %v3234_v47 = vsel %vm1445_vm3, %v3202_v5, %v12255_v48  ;;  %v18480_v37 = vld [vmem:[#allocation39_spill] sm:$0xff] }
 0x36f   :  { %v12263_v52 = vpop.permute.xlu1 %12262  ;;  %12547 = vrot.lane.b32.xlu0 %v12526_v14, %s12967_s21 }
 0x370   :  { %v12264_v38 = vunpack.i.l.bf16 %v12263_v52  ;;  %v3265_v12 = vsel %vm1478_vm4, %v3233_v26, %v12259_v53  ;;  %v5412_v9 = vpop.f32.mrb[98].mxu0  ;;  %v12265_v2 = vunpack.i.h.bf16 %v12263_v52  ;;  %v3266_v50 = vsel %vm1478_vm4, %v3234_v47, %v12260_v21  ;;  %v5719_v21 = vld [vmem:[#allocation2 + $0x98] sm:$0xff] }
 0x371   :  { %12552 = vrot.lane.b32.xlu1 %v12541_v36, %s12969_s23  ;;  %5503 = vst.msk [vmem:[#allocation2 + $0xe1] sm:$0xff] %vm38_vm0, %v5412_v9  ;;  %v12268_v15 = vpop.permute.xlu0 %12267  ;;  %v5414_v49 = vpop.f32.mrb[99].mxu0  ;;  %v5687_v36 = vld [vmem:[#allocation2 + $0x82] sm:$0xff]  ;;  %v18481_v53 = vld [vmem:[#allocation40_spill] sm:$0xff] }
 0x372   :  { %v12270_v42 = vunpack.i.h.bf16 %v12268_v15  ;;  %v12269_v14 = vunpack.i.l.bf16 %v12268_v15  ;;  %v3297_v3 = vsel %vm1511_vm5, %v3265_v12, %v12264_v38  ;;  %v3298_v34 = vsel %vm1511_vm5, %v3266_v50, %v12265_v2  ;;  %v5718_v12 = vld [vmem:[#allocation2 + $0x90] sm:$0xff]  ;;  %v5751_v2 = vld [vmem:[#allocation2 + $0x99] sm:$0xff] }
 0x373   :  { %v12273_v30 = vpop.permute.xlu1 %12272  ;;  %12557 = vrot.lane.b32.xlu0 %v12556_v17, %s12972_s26  ;;  %v12576_v27 = vpack.i.bf16 %v5687_v36, %v5686_v41 }
 0x374   :  { %v12274_v0 = vunpack.i.l.bf16 %v12273_v30  ;;  %v3329_v51 = vsel %vm1544_vm6, %v3297_v3, %v12269_v14  ;;  %v12275_v56 = vunpack.i.h.bf16 %v12273_v30  ;;  %v3330_v11 = vsel %vm1544_vm6, %v3298_v34, %v12270_v42  ;;  %v5750_v14 = vld [vmem:[#allocation2 + $0x91] sm:$0xff] }
 0x375   :  { %12562 = vrot.lane.b32.xlu1 %v12561_v6, %s12973_s27  ;;  %v12278_v23 = vpop.permute.xlu0 %12277 }
 0x376   :  { %v3361_v4 = vsel %vm1577_vm7, %v3329_v51, %v12274_v0  ;;  %v12279_v20 = vunpack.i.l.bf16 %v12278_v23  ;;  %v12280_v18 = vunpack.i.h.bf16 %v12278_v23  ;;  %v3362_v39 = vsel %vm1577_vm7, %v3330_v11, %v12275_v56 }
 0x377   :  { %v12283_v32 = vpop.permute.xlu1 %12282  ;;  %3642 = vmatmul.mubr.f32.gmra.mrb[44].mxu1 %v3361_v4  ;;  %12567 = vrot.lane.b32.xlu0 %v12556_v17, %s12968_s22  ;;  %v12596_v0 = vpack.i.bf16 %v5751_v2, %v5750_v14 }
 0x378   :  { %v12284_v28 = vunpack.i.l.bf16 %v12283_v32  ;;  %9998 = vmatprep.mubr.msk.f32.mxu1 %vm38_vm0, %v14463_v43  ;;  %v3171_v13 = vsel %vm38_vm0, %v18480_v37, %v12279_v20  ;;  %v12285_v43 = vunpack.i.h.bf16 %v12283_v32  ;;  %v3172_v52 = vsel %vm38_vm0, %v18481_v53, %v12280_v18  ;;  %v5688_v20 = vld [vmem:[#allocation2 + $0x92] sm:$0xff]  ;;  %v5689_v32 = vld [vmem:[#allocation2 + $0x9a] sm:$0xff] }
 0x379   :  { %12572 = vrot.lane.b32.xlu1 %v12561_v6, %s12970_s24  ;;  %v12288_v61 = vpop.permute.xlu0 %12287 }
 0x37a   :  { %v5417_v63 = vpop.f32.mrb[100].mxu0  ;;  %v12289_v62 = vunpack.i.l.bf16 %v12288_v61  ;;  %v3203_v1 = vsel %vm1412_vm2, %v3171_v13, %v12284_v28  ;;  %v12290_v25 = vunpack.i.h.bf16 %v12288_v61  ;;  %v3204_v15 = vsel %vm1412_vm2, %v3172_v52, %v12285_v43 }
 0x37b   :  { %v12293_v48 = vpop.permute.xlu1 %12292  ;;  %5504 = vst.msk [vmem:[#allocation2 + $0xf1] sm:$0xff] %vm38_vm0, %v5417_v63  ;;  %3647 = vmatmul.mubr.f32.gmra.mrb[46].mxu1 %v3362_v39  ;;  %v5419_v44 = vpop.f32.mrb[101].mxu0  ;;  %12577 = vrot.lane.b32.xlu0 %v12576_v27, %s12971_s25  ;;  %v12611_v63 = vpack.i.bf16 %v5689_v32, %v5688_v20  ;;  %v5690_v32 = vld [vmem:[#allocation2 + $0xaa] sm:$0xff] }
 0x37c   :  { %v12294_v5 = vunpack.i.l.bf16 %v12293_v48  ;;  %9999 = vmatprep.mubr.msk.f32.mxu1 %vm38_vm0, %v18451_v24  ;;  %v3235_v26 = vsel %vm1445_vm3, %v3203_v1, %v12289_v62  ;;  %v12591_v24 = vpack.i.bf16 %v5719_v21, %v5718_v12  ;;  %v12295_v49 = vunpack.i.h.bf16 %v12293_v48 }
 0x37d   :  { %12582 = vrot.lane.b32.xlu1 %v12561_v6, %s12967_s21  ;;  %v12298_v38 = vpop.permute.xlu0 %12297  ;;  %v3236_v50 = vsel %vm1445_vm3, %v3204_v15, %v12290_v25  ;;  %v5752_v15 = vld [vmem:[#allocation2 + $0xa9] sm:$0xff] }
 0x37e   :  { %v5422_v19 = vpop.f32.mrb[102].mxu0  ;;  %v12299_v9 = vunpack.i.l.bf16 %v12298_v38  ;;  %v3267_v55 = vsel %vm1478_vm4, %v3235_v26, %v12294_v5  ;;  %v12300_v42 = vunpack.i.h.bf16 %v12298_v38  ;;  %v3268_v56 = vsel %vm1478_vm4, %v3236_v50, %v12295_v49  ;;  %v5721_v26 = vld [vmem:[#allocation2 + $0xb0] sm:$0xff] }
 0x37f   :  { %v12303_v31 = vpop.permute.xlu1 %12302  ;;  %5505 = vst.msk [vmem:[#allocation2 + $0xf9] sm:$0xff] %vm38_vm0, %v5422_v19  ;;  %v5424_v47 = vpop.f32.mrb[103].mxu0  ;;  %12587 = vrot.lane.b32.xlu0 %v12576_v27, %s12969_s23 }
 0x380   :  { %v12304_v17 = vunpack.i.l.bf16 %v12303_v31  ;;  %v3299_v30 = vsel %vm1511_vm5, %v3267_v55, %v12299_v9  ;;  %v12305_v23 = vunpack.i.h.bf16 %v12303_v31  ;;  %v3300_v36 = vsel %vm1511_vm5, %v3268_v56, %v12300_v42  ;;  %v5720_v31 = vld [vmem:[#allocation2 + $0xa8] sm:$0xff] }
 0x381   :  { %12592 = vrot.lane.b32.xlu1 %v12591_v24, %s12972_s26  ;;  %v12308_v6 = vpop.permute.xlu0 %12307  ;;  %v12626_v49 = vpack.i.bf16 %v5721_v26, %v5720_v31 }
 0x382   :  { %v12309_v3 = vunpack.i.l.bf16 %v12308_v6  ;;  %v3331_v34 = vsel %vm1544_vm6, %v3299_v30, %v12304_v17  ;;  %v12310_v11 = vunpack.i.h.bf16 %v12308_v6  ;;  %v3332_v62 = vsel %vm1544_vm6, %v3300_v36, %v12305_v23 }
 0x383   :  { %v12313_v51 = vpop.permute.xlu1 %12312  ;;  %12597 = vrot.lane.b32.xlu0 %v12596_v0, %s12973_s27 }
 0x384   :  { %v12314_v4 = vunpack.i.l.bf16 %v12313_v51  ;;  %v3363_v41 = vsel %vm1577_vm7, %v3331_v34, %v12309_v3  ;;  %v12315_v28 = vunpack.i.h.bf16 %v12313_v51  ;;  %v3364_v43 = vsel %vm1577_vm7, %v3332_v62, %v12310_v11  ;;  %v5691_v11 = vld [vmem:[#allocation2 + $0xb2] sm:$0xff] }
 0x385   :  { %12602 = vrot.lane.b32.xlu1 %v12591_v24, %s12968_s22  ;;  %v12318_v18 = vpop.permute.xlu0 %12317  ;;  %3652 = vmatmul.mubr.f32.gmra.mrb[48].mxu1 %v3363_v41 }
 0x386   :  { %v12320_v37 = vunpack.i.h.bf16 %v12318_v18  ;;  %v12319_v13 = vunpack.i.l.bf16 %v12318_v18  ;;  %10000 = vmatprep.mubr.msk.f32.mxu1 %vm38_vm0, %v18452_v45  ;;  %v3173_v39 = vsel %vm38_vm0, %v14443_v60, %v12314_v4  ;;  %v3174_v1 = vsel %vm38_vm0, %v14452_v22, %v12315_v28  ;;  %v5753_v22 = vld [vmem:[#allocation2 + $0xb1] sm:$0xff] }
 0x387   :  { %v12323_v61 = vpop.permute.xlu1 %12322  ;;  %12607 = vrot.lane.b32.xlu0 %v12596_v0, %s12970_s24  ;;  %v12631_v14 = vpack.i.bf16 %v5753_v22, %v5752_v15 }
 0x388   :  { %v12324_v27 = vunpack.i.l.bf16 %v12323_v61  ;;  %v3205_v48 = vsel %vm1412_vm2, %v3173_v39, %v12319_v13  ;;  %v5427_v44 = vpop.f32.mrb[104].mxu0  ;;  %v12325_v45 = vunpack.i.h.bf16 %v12323_v61  ;;  %v3206_v21 = vsel %vm1412_vm2, %v3174_v1, %v12320_v37 }
 0x389   :  { %12612 = vrot.lane.b32.xlu1 %v12611_v63, %s12971_s25  ;;  %5506 = vst.msk [vmem:[#allocation2 + $0x109] sm:$0xff] %vm38_vm0, %v5427_v44  ;;  %v12328_v5 = vpop.permute.xlu0 %12327  ;;  %3657 = vmatmul.mubr.f32.gmra.mrb[50].mxu1 %v3364_v43  ;;  %v5429_v60 = vpop.f32.mrb[105].mxu0  ;;  %v12646_v61 = vpack.i.bf16 %v5691_v11, %v5690_v32 }
 0x38a   :  { %v12330_v53 = vunpack.i.h.bf16 %v12328_v5  ;;  %v12329_v52 = vunpack.i.l.bf16 %v12328_v5  ;;  %10001 = vmatprep.mubr.msk.f32.mxu1 %vm38_vm0, %v18456_v16  ;;  %v3237_v38 = vsel %vm1445_vm3, %v3205_v48, %v12324_v27  ;;  %v3238_v47 = vsel %vm1445_vm3, %v3206_v21, %v12325_v45  ;;  %v5754_v5 = vld [vmem:[#allocation2 + $0xc1] sm:$0xff] }
 0x38b   :  { %v12333_v25 = vpop.permute.xlu1 %12332  ;;  %12617 = vrot.lane.b32.xlu0 %v12596_v0, %s12967_s21 }
 0x38c   :  { %v12334_v19 = vunpack.i.l.bf16 %v12333_v25  ;;  %v3269_v12 = vsel %vm1478_vm4, %v3237_v38, %v12329_v52  ;;  %v5432_v9 = vpop.f32.mrb[106].mxu0  ;;  %v12335_v24 = vunpack.i.h.bf16 %v12333_v25  ;;  %v3270_v55 = vsel %vm1478_vm4, %v3238_v47, %v12330_v53  ;;  %v5722_v52 = vld [vmem:[#allocation2 + $0xc0] sm:$0xff] }
 0x38d   :  { %12622 = vrot.lane.b32.xlu1 %v12611_v63, %s12969_s23  ;;  %5507 = vst.msk [vmem:[#allocation2 + $0x111] sm:$0xff] %vm38_vm0, %v5432_v9  ;;  %v12338_v2 = vpop.permute.xlu0 %12337  ;;  %v5434_v16 = vpop.f32.mrb[107].mxu0 }
 0x38e   :  { %v12340_v17 = vunpack.i.h.bf16 %v12338_v2  ;;  %v12339_v50 = vunpack.i.l.bf16 %v12338_v2  ;;  %v3301_v6 = vsel %vm1511_vm5, %v3269_v12, %v12334_v19  ;;  %v3302_v23 = vsel %vm1511_vm5, %v3270_v55, %v12335_v24 }
 0x38f   :  { %v12343_v42 = vpop.permute.xlu1 %12342  ;;  %12627 = vrot.lane.b32.xlu0 %v12626_v49, %s12972_s26 }
 0x390   :  { %v12344_v30 = vunpack.i.l.bf16 %v12343_v42  ;;  %v3333_v0 = vsel %vm1544_vm6, %v3301_v6, %v12339_v50  ;;  %v12345_v3 = vunpack.i.h.bf16 %v12343_v42  ;;  %v3334_v20 = vsel %vm1544_vm6, %v3302_v23, %v12340_v17  ;;  %v5692_v50 = vld [vmem:[#allocation2 + $0xc2] sm:$0xff]  ;;  %v5693_v42 = vld [vmem:[#allocation2 + $0xca] sm:$0xff] }
 0x391   :  { %12632 = vrot.lane.b32.xlu1 %v12631_v14, %s12973_s27  ;;  %v12348_v51 = vpop.permute.xlu0 %12347 }
 0x392   :  { %v3365_v56 = vsel %vm1577_vm7, %v3333_v0, %v12344_v30  ;;  %v12349_v4 = vunpack.i.l.bf16 %v12348_v51  ;;  %v12350_v36 = vunpack.i.h.bf16 %v12348_v51  ;;  %v3366_v13 = vsel %vm1577_vm7, %v3334_v20, %v12345_v3 }
 0x393   :  { %v12353_v34 = vpop.permute.xlu1 %12352  ;;  %3662 = vmatmul.mubr.f32.gmra.mrb[52].mxu1 %v3365_v56  ;;  %12637 = vrot.lane.b32.xlu0 %v12626_v49, %s12968_s22 }
 0x394   :  { %v12354_v41 = vunpack.i.l.bf16 %v12353_v34  ;;  %10002 = vmatprep.mubr.msk.f32.mxu1 %vm38_vm0, %v18457_v29  ;;  %v3175_v28 = vsel %vm38_vm0, %v14520_v40, %v12349_v4  ;;  %v5755_v29 = vld [vmem:[#allocation2 + $0xc9] sm:$0xff]  ;;  %v12355_v62 = vunpack.i.h.bf16 %v12353_v34  ;;  %v3176_v43 = vsel %vm38_vm0, %v14527_v46, %v12350_v36  ;;  %v5725_v34 = vld [vmem:[#allocation2 + $0xe0] sm:$0xff] }
 0x395   :  { %12642 = vrot.lane.b32.xlu1 %v12631_v14, %s12970_s24  ;;  %v12358_v18 = vpop.permute.xlu0 %12357  ;;  %v5723_v40 = vld [vmem:[#allocation2 + $0xc8] sm:$0xff]  ;;  %v15489_v53 = vpack.i.bf16 %v5755_v29, %v5754_v5  ;;  %v12681_v4 = vpack.i.bf16 %v5693_v42, %v5692_v50  ;;  %v2249_v36 = vld [vmem:[#allocation2 + $0x19a] sm:$0xff] }
 0x396   :  { %v5437_v37 = vpop.f32.mrb[108].mxu0  ;;  %v12359_v63 = vunpack.i.l.bf16 %v12358_v18  ;;  %v3207_v48 = vsel %vm1412_vm2, %v3175_v28, %v12354_v41  ;;  %v12360_v1 = vunpack.i.h.bf16 %v12358_v18  ;;  %v12656_v38 = vpack.i.bf16 %v5723_v40, %v5722_v52  ;;  %v5757_v41 = vld [vmem:[#allocation2 + $0xe1] sm:$0xff] }
 0x397   :  { %v12363_v39 = vpop.permute.xlu1 %12362  ;;  %5508 = vst.msk [vmem:[#allocation2 + $0x121] sm:$0xff] %vm38_vm0, %v5437_v37  ;;  %3667 = vmatmul.mubr.f32.gmra.mrb[54].mxu1 %v3366_v13  ;;  %v5439_v27 = vpop.f32.mrb[109].mxu0  ;;  %12647 = vrot.lane.b32.xlu0 %v12646_v61, %s12971_s25  ;;  %v3208_v19 = vsel %vm1412_vm2, %v3176_v43, %v12355_v62  ;;  %v5724_v37 = vld [vmem:[#allocation2 + $0xd8] sm:$0xff] }
 0x398   :  { %v12364_v44 = vunpack.i.l.bf16 %v12363_v39  ;;  %10003 = vmatprep.mubr.msk.f32.mxu1 %vm38_vm0, %v18463_v8  ;;  %v3239_v45 = vsel %vm1445_vm3, %v3207_v48, %v12359_v63  ;;  %v12365_v46 = vunpack.i.h.bf16 %v12363_v39  ;;  %v3240_v9 = vsel %vm1445_vm3, %v3208_v19, %v12360_v1  ;;  %v5756_v39 = vld [vmem:[#allocation2 + $0xd9] sm:$0xff] }
 0x399   :  { %12652 = vrot.lane.b32.xlu1 %v12631_v14, %s12967_s21  ;;  %v12368_v60 = vpop.permute.xlu0 %12367  ;;  %v12686_v27 = vpack.i.bf16 %v5725_v34, %v5724_v37  ;;  %v15519_v40 = vpack.i.bf16 %v5757_v41, %v5756_v39  ;;  %v5519_v37 = vld [vmem:[#allocation2 + $0x8] sm:$0xff] }
 0x39a   :  { %v5442_v21 = vpop.f32.mrb[110].mxu0  ;;  %v12369_v25 = vunpack.i.l.bf16 %v12368_v60  ;;  %v3271_v22 = vsel %vm1478_vm4, %v3239_v45, %v12364_v44  ;;  %v12370_v31 = vunpack.i.h.bf16 %v12368_v60  ;;  %v3272_v15 = vsel %vm1478_vm4, %v3240_v9, %v12365_v46 }
 0x39b   :  { %v12373_v26 = vpop.permute.xlu1 %12372  ;;  %5509 = vst.msk [vmem:[#allocation2 + $0x129] sm:$0xff] %vm38_vm0, %v5442_v21  ;;  %v5444_v8 = vpop.f32.mrb[111].mxu0  ;;  %12662 = vrot.lane.b32.xlu0 %v15489_v53, %s12973_s27 }
 0x39c   :  { %v12374_v12 = vunpack.i.l.bf16 %v12373_v26  ;;  %v3303_v47 = vsel %vm1511_vm5, %v3271_v22, %v12369_v25  ;;  %v12375_v49 = vunpack.i.h.bf16 %v12373_v26  ;;  %v3304_v6 = vsel %vm1511_vm5, %v3272_v15, %v12370_v31  ;;  %v5694_v15 = vld [vmem:[#allocation2 + $0xda] sm:$0xff] }
 0x39d   :  { %12657 = vrot.lane.b32.xlu1 %v12656_v38, %s12972_s26  ;;  %v12378_v24 = vpop.permute.xlu0 %12377 }
 0x39e   :  { %v12379_v2 = vunpack.i.l.bf16 %v12378_v24  ;;  %v3335_v17 = vsel %vm1544_vm6, %v3303_v47, %v12374_v12  ;;  %v12380_v14 = vunpack.i.h.bf16 %v12378_v24  ;;  %v3336_v11 = vsel %vm1544_vm6, %v3304_v6, %v12375_v49  ;;  %v2250_v12 = vld [vmem:[#allocation2 + $0x1a2] sm:$0xff] }
 0x39f   :  { %v12383_v16 = vpop.permute.xlu1 %12382  ;;  %12667 = vrot.lane.b32.xlu0 %v12646_v61, %s12969_s23  ;;  %v5695_v49 = vld [vmem:[#allocation2 + $0xe2] sm:$0xff] }
 0x3a0   :  { %v12384_v55 = vunpack.i.l.bf16 %v12383_v16  ;;  %v3367_v30 = vsel %vm1577_vm7, %v3335_v17, %v12379_v2  ;;  %v12385_v0 = vunpack.i.h.bf16 %v12383_v16  ;;  %v12716_v42 = vpack.i.bf16 %v5695_v49, %v5694_v15  ;;  %v5775_v15 = vld [vmem:[#allocation2 + $0x3a] sm:$0xff]  ;;  %v5760_v49 = vld [vmem:[#allocation2 + $0x109] sm:$0xff] }
 0x3a1   :  { %12672 = vrot.lane.b32.xlu1 %v12656_v38, %s12968_s22  ;;  %v12388_v3 = vpop.permute.xlu0 %12387  ;;  %3672 = vmatmul.mubr.f32.gmra.mrb[56].mxu1 %v3367_v30 }
 0x3a2   :  { %v12390_v51 = vunpack.i.h.bf16 %v12388_v3  ;;  %v12389_v56 = vunpack.i.l.bf16 %v12388_v3  ;;  %10004 = vmatprep.mubr.msk.f32.mxu1 %vm38_vm0, %v18464_v54  ;;  %v3177_v20 = vsel %vm38_vm0, %v18453_v35, %v12384_v55  ;;  %v3368_v54 = vsel %vm1577_vm7, %v3336_v11, %v12380_v14  ;;  %v5726_v14 = vld [vmem:[#allocation2 + $0xf0] sm:$0xff] }
 0x3a3   :  { %v12393_v23 = vpop.permute.xlu1 %12392  ;;  %12677 = vrot.lane.b32.xlu0 %v15489_v53, %s12970_s24  ;;  %v3178_v13 = vsel %vm38_vm0, %v18454_v59, %v12385_v0  ;;  %v5774_v3 = vld [vmem:[#allocation2 + $0x32] sm:$0xff] }
 0x3a4   :  { %v12394_v32 = vunpack.i.l.bf16 %v12393_v23  ;;  %v3209_v28 = vsel %vm1412_vm2, %v3177_v20, %v12389_v56  ;;  %v5447_v18 = vpop.f32.mrb[112].mxu0  ;;  %v12395_v35 = vunpack.i.h.bf16 %v12393_v23  ;;  %v3210_v29 = vsel %vm1412_vm2, %v3178_v13, %v12390_v51  ;;  %v5759_v56 = vld [vmem:[#allocation2 + $0xf9] sm:$0xff] }
 0x3a5   :  { %12682 = vrot.lane.b32.xlu1 %v12681_v4, %s12971_s25  ;;  %5510 = vst.msk [vmem:[#allocation2 + $0x139] sm:$0xff] %vm38_vm0, %v5447_v18  ;;  %v12398_v61 = vpop.permute.xlu0 %12397  ;;  %3677 = vmatmul.mubr.f32.gmra.mrb[58].mxu1 %v3368_v54  ;;  %v5449_v63 = vpop.f32.mrb[113].mxu0  ;;  %v5518_v23 = vld [vmem:[#allocation2] sm:$0xff] }
 0x3a6   :  { %v12400_v62 = vunpack.i.h.bf16 %v12398_v61  ;;  %v12399_v48 = vunpack.i.l.bf16 %v12398_v61  ;;  %10005 = vmatprep.mubr.msk.f32.mxu1 %vm38_vm0, %v2249_v36  ;;  %v3241_v43 = vsel %vm1445_vm3, %v3209_v28, %v12394_v32  ;;  %v3242_v5 = vsel %vm1445_vm3, %v3210_v29, %v12395_v35 }
 0x3a7   :  { %v12403_v44 = vpop.permute.xlu1 %12402  ;;  %12687 = vrot.lane.b32.xlu0 %v12686_v27, %s12972_s26 }
 0x3a8   :  { %v12404_v59 = vunpack.i.l.bf16 %v12403_v44  ;;  %v3273_v1 = vsel %vm1478_vm4, %v3241_v43, %v12399_v48  ;;  %v5452_v45 = vpop.f32.mrb[114].mxu0  ;;  %v12405_v60 = vunpack.i.h.bf16 %v12403_v44  ;;  %v3274_v25 = vsel %vm1478_vm4, %v3242_v5, %v12400_v62  ;;  %v5696_v44 = vld [vmem:[#allocation2 + $0xf2] sm:$0xff]  ;;  %v5697_v43 = vld [vmem:[#allocation2 + $0xfa] sm:$0xff] }
 0x3a9   :  { %12692 = vrot.lane.b32.xlu1 %v15519_v40, %s12973_s27  ;;  %5511 = vst.msk [vmem:[#allocation2 + $0x141] sm:$0xff] %vm38_vm0, %v5452_v45  ;;  %v12408_v21 = vpop.permute.xlu0 %12407  ;;  %v5454_v52 = vpop.f32.mrb[115].mxu0 }
 0x3aa   :  { %v12410_v26 = vunpack.i.h.bf16 %v12408_v21  ;;  %v12409_v8 = vunpack.i.l.bf16 %v12408_v21  ;;  %v3305_v46 = vsel %vm1511_vm5, %v3273_v1, %v12404_v59  ;;  %v3306_v24 = vsel %vm1511_vm5, %v3274_v25, %v12405_v60 }
 0x3ab   :  { %v12413_v38 = vpop.permute.xlu1 %12412  ;;  %12697 = vrot.lane.b32.xlu0 %v15489_v53, %s12967_s21  ;;  %v5727_v53 = vld [vmem:[#allocation2 + $0xf8] sm:$0xff]  ;;  %v12751_v60 = vpack.i.bf16 %v5697_v43, %v5696_v44  ;;  %v5698_v43 = vld [vmem:[#allocation2 + $0x10a] sm:$0xff] }
 0x3ac   :  { %v12414_v19 = vunpack.i.l.bf16 %v12413_v38  ;;  %v3337_v22 = vsel %vm1544_vm6, %v3305_v46, %v12409_v8  ;;  %v12415_v9 = vunpack.i.h.bf16 %v12413_v38  ;;  %v3338_v16 = vsel %vm1544_vm6, %v3306_v24, %v12410_v26  ;;  %v5729_v38 = vld [vmem:[#allocation2 + $0x110] sm:$0xff] }
 0x3ad   :  { %12702 = vrot.lane.b32.xlu1 %v12681_v4, %s12969_s23  ;;  %v12418_v31 = vpop.permute.xlu0 %12417  ;;  %v12721_v51 = vpack.i.bf16 %v5727_v53, %v5726_v14  ;;  %v5758_v4 = vld [vmem:[#allocation2 + $0xf1] sm:$0xff] }
 0x3ae   :  { %v3369_v47 = vsel %vm1577_vm7, %v3337_v22, %v12414_v19  ;;  %v3370_v50 = vsel %vm1577_vm7, %v3338_v16, %v12415_v9  ;;  %v12419_v30 = vunpack.i.l.bf16 %v12418_v31  ;;  %v15549_v11 = vpack.i.bf16 %v5759_v56, %v5758_v4  ;;  %v5761_v22 = vld [vmem:[#allocation2 + $0x111] sm:$0xff] }
 0x3af   :  { %v12423_v2 = vpop.permute.xlu1 %12422  ;;  %3682 = vmatmul.mubr.f32.gmra.mrb[60].mxu1 %v3369_v47  ;;  %12707 = vrot.lane.b32.xlu0 %v12686_v27, %s12968_s22  ;;  %v12420_v41 = vunpack.i.h.bf16 %v12418_v31  ;;  %v5728_v47 = vld [vmem:[#allocation2 + $0x108] sm:$0xff] }
 0x3b0   :  { %10006 = vmatprep.mubr.msk.f32.mxu1 %vm38_vm0, %v2250_v12  ;;  %v12424_v34 = vunpack.i.l.bf16 %v12423_v2  ;;  %v6702_v36 = vsel %vm38_vm0, %v5518_v23, %v12419_v30  ;;  %v12425_v13 = vunpack.i.h.bf16 %v12423_v2  ;;  %v12756_v53 = vpack.i.bf16 %v5729_v38, %v5728_v47  ;;  %v5763_v47 = vld [vmem:[#allocation2 + $0x129] sm:$0xff] }
 0x3b1   :  { %12712 = vrot.lane.b32.xlu1 %v15519_v40, %s12970_s24  ;;  %v12428_v55 = vpop.permute.xlu0 %12427  ;;  %v6703_v39 = vsel %vm38_vm0, %v5519_v37, %v12420_v41 }
 0x3b2   :  { %v5457_v17 = vpop.f32.mrb[116].mxu0  ;;  %v12429_v28 = vunpack.i.l.bf16 %v12428_v55  ;;  %v6734_v35 = vsel %vm1412_vm2, %v6702_v36, %v12424_v34  ;;  %v12430_v27 = vunpack.i.h.bf16 %v12428_v55  ;;  %v5776_v36 = vld [vmem:[#allocation2 + $0x4a] sm:$0xff] }
 0x3b3   :  { %v15543_v6 = vpop.permute.xlu1 %12432  ;;  %5512 = vst.msk [vmem:[#allocation2 + $0x151] sm:$0xff] %vm38_vm0, %v5457_v17  ;;  %3687 = vmatmul.mubr.f32.gmra.mrb[62].mxu1 %v3370_v50  ;;  %v5459_v0 = vpop.f32.mrb[117].mxu0  ;;  %12717 = vrot.lane.b32.xlu0 %v12716_v42, %s12971_s25 }
 0x3b4   :  { %10071 = vmatprep.mubr.msk.f32.mxu1 %vm38_vm0, %v5774_v3  ;;  %v12434_v61 = vunpack.i.l.bf16 %v15543_v6  ;;  %v6766_v29 = vsel %vm1445_vm3, %v6734_v35, %v12429_v28  ;;  %v12435_v1 = vunpack.i.h.bf16 %v15543_v6  ;;  %v5520_v3 = vld [vmem:[#allocation2 + $0x18] sm:$0xff]  ;;  %v5521_v28 = vld [vmem:[#allocation2 + $0x20] sm:$0xff] }
 0x3b5   :  { %12722 = vrot.lane.b32.xlu1 %v12721_v51, %s12972_s26  ;;  %v12438_v20 = vpop.permute.xlu0 %12437 }
 0x3b6   :  { %v5462_v32 = vpop.f32.mrb[118].mxu0  ;;  %v12439_v62 = vunpack.i.l.bf16 %v12438_v20  ;;  %v6798_v45 = vsel %vm1478_vm4, %v6766_v29, %v12434_v61  ;;  %v12440_v52 = vunpack.i.h.bf16 %v12438_v20 }
 0x3b7   :  { %v15552_v18 = vpop.permute.xlu1 %12442  ;;  %5513 = vst.msk [vmem:[#allocation2 + $0x159] sm:$0xff] %vm38_vm0, %v5462_v32  ;;  %v5464_v54 = vpop.f32.mrb[119].mxu0  ;;  %12727 = vrot.lane.b32.xlu0 %v15549_v11, %s12973_s27 }
 0x3b8   :  { %v6830_v25 = vsel %vm1511_vm5, %v6798_v45, %v12439_v62  ;;  %v12444_v24 = vunpack.i.l.bf16 %v15552_v18  ;;  %v12445_v30 = vunpack.i.h.bf16 %v15552_v18 }
 0x3b9   :  { %12732 = vrot.lane.b32.xlu1 %v15519_v40, %s12967_s21  ;;  %v15561_v63 = vpop.permute.xlu0 %12447  ;;  %v6735_v40 = vsel %vm1412_vm2, %v6703_v39, %v12425_v13 }
 0x3ba   :  { %v6767_v21 = vsel %vm1445_vm3, %v6735_v40, %v12430_v27  ;;  %v12449_v17 = vunpack.i.l.bf16 %v15561_v63  ;;  %v6704_v34 = vsel %vm38_vm0, %v5520_v3, %v12444_v24  ;;  %v6705_v13 = vsel %vm38_vm0, %v5521_v28, %v12445_v30  ;;  %v5522_v30 = vld [vmem:[#allocation2 + $0x30] sm:$0xff] }
 0x3bb   :  { %v12453_v48 = vpop.permute.xlu1 %12452  ;;  %12737 = vrot.lane.b32.xlu0 %v12716_v42, %s12969_s23  ;;  %v6799_v55 = vsel %vm1478_vm4, %v6767_v21, %v12435_v1  ;;  %v15584_v42 = vpack.i.bf16 %v5761_v22, %v5760_v49  ;;  %v5731_v21 = vld [vmem:[#allocation2 + $0x128] sm:$0xff]  ;;  %v5777_v49 = vld [vmem:[#allocation2 + $0x52] sm:$0xff] }
 0x3bc   :  { %v12454_v59 = vunpack.i.l.bf16 %v12453_v48  ;;  %v12455_v19 = vunpack.i.h.bf16 %v12453_v48  ;;  %v6831_v14 = vsel %vm1511_vm5, %v6799_v55, %v12440_v52  ;;  %v6736_v18 = vsel %vm1412_vm2, %v6704_v34, %v12449_v17  ;;  %v5762_v17 = vld [vmem:[#allocation2 + $0x121] sm:$0xff] }
 0x3bd   :  { %12742 = vrot.lane.b32.xlu1 %v12721_v51, %s12968_s22  ;;  %v12458_v5 = vpop.permute.xlu0 %12457  ;;  %v12450_v51 = vunpack.i.h.bf16 %v15561_v63 }
 0x3be   :  { %v12459_v26 = vunpack.i.l.bf16 %v12458_v5  ;;  %v6862_v46 = vsel %vm1544_vm6, %v6830_v25, %v12454_v59  ;;  %v12460_v12 = vunpack.i.h.bf16 %v12458_v5  ;;  %v6863_v0 = vsel %vm1544_vm6, %v6831_v14, %v12455_v19  ;;  %v5699_v59 = vld [vmem:[#allocation2 + $0x112] sm:$0xff] }
 0x3bf   :  { %v12463_v8 = vpop.permute.xlu1 %12462  ;;  %12747 = vrot.lane.b32.xlu0 %v15549_v11, %s12970_s24  ;;  %v6737_v63 = vsel %vm1412_vm2, %v6705_v13, %v12450_v51  ;;  %v15636_v14 = vpack.i.bf16 %v5763_v47, %v5762_v17 }
 0x3c0   :  { %v5467_v9 = vpop.f32.mrb[120].mxu0  ;;  %v6894_v31 = vsel %vm1577_vm7, %v6862_v46, %v12459_v26  ;;  %v12464_v6 = vunpack.i.l.bf16 %v12463_v8  ;;  %v6895_v4 = vsel %vm1577_vm7, %v6863_v0, %v12460_v12  ;;  %v12465_v20 = vunpack.i.h.bf16 %v12463_v8 }
 0x3c1   :  { %12752 = vrot.lane.b32.xlu1 %v12751_v60, %s12971_s25  ;;  %5514 = vst.msk [vmem:[#allocation2 + $0x169] sm:$0xff] %vm38_vm0, %v5467_v9  ;;  %7087 = vmatmul.mubr.f32.vlgmr.msra.gmra.mrb[64].mxu1 %v6894_v31  ;;  %v12468_v2 = vpop.permute.xlu0 %12467  ;;  %v5469_v16 = vpop.f32.mrb[121].mxu0  ;;  %v12786_v8 = vpack.i.bf16 %v5699_v59, %v5698_v43  ;;  %v5730_v9 = vld [vmem:[#allocation2 + $0x120] sm:$0xff] }
 0x3c2   :  { %10072 = vmatprep.mubr.msk.f32.mxu1 %vm38_vm0, %v5775_v15  ;;  %v12469_v56 = vunpack.i.l.bf16 %v12468_v2  ;;  %v12470_v54 = vunpack.i.h.bf16 %v12468_v2  ;;  %v6768_v35 = vsel %vm1445_vm3, %v6736_v18, %v12464_v6  ;;  %v6769_v29 = vsel %vm1445_vm3, %v6737_v63, %v12465_v20 }
 0x3c3   :  { %v15581_v50 = vpop.permute.xlu1 %12472  ;;  %12757 = vrot.lane.b32.xlu0 %v12756_v53, %s12972_s26 }
 0x3c4   :  { %v5472_v23 = vpop.f32.mrb[122].mxu0  ;;  %v12474_v61 = vunpack.i.l.bf16 %v15581_v50  ;;  %v6800_v39 = vsel %vm1478_vm4, %v6768_v35, %v12469_v56  ;;  %v12475_v62 = vunpack.i.h.bf16 %v15581_v50  ;;  %v6801_v40 = vsel %vm1478_vm4, %v6769_v29, %v12470_v54 }
 0x3c5   :  { %12762 = vrot.lane.b32.xlu1 %v15584_v42, %s12973_s27  ;;  %5515 = vst.msk [vmem:[#allocation2 + $0x171] sm:$0xff] %vm38_vm0, %v5472_v23  ;;  %7092 = vmatmul.mubr.f32.gmra.mrb[66].mxu1 %v6895_v4  ;;  %v15596_v32 = vpop.permute.xlu0 %12477  ;;  %v5474_v41 = vpop.f32.mrb[123].mxu0 }
 0x3c6   :  { %10073 = vmatprep.mubr.msk.f32.mxu1 %vm38_vm0, %v5776_v36  ;;  %v6833_v31 = vsel %vm1511_vm5, %v6801_v40, %v12475_v62  ;;  %v12479_v24 = vunpack.i.l.bf16 %v15596_v32  ;;  %v12480_v6 = vunpack.i.h.bf16 %v15596_v32  ;;  %v5778_v41 = vld [vmem:[#allocation2 + $0x62] sm:$0xff]  ;;  %v5523_v36 = vld [vmem:[#allocation2 + $0x38] sm:$0xff] }
 0x3c7   :  { %v15599_v37 = vpop.permute.xlu1 %12482  ;;  %12767 = vrot.lane.b32.xlu0 %v15549_v11, %s12967_s21 }
 0x3c8   :  { %v5477_v27 = vpop.f32.mrb[124].mxu0  ;;  %v6706_v23 = vsel %vm38_vm0, %v5522_v30, %v12479_v24  ;;  %v12485_v32 = vunpack.i.h.bf16 %v15599_v37  ;;  %v6707_v28 = vsel %vm38_vm0, %v5523_v36, %v12480_v6  ;;  %v5779_v24 = vld [vmem:[#allocation2 + $0x6a] sm:$0xff]  ;;  %v5780_v36 = vld [vmem:[#allocation2 + $0x7a] sm:$0xff] }
 0x3c9   :  { %12772 = vrot.lane.b32.xlu1 %v12751_v60, %s12969_s23  ;;  %5516 = vst.msk [vmem:[#allocation2 + $0x181] sm:$0xff] %vm38_vm0, %v5477_v27  ;;  %v12488_v48 = vpop.permute.xlu0 %12487  ;;  %v5479_v44 = vpop.f32.mrb[125].mxu0  ;;  %v6832_v60 = vsel %vm1511_vm5, %v6800_v39, %v12474_v61  ;;  %v15661_v27 = vld [vmem:[#allocation2 + $0x122] sm:$0xff] }
 0x3ca   :  { %v12490_v1 = vunpack.i.h.bf16 %v12488_v48  ;;  %v12489_v45 = vunpack.i.l.bf16 %v12488_v48 }
 0x3cb   :  { %v12493_v11 = vpop.permute.xlu1 %12492  ;;  %12777 = vrot.lane.b32.xlu0 %v12756_v53, %s12968_s22  ;;  %v12791_v53 = vpack.i.bf16 %v5731_v21, %v5730_v9 }
 0x3cc   :  { %v12494_v5 = vunpack.i.l.bf16 %v12493_v11  ;;  %v15618_v52 = vpop.f32.mrb[8].mxu1  ;;  %v6864_v26 = vsel %vm1544_vm6, %v6832_v60, %v12489_v45  ;;  %v12495_v38 = vunpack.i.h.bf16 %v12493_v11  ;;  %v6865_v55 = vsel %vm1544_vm6, %v6833_v31, %v12490_v1 }
 0x3cd   :  { %12782 = vrot.lane.b32.xlu1 %v15584_v42, %s12970_s24  ;;  %v5482_v25 = vpop.f32.mrb[126].mxu0  ;;  %v7255_v19 = vsel %vm7247_vm8, %v15618_v52, 0.0  ;;  %v3555_v46 = vpop.f32.mrb[9].mxu1 }
 0x3ce   :  { %5517 = vst.msk [vmem:[#allocation2 + $0x189] sm:$0xff] %vm38_vm0, %v5482_v25  ;;  %v12498_v22 = vpop.permute.xlu0 %12497  ;;  %v6896_v12 = vsel %vm1577_vm7, %v6864_v26, %v12494_v5  ;;  %v7256_v2 = vadd.f32 %v7255_v19, %v15157_v10  ;;  %v5484_v15 = vpop.f32.mrb[127].mxu0  ;;  %v12484_v10 = vunpack.i.l.bf16 %v15599_v37  ;;  %v6897_v56 = vsel %vm1577_vm7, %v6865_v55, %v12495_v38  ;;  %v5701_v37 = vld [vmem:[#allocation2 + $0x12a] sm:$0xff]  ;;  %v5733_v25 = vld [vmem:[#allocation2 + $0x140] sm:$0xff] }
 0x3cf   :  { %v15628_v16 = vpop.permute.xlu1 %12502  ;;  %7097 = vmatmul.mubr.f32.gmra.mrb[68].mxu1 %v6896_v12  ;;  %12787 = vrot.lane.b32.xlu0 %v12786_v8, %s12971_s25  ;;  %v12499_v4 = vunpack.i.l.bf16 %v12498_v22  ;;  %v12500_v13 = vunpack.i.h.bf16 %v12498_v22  ;;  %v12821_v59 = vpack.i.bf16 %v5701_v37, %v15661_v27  ;;  %v5765_v19 = vld [vmem:[#allocation2 + $0x141] sm:$0xff]  ;;  %v5732_v12 = vld [vmem:[#allocation2 + $0x138] sm:$0xff] }
 0x3d0   :  { %10074 = vmatprep.mubr.msk.f32.mxu1 %vm38_vm0, %v5777_v49  ;;  %v15634_v50 = vpop.f32.mrb[10].mxu1  ;;  %v12504_v18 = vunpack.i.l.bf16 %v15628_v16  ;;  %v6738_v54 = vsel %vm1412_vm2, %v6706_v23, %v12484_v10  ;;  %v12505_v62 = vunpack.i.h.bf16 %v15628_v16  ;;  %v12826_v16 = vpack.i.bf16 %v5733_v25, %v5732_v12 }
 0x3d1   :  { %12792 = vrot.lane.b32.xlu1 %v12791_v53, %s12972_s26  ;;  %v7257_v0 = vsel %vm7247_vm8, %v15634_v50, 0.0  ;;  %v3560_v3 = vpop.f32.mrb[11].mxu1  ;;  %v6770_v61 = vsel %vm1445_vm3, %v6738_v54, %v12499_v4 }
 0x3d2   :  { %v15642_v51 = vpop.permute.xlu0 %12507  ;;  %v7258_v34 = vadd.f32 %v7257_v0, %v7256_v2  ;;  %v6802_v40 = vsel %vm1478_vm4, %v6770_v61, %v12504_v18  ;;  %v5764_v2 = vld [vmem:[#allocation2 + $0x139] sm:$0xff] }
 0x3d3   :  { %v15646_v20 = vpop.permute.xlu1 %12512  ;;  %7102 = vmatmul.mubr.f32.gmra.mrb[70].mxu1 %v6897_v56  ;;  %12797 = vrot.lane.b32.xlu0 %v15636_v14, %s12973_s27  ;;  %v12509_v63 = vunpack.i.l.bf16 %v15642_v51  ;;  %v12510_v11 = vunpack.i.h.bf16 %v15642_v51  ;;  %v15689_v10 = vpack.i.bf16 %v5765_v19, %v5764_v2  ;;  %v5524_v56 = vld [vmem:[#allocation2 + $0x48] sm:$0xff] }
 0x3d4   :  { %10075 = vmatprep.mubr.msk.f32.mxu1 %vm38_vm0, %v5778_v41  ;;  %v12514_v9 = vunpack.i.l.bf16 %v15646_v20  ;;  %v12515_v6 = vunpack.i.h.bf16 %v15646_v20 }
 0x3d5   :  { %12802 = vrot.lane.b32.xlu1 %v15584_v42, %s12967_s21  ;;  %v6739_v42 = vsel %vm1412_vm2, %v6707_v28, %v12485_v32  ;;  %v6834_v21 = vsel %vm1511_vm5, %v6802_v40, %v12509_v63  ;;  %v5525_v28 = vld [vmem:[#allocation2 + $0x50] sm:$0xff] }
 0x3d6   :  { %v15657_v35 = vpop.permute.xlu0 %12517  ;;  %v6771_v48 = vsel %vm1445_vm3, %v6739_v42, %v12500_v13  ;;  %v6708_v41 = vsel %vm38_vm0, %v5524_v56, %v12514_v9  ;;  %v5767_v9 = vld [vmem:[#allocation2 + $0x159] sm:$0xff] }
 0x3d7   :  { %v12523_v39 = vpop.permute.xlu1 %12522  ;;  %12807 = vrot.lane.b32.xlu0 %v12786_v8, %s12969_s23  ;;  %v6803_v15 = vsel %vm1478_vm4, %v6771_v48, %v12505_v62  ;;  %v12519_v49 = vunpack.i.l.bf16 %v15657_v35  ;;  %v12520_v23 = vunpack.i.h.bf16 %v15657_v35  ;;  %v6709_v35 = vsel %vm38_vm0, %v5525_v28, %v12515_v6  ;;  %v15714_v48 = vld [vmem:[#allocation2 + $0x13a] sm:$0xff]  ;;  %v5527_v28 = vld [vmem:[#allocation2 + $0x68] sm:$0xff] }
 0x3d8   :  { %v12524_v29 = vunpack.i.l.bf16 %v12523_v39  ;;  %v12525_v26 = vunpack.i.h.bf16 %v12523_v39  ;;  %v6835_v30 = vsel %vm1511_vm5, %v6803_v15, %v12510_v11  ;;  %v5526_v6 = vld [vmem:[#allocation2 + $0x60] sm:$0xff] }
 0x3d9   :  { %12812 = vrot.lane.b32.xlu1 %v12791_v53, %s12968_s22  ;;  %v6740_v18 = vsel %vm1412_vm2, %v6708_v41, %v12519_v49  ;;  %v6741_v39 = vsel %vm1412_vm2, %v6709_v35, %v12520_v23 }
 0x3da   :  { %v15668_v44 = vpop.f32.mrb[12].mxu1  ;;  %v12528_v43 = vpop.permute.xlu0 %12527  ;;  %v6866_v38 = vsel %vm1544_vm6, %v6834_v21, %v12524_v29  ;;  %v6867_v51 = vsel %vm1544_vm6, %v6835_v30, %v12525_v26 }
 0x3db   :  { %v7259_v1 = vsel %vm7247_vm8, %v15668_v44, 0.0  ;;  %v12529_v45 = vunpack.i.l.bf16 %v12528_v43  ;;  %v12533_v5 = vpop.permute.xlu1 %12532  ;;  %v3565_v60 = vpop.f32.mrb[13].mxu1  ;;  %12817 = vrot.lane.b32.xlu0 %v15636_v14, %s12970_s24  ;;  %v12530_v46 = vunpack.i.h.bf16 %v12528_v43  ;;  %v15716_v43 = vld [vmem:[#allocation2 + $0x142] sm:$0xff] }
 0x3dc   :  { %v7260_v8 = vadd.f32 %v7259_v1, %v7258_v34  ;;  %v12534_v0 = vunpack.i.l.bf16 %v12533_v5  ;;  %v12535_v32 = vunpack.i.h.bf16 %v12533_v5  ;;  %v5735_v60 = vld [vmem:[#allocation2 + $0x158] sm:$0xff]  ;;  %v12856_v25 = vpack.i.bf16 %v15716_v43, %v15714_v48 }
 0x3dd   :  { %12822 = vrot.lane.b32.xlu1 %v12821_v59, %s12971_s25  ;;  %v6898_v22 = vsel %vm1577_vm7, %v6866_v38, %v12529_v45  ;;  %v6899_v34 = vsel %vm1577_vm7, %v6867_v51, %v12530_v46 }
 0x3de   :  { %v15682_v31 = vpop.f32.mrb[14].mxu1  ;;  %7107 = vmatmul.mubr.f32.gmra.mrb[72].mxu1 %v6898_v22  ;;  %v12538_v47 = vpop.permute.xlu0 %12537  ;;  %v6772_v61 = vsel %vm1445_vm3, %v6740_v18, %v12534_v0  ;;  %v6773_v29 = vsel %vm1445_vm3, %v6741_v39, %v12535_v32  ;;  %v5734_v22 = vld [vmem:[#allocation2 + $0x150] sm:$0xff] }
 0x3df   :  { %v7261_v53 = vsel %vm7247_vm8, %v15682_v31, 0.0  ;;  %v12543_v55 = vpop.permute.xlu1 %12542  ;;  %v3570_v17 = vpop.f32.mrb[15].mxu1  ;;  %10076 = vmatprep.mubr.msk.f32.mxu1 %vm38_vm0, %v5779_v24  ;;  %12827 = vrot.lane.b32.xlu0 %v12826_v16, %s12972_s26  ;;  %v12539_v4 = vunpack.i.l.bf16 %v12538_v47  ;;  %v12540_v54 = vunpack.i.h.bf16 %v12538_v47  ;;  %v12861_v15 = vpack.i.bf16 %v5735_v60, %v5734_v22 }
 0x3e0   :  { %v7262_v3 = vadd.f32 %v7261_v53, %v7260_v8  ;;  %v12544_v63 = vunpack.i.l.bf16 %v12543_v55  ;;  %v12545_v42 = vunpack.i.h.bf16 %v12543_v55  ;;  %v5766_v53 = vld [vmem:[#allocation2 + $0x151] sm:$0xff] }
 0x3e1   :  { %12832 = vrot.lane.b32.xlu1 %v15689_v10, %s12973_s27  ;;  %v6804_v37 = vsel %vm1478_vm4, %v6772_v61, %v12539_v4  ;;  %v6805_v40 = vsel %vm1478_vm4, %v6773_v29, %v12540_v54  ;;  %v15741_v17 = vpack.i.bf16 %v5767_v9, %v5766_v53  ;;  %v5769_v9 = vld [vmem:[#allocation2 + $0x171] sm:$0xff]  ;;  %v5783_v53 = vld [vmem:[#allocation2 + $0x9a] sm:$0xff] }
 0x3e2   :  { %7112 = vmatmul.mubr.f32.gmra.mrb[74].mxu1 %v6899_v34  ;;  %v15700_v20 = vpop.permute.xlu0 %12547  ;;  %v6836_v5 = vsel %vm1511_vm5, %v6804_v37, %v12544_v63  ;;  %v6837_v12 = vsel %vm1511_vm5, %v6805_v40, %v12545_v42  ;;  %v15766_v42 = vld [vmem:[#allocation2 + $0x152] sm:$0xff] }
 0x3e3   :  { %v15703_v13 = vpop.permute.xlu1 %12552  ;;  %10077 = vmatprep.mubr.msk.f32.mxu1 %vm38_vm0, %v5780_v36  ;;  %12837 = vrot.lane.b32.xlu0 %v15636_v14, %s12967_s21  ;;  %v12549_v47 = vunpack.i.l.bf16 %v15700_v20  ;;  %v12550_v0 = vunpack.i.h.bf16 %v15700_v20  ;;  %v5782_v36 = vld [vmem:[#allocation2 + $0x92] sm:$0xff] }
 0x3e4   :  { %v12554_v30 = vunpack.i.l.bf16 %v15703_v13  ;;  %v12555_v20 = vunpack.i.h.bf16 %v15703_v13  ;;  %v15768_v13 = vld [vmem:[#allocation2 + $0x15a] sm:$0xff] }
 0x3e5   :  { %12842 = vrot.lane.b32.xlu1 %v12821_v59, %s12969_s23  ;;  %v6710_v4 = vsel %vm38_vm0, %v5526_v6, %v12549_v47  ;;  %v6711_v18 = vsel %vm38_vm0, %v5527_v28, %v12550_v0 }
 0x3e6   :  { %v12558_v62 = vpop.permute.xlu0 %12557  ;;  %v6742_v35 = vsel %vm1412_vm2, %v6710_v4, %v12554_v30  ;;  %v5768_v30 = vld [vmem:[#allocation2 + $0x169] sm:$0xff] }
 0x3e7   :  { %v12563_v11 = vpop.permute.xlu1 %12562  ;;  %v12560_v1 = vunpack.i.h.bf16 %v12558_v62  ;;  %v12559_v45 = vunpack.i.l.bf16 %v12558_v62  ;;  %12847 = vrot.lane.b32.xlu0 %v12826_v16, %s12968_s22  ;;  %v5781_v16 = vld [vmem:[#allocation2 + $0x82] sm:$0xff]  ;;  %v15797_v4 = vpack.i.bf16 %v5769_v9, %v5768_v30 }
 0x3e8   :  { %v12564_v14 = vunpack.i.l.bf16 %v12563_v11  ;;  %v15723_v59 = vpop.f32.mrb[16].mxu1  ;;  %v12565_v26 = vunpack.i.h.bf16 %v12563_v11 }
 0x3e9   :  { %12852 = vrot.lane.b32.xlu1 %v15689_v10, %s12970_s24  ;;  %v6868_v21 = vsel %vm1544_vm6, %v6836_v5, %v12559_v45  ;;  %v7263_v8 = vsel %vm7247_vm8, %v15723_v59, 0.0  ;;  %v3575_v38 = vpop.f32.mrb[17].mxu1  ;;  %v6869_v49 = vsel %vm1544_vm6, %v6837_v12, %v12560_v1 }
 0x3ea   :  { %v12568_v19 = vpop.permute.xlu0 %12567  ;;  %v6900_v46 = vsel %vm1577_vm7, %v6868_v21, %v12564_v14  ;;  %v7264_v24 = vadd.f32 %v7263_v8, %v7262_v3  ;;  %v6901_v23 = vsel %vm1577_vm7, %v6869_v49, %v12565_v26  ;;  %v12891_v14 = vpack.i.bf16 %v15768_v13, %v15766_v42 }
 0x3eb   :  { %v15733_v2 = vpop.permute.xlu1 %12572  ;;  %7117 = vmatmul.mubr.f32.gmra.mrb[76].mxu1 %v6900_v46  ;;  %12857 = vrot.lane.b32.xlu0 %v12856_v25, %s12971_s25  ;;  %v12569_v34 = vunpack.i.l.bf16 %v12568_v19  ;;  %v12570_v61 = vunpack.i.h.bf16 %v12568_v19  ;;  %v5737_v19 = vld [vmem:[#allocation2 + $0x170] sm:$0xff] }
 0x3ec   :  { %10078 = vmatprep.mubr.msk.f32.mxu1 %vm38_vm0, %v5781_v16  ;;  %v15739_v55 = vpop.f32.mrb[18].mxu1  ;;  %v12574_v54 = vunpack.i.l.bf16 %v15733_v2  ;;  %v12575_v40 = vunpack.i.h.bf16 %v15733_v2  ;;  %v5736_v2 = vld [vmem:[#allocation2 + $0x168] sm:$0xff] }
 0x3ed   :  { %12862 = vrot.lane.b32.xlu1 %v12861_v15, %s12972_s26  ;;  %v7265_v3 = vsel %vm7247_vm8, %v15739_v55, 0.0  ;;  %v3580_v51 = vpop.f32.mrb[19].mxu1  ;;  %v6774_v39 = vsel %vm1445_vm3, %v6742_v35, %v12569_v34  ;;  %v12896_v6 = vpack.i.bf16 %v5737_v19, %v5736_v2  ;;  %v15822_v19 = vld [vmem:[#allocation2 + $0x172] sm:$0xff] }
 0x3ee   :  { %v15747_v56 = vpop.permute.xlu0 %12577  ;;  %v7266_v41 = vadd.f32 %v7265_v3, %v7264_v24  ;;  %v6806_v5 = vsel %vm1478_vm4, %v6774_v39, %v12574_v54 }
 0x3ef   :  { %v15751_v32 = vpop.permute.xlu1 %12582  ;;  %7122 = vmatmul.mubr.f32.gmra.mrb[78].mxu1 %v6901_v23  ;;  %12867 = vrot.lane.b32.xlu0 %v15741_v17, %s12973_s27  ;;  %v12579_v37 = vunpack.i.l.bf16 %v15747_v56  ;;  %v12580_v60 = vunpack.i.h.bf16 %v15747_v56 }
 0x3f0   :  { %10079 = vmatprep.mubr.msk.f32.mxu1 %vm38_vm0, %v5782_v36  ;;  %v12584_v16 = vunpack.i.l.bf16 %v15751_v32 }
 0x3f1   :  { %12872 = vrot.lane.b32.xlu1 %v15689_v10, %s12967_s21  ;;  %v6743_v10 = vsel %vm1412_vm2, %v6711_v18, %v12555_v20  ;;  %v6838_v38 = vsel %vm1511_vm5, %v6806_v5, %v12579_v37  ;;  %v5528_v18 = vld [vmem:[#allocation2 + $0x78] sm:$0xff] }
 0x3f2   :  { %v15762_v63 = vpop.permute.xlu0 %12587  ;;  %v6775_v11 = vsel %vm1445_vm3, %v6743_v10, %v12570_v61  ;;  %v6712_v39 = vsel %vm38_vm0, %v5528_v18, %v12584_v16  ;;  %v5785_v18 = vld [vmem:[#allocation2 + $0xb2] sm:$0xff] }
 0x3f3   :  { %v12593_v29 = vpop.permute.xlu1 %12592  ;;  %12877 = vrot.lane.b32.xlu0 %v12856_v25, %s12969_s23  ;;  %v6807_v0 = vsel %vm1478_vm4, %v6775_v11, %v12575_v40  ;;  %v12589_v3 = vunpack.i.l.bf16 %v15762_v63  ;;  %v12590_v54 = vunpack.i.h.bf16 %v15762_v63 }
 0x3f4   :  { %v12594_v62 = vunpack.i.l.bf16 %v12593_v29  ;;  %v12595_v46 = vunpack.i.h.bf16 %v12593_v29  ;;  %v6839_v34 = vsel %vm1511_vm5, %v6807_v0, %v12580_v60  ;;  %v5784_v29 = vld [vmem:[#allocation2 + $0xaa] sm:$0xff] }
 0x3f5   :  { %12882 = vrot.lane.b32.xlu1 %v12861_v15, %s12968_s22  ;;  %v6744_v10 = vsel %vm1412_vm2, %v6712_v39, %v12589_v3 }
 0x3f6   :  { %v15775_v1 = vpop.f32.mrb[20].mxu1  ;;  %v12598_v45 = vpop.permute.xlu0 %12597  ;;  %v6870_v12 = vsel %vm1544_vm6, %v6838_v38, %v12594_v62  ;;  %v6871_v28 = vsel %vm1544_vm6, %v6839_v34, %v12595_v46  ;;  %v5529_v62 = vld [vmem:[#allocation2 + $0x80] sm:$0xff]  ;;  %v15820_v38 = vld [vmem:[#allocation2 + $0x16a] sm:$0xff] }
 0x3f7   :  { %v7267_v21 = vsel %vm7247_vm8, %v15775_v1, 0.0  ;;  %v12599_v25 = vunpack.i.l.bf16 %v12598_v45  ;;  %v12603_v26 = vpop.permute.xlu1 %12602  ;;  %v3585_v8 = vpop.f32.mrb[21].mxu1  ;;  %12887 = vrot.lane.b32.xlu0 %v15741_v17, %s12970_s24  ;;  %v12600_v47 = vunpack.i.h.bf16 %v12598_v45 }
 0x3f8   :  { %v7268_v22 = vadd.f32 %v7267_v21, %v7266_v41  ;;  %v12585_v41 = vunpack.i.h.bf16 %v15751_v32  ;;  %v12604_v36 = vunpack.i.l.bf16 %v12603_v26  ;;  %v12605_v37 = vunpack.i.h.bf16 %v12603_v26 }
 0x3f9   :  { %12892 = vrot.lane.b32.xlu1 %v12891_v14, %s12971_s25  ;;  %v6902_v24 = vsel %vm1577_vm7, %v6870_v12, %v12599_v25  ;;  %v6903_v61 = vsel %vm1577_vm7, %v6871_v28, %v12600_v47 }
 0x3fa   :  { %v15790_v15 = vpop.f32.mrb[22].mxu1  ;;  %7127 = vmatmul.mubr.f32.gmra.mrb[80].mxu1 %v6902_v24  ;;  %v12608_v49 = vpop.permute.xlu0 %12607  ;;  %v6713_v63 = vsel %vm38_vm0, %v5529_v62, %v12585_v41  ;;  %v6776_v45 = vsel %vm1445_vm3, %v6744_v10, %v12604_v36  ;;  %v5530_v41 = vld [vmem:[#allocation2 + $0x90] sm:$0xff] }
 0x3fb   :  { %v7269_v51 = vsel %vm7247_vm8, %v15790_v15, 0.0  ;;  %v12613_v56 = vpop.permute.xlu1 %12612  ;;  %v3590_v23 = vpop.f32.mrb[23].mxu1  ;;  %10080 = vmatprep.mubr.msk.f32.mxu1 %vm38_vm0, %v5783_v53  ;;  %12897 = vrot.lane.b32.xlu0 %v12896_v6, %s12972_s26  ;;  %v12609_v35 = vunpack.i.l.bf16 %v12608_v49  ;;  %v12610_v40 = vunpack.i.h.bf16 %v12608_v49  ;;  %v6745_v60 = vsel %vm1412_vm2, %v6713_v63, %v12590_v54 }
 0x3fc   :  { %v7270_v20 = vadd.f32 %v7269_v51, %v7268_v22  ;;  %v12614_v5 = vunpack.i.l.bf16 %v12613_v56  ;;  %v6777_v25 = vsel %vm1445_vm3, %v6745_v60, %v12605_v37  ;;  %v12615_v26 = vunpack.i.h.bf16 %v12613_v56  ;;  %v5738_v56 = vld [vmem:[#allocation2 + $0x180] sm:$0xff]  ;;  %v5531_v37 = vld [vmem:[#allocation2 + $0x98] sm:$0xff] }
 0x3fd   :  { %12902 = vrot.lane.b32.xlu1 %v15797_v4, %s12973_s27  ;;  %v6808_v21 = vsel %vm1478_vm4, %v6776_v45, %v12609_v35  ;;  %v6809_v46 = vsel %vm1478_vm4, %v6777_v25, %v12610_v40  ;;  %v12926_v53 = vpack.i.bf16 %v15822_v19, %v15820_v38  ;;  %v5770_v40 = vld [vmem:[#allocation2 + $0x181] sm:$0xff] }
 0x3fe   :  { %7132 = vmatmul.mubr.f32.gmra.mrb[82].mxu1 %v6903_v61  ;;  %v12618_v32 = vpop.permute.xlu0 %12617  ;;  %v6840_v24 = vsel %vm1511_vm5, %v6808_v21, %v12614_v5  ;;  %v6841_v23 = vsel %vm1511_vm5, %v6809_v46, %v12615_v26  ;;  %v5771_v61 = vld [vmem:[#allocation2 + $0x189] sm:$0xff] }
 0x3ff   :  { %v15809_v11 = vpop.permute.xlu1 %12622  ;;  %10081 = vmatprep.mubr.msk.f32.mxu1 %vm38_vm0, %v5784_v29  ;;  %12907 = vrot.lane.b32.xlu0 %v15741_v17, %s12967_s21  ;;  %v12619_v17 = vunpack.i.l.bf16 %v12618_v32  ;;  %v12620_v2 = vunpack.i.h.bf16 %v12618_v32  ;;  %v12936_v60 = vpack.i.bf16 %v5771_v61, %v5770_v40  ;;  %v5786_v46 = vld [vmem:[#allocation2 + $0xc2] sm:$0xff]  ;;  %v5787_v40 = vld [vmem:[#allocation2 + $0xca] sm:$0xff] }
 0x400   :  { %v12624_v34 = vunpack.i.l.bf16 %v15809_v11  ;;  %v12625_v39 = vunpack.i.h.bf16 %v15809_v11 }
 0x401   :  { %12912 = vrot.lane.b32.xlu1 %v12891_v14, %s12969_s23  ;;  %v5739_v14 = vld [vmem:[#allocation2 + $0x188] sm:$0xff]  ;;  %v6714_v32 = vsel %vm38_vm0, %v5530_v41, %v12619_v17  ;;  %v6715_v62 = vsel %vm38_vm0, %v5531_v37, %v12620_v2 }
 0x402   :  { %v12628_v8 = vpop.permute.xlu0 %12627  ;;  %v12931_v54 = vpack.i.bf16 %v5739_v14, %v5738_v56  ;;  %v6746_v25 = vsel %vm1412_vm2, %v6714_v32, %v12624_v34 }
 0x403   :  { %v12633_v22 = vpop.permute.xlu1 %12632  ;;  %v12630_v12 = vunpack.i.h.bf16 %v12628_v8  ;;  %v12629_v9 = vunpack.i.l.bf16 %v12628_v8  ;;  %12917 = vrot.lane.b32.xlu0 %v12896_v6, %s12968_s22 }
 0x404   :  { %v12634_v47 = vunpack.i.l.bf16 %v12633_v22  ;;  %v15829_v16 = vpop.f32.mrb[24].mxu1  ;;  %v12635_v30 = vunpack.i.h.bf16 %v12633_v22 }
 0x405   :  { %12922 = vrot.lane.b32.xlu1 %v15797_v4, %s12970_s24  ;;  %v6872_v49 = vsel %vm1544_vm6, %v6840_v24, %v12629_v9  ;;  %v7271_v0 = vsel %vm7247_vm8, %v15829_v16, 0.0  ;;  %v3595_v3 = vpop.f32.mrb[25].mxu1  ;;  %v6873_v35 = vsel %vm1544_vm6, %v6841_v23, %v12630_v12  ;;  %v6747_v12 = vsel %vm1412_vm2, %v6715_v62, %v12625_v39 }
 0x406   :  { %v12638_v6 = vpop.permute.xlu0 %12637  ;;  %v6904_v51 = vsel %vm1577_vm7, %v6872_v49, %v12634_v47  ;;  %v7272_v36 = vadd.f32 %v7271_v0, %v7270_v20  ;;  %v6905_v5 = vsel %vm1577_vm7, %v6873_v35, %v12635_v30  ;;  %v5532_v35 = vld [vmem:[#allocation2 + $0xa8] sm:$0xff] }
 0x407   :  { %v12643_v28 = vpop.permute.xlu1 %12642  ;;  %7137 = vmatmul.mubr.f32.gmra.mrb[84].mxu1 %v6904_v51  ;;  %v12639_v29 = vunpack.i.l.bf16 %v12638_v6  ;;  %12927 = vrot.lane.b32.xlu0 %v12926_v53, %s12971_s25  ;;  %v12640_v20 = vunpack.i.h.bf16 %v12638_v6 }
 0x408   :  { %10082 = vmatprep.mubr.msk.f32.mxu1 %vm38_vm0, %v5785_v18  ;;  %v15846_v10 = vpop.f32.mrb[26].mxu1  ;;  %v12644_v21 = vunpack.i.l.bf16 %v12643_v28  ;;  %v12645_v22 = vunpack.i.h.bf16 %v12643_v28 }
 0x409   :  { %12932 = vrot.lane.b32.xlu1 %v12931_v54, %s12972_s26  ;;  %v7273_v63 = vsel %vm7247_vm8, %v15846_v10, 0.0  ;;  %v3600_v11 = vpop.f32.mrb[27].mxu1  ;;  %v6778_v9 = vsel %vm1445_vm3, %v6746_v25, %v12639_v29  ;;  %v6779_v17 = vsel %vm1445_vm3, %v6747_v12, %v12640_v20 }
 0x40a   :  { %v12648_v45 = vpop.permute.xlu0 %12647  ;;  %v7274_v26 = vadd.f32 %v7273_v63, %v7272_v36  ;;  %v6810_v30 = vsel %vm1478_vm4, %v6778_v9, %v12644_v21  ;;  %v6811_v51 = vsel %vm1478_vm4, %v6779_v17, %v12645_v22  ;;  %v15874_v63 = vld [vmem:[#allocation2 + $0x182] sm:$0xff]  ;;  %v5533_v11 = vld [vmem:[#allocation2 + $0xb0] sm:$0xff] }
 0x40b   :  { %v12653_v8 = vpop.permute.xlu1 %12652  ;;  %7142 = vmatmul.mubr.f32.gmra.mrb[86].mxu1 %v6905_v5  ;;  %12937 = vrot.lane.b32.xlu0 %v12936_v60, %s12973_s27  ;;  %v12650_v47 = vunpack.i.h.bf16 %v12648_v45  ;;  %v12649_v24 = vunpack.i.l.bf16 %v12648_v45  ;;  %v5740_v5 = vld [vmem:[#allocation2 + $0x198] sm:$0xff] }
 0x40c   :  { %10083 = vmatprep.mubr.msk.f32.mxu1 %vm38_vm0, %v5786_v46  ;;  %v12654_v0 = vunpack.i.l.bf16 %v12653_v8  ;;  %v12655_v34 = vunpack.i.h.bf16 %v12653_v8 }
 0x40d   :  { %12942 = vrot.lane.b32.xlu1 %v15797_v4, %s12967_s21  ;;  %v6842_v56 = vsel %vm1511_vm5, %v6810_v30, %v12649_v24  ;;  %v6843_v23 = vsel %vm1511_vm5, %v6811_v51, %v12650_v47  ;;  %v5788_v30 = vld [vmem:[#allocation2 + $0xda] sm:$0xff] }
 0x40e   :  { %v12663_v14 = vpop.permute.xlu0 %12662  ;;  %v6716_v29 = vsel %vm38_vm0, %v5532_v35, %v12654_v0  ;;  %v6717_v21 = vsel %vm38_vm0, %v5533_v11, %v12655_v34 }
 0x40f   :  { %v12664_v2 = vunpack.i.l.bf16 %v12663_v14  ;;  %v12658_v49 = vpop.permute.xlu1 %12657  ;;  %12947 = vrot.lane.b32.xlu0 %v12926_v53, %s12969_s23  ;;  %v12665_v4 = vunpack.i.h.bf16 %v12663_v14 }
 0x410   :  { %v12660_v3 = vunpack.i.h.bf16 %v12658_v49  ;;  %v12659_v6 = vunpack.i.l.bf16 %v12658_v49 }
 0x411   :  { %12952 = vrot.lane.b32.xlu1 %v12931_v54, %s12968_s22 }
 0x412   :  { %v15865_v41 = vpop.f32.mrb[28].mxu1  ;;  %v12668_v36 = vpop.permute.xlu0 %12667  ;;  %v6874_v28 = vsel %vm1544_vm6, %v6842_v56, %v12659_v6  ;;  %v6875_v18 = vsel %vm1544_vm6, %v6843_v23, %v12660_v3  ;;  %v5741_v56 = vld [vmem:[#allocation2 + $0x1a0] sm:$0xff] }
 0x413   :  { %v7275_v53 = vsel %vm7247_vm8, %v15865_v41, 0.0  ;;  %v12670_v61 = vunpack.i.h.bf16 %v12668_v36  ;;  %v12669_v39 = vunpack.i.l.bf16 %v12668_v36  ;;  %v12673_v54 = vpop.permute.xlu1 %12672  ;;  %v3605_v37 = vpop.f32.mrb[29].mxu1  ;;  %v6906_v32 = vsel %vm1577_vm7, %v6874_v28, %v12664_v2  ;;  %12957 = vrot.lane.b32.xlu0 %v12936_v60, %s12970_s24  ;;  %v5772_v60 = vld [vmem:[#allocation2 + $0x199] sm:$0xff]  ;;  %v15894_v28 = vld [vmem:[#allocation2 + $0x18a] sm:$0xff] }
 0x414   :  { %v7276_v62 = vadd.f32 %v7275_v53, %v7274_v26  ;;  %v12674_v20 = vunpack.i.l.bf16 %v12673_v54  ;;  %7147 = vmatmul.mubr.f32.gmra.mrb[88].mxu1 %v6906_v32  ;;  %v12675_v25 = vunpack.i.h.bf16 %v12673_v54  ;;  %v6907_v46 = vsel %vm1577_vm7, %v6875_v18, %v12665_v4 }
 0x415   :  { %v6748_v45 = vsel %vm1412_vm2, %v6716_v29, %v12669_v39  ;;  %10084 = vmatprep.mubr.msk.f32.mxu1 %vm38_vm0, %v5787_v40  ;;  %6410 = vrot.lane.b32.xlu1 %v15874_v63, %s12971_s25  ;;  %v6749_v22 = vsel %vm1412_vm2, %v6717_v21, %v12670_v61  ;;  %v5773_v61 = vld [vmem:[#allocation2 + $0x1a1] sm:$0xff] }
 0x416   :  { %v15881_v26 = vpop.f32.mrb[30].mxu1  ;;  %v12678_v8 = vpop.permute.xlu0 %12677  ;;  %v6780_v14 = vsel %vm1445_vm3, %v6748_v45, %v12674_v20  ;;  %v6781_v3 = vsel %vm1445_vm3, %v6749_v22, %v12675_v25  ;;  %v5789_v20 = vld [vmem:[#allocation2 + $0xe2] sm:$0xff] }
 0x417   :  { %v7277_v12 = vsel %vm7247_vm8, %v15881_v26, 0.0  ;;  %v12680_v9 = vunpack.i.h.bf16 %v12678_v8  ;;  %v12679_v17 = vunpack.i.l.bf16 %v12678_v8  ;;  %v12683_v47 = vpop.permute.xlu1 %12682  ;;  %v3610_v24 = vpop.f32.mrb[31].mxu1  ;;  %6538 = vrot.lane.b32.xlu0 %v5740_v5, %s12972_s26  ;;  %v5534_v45 = vld [vmem:[#allocation2 + $0xc0] sm:$0xff] }
 0x418   :  { %v7278_v2 = vadd.f32 %v7277_v12, %v7276_v62  ;;  %v12684_v49 = vunpack.i.l.bf16 %v12683_v47  ;;  %7152 = vmatmul.mubr.f32.gmra.mrb[90].mxu1 %v6907_v46  ;;  %v12685_v6 = vunpack.i.h.bf16 %v12683_v47  ;;  %v5790_v47 = vld [vmem:[#allocation2 + $0xf2] sm:$0xff] }
 0x419   :  { %v6812_v0 = vsel %vm1478_vm4, %v6780_v14, %v12679_v17  ;;  %10085 = vmatprep.mubr.msk.f32.mxu1 %vm38_vm0, %v5788_v30  ;;  %6666 = vrot.lane.b32.xlu1 %v5772_v60, %s12973_s27  ;;  %v6813_v23 = vsel %vm1478_vm4, %v6781_v3, %v12680_v9  ;;  %v5535_v14 = vld [vmem:[#allocation2 + $0xc8] sm:$0xff] }
 0x41a   :  { %v12688_v51 = vpop.permute.xlu0 %12687  ;;  %v6844_v35 = vsel %vm1511_vm5, %v6812_v0, %v12684_v49  ;;  %v6845_v32 = vsel %vm1511_vm5, %v6813_v23, %v12685_v6 }
 0x41b   :  { %v12693_v34 = vpop.permute.xlu1 %12692  ;;  %v12690_v4 = vunpack.i.h.bf16 %v12688_v51  ;;  %v12689_v36 = vunpack.i.l.bf16 %v12688_v51  ;;  %6412 = vrot.lane.b32.xlu0 %v15894_v28, %s12971_s25  ;;  %s12975_s25 = smov 124  }
 0x41c   :  { %v12694_v18 = vunpack.i.l.bf16 %v12693_v34  ;;  %v12695_v39 = vunpack.i.h.bf16 %v12693_v34 }
 0x41d   :  { %6540 = vrot.lane.b32.xlu1 %v5741_v56, %s12972_s26  ;;  %v6876_v53 = vsel %vm1544_vm6, %v6844_v35, %v12689_v36  ;;  %v6877_v40 = vsel %vm1544_vm6, %v6845_v32, %v12690_v4  ;;  %s12976_s26 = smov 116  }
 0x41e   :  { %v12698_v54 = vpop.permute.xlu0 %12697  ;;  %v6908_v37 = vsel %vm1577_vm7, %v6876_v53, %v12694_v18  ;;  %v6909_v22 = vsel %vm1577_vm7, %v6877_v40, %v12695_v39 }
 0x41f   :  { %v12703_v29 = vpop.permute.xlu1 %12702  ;;  %v12699_v62 = vunpack.i.l.bf16 %v12698_v54  ;;  %7157 = vmatmul.mubr.f32.gmra.mrb[92].mxu1 %v6908_v37  ;;  %6668 = vrot.lane.b32.xlu0 %v5773_v61, %s12973_s27  ;;  %v12700_v5 = vunpack.i.h.bf16 %v12698_v54  ;;  %s12977_s27 = smov 8  }
 0x420   :  { %v12704_v11 = vunpack.i.l.bf16 %v12703_v29  ;;  %10086 = vmatprep.mubr.msk.f32.mxu1 %vm38_vm0, %v5789_v20  ;;  %v15907_v25 = vpop.f32.mrb[32].mxu1  ;;  %v12705_v24 = vunpack.i.h.bf16 %v12703_v29 }
 0x421   :  { %v6718_v21 = vsel %vm38_vm0, %v5534_v45, %v12699_v62  ;;  %v7279_v8 = vsel %vm7247_vm8, %v15907_v25, 0.0  ;;  %v3615_v46 = vpop.f32.mrb[33].mxu1  ;;  %v6719_v0 = vsel %vm38_vm0, %v5535_v14, %v12700_v5 }
 0x422   :  { %v12708_v60 = vpop.permute.xlu0 %12707  ;;  %v7280_v12 = vadd.f32 %v7279_v8, %v7278_v2  ;;  %v6750_v30 = vsel %vm1412_vm2, %v6718_v21, %v12704_v11  ;;  %v6751_v35 = vsel %vm1412_vm2, %v6719_v0, %v12705_v24 }
 0x423   :  { %v12713_v9 = vpop.permute.xlu1 %12712  ;;  %v12709_v17 = vunpack.i.l.bf16 %v12708_v60  ;;  %7162 = vmatmul.mubr.f32.gmra.mrb[94].mxu1 %v6909_v22  ;;  %v12710_v3 = vunpack.i.h.bf16 %v12708_v60 }
 0x424   :  { %v12714_v49 = vunpack.i.l.bf16 %v12713_v9  ;;  %10087 = vmatprep.mubr.msk.f32.mxu1 %vm38_vm0, %v5790_v47  ;;  %v15916_v51 = vpop.f32.mrb[34].mxu1  ;;  %v12715_v18 = vunpack.i.h.bf16 %v12713_v9  ;;  %v5536_v9 = vld [vmem:[#allocation2 + $0xd8] sm:$0xff] }
 0x425   :  { %v6782_v6 = vsel %vm1445_vm3, %v6750_v30, %v12709_v17  ;;  %v7281_v2 = vsel %vm7247_vm8, %v15916_v51, 0.0  ;;  %v3620_v56 = vpop.f32.mrb[35].mxu1  ;;  %v6783_v39 = vsel %vm1445_vm3, %v6751_v35, %v12710_v3 }
 0x426   :  { %v12718_v23 = vpop.permute.xlu0 %12717  ;;  %v7282_v34 = vadd.f32 %v7281_v2, %v7280_v12  ;;  %v6814_v61 = vsel %vm1478_vm4, %v6782_v6, %v12714_v49  ;;  %v6815_v45 = vsel %vm1478_vm4, %v6783_v39, %v12715_v18  ;;  %v5791_v12 = vld [vmem:[#allocation2 + $0xfa] sm:$0xff] }
 0x427   :  { %v12719_v4 = vunpack.i.l.bf16 %v12718_v23  ;;  %v12723_v36 = vpop.permute.xlu1 %12722  ;;  %v12720_v54 = vunpack.i.h.bf16 %v12718_v23  ;;  %v5537_v2 = vld [vmem:[#allocation2 + $0xe0] sm:$0xff] }
 0x428   :  { %v12724_v53 = vunpack.i.l.bf16 %v12723_v36  ;;  %v12725_v20 = vunpack.i.h.bf16 %v12723_v36 }
 0x429   :  { %v6846_v37 = vsel %vm1511_vm5, %v6814_v61, %v12719_v4  ;;  %v6847_v8 = vsel %vm1511_vm5, %v6815_v45, %v12720_v54 }
 0x42a   :  { %v12728_v32 = vpop.permute.xlu0 %12727  ;;  %v6878_v11 = vsel %vm1544_vm6, %v6846_v37, %v12724_v53  ;;  %v6879_v6 = vsel %vm1544_vm6, %v6847_v8, %v12725_v20  ;;  %v5792_v53 = vld [vmem:[#allocation2 + $0x10a] sm:$0xff] }
 0x42b   :  { %v12729_v29 = vunpack.i.l.bf16 %v12728_v32  ;;  %v12733_v62 = vpop.permute.xlu1 %12732  ;;  %v12730_v5 = vunpack.i.h.bf16 %v12728_v32 }
 0x42c   :  { %v12734_v40 = vunpack.i.l.bf16 %v12733_v62  ;;  %v12735_v46 = vunpack.i.h.bf16 %v12733_v62 }
 0x42d   :  { %v6910_v21 = vsel %vm1577_vm7, %v6878_v11, %v12729_v29  ;;  %v6911_v23 = vsel %vm1577_vm7, %v6879_v6, %v12730_v5 }
 0x42e   :  { %v15928_v60 = vpop.f32.mrb[36].mxu1  ;;  %v12738_v22 = vpop.permute.xlu0 %12737  ;;  %7167 = vmatmul.mubr.f32.gmra.mrb[96].mxu1 %v6910_v21  ;;  %v6720_v30 = vsel %vm38_vm0, %v5536_v9, %v12734_v40  ;;  %v6721_v4 = vsel %vm38_vm0, %v5537_v2, %v12735_v46 }
 0x42f   :  { %v7283_v17 = vsel %vm7247_vm8, %v15928_v60, 0.0  ;;  %v12740_v47 = vunpack.i.h.bf16 %v12738_v22  ;;  %v12739_v24 = vunpack.i.l.bf16 %v12738_v22  ;;  %v12743_v14 = vpop.permute.xlu1 %12742  ;;  %v3625_v49 = vpop.f32.mrb[37].mxu1  ;;  %10088 = vmatprep.mubr.msk.f32.mxu1 %vm38_vm0, %v5791_v12 }
 0x430   :  { %v7284_v0 = vadd.f32 %v7283_v17, %v7282_v34  ;;  %v12744_v3 = vunpack.i.l.bf16 %v12743_v14  ;;  %v12745_v36 = vunpack.i.h.bf16 %v12743_v14 }
 0x431   :  { %v6752_v56 = vsel %vm1412_vm2, %v6720_v30, %v12739_v24  ;;  %v6753_v61 = vsel %vm1412_vm2, %v6721_v4, %v12740_v47 }
 0x432   :  { %v15938_v18 = vpop.f32.mrb[38].mxu1  ;;  %7172 = vmatmul.mubr.f32.gmra.mrb[98].mxu1 %v6911_v23  ;;  %v12748_v35 = vpop.permute.xlu0 %12747  ;;  %v6784_v29 = vsel %vm1445_vm3, %v6752_v56, %v12744_v3  ;;  %v6785_v11 = vsel %vm1445_vm3, %v6753_v61, %v12745_v36  ;;  %v5793_v3 = vld [vmem:[#allocation2 + $0x112] sm:$0xff] }
 0x433   :  { %18482 = vst [vmem:[#allocation7_spill] sm:$0xff] %v15938_v18  ;;  %v7285_v34 = vsel %vm7247_vm8, %v15938_v18, 0.0  ;;  %v12750_v39 = vunpack.i.h.bf16 %v12748_v35  ;;  %v12749_v54 = vunpack.i.l.bf16 %v12748_v35  ;;  %v12753_v37 = vpop.permute.xlu1 %12752  ;;  %v3630_v32 = vpop.f32.mrb[39].mxu1  ;;  %10089 = vmatprep.mubr.msk.f32.mxu1 %vm38_vm0, %v5792_v53  ;;  %v5538_v56 = vld [vmem:[#allocation2 + $0xf0] sm:$0xff] }
 0x434   :  { %v7286_v62 = vadd.f32 %v7285_v34, %v7284_v0  ;;  %v12754_v20 = vunpack.i.l.bf16 %v12753_v37  ;;  %v12755_v45 = vunpack.i.h.bf16 %v12753_v37 }
 0x435   :  { %v6816_v40 = vsel %vm1478_vm4, %v6784_v29, %v12749_v54  ;;  %v6817_v21 = vsel %vm1478_vm4, %v6785_v11, %v12750_v39  ;;  %v5539_v29 = vld [vmem:[#allocation2 + $0xf8] sm:$0xff] }
 0x436   :  { %v12758_v5 = vpop.permute.xlu0 %12757  ;;  %v6848_v9 = vsel %vm1511_vm5, %v6816_v40, %v12754_v20  ;;  %v6849_v49 = vsel %vm1511_vm5, %v6817_v21, %v12755_v45 }
 0x437   :  { %v12763_v8 = vpop.permute.xlu1 %12762  ;;  %v12760_v46 = vunpack.i.h.bf16 %v12758_v5  ;;  %v12759_v22 = vunpack.i.l.bf16 %v12758_v5 }
 0x438   :  { %v12764_v12 = vunpack.i.l.bf16 %v12763_v8  ;;  %v12765_v47 = vunpack.i.h.bf16 %v12763_v8 }
 0x439   :  { %v6880_v17 = vsel %vm1544_vm6, %v6848_v9, %v12759_v22  ;;  %v6881_v6 = vsel %vm1544_vm6, %v6849_v49, %v12760_v46 }
 0x43a   :  { %v12768_v24 = vpop.permute.xlu0 %12767  ;;  %v6912_v14 = vsel %vm1577_vm7, %v6880_v17, %v12764_v12  ;;  %v6913_v34 = vsel %vm1577_vm7, %v6881_v6, %v12765_v47 }
 0x43b   :  { %v12773_v30 = vpop.permute.xlu1 %12772  ;;  %v12769_v0 = vunpack.i.l.bf16 %v12768_v24  ;;  %7177 = vmatmul.mubr.f32.gmra.mrb[100].mxu1 %v6912_v14  ;;  %v12770_v23 = vunpack.i.h.bf16 %v12768_v24 }
 0x43c   :  { %v12774_v2 = vunpack.i.l.bf16 %v12773_v30  ;;  %10090 = vmatprep.mubr.msk.f32.mxu1 %vm38_vm0, %v5793_v3  ;;  %v15955_v36 = vpop.f32.mrb[40].mxu1  ;;  %v12775_v32 = vunpack.i.h.bf16 %v12773_v30 }
 0x43d   :  { %v6722_v4 = vsel %vm38_vm0, %v5538_v56, %v12769_v0  ;;  %v7287_v35 = vsel %vm7247_vm8, %v15955_v36, 0.0  ;;  %v3635_v53 = vpop.f32.mrb[41].mxu1  ;;  %v6723_v11 = vsel %vm38_vm0, %v5539_v29, %v12770_v23 }
 0x43e   :  { %v12778_v61 = vpop.permute.xlu0 %12777  ;;  %v7288_v39 = vadd.f32 %v7287_v35, %v7286_v62  ;;  %v6754_v40 = vsel %vm1412_vm2, %v6722_v4, %v12774_v2  ;;  %v6755_v47 = vsel %vm1412_vm2, %v6723_v11, %v12775_v32  ;;  %v5540_v32 = vld [vmem:[#allocation2 + $0x108] sm:$0xff] }
 0x43f   :  { %v12783_v54 = vpop.permute.xlu1 %12782  ;;  %v12779_v37 = vunpack.i.l.bf16 %v12778_v61  ;;  %7182 = vmatmul.mubr.f32.gmra.mrb[102].mxu1 %v6913_v34  ;;  %v12780_v45 = vunpack.i.h.bf16 %v12778_v61 }
 0x440   :  { %v12784_v20 = vunpack.i.l.bf16 %v12783_v54  ;;  %10091 = vmatprep.mubr.msk.f32.mxu1 %vm38_vm0, %v15661_v27  ;;  %v15965_v21 = vpop.f32.mrb[42].mxu1  ;;  %v12785_v17 = vunpack.i.h.bf16 %v12783_v54 }
 0x441   :  { %v6786_v5 = vsel %vm1445_vm3, %v6754_v40, %v12779_v37  ;;  %v7289_v62 = vsel %vm7247_vm8, %v15965_v21, 0.0  ;;  %v3640_v8 = vpop.f32.mrb[43].mxu1  ;;  %v6787_v14 = vsel %vm1445_vm3, %v6755_v47, %v12780_v45  ;;  %v5795_v37 = vld [vmem:[#allocation2 + $0x12a] sm:$0xff] }
 0x442   :  { %v12788_v46 = vpop.permute.xlu0 %12787  ;;  %v7290_v22 = vadd.f32 %v7289_v62, %v7288_v39  ;;  %v6818_v27 = vsel %vm1478_vm4, %v6786_v5, %v12784_v20  ;;  %v6819_v4 = vsel %vm1478_vm4, %v6787_v14, %v12785_v17 }
 0x443   :  { %v12789_v12 = vunpack.i.l.bf16 %v12788_v46  ;;  %v12793_v9 = vpop.permute.xlu1 %12792  ;;  %v12790_v49 = vunpack.i.h.bf16 %v12788_v46 }
 0x444   :  { %v12794_v24 = vunpack.i.l.bf16 %v12793_v9  ;;  %v12795_v2 = vunpack.i.h.bf16 %v12793_v9 }
 0x445   :  { %v6850_v30 = vsel %vm1511_vm5, %v6818_v27, %v12789_v12  ;;  %v6851_v61 = vsel %vm1511_vm5, %v6819_v4, %v12790_v49  ;;  %v5541_v12 = vld [vmem:[#allocation2 + $0x110] sm:$0xff] }
 0x446   :  { %v12798_v0 = vpop.permute.xlu0 %12797  ;;  %v6882_v23 = vsel %vm1544_vm6, %v6850_v30, %v12794_v24  ;;  %v6883_v46 = vsel %vm1544_vm6, %v6851_v61, %v12795_v2 }
 0x447   :  { %v12799_v3 = vunpack.i.l.bf16 %v12798_v0  ;;  %v12803_v6 = vpop.permute.xlu1 %12802  ;;  %v12800_v35 = vunpack.i.h.bf16 %v12798_v0 }
 0x448   :  { %v12804_v56 = vunpack.i.l.bf16 %v12803_v6  ;;  %v12805_v34 = vunpack.i.h.bf16 %v12803_v6 }
 0x449   :  { %v6914_v53 = vsel %vm1577_vm7, %v6882_v23, %v12799_v3  ;;  %v6915_v17 = vsel %vm1577_vm7, %v6883_v46, %v12800_v35 }
 0x44a   :  { %v15977_v39 = vpop.f32.mrb[44].mxu1  ;;  %v12808_v54 = vpop.permute.xlu0 %12807  ;;  %7187 = vmatmul.mubr.f32.gmra.mrb[104].mxu1 %v6914_v53  ;;  %v6724_v5 = vsel %vm38_vm0, %v5540_v32, %v12804_v56  ;;  %v6725_v47 = vsel %vm38_vm0, %v5541_v12, %v12805_v34 }
 0x44b   :  { %v7291_v29 = vsel %vm7247_vm8, %v15977_v39, 0.0  ;;  %v12810_v20 = vunpack.i.h.bf16 %v12808_v54  ;;  %v12809_v40 = vunpack.i.l.bf16 %v12808_v54  ;;  %v12813_v11 = vpop.permute.xlu1 %12812  ;;  %v3645_v45 = vpop.f32.mrb[45].mxu1  ;;  %10092 = vmatprep.mubr.msk.f32.mxu1 %vm38_vm0, %v5795_v37 }
 0x44c   :  { %v7292_v62 = vadd.f32 %v7291_v29, %v7290_v22  ;;  %v12814_v8 = vunpack.i.l.bf16 %v12813_v11  ;;  %v12815_v24 = vunpack.i.h.bf16 %v12813_v11 }
 0x44d   :  { %v6756_v9 = vsel %vm1412_vm2, %v6724_v5, %v12809_v40  ;;  %v6757_v49 = vsel %vm1412_vm2, %v6725_v47, %v12810_v20 }
 0x44e   :  { %v15987_v27 = vpop.f32.mrb[46].mxu1  ;;  %7192 = vmatmul.mubr.f32.gmra.mrb[106].mxu1 %v6915_v17  ;;  %v12818_v14 = vpop.permute.xlu0 %12817  ;;  %v6788_v2 = vsel %vm1445_vm3, %v6756_v9, %v12814_v8  ;;  %v6789_v35 = vsel %vm1445_vm3, %v6757_v49, %v12815_v24  ;;  %v5542_v9 = vld [vmem:[#allocation2 + $0x120] sm:$0xff] }
 0x44f   :  { %v7293_v22 = vsel %vm7247_vm8, %v15987_v27, 0.0  ;;  %v12820_v30 = vunpack.i.h.bf16 %v12818_v14  ;;  %v12819_v0 = vunpack.i.l.bf16 %v12818_v14  ;;  %v12823_v3 = vpop.permute.xlu1 %12822  ;;  %v3650_v6 = vpop.f32.mrb[47].mxu1  ;;  %10093 = vmatprep.mubr.msk.f32.mxu1 %vm38_vm0, %v15714_v48 }
 0x450   :  { %v7294_v56 = vadd.f32 %v7293_v22, %v7292_v62  ;;  %v12824_v23 = vunpack.i.l.bf16 %v12823_v3  ;;  %v12825_v53 = vunpack.i.h.bf16 %v12823_v3 }
 0x451   :  { %v6820_v4 = vsel %vm1478_vm4, %v6788_v2, %v12819_v0  ;;  %v6821_v34 = vsel %vm1478_vm4, %v6789_v35, %v12820_v30 }
 0x452   :  { %v12828_v61 = vpop.permute.xlu0 %12827  ;;  %v6852_v20 = vsel %vm1511_vm5, %v6820_v4, %v12824_v23  ;;  %v6853_v5 = vsel %vm1511_vm5, %v6821_v34, %v12825_v53  ;;  %v5543_v23 = vld [vmem:[#allocation2 + $0x128] sm:$0xff] }
 0x453   :  { %v12833_v54 = vpop.permute.xlu1 %12832  ;;  %v12830_v37 = vunpack.i.h.bf16 %v12828_v61  ;;  %v12829_v32 = vunpack.i.l.bf16 %v12828_v61 }
 0x454   :  { %v12834_v29 = vunpack.i.l.bf16 %v12833_v54  ;;  %v12835_v40 = vunpack.i.h.bf16 %v12833_v54 }
 0x455   :  { %v6884_v48 = vsel %vm1544_vm6, %v6852_v20, %v12829_v32  ;;  %v6885_v46 = vsel %vm1544_vm6, %v6853_v5, %v12830_v37 }
 0x456   :  { %v12838_v11 = vpop.permute.xlu0 %12837  ;;  %v6916_v45 = vsel %vm1577_vm7, %v6884_v48, %v12834_v29  ;;  %v6917_v30 = vsel %vm1577_vm7, %v6885_v46, %v12835_v40 }
 0x457   :  { %v12843_v62 = vpop.permute.xlu1 %12842  ;;  %v12839_v8 = vunpack.i.l.bf16 %v12838_v11  ;;  %7197 = vmatmul.mubr.f32.gmra.mrb[108].mxu1 %v6916_v45  ;;  %v12840_v17 = vunpack.i.h.bf16 %v12838_v11 }
 0x458   :  { %v12844_v12 = vunpack.i.l.bf16 %v12843_v62  ;;  %10094 = vmatprep.mubr.msk.f32.mxu1 %vm38_vm0, %v15716_v43  ;;  %v16006_v24 = vpop.f32.mrb[48].mxu1  ;;  %v12845_v2 = vunpack.i.h.bf16 %v12843_v62 }
 0x459   :  { %v6726_v47 = vsel %vm38_vm0, %v5542_v9, %v12839_v8  ;;  %v7295_v14 = vsel %vm7247_vm8, %v16006_v24, 0.0  ;;  %v3655_v49 = vpop.f32.mrb[49].mxu1  ;;  %v6727_v35 = vsel %vm38_vm0, %v5543_v23, %v12840_v17 }
 0x45a   :  { %v12848_v22 = vpop.permute.xlu0 %12847  ;;  %v7296_v0 = vadd.f32 %v7295_v14, %v7294_v56  ;;  %v6758_v43 = vsel %vm1412_vm2, %v6726_v47, %v12844_v12  ;;  %v6759_v40 = vsel %vm1412_vm2, %v6727_v35, %v12845_v2  ;;  %v5544_v2 = vld [vmem:[#allocation2 + $0x138] sm:$0xff] }
 0x45b   :  { %v12853_v3 = vpop.permute.xlu1 %12852  ;;  %v12849_v6 = vunpack.i.l.bf16 %v12848_v22  ;;  %7202 = vmatmul.mubr.f32.gmra.mrb[110].mxu1 %v6917_v30  ;;  %v12850_v53 = vunpack.i.h.bf16 %v12848_v22 }
 0x45c   :  { %v12854_v4 = vunpack.i.l.bf16 %v12853_v3  ;;  %10095 = vmatprep.mubr.msk.f32.mxu1 %vm38_vm0, %v15766_v42  ;;  %v16016_v34 = vpop.f32.mrb[50].mxu1  ;;  %v12855_v48 = vunpack.i.h.bf16 %v12853_v3 }
 0x45d   :  { %v6790_v61 = vsel %vm1445_vm3, %v6758_v43, %v12849_v6  ;;  %v7297_v56 = vsel %vm7247_vm8, %v16016_v34, 0.0  ;;  %v3660_v54 = vpop.f32.mrb[51].mxu1  ;;  %v6791_v45 = vsel %vm1445_vm3, %v6759_v40, %v12850_v53 }
 0x45e   :  { %v12858_v37 = vpop.permute.xlu0 %12857  ;;  %v7298_v32 = vadd.f32 %v7297_v56, %v7296_v0  ;;  %v6822_v42 = vsel %vm1478_vm4, %v6790_v61, %v12854_v4  ;;  %v6823_v14 = vsel %vm1478_vm4, %v6791_v45, %v12855_v48 }
 0x45f   :  { %v12859_v29 = vunpack.i.l.bf16 %v12858_v37  ;;  %v12863_v20 = vpop.permute.xlu1 %12862  ;;  %v12860_v5 = vunpack.i.h.bf16 %v12858_v37 }
 0x460   :  { %v12864_v11 = vunpack.i.l.bf16 %v12863_v20  ;;  %v12865_v9 = vunpack.i.h.bf16 %v12863_v20 }
 0x461   :  { %v6854_v62 = vsel %vm1511_vm5, %v6822_v42, %v12859_v29  ;;  %v6855_v30 = vsel %vm1511_vm5, %v6823_v14, %v12860_v5  ;;  %v5545_v29 = vld [vmem:[#allocation2 + $0x140] sm:$0xff] }
 0x462   :  { %v12868_v8 = vpop.permute.xlu0 %12867  ;;  %v6886_v47 = vsel %vm1544_vm6, %v6854_v62, %v12864_v11  ;;  %v6887_v37 = vsel %vm1544_vm6, %v6855_v30, %v12865_v9 }
 0x463   :  { %v12869_v46 = vunpack.i.l.bf16 %v12868_v8  ;;  %v12873_v12 = vpop.permute.xlu1 %12872  ;;  %v12870_v49 = vunpack.i.h.bf16 %v12868_v8 }
 0x464   :  { %v12874_v17 = vunpack.i.l.bf16 %v12873_v12  ;;  %v12875_v0 = vunpack.i.h.bf16 %v12873_v12 }
 0x465   :  { %v6918_v22 = vsel %vm1577_vm7, %v6886_v47, %v12869_v46  ;;  %v6919_v48 = vsel %vm1577_vm7, %v6887_v37, %v12870_v49 }
 0x466   :  { %v16028_v3 = vpop.f32.mrb[52].mxu1  ;;  %v12878_v6 = vpop.permute.xlu0 %12877  ;;  %7207 = vmatmul.mubr.f32.gmra.mrb[112].mxu1 %v6918_v22  ;;  %v6728_v61 = vsel %vm38_vm0, %v5544_v2, %v12874_v17  ;;  %v6729_v40 = vsel %vm38_vm0, %v5545_v29, %v12875_v0 }
 0x467   :  { %v7299_v23 = vsel %vm7247_vm8, %v16028_v3, 0.0  ;;  %v12880_v4 = vunpack.i.h.bf16 %v12878_v6  ;;  %v12879_v43 = vunpack.i.l.bf16 %v12878_v6  ;;  %v12883_v35 = vpop.permute.xlu1 %12882  ;;  %v3665_v53 = vpop.f32.mrb[53].mxu1  ;;  %10096 = vmatprep.mubr.msk.f32.mxu1 %vm38_vm0, %v15768_v13 }
 0x468   :  { %v7300_v56 = vadd.f32 %v7299_v23, %v7298_v32  ;;  %v12884_v54 = vunpack.i.l.bf16 %v12883_v35  ;;  %v12885_v11 = vunpack.i.h.bf16 %v12883_v35 }
 0x469   :  { %v6760_v20 = vsel %vm1412_vm2, %v6728_v61, %v12879_v43  ;;  %v6761_v13 = vsel %vm1412_vm2, %v6729_v40, %v12880_v4 }
 0x46a   :  { %v16039_v42 = vpop.f32.mrb[54].mxu1  ;;  %7212 = vmatmul.mubr.f32.gmra.mrb[114].mxu1 %v6919_v48  ;;  %v12888_v45 = vpop.permute.xlu0 %12887  ;;  %v6792_v12 = vsel %vm1445_vm3, %v6760_v20, %v12884_v54  ;;  %v6793_v14 = vsel %vm1445_vm3, %v6761_v13, %v12885_v11  ;;  %v5546_v20 = vld [vmem:[#allocation2 + $0x150] sm:$0xff] }
 0x46b   :  { %v7301_v32 = vsel %vm7247_vm8, %v16039_v42, 0.0  ;;  %v12890_v5 = vunpack.i.h.bf16 %v12888_v45  ;;  %v12889_v62 = vunpack.i.l.bf16 %v12888_v45  ;;  %v12893_v8 = vpop.permute.xlu1 %12892  ;;  %v3670_v46 = vpop.f32.mrb[55].mxu1  ;;  %10097 = vmatprep.mubr.msk.f32.mxu1 %vm38_vm0, %v15820_v38 }
 0x46c   :  { %v7302_v9 = vadd.f32 %v7301_v32, %v7300_v56  ;;  %v12894_v17 = vunpack.i.l.bf16 %v12893_v8  ;;  %v12895_v49 = vunpack.i.h.bf16 %v12893_v8 }
 0x46d   :  { %v6824_v47 = vsel %vm1478_vm4, %v6792_v12, %v12889_v62  ;;  %v6825_v30 = vsel %vm1478_vm4, %v6793_v14, %v12890_v5 }
 0x46e   :  { %v12898_v22 = vpop.permute.xlu0 %12897  ;;  %v6856_v4 = vsel %vm1511_vm5, %v6824_v47, %v12894_v17  ;;  %v6857_v61 = vsel %vm1511_vm5, %v6825_v30, %v12895_v49  ;;  %v5547_v17 = vld [vmem:[#allocation2 + $0x158] sm:$0xff] }
 0x46f   :  { %v12903_v0 = vpop.permute.xlu1 %12902  ;;  %v12900_v6 = vunpack.i.h.bf16 %v12898_v22  ;;  %v12899_v2 = vunpack.i.l.bf16 %v12898_v22 }
 0x470   :  { %v12904_v23 = vunpack.i.l.bf16 %v12903_v0  ;;  %v12905_v43 = vunpack.i.h.bf16 %v12903_v0 }
 0x471   :  { %v6888_v38 = vsel %vm1544_vm6, %v6856_v4, %v12899_v2  ;;  %v6889_v37 = vsel %vm1544_vm6, %v6857_v61, %v12900_v6 }
 0x472   :  { %v12908_v35 = vpop.permute.xlu0 %12907  ;;  %v6920_v53 = vsel %vm1577_vm7, %v6888_v38, %v12904_v23  ;;  %v6921_v5 = vsel %vm1577_vm7, %v6889_v37, %v12905_v43 }
 0x473   :  { %v12913_v56 = vpop.permute.xlu1 %12912  ;;  %v12909_v54 = vunpack.i.l.bf16 %v12908_v35  ;;  %7217 = vmatmul.mubr.f32.gmra.mrb[116].mxu1 %v6920_v53  ;;  %v12910_v48 = vunpack.i.h.bf16 %v12908_v35 }
 0x474   :  { %v12914_v29 = vunpack.i.l.bf16 %v12913_v56  ;;  %10098 = vmatprep.mubr.msk.f32.mxu1 %vm38_vm0, %v15822_v19  ;;  %v16058_v11 = vpop.f32.mrb[56].mxu1  ;;  %v12915_v12 = vunpack.i.h.bf16 %v12913_v56 }
 0x475   :  { %v6730_v40 = vsel %vm38_vm0, %v5546_v20, %v12909_v54  ;;  %v7303_v45 = vsel %vm7247_vm8, %v16058_v11, 0.0  ;;  %v3675_v13 = vpop.f32.mrb[57].mxu1  ;;  %v6731_v14 = vsel %vm38_vm0, %v5547_v17, %v12910_v48 }
 0x476   :  { %v12918_v32 = vpop.permute.xlu0 %12917  ;;  %v7304_v62 = vadd.f32 %v7303_v45, %v7302_v9  ;;  %v6762_v19 = vsel %vm1412_vm2, %v6730_v40, %v12914_v29  ;;  %v6763_v43 = vsel %vm1412_vm2, %v6731_v14, %v12915_v12 }
 0x477   :  { %v12923_v8 = vpop.permute.xlu1 %12922  ;;  %v12919_v46 = vunpack.i.l.bf16 %v12918_v32  ;;  %7222 = vmatmul.mubr.f32.gmra.mrb[118].mxu1 %v6921_v5  ;;  %v12920_v49 = vunpack.i.h.bf16 %v12918_v32 }
 0x478   :  { %v12924_v47 = vunpack.i.l.bf16 %v12923_v8  ;;  %10099 = vmatprep.mubr.msk.f32.mxu1 %vm38_vm0, %v15874_v63  ;;  %v16068_v30 = vpop.f32.mrb[58].mxu1  ;;  %v12925_v38 = vunpack.i.h.bf16 %v12923_v8 }
 0x479   :  { %v6794_v22 = vsel %vm1445_vm3, %v6762_v19, %v12919_v46  ;;  %18483 = vst [vmem:[#allocation8_spill] sm:$0xff] %v16068_v30  ;;  %v7305_v9 = vsel %vm7247_vm8, %v16068_v30, 0.0  ;;  %v3680_v0 = vpop.f32.mrb[59].mxu1  ;;  %v6795_v53 = vsel %vm1445_vm3, %v6763_v43, %v12920_v49  ;;  %v5548_v46 = vld [vmem:[#allocation2 + $0x168] sm:$0xff] }
 0x47a   :  { %v12928_v6 = vpop.permute.xlu0 %12927  ;;  %v7306_v2 = vadd.f32 %v7305_v9, %v7304_v62  ;;  %v6826_v63 = vsel %vm1478_vm4, %v6794_v22, %v12924_v47  ;;  %v6827_v45 = vsel %vm1478_vm4, %v6795_v53, %v12925_v38  ;;  %v5804_v0 = vld [vmem:[#allocation2 + $0x19a] sm:$0xff] }
 0x47b   :  { %v12929_v23 = vunpack.i.l.bf16 %v12928_v6  ;;  %v12933_v4 = vpop.permute.xlu1 %12932  ;;  %v12930_v61 = vunpack.i.h.bf16 %v12928_v6 }
 0x47c   :  { %v12934_v35 = vunpack.i.l.bf16 %v12933_v4  ;;  %v12935_v20 = vunpack.i.h.bf16 %v12933_v4 }
 0x47d   :  { %v6858_v56 = vsel %vm1511_vm5, %v6826_v63, %v12929_v23  ;;  %v6859_v5 = vsel %vm1511_vm5, %v6827_v45, %v12930_v61  ;;  %v5549_v61 = vld [vmem:[#allocation2 + $0x170] sm:$0xff] }
 0x47e   :  { %v12938_v54 = vpop.permute.xlu0 %12937  ;;  %v6890_v40 = vsel %vm1544_vm6, %v6858_v56, %v12934_v35  ;;  %v6891_v9 = vsel %vm1544_vm6, %v6859_v5, %v12935_v20 }
 0x47f   :  { %v12939_v37 = vunpack.i.l.bf16 %v12938_v54  ;;  %v12943_v29 = vpop.permute.xlu1 %12942  ;;  %v12940_v13 = vunpack.i.h.bf16 %v12938_v54 }
 0x480   :  { %v12944_v48 = vunpack.i.l.bf16 %v12943_v29  ;;  %v12945_v6 = vunpack.i.h.bf16 %v12943_v29 }
 0x481   :  { %v6922_v32 = vsel %vm1577_vm7, %v6890_v40, %v12939_v37  ;;  %v6923_v4 = vsel %vm1577_vm7, %v6891_v9, %v12940_v13 }
 0x482   :  { %v16080_v62 = vpop.f32.mrb[60].mxu1  ;;  %v12948_v8 = vpop.permute.xlu0 %12947  ;;  %7227 = vmatmul.mubr.f32.gmra.mrb[120].mxu1 %v6922_v32  ;;  %v6732_v14 = vsel %vm38_vm0, %v5548_v46, %v12944_v48  ;;  %v6733_v37 = vsel %vm38_vm0, %v5549_v61, %v12945_v6 }
 0x483   :  { %18484 = vst [vmem:[#allocation12_spill] sm:$0xff] %v16080_v62  ;;  %v7307_v12 = vsel %vm7247_vm8, %v16080_v62, 0.0  ;;  %v12949_v17 = vunpack.i.l.bf16 %v12948_v8  ;;  %v12953_v47 = vpop.permute.xlu1 %12952  ;;  %v3685_v19 = vpop.f32.mrb[61].mxu1  ;;  %10100 = vmatprep.mubr.msk.f32.mxu1 %vm38_vm0, %v15894_v28  ;;  %v12950_v38 = vunpack.i.h.bf16 %v12948_v8  ;;  %v5805_v8 = vld [vmem:[#allocation2 + $0x1a2] sm:$0xff] }
 0x484   :  { %v7308_v49 = vadd.f32 %v7307_v12, %v7306_v2  ;;  %v12954_v22 = vunpack.i.l.bf16 %v12953_v47  ;;  %v12955_v29 = vunpack.i.h.bf16 %v12953_v47 }
 0x485   :  { %v6764_v23 = vsel %vm1412_vm2, %v6732_v14, %v12949_v17  ;;  %v6765_v48 = vsel %vm1412_vm2, %v6733_v37, %v12950_v38 }
 0x486   :  { %v16090_v43 = vpop.f32.mrb[62].mxu1  ;;  %7232 = vmatmul.mubr.f32.gmra.mrb[122].mxu1 %v6923_v4  ;;  %v12958_v35 = vpop.permute.xlu0 %12957  ;;  %v6796_v54 = vsel %vm1445_vm3, %v6764_v23, %v12954_v22  ;;  %v6797_v12 = vsel %vm1445_vm3, %v6765_v48, %v12955_v29 }
 0x487   :  { %18485 = vst [vmem:[#allocation10_spill] sm:$0xff] %v16090_v43  ;;  %v7309_v28 = vsel %vm7247_vm8, %v16090_v43, 0.0  ;;  %v12959_v63 = vunpack.i.l.bf16 %v12958_v35  ;;  %v6411_v53 = vpop.permute.xlu1 %6410  ;;  %v3690_v2 = vpop.f32.mrb[63].mxu1  ;;  %10101 = vmatprep.mubr.msk.f32.mxu1 %vm38_vm0, %v5804_v0  ;;  %v12960_v40 = vunpack.i.h.bf16 %v12958_v35 }
 0x488   :  { %v16095_v56 = vadd.f32 %v7309_v28, %v7308_v49 }
 0x489   :  { %v6828_v20 = vsel %vm1478_vm4, %v6796_v54, %v12959_v63  ;;  %v6829_v47 = vsel %vm1478_vm4, %v6797_v12, %v12960_v40 }
 0x48a   :  { %v6860_v45 = vsel %vm1511_vm5, %v6828_v20, %v6411_v53  ;;  %v6539_v13 = vpop.permute.xlu0 %6538 }
 0x48b   :  { %v6892_v32 = vsel %vm1544_vm6, %v6860_v45, %v6539_v13  ;;  %v6667_v5 = vpop.permute.xlu1 %6666 }
 0x48c   :  { %v6924_v46 = vsel %vm1577_vm7, %v6892_v32, %v6667_v5 }
 0x48d   :  { %7237 = vmatmul.mubr.f32.gmra.mrb[124].mxu1 %v6924_v46 }
 0x48e   :  { %v6413_v17 = vpop.permute.xlu0 %6412  ;;  %10102 = vmatprep.mubr.msk.f32.mxu1 %vm38_vm0, %v5805_v8 }
 0x48f   :  { %v6861_v19 = vsel %vm1511_vm5, %v6829_v47, %v6413_v17  ;;  %v6541_v14 = vpop.permute.xlu1 %6540 }
 0x490   :  { %v6893_v49 = vsel %vm1544_vm6, %v6861_v19, %v6541_v14 }
 0x492   :  { %v6669_v22 = vpop.permute.xlu0 %6668 }
 0x493   :  { %v6925_v9 = vsel %vm1577_vm7, %v6893_v49, %v6669_v22 }
 0x494   :  { %7242 = vmatmul.mubr.f32.gmra.mrb[126].mxu1 %v6925_v9  ;;  %v16110_v0 = vpop.f32.mrb[64].mxu1 }
 0x495   :  { %18486 = vst [vmem:[#allocation11_spill] sm:$0xff] %v16110_v0  ;;  %v7090_v6 = vpop.f32.mrb[65].mxu1  ;;  %v7318_v4 = vsel %vm7247_vm8, %v16110_v0, 0.0 }
 0x498   :  { %v16112_v23 = vpop.f32.mrb[66].mxu1 }
 0x499   :  { %18487 = vst [vmem:[#allocation17_spill] sm:$0xff] %v16112_v23  ;;  %v7319_v38 = vsel %vm7247_vm8, %v16112_v23, 0.0  ;;  %v7095_v35 = vpop.f32.mrb[67].mxu1 }
 0x49a   :  { %v7320_v28 = vadd.f32 %v7319_v38, %v7318_v4 }
 0x4a2   :  { %v16118_v63 = vpop.f32.mrb[68].mxu1 }
 0x4a3   :  { %18488 = vst [vmem:[#allocation15_spill] sm:$0xff] %v16118_v63  ;;  %v7321_v53 = vsel %vm7247_vm8, %v16118_v63, 0.0  ;;  %v7100_v2 = vpop.f32.mrb[69].mxu1 }
 0x4a4   :  { %v7322_v61 = vadd.f32 %v7321_v53, %v7320_v28 }
 0x4a6   :  { %v16122_v54 = vpop.f32.mrb[70].mxu1 }
 0x4a7   :  { %18489 = vst [vmem:[#allocation16_spill] sm:$0xff] %v16122_v54  ;;  %v7323_v37 = vsel %vm7247_vm8, %v16122_v54, 0.0  ;;  %v7105_v29 = vpop.f32.mrb[71].mxu1 }
 0x4a8   :  { %v7324_v20 = vadd.f32 %v7323_v37, %v7322_v61 }
 0x4b1   :  { %v16126_v48 = vpop.f32.mrb[72].mxu1 }
 0x4b2   :  { %18490 = vst [vmem:[#allocation22_spill] sm:$0xff] %v16126_v48  ;;  %v7325_v40 = vsel %vm7247_vm8, %v16126_v48, 0.0  ;;  %v7110_v45 = vpop.f32.mrb[73].mxu1 }
 0x4b3   :  { %v7326_v13 = vadd.f32 %v7325_v40, %v7324_v20 }
 0x4b5   :  { %v16130_v32 = vpop.f32.mrb[74].mxu1 }
 0x4b6   :  { %18491 = vst [vmem:[#allocation20_spill] sm:$0xff] %v16130_v32  ;;  %v7327_v5 = vsel %vm7247_vm8, %v16130_v32, 0.0  ;;  %v7115_v8 = vpop.f32.mrb[75].mxu1 }
 0x4b7   :  { %v7328_v46 = vadd.f32 %v7327_v5, %v7326_v13 }
 0x4be   :  { %v16134_v12 = vpop.f32.mrb[76].mxu1 }
 0x4bf   :  { %v7329_v17 = vsel %vm7247_vm8, %v16134_v12, 0.0  ;;  %v7120_v47 = vpop.f32.mrb[77].mxu1 }
 0x4c0   :  { %v7330_v19 = vadd.f32 %v7329_v17, %v7328_v46 }
 0x4c2   :  { %v16138_v14 = vpop.f32.mrb[78].mxu1 }
 0x4c3   :  { %v7331_v49 = vsel %vm7247_vm8, %v16138_v14, 0.0  ;;  %v7125_v22 = vpop.f32.mrb[79].mxu1 }
 0x4c4   :  { %v7332_v9 = vadd.f32 %v7331_v49, %v7330_v19 }
 0x4cd   :  { %v16142_v6 = vpop.f32.mrb[80].mxu1 }
 0x4ce   :  { %v7333_v4 = vsel %vm7247_vm8, %v16142_v6, 0.0  ;;  %v7130_v38 = vpop.f32.mrb[81].mxu1 }
 0x4cf   :  { %v7334_v35 = vadd.f32 %v7333_v4, %v7332_v9 }
 0x4d1   :  { %v16146_v28 = vpop.f32.mrb[82].mxu1 }
 0x4d2   :  { %v7335_v53 = vsel %vm7247_vm8, %v16146_v28, 0.0  ;;  %v7135_v2 = vpop.f32.mrb[83].mxu1 }
 0x4d3   :  { %v7336_v61 = vadd.f32 %v7335_v53, %v7334_v35 }
 0x4da   :  { %v16150_v37 = vpop.f32.mrb[84].mxu1 }
 0x4db   :  { %18492 = vst [vmem:[#allocation29_spill] sm:$0xff] %v16150_v37  ;;  %v7337_v29 = vsel %vm7247_vm8, %v16150_v37, 0.0  ;;  %v7140_v20 = vpop.f32.mrb[85].mxu1 }
 0x4dc   :  { %v7338_v40 = vadd.f32 %v7337_v29, %v7336_v61 }
 0x4de   :  { %v16154_v45 = vpop.f32.mrb[86].mxu1 }
 0x4df   :  { %18493 = vst [vmem:[#allocation27_spill] sm:$0xff] %v16154_v45  ;;  %v7339_v13 = vsel %vm7247_vm8, %v16154_v45, 0.0  ;;  %v7145_v5 = vpop.f32.mrb[87].mxu1 }
 0x4e0   :  { %v7340_v8 = vadd.f32 %v7339_v13, %v7338_v40 }
 0x4e7   :  { %v16158_v46 = vpop.f32.mrb[88].mxu1 }
 0x4e8   :  { %18494 = vst [vmem:[#allocation34_spill] sm:$0xff] %v16158_v46  ;;  %v7341_v17 = vsel %vm7247_vm8, %v16158_v46, 0.0  ;;  %v7150_v47 = vpop.f32.mrb[89].mxu1 }
 0x4e9   :  { %v7342_v19 = vadd.f32 %v7341_v17, %v7340_v8 }
 0x4eb   :  { %v16162_v49 = vpop.f32.mrb[90].mxu1 }
 0x4ec   :  { %18495 = vst [vmem:[#allocation23_spill] sm:$0xff] %v16162_v49  ;;  %v7343_v22 = vsel %vm7247_vm8, %v16162_v49, 0.0  ;;  %v7155_v9 = vpop.f32.mrb[91].mxu1 }
 0x4ed   :  { %v7344_v4 = vadd.f32 %v7343_v22, %v7342_v19 }
 0x4f2   :  { %v16166_v38 = vpop.f32.mrb[92].mxu1 }
 0x4f3   :  { %18496 = vst [vmem:[#allocation3_spill] sm:$0xff] %v16166_v38  ;;  %v7345_v35 = vsel %vm7247_vm8, %v16166_v38, 0.0  ;;  %v7160_v53 = vpop.f32.mrb[93].mxu1 }
 0x4f4   :  { %v7346_v2 = vadd.f32 %v7345_v35, %v7344_v4 }
 0x4f6   :  { %v16170_v61 = vpop.f32.mrb[94].mxu1 }
 0x4f7   :  { %18497 = vst [vmem:[#allocation4_spill] sm:$0xff] %v16170_v61  ;;  %v7347_v29 = vsel %vm7247_vm8, %v16170_v61, 0.0  ;;  %v7165_v20 = vpop.f32.mrb[95].mxu1 }
 0x4f8   :  { %v7348_v40 = vadd.f32 %v7347_v29, %v7346_v2 }
 0x501   :  { %v16174_v13 = vpop.f32.mrb[96].mxu1 }
 0x502   :  { %18498 = vst [vmem:[#allocation24_spill] sm:$0xff] %v16174_v13  ;;  %v7349_v5 = vsel %vm7247_vm8, %v16174_v13, 0.0  ;;  %v7170_v8 = vpop.f32.mrb[97].mxu1 }
 0x503   :  { %v7350_v17 = vadd.f32 %v7349_v5, %v7348_v40 }
 0x505   :  { %v16178_v47 = vpop.f32.mrb[98].mxu1 }
 0x506   :  { %18499 = vst [vmem:[#allocation5_spill] sm:$0xff] %v16178_v47  ;;  %v7351_v19 = vsel %vm7247_vm8, %v16178_v47, 0.0  ;;  %v7175_v22 = vpop.f32.mrb[99].mxu1 }
 0x507   :  { %v7352_v9 = vadd.f32 %v7351_v19, %v7350_v17 }
 0x50e   :  { %v16182_v4 = vpop.f32.mrb[100].mxu1 }
 0x50f   :  { %18500 = vst [vmem:[#allocation6_spill] sm:$0xff] %v16182_v4  ;;  %v7353_v35 = vsel %vm7247_vm8, %v16182_v4, 0.0  ;;  %v7180_v53 = vpop.f32.mrb[101].mxu1 }
 0x510   :  { %v7354_v2 = vadd.f32 %v7353_v35, %v7352_v9 }
 0x512   :  { %v16186_v29 = vpop.f32.mrb[102].mxu1 }
 0x513   :  { %18501 = vst [vmem:[#allocation41_spill] sm:$0xff] %v16186_v29  ;;  %v7355_v20 = vsel %vm7247_vm8, %v16186_v29, 0.0  ;;  %v7185_v40 = vpop.f32.mrb[103].mxu1 }
 0x514   :  { %v7356_v5 = vadd.f32 %v7355_v20, %v7354_v2 }
 0x51d   :  { %v16190_v8 = vpop.f32.mrb[104].mxu1 }
 0x51e   :  { %18502 = vst [vmem:[#allocation42_spill] sm:$0xff] %v16190_v8  ;;  %v7357_v22 = vsel %vm7247_vm8, %v16190_v8, 0.0  ;;  %v7190_v17 = vpop.f32.mrb[105].mxu1 }
 0x51f   :  { %v7358_v19 = vadd.f32 %v7357_v22, %v7356_v5 }
 0x521   :  { %v16194_v43 = vpop.f32.mrb[106].mxu1 }
 0x522   :  { %18503 = vst [vmem:[#allocation43_spill] sm:$0xff] %v16194_v43  ;;  %v7359_v53 = vsel %vm7247_vm8, %v16194_v43, 0.0  ;;  %v7195_v9 = vpop.f32.mrb[107].mxu1 }
 0x523   :  { %v7360_v35 = vadd.f32 %v7359_v53, %v7358_v19 }
 0x52a   :  { %v16198_v4 = vpop.f32.mrb[108].mxu1 }
 0x52b   :  { %18504 = vst [vmem:[#allocation44_spill] sm:$0xff] %v16198_v4  ;;  %v7361_v40 = vsel %vm7247_vm8, %v16198_v4, 0.0  ;;  %v7200_v2 = vpop.f32.mrb[109].mxu1 }
 0x52c   :  { %v7362_v20 = vadd.f32 %v7361_v40, %v7360_v35 }
 0x52e   :  { %v16202_v29 = vpop.f32.mrb[110].mxu1 }
 0x52f   :  { %18505 = vst [vmem:[#allocation47_spill] sm:$0xff] %v16202_v29  ;;  %v7363_v17 = vsel %vm7247_vm8, %v16202_v29, 0.0  ;;  %v7205_v5 = vpop.f32.mrb[111].mxu1 }
 0x530   :  { %v7364_v22 = vadd.f32 %v7363_v17, %v7362_v20 }
 0x539   :  { %v16206_v8 = vpop.f32.mrb[112].mxu1 }
 0x53a   :  { %18506 = vst [vmem:[#allocation45_spill] sm:$0xff] %v16206_v8  ;;  %v7365_v9 = vsel %vm7247_vm8, %v16206_v8, 0.0  ;;  %v7210_v19 = vpop.f32.mrb[113].mxu1 }
 0x53b   :  { %v7366_v53 = vadd.f32 %v7365_v9, %v7364_v22 }
 0x53d   :  { %v16210_v43 = vpop.f32.mrb[114].mxu1 }
 0x53e   :  { %18507 = vst [vmem:[#allocation46_spill] sm:$0xff] %v16210_v43  ;;  %v7367_v2 = vsel %vm7247_vm8, %v16210_v43, 0.0  ;;  %v7215_v35 = vpop.f32.mrb[115].mxu1 }
 0x53f   :  { %v7368_v40 = vadd.f32 %v7367_v2, %v7366_v53 }
 0x546   :  { %v16214_v4 = vpop.f32.mrb[116].mxu1 }
 0x547   :  { %18508 = vst [vmem:[#allocation48_spill] sm:$0xff] %v16214_v4  ;;  %v7369_v5 = vsel %vm7247_vm8, %v16214_v4, 0.0  ;;  %v7220_v20 = vpop.f32.mrb[117].mxu1 }
 0x548   :  { %v7370_v17 = vadd.f32 %v7369_v5, %v7368_v40 }
 0x54a   :  { %v16218_v29 = vpop.f32.mrb[118].mxu1 }
 0x54b   :  { %18509 = vst [vmem:[#allocation49_spill] sm:$0xff] %v16218_v29  ;;  %v7371_v19 = vsel %vm7247_vm8, %v16218_v29, 0.0  ;;  %v7225_v22 = vpop.f32.mrb[119].mxu1  ;;  %v7311_v29 = vrot.slane %v16095_v56, 4 }
 0x54c   :  { %v7372_v9 = vadd.f32 %v7371_v19, %v7370_v17 }
 0x555   :  { %v16222_v8 = vpop.f32.mrb[120].mxu1 }
 0x556   :  { %18510 = vst [vmem:[#allocation9_spill] sm:$0xff] %v16222_v8  ;;  %v7373_v35 = vsel %vm7247_vm8, %v16222_v8, 0.0  ;;  %v7230_v53 = vpop.f32.mrb[121].mxu1  ;;  %v7312_v8 = vadd.f32 %v7311_v29, %v16095_v56 }
 0x557   :  { %v7374_v2 = vadd.f32 %v7373_v35, %v7372_v9 }
 0x559   :  { %v16226_v43 = vpop.f32.mrb[122].mxu1 }
 0x55a   :  { %18511 = vst [vmem:[#allocation52_spill] sm:$0xff] %v16226_v43  ;;  %v7375_v20 = vsel %vm7247_vm8, %v16226_v43, 0.0  ;;  %v7235_v40 = vpop.f32.mrb[123].mxu1  ;;  %v7313_v43 = vrot.slane %v7312_v8, 2 }
 0x55b   :  { %v7376_v5 = vadd.f32 %v7375_v20, %v7374_v2 }
 0x55c   :  { %v7314_v20 = vadd.f32 %v7313_v43, %v7312_v8 }
 0x55e   :  { %v7315_v13 = vrot.slane %v7314_v20, 1 }
 0x560   :  { %v16230_v4 = vpop.f32.mrb[124].mxu1 }
 0x561   :  { %18512 = vst [vmem:[#allocation21_spill] sm:$0xff] %v16230_v4  ;;  %v7377_v17 = vsel %vm7247_vm8, %v16230_v4, 0.0  ;;  %v7240_v19 = vpop.f32.mrb[125].mxu1  ;;  %v7316_v4 = vadd.f32 %v7315_v13, %v7314_v20 }
 0x562   :  { %v7378_v22 = vadd.f32 %v7377_v17, %v7376_v5 }
 0x567   :  { %v16236_v53 = vpop.f32.mrb[126].mxu1 }
 0x568   :  { %v7379_v9 = vsel %vm7247_vm8, %v16236_v53, 0.0  ;;  %v7245_v35 = vpop.f32.mrb[127].mxu1 }
 0x569   :  { %v7380_v40 = vadd.f32 %v7379_v9, %v7378_v22 }
 0x56b   :  { %v7381_v2 = vrot.slane %v7380_v40, 4 }
 0x56d   :  { %v7382_v47 = vadd.f32 %v7381_v2, %v7380_v40 }
 0x56f   :  { %v7383_v62 = vrot.slane %v7382_v47, 2 }
 0x571   :  { %v7384_v30 = vadd.f32 %v7383_v62, %v7382_v47 }
 0x573   :  { %v7385_v61 = vrot.slane %v7384_v30, 1 }
 0x575   :  { %v7386_v19 = vadd.f32 %v7385_v61, %v7384_v30 }
 0x577   :  { %v7387_v5 = vadd.f32 %v7386_v19, %v7316_v4 }
 0x579   :  { %v16240_v17 = vmul.f32 0.001953125, %v7387_v5 }
 0x57b   :  { %v7390_v56 = vsub.f32 %v15040_v57, %v16240_v17  ;;  %v7391_v29 = vsub.f32 %v15052_v58, %v16240_v17  ;;  %v7392_v22 = vsub.f32 %v15139_v33, %v16240_v17  ;;  %v7393_v43 = vsub.f32 %v15150_v7, %v16240_v17 }
 0x57c   :  { %v7394_v30 = vsub.f32 %v15618_v52, %v16240_v17  ;;  %v7395_v13 = vsub.f32 %v15634_v50, %v16240_v17  ;;  %v7396_v40 = vsub.f32 %v15668_v44, %v16240_v17  ;;  %v7397_v5 = vsub.f32 %v15682_v31, %v16240_v17 }
 0x57d   :  { %v7422_v8 = vmul.f32 %v7390_v56, %v7390_v56  ;;  %v7423_v62 = vmul.f32 %v7391_v29, %v7391_v29  ;;  %v7424_v61 = vmul.f32 %v7392_v22, %v7392_v22  ;;  %v7425_v47 = vmul.f32 %v7393_v43, %v7393_v43 }
 0x57e   :  { %v7426_v2 = vmul.f32 %v7394_v30, %v7394_v30  ;;  %v7427_v56 = vmul.f32 %v7395_v13, %v7395_v13  ;;  %v7398_v43 = vsub.f32 %v15723_v59, %v16240_v17  ;;  %v7399_v30 = vsub.f32 %v15739_v55, %v16240_v17 }
 0x57f   :  { %v7454_v4 = vsel %vm7247_vm8, %v7422_v8, 0.0  ;;  %v7455_v9 = vsel %vm7247_vm8, %v7423_v62, 0.0  ;;  %v7457_v20 = vsel %vm7247_vm8, %v7424_v61, 0.0  ;;  %v7459_v29 = vsel %vm7247_vm8, %v7425_v47, 0.0 }
 0x580   :  { %v7456_v35 = vadd.f32 %v7455_v9, %v7454_v4  ;;  %v7428_v8 = vmul.f32 %v7396_v40, %v7396_v40  ;;  %v7461_v62 = vsel %vm7247_vm8, %v7426_v2, 0.0  ;;  %v7429_v9 = vmul.f32 %v7397_v5, %v7397_v5 }
 0x581   :  { %v7463_v61 = vsel %vm7247_vm8, %v7427_v56, 0.0  ;;  %v7400_v13 = vsub.f32 %v15775_v1, %v16240_v17  ;;  %v7401_v40 = vsub.f32 %v15790_v15, %v16240_v17  ;;  %v7402_v5 = vsub.f32 %v15829_v16, %v16240_v17 }
 0x582   :  { %v7458_v19 = vadd.f32 %v7457_v20, %v7456_v35  ;;  %v7430_v20 = vmul.f32 %v7398_v43, %v7398_v43  ;;  %v7465_v47 = vsel %vm7247_vm8, %v7428_v8, 0.0  ;;  %v7467_v2 = vsel %vm7247_vm8, %v7429_v9, 0.0 }
 0x583   :  { %v7403_v43 = vsub.f32 %v15846_v10, %v16240_v17 }
 0x584   :  { %v7460_v22 = vadd.f32 %v7459_v29, %v7458_v19  ;;  %v7431_v29 = vmul.f32 %v7399_v30, %v7399_v30  ;;  %v7469_v56 = vsel %vm7247_vm8, %v7430_v20, 0.0  ;;  %v7404_v30 = vsub.f32 %v15865_v41, %v16240_v17 }
 0x585   :  { %v7525_v20 = vsub.f32 %v16112_v23, %v16240_v17 }
 0x586   :  { %v7462_v4 = vadd.f32 %v7461_v62, %v7460_v22  ;;  %v7432_v62 = vmul.f32 %v7400_v13, %v7400_v13  ;;  %v7471_v8 = vsel %vm7247_vm8, %v7431_v29, 0.0  ;;  %v7524_v13 = vsub.f32 %v16110_v0, %v16240_v17 }
 0x587   :  { %v7557_v23 = vmul.f32 %v7525_v20, %v7525_v20  ;;  %v7529_v20 = vsub.f32 %v16130_v32, %v16240_v17 }
 0x588   :  { %v7464_v35 = vadd.f32 %v7463_v61, %v7462_v4  ;;  %v7433_v61 = vmul.f32 %v7401_v40, %v7401_v40  ;;  %v7473_v9 = vsel %vm7247_vm8, %v7432_v62, 0.0  ;;  %v7435_v40 = vmul.f32 %v7403_v43, %v7403_v43 }
 0x589   :  { %v7436_v62 = vmul.f32 %v7404_v30, %v7404_v30  ;;  %v7407_v43 = vsub.f32 %v15916_v51, %v16240_v17  ;;  %v7528_v30 = vsub.f32 %v16126_v48, %v16240_v17  ;;  %v7589_v0 = vsel %vm7247_vm8, %v7557_v23, 0.0 }
 0x58a   :  { %v7466_v19 = vadd.f32 %v7465_v47, %v7464_v35  ;;  %v7434_v47 = vmul.f32 %v7402_v5, %v7402_v5  ;;  %v7475_v29 = vsel %vm7247_vm8, %v7433_v61, 0.0  ;;  %v7406_v5 = vsub.f32 %v15907_v25, %v16240_v17 }
 0x58c   :  { %v7468_v22 = vadd.f32 %v7467_v2, %v7466_v19  ;;  %v7405_v2 = vsub.f32 %v15881_v26, %v16240_v17 }
 0x58e   :  { %v7470_v4 = vadd.f32 %v7469_v56, %v7468_v22  ;;  %v7526_v56 = vsub.f32 %v16118_v63, %v16240_v17  ;;  %v7437_v61 = vmul.f32 %v7405_v2, %v7405_v2 }
 0x590   :  { %v7472_v35 = vadd.f32 %v7471_v8, %v7470_v4  ;;  %v7477_v4 = vsel %vm7247_vm8, %v7434_v47, 0.0  ;;  %v7558_v47 = vmul.f32 %v7526_v56, %v7526_v56  ;;  %v7483_v56 = vsel %vm7247_vm8, %v7437_v61, 0.0 }
 0x591   :  { %v7561_v61 = vmul.f32 %v7529_v20, %v7529_v20 }
 0x592   :  { %v7474_v19 = vadd.f32 %v7473_v9, %v7472_v35  ;;  %v7527_v35 = vsub.f32 %v16122_v54, %v16240_v17  ;;  %v7556_v9 = vmul.f32 %v7524_v13, %v7524_v13  ;;  %v7481_v13 = vsel %vm7247_vm8, %v7436_v62, 0.0 }
 0x593   :  { %v7560_v62 = vmul.f32 %v7528_v30, %v7528_v30  ;;  %v7591_v32 = vsel %vm7247_vm8, %v7558_v47, 0.0 }
 0x594   :  { %v7476_v22 = vadd.f32 %v7475_v29, %v7474_v19  ;;  %v7479_v19 = vsel %vm7247_vm8, %v7435_v40, 0.0  ;;  %v7408_v29 = vsub.f32 %v15928_v60, %v16240_v17  ;;  %v7559_v54 = vmul.f32 %v7527_v35, %v7527_v35 }
 0x595   :  { %v7588_v40 = vsel %vm7247_vm8, %v7556_v9, 0.0 }
 0x596   :  { %v7478_v8 = vadd.f32 %v7477_v4, %v7476_v22  ;;  %v7409_v22 = vsub.f32 %v15938_v18, %v16240_v17  ;;  %v7438_v4 = vmul.f32 %v7406_v5, %v7406_v5  ;;  %v7590_v48 = vadd.f32 %v7589_v0, %v7588_v40 }
 0x597   :  { %v7530_v5 = vsub.f32 %v16134_v12, %v16240_v17  ;;  %v7440_v35 = vmul.f32 %v7408_v29, %v7408_v29  ;;  %v7593_v0 = vsel %vm7247_vm8, %v7559_v54, 0.0  ;;  %v7532_v29 = vsub.f32 %v16142_v6, %v16240_v17 }
 0x598   :  { %v7480_v63 = vadd.f32 %v7479_v19, %v7478_v8  ;;  %v7410_v8 = vsub.f32 %v15955_v36, %v16240_v17  ;;  %v7439_v19 = vmul.f32 %v7407_v43, %v7407_v43  ;;  %v7485_v23 = vsel %vm7247_vm8, %v7438_v4, 0.0 }
 0x599   :  { %v7592_v9 = vadd.f32 %v7591_v32, %v7590_v48  ;;  %v7531_v43 = vsub.f32 %v16138_v14, %v16240_v17  ;;  %v7441_v30 = vmul.f32 %v7409_v22, %v7409_v22  ;;  %v7562_v4 = vmul.f32 %v7530_v5, %v7530_v5 }
 0x59a   :  { %v7482_v2 = vadd.f32 %v7481_v13, %v7480_v63  ;;  %v7411_v63 = vsub.f32 %v15965_v21, %v16240_v17  ;;  %v7487_v47 = vsel %vm7247_vm8, %v7439_v19, 0.0  ;;  %v7413_v48 = vsub.f32 %v15987_v27, %v16240_v17 }
 0x59b   :  { %v7594_v40 = vadd.f32 %v7593_v0, %v7592_v9  ;;  %v7442_v32 = vmul.f32 %v7410_v8, %v7410_v8  ;;  %v7489_v54 = vsel %vm7247_vm8, %v7440_v35, 0.0  ;;  %v7533_v22 = vsub.f32 %v16146_v28, %v16240_v17  ;;  %v7666_v8 = vld [vmem:[%s18196_s5] sm:$0xf] }
 0x59c   :  { %v7484_v18 = vadd.f32 %v7483_v56, %v7482_v2  ;;  %v7412_v2 = vsub.f32 %v15977_v39, %v16240_v17  ;;  %v7563_v19 = vmul.f32 %v7531_v43, %v7531_v43  ;;  %v7597_v9 = vsel %vm7247_vm8, %v7561_v61, 0.0  ;;  %10401 = vmatprep.subr.msk.mxu0 %vm7878_vm9, %v7666_v8  ;;  %10451 = vmatprep.subr.msk.mxu1 %vm7878_vm9, %v7666_v8 }
 0x59d   :  { %v7443_v5 = vmul.f32 %v7411_v63, %v7411_v63  ;;  %v7599_v43 = vsel %vm7247_vm8, %v7562_v4, 0.0  ;;  %v7493_v61 = vsel %vm7247_vm8, %v7442_v32, 0.0  ;;  %10402 = vmatpush3.msk.msra.mxu0 %vm7878_vm9, %v7666_v8  ;;  %10452 = vmatpush3.msk.msra.mxu1 %vm7878_vm9, %v7666_v8 }
 0x59e   :  { %v7486_v13 = vadd.f32 %v7485_v23, %v7484_v18  ;;  %v7595_v18 = vsel %vm7247_vm8, %v7560_v62, 0.0  ;;  %v7491_v62 = vsel %vm7247_vm8, %v7441_v30, 0.0  ;;  %v7535_v30 = vsub.f32 %v16154_v45, %v16240_v17 }
 0x59f   :  { %v7596_v20 = vadd.f32 %v7595_v18, %v7594_v40  ;;  %v7564_v40 = vmul.f32 %v7532_v29, %v7532_v29  ;;  %v7445_v29 = vmul.f32 %v7413_v48, %v7413_v48  ;;  %v7495_v4 = vsel %vm7247_vm8, %v7443_v5, 0.0 }
 0x5a0   :  { %v7488_v56 = vadd.f32 %v7487_v47, %v7486_v13  ;;  %v7414_v13 = vsub.f32 %v16006_v24, %v16240_v17  ;;  %v7534_v47 = vsub.f32 %v16150_v37, %v16240_v17  ;;  %v7537_v5 = vsub.f32 %v16162_v49, %v16240_v17 }
 0x5a1   :  { %v7598_v0 = vadd.f32 %v7597_v9, %v7596_v20  ;;  %v7601_v20 = vsel %vm7247_vm8, %v7563_v19, 0.0  ;;  %v7536_v9 = vsub.f32 %v16158_v46, %v16240_v17  ;;  %v7416_v19 = vsub.f32 %v16028_v3, %v16240_v17 }
 0x5a2   :  { %v7490_v23 = vadd.f32 %v7489_v54, %v7488_v56  ;;  %v7444_v56 = vmul.f32 %v7412_v2, %v7412_v2  ;;  %v7565_v54 = vmul.f32 %v7533_v22, %v7533_v22  ;;  %v7603_v22 = vsel %vm7247_vm8, %v7564_v40, 0.0 }
 0x5a3   :  { %v7600_v18 = vadd.f32 %v7599_v43, %v7598_v0  ;;  %v7446_v0 = vmul.f32 %v7414_v13, %v7414_v13  ;;  %v7499_v40 = vsel %vm7247_vm8, %v7445_v29, 0.0  ;;  %v7538_v13 = vsub.f32 %v16166_v38, %v16240_v17 }
 0x5a4   :  { %v7492_v35 = vadd.f32 %v7491_v62, %v7490_v23  ;;  %v7415_v23 = vsub.f32 %v16016_v34, %v16240_v17  ;;  %v7566_v62 = vmul.f32 %v7534_v47, %v7534_v47  ;;  %v7605_v8 = vsel %vm7247_vm8, %v7565_v54, 0.0 }
 0x5a5   :  { %v7602_v2 = vadd.f32 %v7601_v20, %v7600_v18  ;;  %v7417_v18 = vsub.f32 %v16039_v42, %v16240_v17  ;;  %v7501_v54 = vsel %vm7247_vm8, %v7446_v0, 0.0  ;;  %v7569_v29 = vmul.f32 %v7537_v5, %v7537_v5 }
 0x5a6   :  { %v7494_v63 = vadd.f32 %v7493_v61, %v7492_v35  ;;  %v7497_v35 = vsel %vm7247_vm8, %v7444_v56, 0.0  ;;  %v7567_v61 = vmul.f32 %v7535_v30, %v7535_v30  ;;  %v7447_v47 = vmul.f32 %v7415_v23, %v7415_v23  ;;  %v18513_v23 = vld [vmem:[#allocation4_spill] sm:$0xff] }
 0x5a7   :  { %v7604_v43 = vadd.f32 %v7603_v22, %v7602_v2  ;;  %v7568_v56 = vmul.f32 %v7536_v9, %v7536_v9  ;;  %v7418_v2 = vsub.f32 %v16058_v11, %v16240_v17  ;;  %v7448_v30 = vmul.f32 %v7416_v19, %v7416_v19  ;;  %v18515_v19 = vld [vmem:[#allocation24_spill] sm:$0xff] }
 0x5a8   :  { %v7496_v32 = vadd.f32 %v7495_v4, %v7494_v63  ;;  %v7607_v4 = vsel %vm7247_vm8, %v7566_v62, 0.0  ;;  %v7449_v9 = vmul.f32 %v7417_v18, %v7417_v18  ;;  %v7503_v62 = vsel %vm7247_vm8, %v7447_v47, 0.0  ;;  %v18517_v18 = vld [vmem:[#allocation5_spill] sm:$0xff] }
 0x5a9   :  { %v7606_v63 = vadd.f32 %v7605_v8, %v7604_v43  ;;  %v7609_v43 = vsel %vm7247_vm8, %v7567_v61, 0.0  ;;  %v7540_v49 = vsub.f32 %v18515_v19, %v16240_v17  ;;  %v7570_v0 = vmul.f32 %v7538_v13, %v7538_v13 }
 0x5aa   :  { %v7498_v48 = vadd.f32 %v7497_v35, %v7496_v32  ;;  %v7539_v35 = vsub.f32 %v18513_v23, %v16240_v17  ;;  %v7450_v5 = vmul.f32 %v7418_v2, %v7418_v2  ;;  %v7505_v61 = vsel %vm7247_vm8, %v7448_v30, 0.0  ;;  %v18519_v2 = vld [vmem:[#allocation6_spill] sm:$0xff] }
 0x5ab   :  { %v7608_v32 = vadd.f32 %v7607_v4, %v7606_v63  ;;  %v7611_v63 = vsel %vm7247_vm8, %v7568_v56, 0.0  ;;  %v7541_v46 = vsub.f32 %v18517_v18, %v16240_v17  ;;  %v7507_v56 = vsel %vm7247_vm8, %v7449_v9, 0.0 }
 0x5ac   :  { %v7500_v20 = vadd.f32 %v7499_v40, %v7498_v48  ;;  %v18514_v48 = vld [vmem:[#allocation8_spill] sm:$0xff]  ;;  %v7571_v47 = vmul.f32 %v7539_v35, %v7539_v35  ;;  %v7542_v45 = vsub.f32 %v18519_v2, %v16240_v17  ;;  %v7572_v30 = vmul.f32 %v7540_v49, %v7540_v49  ;;  %v18521_v49 = vld [vmem:[#allocation42_spill] sm:$0xff] }
 0x5ad   :  { %v7419_v8 = vsub.f32 %v18514_v48, %v16240_v17  ;;  %v7610_v40 = vadd.f32 %v7609_v43, %v7608_v32  ;;  %v7613_v32 = vsel %vm7247_vm8, %v7569_v29, 0.0  ;;  %v18520_v29 = vld [vmem:[#allocation41_spill] sm:$0xff]  ;;  %v7573_v37 = vmul.f32 %v7541_v46, %v7541_v46 }
 0x5ae   :  { %v7502_v22 = vadd.f32 %v7501_v54, %v7500_v20  ;;  %v18516_v20 = vld [vmem:[#allocation12_spill] sm:$0xff]  ;;  %v7543_v18 = vsub.f32 %v18520_v29, %v16240_v17 }
 0x5af   :  { %v7420_v4 = vsub.f32 %v18516_v20, %v16240_v17  ;;  %v7612_v54 = vadd.f32 %v7611_v63, %v7610_v40  ;;  %v7451_v13 = vmul.f32 %v7419_v8, %v7419_v8  ;;  %v7509_v63 = vsel %vm7247_vm8, %v7450_v5, 0.0 }
 0x5b0   :  { %v7504_v38 = vadd.f32 %v7503_v62, %v7502_v22  ;;  %v18518_v22 = vld [vmem:[#allocation10_spill] sm:$0xff]  ;;  %v7617_v8 = vsel %vm7247_vm8, %v7571_v47, 0.0  ;;  %v7621_v47 = vsel %vm7247_vm8, %v7573_v37, 0.0  ;;  %v18525_v37 = vld [vmem:[#allocation45_spill] sm:$0xff] }
 0x5b1   :  { %v7421_v43 = vsub.f32 %v18518_v22, %v16240_v17  ;;  %v7614_v62 = vadd.f32 %v7613_v32, %v7612_v54  ;;  %v7452_v40 = vmul.f32 %v7420_v4, %v7420_v4  ;;  %v7619_v4 = vsel %vm7247_vm8, %v7572_v30, 0.0 }
 0x5b2   :  { %v7506_v23 = vadd.f32 %v7505_v61, %v7504_v38  ;;  %v7615_v38 = vsel %vm7247_vm8, %v7570_v0, 0.0  ;;  %v7574_v0 = vmul.f32 %v7542_v45, %v7542_v45 }
 0x5b3   :  { %v7616_v35 = vadd.f32 %v7615_v38, %v7614_v62  ;;  %v7453_v9 = vmul.f32 %v7421_v43, %v7421_v43  ;;  %v7513_v5 = vsel %vm7247_vm8, %v7452_v40, 0.0  ;;  %v18522_v38 = vld [vmem:[#allocation43_spill] sm:$0xff] }
 0x5b4   :  { %v7508_v19 = vadd.f32 %v7507_v56, %v7506_v23  ;;  %v7511_v23 = vsel %vm7247_vm8, %v7451_v13, 0.0  ;;  %v7544_v56 = vsub.f32 %v18521_v49, %v16240_v17  ;;  %v7545_v46 = vsub.f32 %v18522_v38, %v16240_v17  ;;  %v18524_v40 = vld [vmem:[#allocation47_spill] sm:$0xff] }
 0x5b5   :  { %v7618_v54 = vadd.f32 %v7617_v8, %v7616_v35  ;;  %v7515_v43 = vsel %vm7247_vm8, %v7453_v9, 0.0  ;;  %v7623_v30 = vsel %vm7247_vm8, %v7574_v0, 0.0 }
 0x5b6   :  { %v7510_v61 = vadd.f32 %v7509_v63, %v7508_v19  ;;  %v7575_v63 = vmul.f32 %v7543_v18, %v7543_v18  ;;  %v7576_v45 = vmul.f32 %v7544_v56, %v7544_v56 }
 0x5b7   :  { %v7620_v19 = vadd.f32 %v7619_v4, %v7618_v54  ;;  %v7547_v54 = vsub.f32 %v18524_v40, %v16240_v17 }
 0x5b8   :  { %v7512_v32 = vadd.f32 %v7511_v23, %v7510_v61  ;;  %v18523_v61 = vld [vmem:[#allocation44_spill] sm:$0xff]  ;;  %v7625_v4 = vsel %vm7247_vm8, %v7575_v63, 0.0 }
 0x5b9   :  { %v7622_v13 = vadd.f32 %v7621_v47, %v7620_v19  ;;  %v7546_v8 = vsub.f32 %v18523_v61, %v16240_v17  ;;  %v7627_v19 = vsel %vm7247_vm8, %v7576_v45, 0.0  ;;  %v18526_v47 = vld [vmem:[#allocation46_spill] sm:$0xff] }
 0x5ba   :  { %v7514_v62 = vadd.f32 %v7513_v5, %v7512_v32  ;;  %v7577_v32 = vmul.f32 %v7545_v46, %v7545_v46  ;;  %v7548_v5 = vsub.f32 %v18525_v37, %v16240_v17  ;;  %v7549_v56 = vsub.f32 %v18526_v47, %v16240_v17 }
 0x5bb   :  { %v7624_v23 = vadd.f32 %v7623_v30, %v7622_v13  ;;  %v7578_v9 = vmul.f32 %v7546_v8, %v7546_v8  ;;  %v18527_v30 = vld [vmem:[#allocation48_spill] sm:$0xff] }
 0x5bc   :  { %v7516_v35 = vadd.f32 %v7515_v43, %v7514_v62  ;;  %v7579_v43 = vmul.f32 %v7547_v54, %v7547_v54  ;;  %v7629_v0 = vsel %vm7247_vm8, %v7577_v32, 0.0  ;;  %v7550_v46 = vsub.f32 %v18527_v30, %v16240_v17 }
 0x5bd   :  { %v7626_v18 = vadd.f32 %v7625_v4, %v7624_v23  ;;  %v7580_v40 = vmul.f32 %v7548_v5, %v7548_v5  ;;  %v7631_v63 = vsel %vm7247_vm8, %v7578_v9, 0.0  ;;  %v18528_v4 = vld [vmem:[#allocation49_spill] sm:$0xff]  ;;  %v7581_v37 = vmul.f32 %v7549_v56, %v7549_v56 }
 0x5be   :  { %v7551_v8 = vsub.f32 %v18528_v4, %v16240_v17  ;;  %v7633_v45 = vsel %vm7247_vm8, %v7579_v43, 0.0  ;;  %v7582_v47 = vmul.f32 %v7550_v46, %v7550_v46  ;;  %v7555_v46 = vsub.f32 %v16236_v53, %v16240_v17 }
 0x5bf   :  { %v7628_v62 = vadd.f32 %v7627_v19, %v7626_v18  ;;  %v18529_v19 = vld [vmem:[#allocation9_spill] sm:$0xff]  ;;  %v7635_v32 = vsel %vm7247_vm8, %v7580_v40, 0.0  ;;  %v7637_v9 = vsel %vm7247_vm8, %v7581_v37, 0.0 }
 0x5c0   :  { %v7552_v54 = vsub.f32 %v18529_v19, %v16240_v17  ;;  %v7583_v30 = vmul.f32 %v7551_v8, %v7551_v8  ;;  %v7639_v43 = vsel %vm7247_vm8, %v7582_v47, 0.0 }
 0x5c1   :  { %v7630_v13 = vadd.f32 %v7629_v0, %v7628_v62  ;;  %v18530_v0 = vld [vmem:[#allocation52_spill] sm:$0xff] }
 0x5c2   :  { %v7553_v5 = vsub.f32 %v18530_v0, %v16240_v17  ;;  %v7584_v4 = vmul.f32 %v7552_v54, %v7552_v54 }
 0x5c3   :  { %v7632_v23 = vadd.f32 %v7631_v63, %v7630_v13  ;;  %v18531_v63 = vld [vmem:[#allocation21_spill] sm:$0xff] }
 0x5c4   :  { %v7554_v56 = vsub.f32 %v18531_v63, %v16240_v17  ;;  %v7585_v40 = vmul.f32 %v7553_v5, %v7553_v5  ;;  %v7643_v8 = vsel %vm7247_vm8, %v7584_v4, 0.0 }
 0x5c5   :  { %v7634_v18 = vadd.f32 %v7633_v45, %v7632_v23  ;;  %v7517_v23 = vrot.slane %v7516_v35, 4 }
 0x5c6   :  { %v7586_v0 = vmul.f32 %v7554_v56, %v7554_v56  ;;  %v7645_v63 = vsel %vm7247_vm8, %v7585_v40, 0.0 }
 0x5c7   :  { %v7636_v62 = vadd.f32 %v7635_v32, %v7634_v18  ;;  %v7641_v18 = vsel %vm7247_vm8, %v7583_v30, 0.0  ;;  %v7518_v37 = vadd.f32 %v7517_v23, %v7516_v35 }
 0x5c8   :  { %v7647_v47 = vsel %vm7247_vm8, %v7586_v0, 0.0 }
 0x5c9   :  { %v7638_v13 = vadd.f32 %v7637_v9, %v7636_v62  ;;  %v7587_v9 = vmul.f32 %v7555_v46, %v7555_v46  ;;  %v7519_v19 = vrot.slane %v7518_v37, 2 }
 0x5cb   :  { %v7640_v45 = vadd.f32 %v7639_v43, %v7638_v13  ;;  %v7649_v43 = vsel %vm7247_vm8, %v7587_v9, 0.0  ;;  %v7520_v5 = vadd.f32 %v7519_v19, %v7518_v37 }
 0x5cd   :  { %v7642_v32 = vadd.f32 %v7641_v18, %v7640_v45  ;;  %v7521_v45 = vrot.slane %v7520_v5, 1 }
 0x5cf   :  { %v7644_v62 = vadd.f32 %v7643_v8, %v7642_v32  ;;  %v7522_v4 = vadd.f32 %v7521_v45, %v7520_v5  ;;  %v7659_v8 = vld [vmem:[%s18197_s3] sm:$0x1] }
 0x5d1   :  { %v7646_v54 = vadd.f32 %v7645_v63, %v7644_v62  ;;  %v7669_v63 = vlaneseq }
 0x5d3   :  { %v7648_v13 = vadd.f32 %v7647_v47, %v7646_v54  ;;  %v7670_v0 = vshrl.u32 %v7669_v63, 7 }
 0x5d5   :  { %v7650_v61 = vadd.f32 %v7649_v43, %v7648_v13  ;;  %v16440_v62 = vsub.s32 0, %v7670_v0 }
 0x5d7   :  { %v7651_v38 = vrot.slane %v7650_v61, 4  ;;  %18532 = vst [vmem:[#allocation50_spill] sm:$0xff] %v16440_v62 }
 0x5d9   :  { %v7652_v30 = vadd.f32 %v7651_v38, %v7650_v61  ;;  %v7663_v61 = vld [vmem:[%s18198_s4] sm:$0x1] }
 0x5db   :  { %v7653_v56 = vrot.slane %v7652_v30, 2 }
 0x5dd   :  { %v7654_v18 = vadd.f32 %v7653_v56, %v7652_v30  ;;  %v18534_v56 = vld [vmem:[#allocation7_spill] sm:$0xff] }
 0x5df   :  { %v7655_v35 = vrot.slane %v7654_v18, 1 }
 0x5e1   :  { %v7656_v23 = vadd.f32 %v7655_v35, %v7654_v18  ;;  %v18536_v35 = vld [vmem:[#allocation17_spill] sm:$0xff] }
 0x5e3   :  { %v7657_v46 = vadd.f32 %v7656_v23, %v7522_v4  ;;  %v18535_v4 = vld [vmem:[#allocation11_spill] sm:$0xff] }
 0x5e4   :  { %v18537_v23 = vld [vmem:[#allocation15_spill] sm:$0xff] }
 0x5e5   :  { %v7658_v32 = vmul.f32 0.001953125, %v7657_v46  ;;  %v18538_v46 = vld [vmem:[#allocation16_spill] sm:$0xff] }
 0x5e7   :  { %v7660_v40 = vadd.f32 1e-05, %v7658_v32  ;;  %v18539_v32 = vld [vmem:[#allocation22_spill] sm:$0xff] }
 0x5e9   :  { %12961 = vrsqrt.f32 %v7660_v40  ;;  %v18540_v40 = vld [vmem:[#allocation20_spill] sm:$0xff] }
 0x5f3   :  { %v12962_v19 = vpop.eup %12961 }
 0x5f4   :  { %v7662_v38 = vmul.f32 %v12962_v19, %v7659_v8 }
 0x5f6   :  { %v7664_v37 = vmul.f32 %v7662_v38, %v16240_v17  ;;  %v16447_v9 = vrot.slane %v7662_v38, %v16440_v62 }
 0x5f8   :  { %v7665_v54 = vsub.f32 %v7663_v61, %v7664_v37  ;;  %v8138_v47 = vmul.f32 %v16447_v9, %v16236_v53  ;;  %v16453_v13 = vmul.f32 %v16447_v9, %v15040_v57  ;;  %v16457_v43 = vmul.f32 %v16447_v9, %v15052_v58  ;;  %v18541_v61 = vld [vmem:[#allocation29_spill] sm:$0xff] }
 0x5f9   :  { %v16461_v5 = vmul.f32 %v16447_v9, %v15139_v33  ;;  %v16465_v17 = vmul.f32 %v16447_v9, %v15150_v7  ;;  %v16469_v30 = vmul.f32 %v16447_v9, %v15618_v52  ;;  %v16473_v57 = vmul.f32 %v16447_v9, %v15634_v50 }
 0x5fa   :  { %v16476_v53 = vrot.slane %v7665_v54, %v16440_v62  ;;  %v16480_v58 = vmul.f32 %v16447_v9, %v15668_v44  ;;  %v16484_v33 = vmul.f32 %v16447_v9, %v15682_v31  ;;  %v16488_v7 = vmul.f32 %v16447_v9, %v15723_v59  ;;  %v18542_v54 = vld [vmem:[#allocation27_spill] sm:$0xff] }
 0x5fb   :  { %v16492_v52 = vmul.f32 %v16447_v9, %v15739_v55  ;;  %v16496_v50 = vmul.f32 %v16447_v9, %v15775_v1  ;;  %v16500_v44 = vmul.f32 %v16447_v9, %v15790_v15  ;;  %v16504_v31 = vmul.f32 %v16447_v9, %v15829_v16  ;;  %v18555_v62 = vld [vmem:[#allocation47_spill] sm:$0xff] }
 0x5fc   :  { %v16507_v45 = vadd.f32 %v8138_v47, %v16476_v53  ;;  %v16511_v59 = vmul.f32 %v16447_v9, %v15846_v10  ;;  %v16515_v55 = vmul.f32 %v16447_v9, %v15865_v41  ;;  %v16519_v1 = vmul.f32 %v16447_v9, %v15881_v26  ;;  %v18543_v47 = vld [vmem:[#allocation34_spill] sm:$0xff] }
 0x5fd   :  { %v16523_v15 = vmul.f32 %v16447_v9, %v15907_v25  ;;  %v16527_v16 = vmul.f32 %v16447_v9, %v15916_v51  ;;  %v16531_v10 = vmul.f32 %v16447_v9, %v15928_v60  ;;  %v16535_v41 = vmul.f32 %v16447_v9, %v18534_v56  ;;  %v18544_v56 = vld [vmem:[#allocation23_spill] sm:$0xff] }
 0x5fe   :  { %18533 = vst [vmem:[#allocation51_spill] sm:$0xff] %v16507_v45  ;;  %v16539_v26 = vmul.f32 %v16447_v9, %v15955_v36  ;;  %v16543_v25 = vmul.f32 %v16447_v9, %v15965_v21  ;;  %v16547_v51 = vmul.f32 %v16447_v9, %v15977_v39  ;;  %v16551_v60 = vmul.f32 %v16447_v9, %v15987_v27  ;;  %v18557_v45 = vld [vmem:[#allocation45_spill] sm:$0xff] }
 0x5ff   :  { %v16555_v18 = vmul.f32 %v16447_v9, %v16006_v24  ;;  %v16559_v36 = vmul.f32 %v16447_v9, %v16016_v34  ;;  %v16563_v21 = vmul.f32 %v16447_v9, %v16028_v3  ;;  %v16567_v39 = vmul.f32 %v16447_v9, %v16039_v42 }
 0x600   :  { %v16571_v27 = vmul.f32 %v16447_v9, %v16058_v11  ;;  %v16575_v24 = vmul.f32 %v16447_v9, %v18514_v48  ;;  %v16579_v34 = vmul.f32 %v16447_v9, %v18516_v20  ;;  %v16583_v3 = vmul.f32 %v16447_v9, %v18518_v22 }
 0x601   :  { %v16587_v42 = vmul.f32 %v16447_v9, %v18535_v4  ;;  %v16591_v11 = vmul.f32 %v16447_v9, %v18536_v35  ;;  %v16595_v48 = vmul.f32 %v16447_v9, %v18537_v23  ;;  %v16599_v20 = vmul.f32 %v16447_v9, %v18538_v46  ;;  %v18545_v4 = vld [vmem:[#allocation3_spill] sm:$0xff]  ;;  %v18546_v35 = vld [vmem:[#allocation4_spill] sm:$0xff] }
 0x602   :  { %v16603_v22 = vmul.f32 %v16447_v9, %v18539_v32  ;;  %v16607_v63 = vmul.f32 %v16447_v9, %v18540_v40  ;;  %v16611_v0 = vmul.f32 %v16447_v9, %v16134_v12  ;;  %v16615_v8 = vmul.f32 %v16447_v9, %v16138_v14  ;;  %v18547_v46 = vld [vmem:[#allocation24_spill] sm:$0xff]  ;;  %v18548_v40 = vld [vmem:[#allocation5_spill] sm:$0xff] }
 0x603   :  { %v16619_v19 = vmul.f32 %v16447_v9, %v16142_v6  ;;  %v16623_v38 = vmul.f32 %v16447_v9, %v16146_v28  ;;  %v16627_v37 = vmul.f32 %v16447_v9, %v18541_v61  ;;  %v16631_v12 = vmul.f32 %v16447_v9, %v18542_v54 }
 0x604   :  { %v16635_v14 = vmul.f32 %v16447_v9, %v18543_v47  ;;  %v16639_v6 = vmul.f32 %v16447_v9, %v18544_v56  ;;  %v16643_v28 = vmul.f32 %v16447_v9, %v18545_v4  ;;  %v16647_v23 = vmul.f32 %v16447_v9, %v18546_v35  ;;  %v18551_v4 = vld [vmem:[#allocation43_spill] sm:$0xff] }
 0x605   :  { %v16651_v32 = vmul.f32 %v16447_v9, %v18547_v46  ;;  %v16655_v61 = vmul.f32 %v16447_v9, %v18548_v40  ;;  %v16659_v54 = vmul.f32 %v16447_v9, %v18519_v2  ;;  %v16663_v47 = vmul.f32 %v16447_v9, %v18520_v29  ;;  %v18553_v46 = vld [vmem:[#allocation44_spill] sm:$0xff] }
 0x606   :  { %v16667_v56 = vmul.f32 %v16447_v9, %v18521_v49  ;;  %v16671_v35 = vmul.f32 %v16447_v9, %v18551_v4  ;;  %v16675_v40 = vmul.f32 %v16447_v9, %v18553_v46  ;;  %v16679_v2 = vmul.f32 %v16447_v9, %v18555_v62 }
 0x607   :  { %18549 = vst [vmem:[#allocation13_spill] sm:$0xff] %v16663_v47  ;;  %v16683_v29 = vmul.f32 %v16447_v9, %v18557_v45  ;;  %v18559_v47 = vld [vmem:[#allocation46_spill] sm:$0xff] }
 0x608   :  { %18550 = vst [vmem:[#allocation14_spill] sm:$0xff] %v16667_v56  ;;  %18552 = vst [vmem:[#allocation28_spill] sm:$0xff] %v16671_v35  ;;  %v16687_v49 = vmul.f32 %v16447_v9, %v18559_v47  ;;  %v18560_v56 = vld [vmem:[#allocation48_spill] sm:$0xff]  ;;  %v18562_v35 = vld [vmem:[#allocation49_spill] sm:$0xff] }
 0x609   :  { %18554 = vst [vmem:[#allocation18_spill] sm:$0xff] %v16675_v40  ;;  %18556 = vst [vmem:[#allocation32_spill] sm:$0xff] %v16679_v2  ;;  %v16691_v4 = vmul.f32 %v16447_v9, %v18560_v56  ;;  %v16695_v46 = vmul.f32 %v16447_v9, %v18562_v35  ;;  %v18563_v40 = vld [vmem:[#allocation9_spill] sm:$0xff]  ;;  %v18564_v2 = vld [vmem:[#allocation52_spill] sm:$0xff]  ;;  %v7712_v56 = vadd.f32 %v16476_v53, %v16453_v13 }
 0x60a   :  { %18558 = vst [vmem:[#allocation19_spill] sm:$0xff] %v16683_v29  ;;  %v16699_v62 = vmul.f32 %v16447_v9, %v18563_v40  ;;  %v16703_v45 = vmul.f32 %v16447_v9, %v18564_v2  ;;  %v18566_v29 = vld [vmem:[#allocation21_spill] sm:$0xff]  ;;  %v7714_v35 = vadd.f32 %v16476_v53, %v16461_v5  ;;  %v7715_v40 = vadd.f32 %v16476_v53, %v16465_v17 }
 0x60b   :  { %18561 = vst [vmem:[#allocation33_spill] sm:$0xff] %v16691_v4  ;;  %v16707_v47 = vmul.f32 %v16447_v9, %v18566_v29  ;;  %v7713_v4 = vadd.f32 %v16476_v53, %v16457_v43  ;;  %v7716_v2 = vadd.f32 %v16476_v53, %v16469_v30  ;;  %v7718_v9 = vadd.f32 %v16476_v53, %v16480_v58 }
 0x60c   :  { %18565 = vst [vmem:[#allocation25_spill] sm:$0xff] %v16703_v45  ;;  %v7717_v45 = vadd.f32 %v16476_v53, %v16473_v57  ;;  %v16725_v13 = vadd.f32 %v16476_v53, %v16484_v33  ;;  %v16729_v43 = vadd.f32 %v16476_v53, %v16488_v7  ;;  %v16733_v5 = vadd.f32 %v16476_v53, %v16492_v52 }
 0x60d   :  { %v16737_v17 = vadd.f32 %v16476_v53, %v16496_v50  ;;  %v16741_v30 = vadd.f32 %v16476_v53, %v16500_v44  ;;  %v16745_v57 = vadd.f32 %v16476_v53, %v16504_v31  ;;  %v16749_v58 = vadd.f32 %v16476_v53, %v16511_v59 }
 0x60e   :  { %v16753_v33 = vadd.f32 %v16476_v53, %v16515_v55  ;;  %v16757_v7 = vadd.f32 %v16476_v53, %v16519_v1  ;;  %v16761_v52 = vadd.f32 %v16476_v53, %v16523_v15  ;;  %v16765_v50 = vadd.f32 %v16476_v53, %v16527_v16 }
 0x60f   :  { %v16769_v44 = vadd.f32 %v16476_v53, %v16531_v10  ;;  %v16773_v31 = vadd.f32 %v16476_v53, %v16535_v41  ;;  %v16777_v59 = vadd.f32 %v16476_v53, %v16539_v26  ;;  %v16781_v55 = vadd.f32 %v16476_v53, %v16543_v25 }
 0x610   :  { %v16785_v1 = vadd.f32 %v16476_v53, %v16547_v51  ;;  %v16789_v15 = vadd.f32 %v16476_v53, %v16551_v60  ;;  %v16793_v16 = vadd.f32 %v16476_v53, %v16555_v18  ;;  %v16797_v10 = vadd.f32 %v16476_v53, %v16559_v36 }
 0x611   :  { %v16801_v41 = vadd.f32 %v16476_v53, %v16563_v21  ;;  %v16805_v26 = vadd.f32 %v16476_v53, %v16567_v39  ;;  %v16809_v25 = vadd.f32 %v16476_v53, %v16571_v27  ;;  %v16813_v51 = vadd.f32 %v16476_v53, %v16575_v24 }
 0x612   :  { %v16817_v60 = vadd.f32 %v16476_v53, %v16579_v34  ;;  %v16821_v18 = vadd.f32 %v16476_v53, %v16583_v3  ;;  %v7744_v36 = vmax.f32 %v7712_v56, 0.0  ;;  %v7745_v21 = vmax.f32 %v7713_v4, 0.0 }
 0x613   :  { %18567 = vst [vmem:[#allocation26_spill] sm:$0xff] %v16813_v51  ;;  %v7746_v39 = vmax.f32 %v7714_v35, 0.0  ;;  %v7747_v27 = vmax.f32 %v7715_v40, 0.0  ;;  %v7748_v24 = vmax.f32 %v7716_v2, 0.0  ;;  %v7749_v29 = vmax.f32 %v7717_v45, 0.0 }
 0x614   :  { %18568 = vst [vmem:[#allocation37_spill] sm:$0xff] %v16817_v60  ;;  %10403 = vmatprep.mubr.msk.f32.mxu0 %vm7247_vm8, %v7744_v36  ;;  %v7750_v51 = vmax.f32 %v7718_v9, 0.0  ;;  %v7751_v34 = vmax.f32 %v16725_v13, 0.0  ;;  %v7752_v60 = vmax.f32 %v16729_v43, 0.0  ;;  %v8139_v3 = vadd.f32 %v16587_v42, %v16476_v53  ;;  %v18574_v36 = vld [vmem:[#allocation19_spill] sm:$0xff] }
 0x615   :  { %10404 = vmatmul.mubr.msk.f32.vlgmr.msra.gmra.mrb[128].mxu0 %vm7247_vm8, %v7745_v21  ;;  %v8140_v4 = vadd.f32 %v16591_v11, %v16476_v53  ;;  %v8141_v56 = vadd.f32 %v16595_v48, %v16476_v53  ;;  %v8142_v35 = vadd.f32 %v16599_v20, %v16476_v53  ;;  %v8143_v45 = vadd.f32 %v16603_v22, %v16476_v53 }
 0x616   :  { %10406 = vmatprep.mubr.msk.f32.mxu0 %vm7247_vm8, %v7746_v39  ;;  %v8144_v40 = vadd.f32 %v16607_v63, %v16476_v53  ;;  %v8145_v42 = vadd.f32 %v16611_v0, %v16476_v53  ;;  %v8146_v11 = vadd.f32 %v16615_v8, %v16476_v53  ;;  %v8147_v48 = vadd.f32 %v16619_v19, %v16476_v53  ;;  %v18575_v39 = vld [vmem:[#allocation33_spill] sm:$0xff] }
 0x617   :  { %v16850_v20 = vadd.f32 %v16623_v38, %v16476_v53  ;;  %v16854_v2 = vadd.f32 %v16627_v37, %v16476_v53  ;;  %v16858_v22 = vadd.f32 %v16631_v12, %v16476_v53  ;;  %v16862_v63 = vadd.f32 %v16635_v14, %v16476_v53  ;;  %v18569_v14 = vld [vmem:[#allocation13_spill] sm:$0xff] }
 0x618   :  { %v16866_v0 = vadd.f32 %v16639_v6, %v16476_v53  ;;  %v16870_v8 = vadd.f32 %v16643_v28, %v16476_v53  ;;  %v16874_v19 = vadd.f32 %v16647_v23, %v16476_v53  ;;  %v16879_v38 = vadd.f32 %v16651_v32, %v16476_v53  ;;  %v18570_v28 = vld [vmem:[#allocation14_spill] sm:$0xff]  ;;  %v18571_v32 = vld [vmem:[#allocation28_spill] sm:$0xff] }
 0x619   :  { %10407 = vmatmul.mubr.msk.f32.gmra.mrb[130].mxu0 %vm7247_vm8, %v7747_v27  ;;  %v16883_v37 = vadd.f32 %v16655_v61, %v16476_v53  ;;  %v16887_v12 = vadd.f32 %v16659_v54, %v16476_v53  ;;  %v16891_v6 = vadd.f32 %v18569_v14, %v16476_v53  ;;  %v16896_v23 = vadd.f32 %v18570_v28, %v16476_v53  ;;  %v18572_v61 = vld [vmem:[#allocation18_spill] sm:$0xff]  ;;  %v18573_v54 = vld [vmem:[#allocation32_spill] sm:$0xff]  ;;  %v18576_v14 = vld [vmem:[#allocation25_spill] sm:$0xff] }
 0x61a   :  { %10409 = vmatprep.mubr.msk.f32.mxu0 %vm7247_vm8, %v7748_v24  ;;  %v16900_v9 = vadd.f32 %v18571_v32, %v16476_v53  ;;  %v16904_v13 = vadd.f32 %v18572_v61, %v16476_v53  ;;  %v16908_v43 = vadd.f32 %v18573_v54, %v16476_v53  ;;  %v16912_v21 = vadd.f32 %v18574_v36, %v16476_v53 }
 0x61b   :  { %v16920_v27 = vadd.f32 %v18575_v39, %v16476_v53  ;;  %v16924_v24 = vadd.f32 %v16695_v46, %v16476_v53  ;;  %v16932_v28 = vadd.f32 %v18576_v14, %v16476_v53  ;;  %v8171_v32 = vmax.f32 %v8139_v3, 0.0 }
 0x61c   :  { %v8172_v61 = vmax.f32 %v8140_v4, 0.0  ;;  %v7753_v46 = vmax.f32 %v16733_v5, 0.0  ;;  %v8173_v54 = vmax.f32 %v8141_v56, 0.0  ;;  %v8176_v5 = vmax.f32 %v8144_v40, 0.0 }
 0x61d   :  { %10410 = vmatmul.mubr.msk.f32.gmra.mrb[132].mxu0 %vm7247_vm8, %v7749_v29  ;;  %v16928_v29 = vadd.f32 %v16699_v62, %v16476_v53  ;;  %10453 = vmatprep.mubr.msk.f32.mxu1 %vm7247_vm8, %v8171_v32  ;;  %v7754_v62 = vmax.f32 %v16737_v17, 0.0  ;;  %v7757_v17 = vmax.f32 %v16749_v58, 0.0  ;;  %v8177_v3 = vmax.f32 %v8145_v42, 0.0 }
 0x61e   :  { %10412 = vmatprep.mubr.msk.f32.mxu0 %vm7247_vm8, %v7750_v51  ;;  %v16916_v51 = vadd.f32 %v16687_v49, %v16476_v53  ;;  %v16936_v49 = vadd.f32 %v16707_v47, %v16476_v53  ;;  %10454 = vmatmul.mubr.msk.f32.vlgmr.msra.gmra.mrb[128].mxu1 %vm7247_vm8, %v8172_v61  ;;  %v8174_v53 = vmax.f32 %v8142_v35, 0.0  ;;  %v7755_v47 = vmax.f32 %v16741_v30, 0.0 }
 0x61f   :  { %10456 = vmatprep.mubr.msk.f32.mxu1 %vm7247_vm8, %v8173_v54  ;;  %v7758_v4 = vmax.f32 %v16753_v33, 0.0  ;;  %v8178_v30 = vmax.f32 %v8146_v11, 0.0  ;;  %v8179_v56 = vmax.f32 %v8147_v48, 0.0  ;;  %v7760_v35 = vmax.f32 %v16761_v52, 0.0 }
 0x620   :  { %v8180_v58 = vmax.f32 %v16850_v20, 0.0  ;;  %v7761_v33 = vmax.f32 %v16765_v50, 0.0  ;;  %v7762_v40 = vmax.f32 %v16769_v44, 0.0  ;;  %v7763_v52 = vmax.f32 %v16773_v31, 0.0 }
 0x621   :  { %10413 = vmatmul.mubr.msk.f32.gmra.mrb[134].mxu0 %vm7247_vm8, %v7751_v34  ;;  %v8175_v34 = vmax.f32 %v8143_v45, 0.0  ;;  %v8181_v45 = vmax.f32 %v16854_v2, 0.0  ;;  %v8183_v42 = vmax.f32 %v16862_v63, 0.0  ;;  %v7764_v50 = vmax.f32 %v16777_v59, 0.0 }
 0x622   :  { %10415 = vmatprep.mubr.msk.f32.mxu0 %vm7247_vm8, %v7752_v60  ;;  %v7756_v60 = vmax.f32 %v16745_v57, 0.0  ;;  %10457 = vmatmul.mubr.msk.f32.gmra.mrb[130].mxu1 %vm7247_vm8, %v8174_v53  ;;  %v7759_v57 = vmax.f32 %v16757_v7, 0.0  ;;  %v8182_v7 = vmax.f32 %v16858_v22, 0.0  ;;  %v8184_v44 = vmax.f32 %v16866_v0, 0.0 }
 0x623   :  { %10459 = vmatprep.mubr.msk.f32.mxu1 %vm7247_vm8, %v8175_v34  ;;  %v7765_v11 = vmax.f32 %v16781_v55, 0.0  ;;  %v8185_v48 = vmax.f32 %v16870_v8, 0.0  ;;  %v7766_v31 = vmax.f32 %v16785_v1, 0.0  ;;  %v8186_v59 = vmax.f32 %v16874_v19, 0.0  ;;  %v18577_v19 = vld [vmem:[#allocation26_spill] sm:$0xff] }
 0x624   :  { %v7767_v20 = vmax.f32 %v16789_v15, 0.0  ;;  %v8187_v2 = vmax.f32 %v16879_v38, 0.0  ;;  %v7768_v55 = vmax.f32 %v16793_v16, 0.0  ;;  %v8188_v1 = vmax.f32 %v16883_v37, 0.0 }
 0x625   :  { %10416 = vmatmul.mubr.msk.f32.gmra.mrb[136].mxu0 %vm7247_vm8, %v7753_v46  ;;  %v7769_v22 = vmax.f32 %v16797_v10, 0.0  ;;  %v8189_v63 = vmax.f32 %v16887_v12, 0.0  ;;  %v7770_v15 = vmax.f32 %v16801_v41, 0.0  ;;  %v8190_v16 = vmax.f32 %v16891_v6, 0.0  ;;  %v18578_v12 = vld [vmem:[#allocation37_spill] sm:$0xff] }
 0x626   :  { %10418 = vmatprep.mubr.msk.f32.mxu0 %vm7247_vm8, %v7754_v62  ;;  %10460 = vmatmul.mubr.msk.f32.gmra.mrb[132].mxu1 %vm7247_vm8, %v8176_v5  ;;  %v7771_v0 = vmax.f32 %v16805_v26, 0.0  ;;  %v8191_v8 = vmax.f32 %v16896_v23, 0.0  ;;  %v7772_v10 = vmax.f32 %v16809_v25, 0.0  ;;  %v8192_v41 = vmax.f32 %v16900_v9, 0.0 }
 0x627   :  { %10462 = vmatprep.mubr.msk.f32.mxu1 %vm7247_vm8, %v8177_v3  ;;  %v7773_v38 = vmax.f32 %v18577_v19, 0.0  ;;  %v8193_v37 = vmax.f32 %v16904_v13, 0.0  ;;  %v7774_v26 = vmax.f32 %v18578_v12, 0.0  ;;  %v8194_v25 = vmax.f32 %v16908_v43, 0.0 }
 0x628   :  { %v7775_v6 = vmax.f32 %v16821_v18, 0.0  ;;  %v8195_v23 = vmax.f32 %v16912_v21, 0.0  ;;  %v8196_v9 = vmax.f32 %v16916_v51, 0.0  ;;  %v8197_v13 = vmax.f32 %v16920_v27, 0.0  ;;  %v18579_v51 = vld [vmem:[#allocation51_spill] sm:$0xff] }
 0x629   :  { %10419 = vmatmul.mubr.msk.f32.gmra.mrb[138].mxu0 %vm7247_vm8, %v7755_v47  ;;  %v8198_v43 = vmax.f32 %v16924_v24, 0.0  ;;  %v8199_v18 = vmax.f32 %v16928_v29, 0.0  ;;  %v8200_v36 = vmax.f32 %v16932_v28, 0.0  ;;  %v8201_v21 = vmax.f32 %v16936_v49, 0.0  ;;  %v17044_v27 = vld [vmem:[%s18199_s6] ss:$0 sm:$0xff] }
 0x62a   :  { %10421 = vmatprep.mubr.msk.f32.mxu0 %vm7247_vm8, %v7756_v60  ;;  %10463 = vmatmul.mubr.msk.f32.gmra.mrb[134].mxu1 %vm7247_vm8, %v8178_v30  ;;  %v8202_v39 = vmax.f32 %v18579_v51, 0.0  ;;  %s12974_s6 = smov 120  }
 0x62b   :  { %10465 = vmatprep.mubr.msk.f32.mxu1 %vm7247_vm8, %v8179_v56 }
 0x62d   :  { %10422 = vmatmul.mubr.msk.f32.gmra.mrb[140].mxu0 %vm7247_vm8, %v7757_v17 }
 0x62e   :  { %10424 = vmatprep.mubr.msk.f32.mxu0 %vm7247_vm8, %v7758_v4  ;;  %10466 = vmatmul.mubr.msk.f32.gmra.mrb[136].mxu1 %vm7247_vm8, %v8180_v58 }
 0x62f   :  { %10468 = vmatprep.mubr.msk.f32.mxu1 %vm7247_vm8, %v8181_v45 }
 0x631   :  { %10425 = vmatmul.mubr.msk.f32.gmra.mrb[142].mxu0 %vm7247_vm8, %v7759_v57 }
 0x632   :  { %10427 = vmatprep.mubr.msk.f32.mxu0 %vm7247_vm8, %v7760_v35  ;;  %10469 = vmatmul.mubr.msk.f32.gmra.mrb[138].mxu1 %vm7247_vm8, %v8182_v7 }
 0x633   :  { %10471 = vmatprep.mubr.msk.f32.mxu1 %vm7247_vm8, %v8183_v42 }
 0x635   :  { %10428 = vmatmul.mubr.msk.f32.gmra.mrb[144].mxu0 %vm7247_vm8, %v7761_v33 }
 0x636   :  { %10430 = vmatprep.mubr.msk.f32.mxu0 %vm7247_vm8, %v7762_v40  ;;  %10472 = vmatmul.mubr.msk.f32.gmra.mrb[140].mxu1 %vm7247_vm8, %v8184_v44 }
 0x637   :  { %10474 = vmatprep.mubr.msk.f32.mxu1 %vm7247_vm8, %v8185_v48 }
 0x639   :  { %10431 = vmatmul.mubr.msk.f32.gmra.mrb[146].mxu0 %vm7247_vm8, %v7763_v52 }
 0x63a   :  { %10433 = vmatprep.mubr.msk.f32.mxu0 %vm7247_vm8, %v7764_v50  ;;  %10475 = vmatmul.mubr.msk.f32.gmra.mrb[142].mxu1 %vm7247_vm8, %v8186_v59 }
 0x63b   :  { %10477 = vmatprep.mubr.msk.f32.mxu1 %vm7247_vm8, %v8187_v2 }
 0x63d   :  { %10434 = vmatmul.mubr.msk.f32.gmra.mrb[148].mxu0 %vm7247_vm8, %v7765_v11 }
 0x63e   :  { %10436 = vmatprep.mubr.msk.f32.mxu0 %vm7247_vm8, %v7766_v31  ;;  %10478 = vmatmul.mubr.msk.f32.gmra.mrb[144].mxu1 %vm7247_vm8, %v8188_v1 }
 0x63f   :  { %10480 = vmatprep.mubr.msk.f32.mxu1 %vm7247_vm8, %v8189_v63 }
 0x641   :  { %10437 = vmatmul.mubr.msk.f32.gmra.mrb[150].mxu0 %vm7247_vm8, %v7767_v20 }
 0x642   :  { %10439 = vmatprep.mubr.msk.f32.mxu0 %vm7247_vm8, %v7768_v55  ;;  %10481 = vmatmul.mubr.msk.f32.gmra.mrb[146].mxu1 %vm7247_vm8, %v8190_v16 }
 0x643   :  { %10483 = vmatprep.mubr.msk.f32.mxu1 %vm7247_vm8, %v8191_v8 }
 0x645   :  { %10440 = vmatmul.mubr.msk.f32.gmra.mrb[152].mxu0 %vm7247_vm8, %v7769_v22 }
 0x646   :  { %10442 = vmatprep.mubr.msk.f32.mxu0 %vm7247_vm8, %v7770_v15  ;;  %10484 = vmatmul.mubr.msk.f32.gmra.mrb[148].mxu1 %vm7247_vm8, %v8192_v41 }
 0x647   :  { %10486 = vmatprep.mubr.msk.f32.mxu1 %vm7247_vm8, %v8193_v37 }
 0x649   :  { %10443 = vmatmul.mubr.msk.f32.gmra.mrb[154].mxu0 %vm7247_vm8, %v7771_v0 }
 0x64a   :  { %10445 = vmatprep.mubr.msk.f32.mxu0 %vm7247_vm8, %v7772_v10  ;;  %10487 = vmatmul.mubr.msk.f32.gmra.mrb[150].mxu1 %vm7247_vm8, %v8194_v25 }
 0x64b   :  { %10489 = vmatprep.mubr.msk.f32.mxu1 %vm7247_vm8, %v8195_v23 }
 0x64d   :  { %10446 = vmatmul.mubr.msk.f32.gmra.mrb[156].mxu0 %vm7247_vm8, %v7773_v38 }
 0x64e   :  { %10448 = vmatprep.mubr.msk.f32.mxu0 %vm7247_vm8, %v7774_v26  ;;  %10490 = vmatmul.mubr.msk.f32.gmra.mrb[152].mxu1 %vm7247_vm8, %v8196_v9 }
 0x64f   :  { %10492 = vmatprep.mubr.msk.f32.mxu1 %vm7247_vm8, %v8197_v13 }
 0x651   :  { %10449 = vmatmul.mubr.msk.f32.gmra.mrb[158].mxu0 %vm7247_vm8, %v7775_v6 }
 0x652   :  { %10493 = vmatmul.mubr.msk.f32.gmra.mrb[154].mxu1 %vm7247_vm8, %v8198_v43 }
 0x653   :  { %10495 = vmatprep.mubr.msk.f32.mxu1 %vm7247_vm8, %v8199_v18 }
 0x656   :  { %10496 = vmatmul.mubr.msk.f32.gmra.mrb[156].mxu1 %vm7247_vm8, %v8200_v36 }
 0x657   :  { %10498 = vmatprep.mubr.msk.f32.mxu1 %vm7247_vm8, %v8201_v21 }
 0x65a   :  { %10499 = vmatmul.mubr.msk.f32.gmra.mrb[158].mxu1 %vm7247_vm8, %v8202_v39 }
 0x6e8   :  { %v10405_v24 = vpop.f32.mrb[128].mxu0 }
 0x6e9   :  { %v17047_v29 = vadd.f32 %v10405_v24, %v17044_v27  ;;  %v7948_v14 = vpop.f32.mrb[129].mxu0 }
 0x6ea   :  { %v17050_v28 = vadd.f32 %v17044_v27, %v7948_v14 }
 0x6eb   :  { %v8525_v49 = vsel %vm38_vm0, %v17047_v29, 0.0 }
 0x6ec   :  { %v8524_v32 = vsel %vm38_vm0, %v17050_v28, 0.0  ;;  %v10408_v61 = vpop.f32.mrb[130].mxu0 }
 0x6ed   :  { %v7958_v46 = vpop.f32.mrb[131].mxu0  ;;  %v17057_v54 = vadd.f32 %v10408_v61, %v17044_v27  ;;  %v8526_v53 = vadd.f32 %v8525_v49, %v8524_v32 }
 0x6ee   :  { %v17060_v62 = vadd.f32 %v17044_v27, %v7958_v46 }
 0x6ef   :  { %v8529_v17 = vsel %vm38_vm0, %v17057_v54, 0.0 }
 0x6f0   :  { %v8527_v47 = vsel %vm38_vm0, %v17060_v62, 0.0  ;;  %v10411_v34 = vpop.f32.mrb[132].mxu0 }
 0x6f1   :  { %v8528_v60 = vadd.f32 %v8527_v47, %v8526_v53  ;;  %v7968_v5 = vpop.f32.mrb[133].mxu0  ;;  %v17067_v3 = vadd.f32 %v10411_v34, %v17044_v27  ;;  %v10455_v7 = vpop.f32.mrb[128].mxu1 }
 0x6f2   :  { %v17070_v4 = vadd.f32 %v17044_v27, %v7968_v5  ;;  %v17083_v42 = vadd.f32 %v10455_v7, %v17044_v27  ;;  %v8365_v50 = vpop.f32.mrb[129].mxu1 }
 0x6f3   :  { %18580 = vst [vmem:[#allocation38_spill] sm:$0xff] %v17067_v3  ;;  %v8530_v30 = vadd.f32 %v8529_v17, %v8528_v60  ;;  %v8533_v33 = vsel %vm38_vm0, %v17067_v3, 0.0  ;;  %v17088_v48 = vadd.f32 %v17044_v27, %v8365_v50 }
 0x6f4   :  { %18581 = vst [vmem:[#allocation30_spill] sm:$0xff] %v17070_v4  ;;  %v8531_v57 = vsel %vm38_vm0, %v17070_v4, 0.0  ;;  %v10414_v56 = vpop.f32.mrb[134].mxu0  ;;  %v8595_v1 = vsel %vm38_vm0, %v17083_v42, 0.0 }
 0x6f5   :  { %v8532_v35 = vadd.f32 %v8531_v57, %v8530_v30  ;;  %v7978_v58 = vpop.f32.mrb[135].mxu0  ;;  %v17077_v45 = vadd.f32 %v10414_v56, %v17044_v27  ;;  %v8594_v22 = vsel %vm38_vm0, %v17088_v48, 0.0  ;;  %v10458_v63 = vpop.f32.mrb[130].mxu1 }
 0x6f6   :  { %v17080_v40 = vadd.f32 %v17044_v27, %v7978_v58  ;;  %v8375_v16 = vpop.f32.mrb[131].mxu1  ;;  %v17105_v10 = vadd.f32 %v10458_v63, %v17044_v27  ;;  %v8596_v37 = vadd.f32 %v8595_v1, %v8594_v22 }
 0x6f7   :  { %18582 = vst [vmem:[#allocation31_spill] sm:$0xff] %v17077_v45  ;;  %v8534_v52 = vadd.f32 %v8533_v33, %v8532_v35  ;;  %v8537_v20 = vsel %vm38_vm0, %v17077_v45, 0.0  ;;  %v17108_v41 = vadd.f32 %v17044_v27, %v8375_v16 }
 0x6f8   :  { %v8535_v44 = vsel %vm38_vm0, %v17080_v40, 0.0  ;;  %v10417_v11 = vpop.f32.mrb[136].mxu0  ;;  %v8599_v21 = vsel %vm38_vm0, %v17105_v10, 0.0 }
 0x6f9   :  { %v8536_v31 = vadd.f32 %v8535_v44, %v8534_v52  ;;  %v7988_v59 = vpop.f32.mrb[137].mxu0  ;;  %v17093_v2 = vadd.f32 %v10417_v11, %v17044_v27  ;;  %v8597_v6 = vsel %vm38_vm0, %v17108_v41, 0.0  ;;  %v10461_v23 = vpop.f32.mrb[132].mxu1 }
 0x6fa   :  { %v17096_v55 = vadd.f32 %v17044_v27, %v7988_v59  ;;  %v8598_v13 = vadd.f32 %v8597_v6, %v8596_v37  ;;  %v8385_v43 = vpop.f32.mrb[133].mxu1  ;;  %v17125_v51 = vadd.f32 %v10461_v23, %v17044_v27 }
 0x6fb   :  { %18583 = vst [vmem:[#allocation35_spill] sm:$0xff] %v17093_v2  ;;  %v8538_v15 = vadd.f32 %v8537_v20, %v8536_v31  ;;  %v8541_v12 = vsel %vm38_vm0, %v17093_v2, 0.0  ;;  %v17128_v39 = vadd.f32 %v17044_v27, %v8385_v43 }
 0x6fc   :  { %18584 = vst [vmem:[#allocation36_spill] sm:$0xff] %v17096_v55  ;;  %v8539_v0 = vsel %vm38_vm0, %v17096_v55, 0.0  ;;  %v10420_v8 = vpop.f32.mrb[138].mxu0  ;;  %v8600_v49 = vadd.f32 %v8599_v21, %v8598_v13  ;;  %v8603_v57 = vsel %vm38_vm0, %v17125_v51, 0.0 }
 0x6fd   :  { %v8540_v19 = vadd.f32 %v8539_v0, %v8538_v15  ;;  %v7998_v38 = vpop.f32.mrb[139].mxu0  ;;  %v17113_v26 = vadd.f32 %v10420_v8, %v17044_v27  ;;  %v8601_v53 = vsel %vm38_vm0, %v17128_v39, 0.0  ;;  %v10464_v47 = vpop.f32.mrb[134].mxu1 }
 0x6fe   :  { %v17116_v25 = vadd.f32 %v17044_v27, %v7998_v38  ;;  %v8602_v60 = vadd.f32 %v8601_v53, %v8600_v49  ;;  %v8395_v5 = vpop.f32.mrb[135].mxu1  ;;  %v17145_v56 = vadd.f32 %v10464_v47, %v17044_v27 }
 0x6ff   :  { %18585 = vst [vmem:[#allocation39_spill] sm:$0xff] %v17113_v26  ;;  %v8542_v9 = vadd.f32 %v8541_v12, %v8540_v19  ;;  %v8545_v32 = vsel %vm38_vm0, %v17113_v26, 0.0  ;;  %v17148_v35 = vadd.f32 %v17044_v27, %v8395_v5 }
 0x700   :  { %18586 = vst [vmem:[#allocation40_spill] sm:$0xff] %v17116_v25  ;;  %v8543_v18 = vsel %vm38_vm0, %v17116_v25, 0.0  ;;  %v10423_v36 = vpop.f32.mrb[140].mxu0  ;;  %v8604_v7 = vadd.f32 %v8603_v57, %v8602_v60  ;;  %v8607_v15 = vsel %vm38_vm0, %v17145_v56, 0.0 }
 0x701   :  { %v8544_v24 = vadd.f32 %v8543_v18, %v8542_v9  ;;  %v8008_v14 = vpop.f32.mrb[141].mxu0  ;;  %v17133_v61 = vadd.f32 %v10423_v36, %v17044_v27  ;;  %v8605_v11 = vsel %vm38_vm0, %v17148_v35, 0.0  ;;  %v10467_v31 = vpop.f32.mrb[136].mxu1 }
 0x702   :  { %v17136_v46 = vadd.f32 %v17044_v27, %v8008_v14  ;;  %v8606_v20 = vadd.f32 %v8605_v11, %v8604_v7  ;;  %v8405_v1 = vpop.f32.mrb[137].mxu1  ;;  %v17165_v16 = vadd.f32 %v10467_v31, %v17044_v27 }
 0x703   :  { %18587 = vst [vmem:[#allocation8_spill] sm:$0xff] %v17133_v61  ;;  %v8546_v34 = vadd.f32 %v8545_v32, %v8544_v24  ;;  %v8549_v52 = vsel %vm38_vm0, %v17133_v61, 0.0  ;;  %v17168_v0 = vadd.f32 %v17044_v27, %v8405_v1 }
 0x704   :  { %18588 = vst [vmem:[#allocation12_spill] sm:$0xff] %v17136_v46  ;;  %v8547_v17 = vsel %vm38_vm0, %v17136_v46, 0.0  ;;  %v10426_v30 = vpop.f32.mrb[142].mxu0  ;;  %v8608_v38 = vadd.f32 %v8607_v15, %v8606_v20  ;;  %v8611_v24 = vsel %vm38_vm0, %v17165_v16, 0.0 }
 0x705   :  { %v8548_v58 = vadd.f32 %v8547_v17, %v8546_v34  ;;  %v8018_v33 = vpop.f32.mrb[143].mxu0  ;;  %v17153_v50 = vadd.f32 %v10426_v30, %v17044_v27  ;;  %v8609_v23 = vsel %vm38_vm0, %v17168_v0, 0.0  ;;  %v10470_v9 = vpop.f32.mrb[138].mxu1 }
 0x706   :  { %v17156_v44 = vadd.f32 %v17044_v27, %v8018_v33  ;;  %v8610_v43 = vadd.f32 %v8609_v23, %v8608_v38  ;;  %v8415_v18 = vpop.f32.mrb[139].mxu1  ;;  %v17185_v14 = vadd.f32 %v10470_v9, %v17044_v27 }
 0x707   :  { %18589 = vst [vmem:[#allocation10_spill] sm:$0xff] %v17153_v50  ;;  %v8550_v59 = vadd.f32 %v8549_v52, %v8548_v58  ;;  %v8553_v37 = vsel %vm38_vm0, %v17153_v50, 0.0  ;;  %v17188_v49 = vadd.f32 %v17044_v27, %v8415_v18 }
 0x708   :  { %18590 = vst [vmem:[#allocation6_spill] sm:$0xff] %v17156_v44  ;;  %v8551_v22 = vsel %vm38_vm0, %v17156_v44, 0.0  ;;  %v10429_v63 = vpop.f32.mrb[144].mxu0  ;;  %v8612_v47 = vadd.f32 %v8611_v24, %v8610_v43  ;;  %v8615_v11 = vsel %vm38_vm0, %v17185_v14, 0.0 }
 0x709   :  { %v8552_v8 = vadd.f32 %v8551_v22, %v8550_v59  ;;  %v8028_v19 = vpop.f32.mrb[145].mxu0  ;;  %v17173_v12 = vadd.f32 %v10429_v63, %v17044_v27  ;;  %v8613_v17 = vsel %vm38_vm0, %v17188_v49, 0.0  ;;  %v10473_v30 = vpop.f32.mrb[140].mxu1 }
 0x70a   :  { %v17176_v6 = vadd.f32 %v17044_v27, %v8028_v19  ;;  %v8614_v58 = vadd.f32 %v8613_v17, %v8612_v47  ;;  %v8425_v33 = vpop.f32.mrb[141].mxu1  ;;  %v17205_v31 = vadd.f32 %v10473_v30, %v17044_v27 }
 0x70b   :  { %v8554_v13 = vadd.f32 %v8553_v37, %v8552_v8  ;;  %v8557_v34 = vsel %vm38_vm0, %v17173_v12, 0.0  ;;  %v17208_v59 = vadd.f32 %v17044_v27, %v8425_v33 }
 0x70c   :  { %v8555_v36 = vsel %vm38_vm0, %v17176_v6, 0.0  ;;  %v10432_v21 = vpop.f32.mrb[146].mxu0  ;;  %v8616_v22 = vadd.f32 %v8615_v11, %v8614_v58  ;;  %v8619_v18 = vsel %vm38_vm0, %v17205_v31, 0.0 }
 0x70d   :  { %v8556_v32 = vadd.f32 %v8555_v36, %v8554_v13  ;;  %v8038_v53 = vpop.f32.mrb[147].mxu0  ;;  %v17193_v60 = vadd.f32 %v10432_v21, %v17044_v27  ;;  %v8617_v19 = vsel %vm38_vm0, %v17208_v59, 0.0  ;;  %v10476_v38 = vpop.f32.mrb[142].mxu1 }
 0x70e   :  { %v17196_v5 = vadd.f32 %v17044_v27, %v8038_v53  ;;  %v8618_v23 = vadd.f32 %v8617_v19, %v8616_v22  ;;  %v8435_v9 = vpop.f32.mrb[143].mxu1  ;;  %v17225_v36 = vadd.f32 %v10476_v38, %v17044_v27 }
 0x70f   :  { %v8558_v57 = vadd.f32 %v8557_v34, %v8556_v32  ;;  %v8561_v63 = vsel %vm38_vm0, %v17193_v60, 0.0  ;;  %v17228_v21 = vadd.f32 %v17044_v27, %v8435_v9 }
 0x710   :  { %v8559_v7 = vsel %vm38_vm0, %v17196_v5, 0.0  ;;  %v10435_v52 = vpop.f32.mrb[148].mxu0  ;;  %v8620_v53 = vadd.f32 %v8619_v18, %v8618_v23 }
 0x711   :  { %v8560_v20 = vadd.f32 %v8559_v7, %v8558_v57  ;;  %v8048_v1 = vpop.f32.mrb[149].mxu0  ;;  %v17213_v15 = vadd.f32 %v10435_v52, %v17044_v27  ;;  %v8621_v30 = vsel %vm38_vm0, %v17228_v21, 0.0  ;;  %v10479_v57 = vpop.f32.mrb[144].mxu1 }
 0x712   :  { %v17216_v8 = vadd.f32 %v17044_v27, %v8048_v1  ;;  %v8622_v33 = vadd.f32 %v8621_v30, %v8620_v53  ;;  %v8445_v7 = vpop.f32.mrb[145].mxu1  ;;  %v17245_v1 = vadd.f32 %v10479_v57, %v17044_v27 }
 0x713   :  { %18591 = vst [vmem:[#allocation41_spill] sm:$0xff] %v17213_v15  ;;  %v8562_v37 = vadd.f32 %v8561_v63, %v8560_v20  ;;  %v8565_v47 = vsel %vm38_vm0, %v17213_v15, 0.0  ;;  %v8623_v20 = vsel %vm38_vm0, %v17225_v36, 0.0  ;;  %v17248_v22 = vadd.f32 %v17044_v27, %v8445_v7 }
 0x714   :  { %v8563_v13 = vsel %vm38_vm0, %v17216_v8, 0.0  ;;  %v10438_v43 = vpop.f32.mrb[150].mxu0  ;;  %18594 = vst [vmem:[#allocation11_spill] sm:$0xff] %v17245_v1  ;;  %v8624_v38 = vadd.f32 %v8623_v20, %v8622_v33  ;;  %v8627_v30 = vsel %vm38_vm0, %v17245_v1, 0.0 }
 0x715   :  { %v8564_v24 = vadd.f32 %v8563_v13, %v8562_v37  ;;  %v8058_v32 = vpop.f32.mrb[151].mxu0  ;;  %v17233_v34 = vadd.f32 %v10438_v43, %v17044_v27  ;;  %v8625_v13 = vsel %vm38_vm0, %v17248_v22, 0.0  ;;  %v10482_v43 = vpop.f32.mrb[146].mxu1 }
 0x716   :  { %v17236_v17 = vadd.f32 %v17044_v27, %v8058_v32  ;;  %v8455_v32 = vpop.f32.mrb[147].mxu1  ;;  %v17265_v57 = vadd.f32 %v10482_v43, %v17044_v27 }
 0x717   :  { %18592 = vst [vmem:[#allocation42_spill] sm:$0xff] %v17233_v34  ;;  %v8566_v58 = vadd.f32 %v8565_v47, %v8564_v24  ;;  %v8569_v37 = vsel %vm38_vm0, %v17233_v34, 0.0  ;;  %v8626_v24 = vadd.f32 %v8625_v13, %v8624_v38 }
 0x718   :  { %18593 = vst [vmem:[#allocation7_spill] sm:$0xff] %v17236_v17  ;;  %v8567_v52 = vsel %vm38_vm0, %v17236_v17, 0.0  ;;  %v10441_v11 = vpop.f32.mrb[152].mxu0  ;;  %18597 = vst [vmem:[#allocation16_spill] sm:$0xff] %v17265_v57 }
 0x719   :  { %v8568_v63 = vadd.f32 %v8567_v52, %v8566_v58  ;;  %v8068_v19 = vpop.f32.mrb[153].mxu0  ;;  %v17253_v23 = vadd.f32 %v10441_v11, %v17044_v27  ;;  %v17268_v58 = vadd.f32 %v17044_v27, %v8455_v32  ;;  %v8628_v52 = vadd.f32 %v8627_v30, %v8626_v24  ;;  %v10485_v38 = vpop.f32.mrb[148].mxu1 }
 0x71a   :  { %v17256_v9 = vadd.f32 %v17044_v27, %v8068_v19  ;;  %v8465_v43 = vpop.f32.mrb[149].mxu1  ;;  %v8631_v32 = vsel %vm38_vm0, %v17265_v57, 0.0 }
 0x71b   :  { %18595 = vst [vmem:[#allocation17_spill] sm:$0xff] %v17253_v23  ;;  %v8570_v18 = vadd.f32 %v8569_v37, %v8568_v63  ;;  %18598 = vst [vmem:[#allocation22_spill] sm:$0xff] %v17268_v58  ;;  %v8573_v11 = vsel %vm38_vm0, %v17253_v23, 0.0  ;;  %v8629_v19 = vsel %vm38_vm0, %v17268_v58, 0.0 }
 0x71c   :  { %18596 = vst [vmem:[#allocation15_spill] sm:$0xff] %v17256_v9  ;;  %v8571_v53 = vsel %vm38_vm0, %v17256_v9, 0.0  ;;  %v10444_v47 = vpop.f32.mrb[154].mxu0  ;;  %v8630_v13 = vadd.f32 %v8629_v19, %v8628_v52 }
 0x71d   :  { %v8572_v33 = vadd.f32 %v8571_v53, %v8570_v18  ;;  %v8078_v7 = vpop.f32.mrb[155].mxu0  ;;  %v17273_v20 = vadd.f32 %v10444_v47, %v17044_v27  ;;  %v17285_v53 = vadd.f32 %v10485_v38, %v17044_v27  ;;  %v17288_v47 = vadd.f32 %v17044_v27, %v8465_v43  ;;  %v10488_v38 = vpop.f32.mrb[150].mxu1 }
 0x71e   :  { %v17276_v63 = vadd.f32 %v17044_v27, %v8078_v7  ;;  %v8632_v58 = vadd.f32 %v8631_v32, %v8630_v13  ;;  %v8475_v43 = vpop.f32.mrb[151].mxu1 }
 0x71f   :  { %18599 = vst [vmem:[#allocation20_spill] sm:$0xff] %v17273_v20  ;;  %v8574_v37 = vadd.f32 %v8573_v11, %v8572_v33  ;;  %18601 = vst [vmem:[#allocation27_spill] sm:$0xff] %v17285_v53  ;;  %v8577_v33 = vsel %vm38_vm0, %v17273_v20, 0.0  ;;  %v8633_v19 = vsel %vm38_vm0, %v17288_v47, 0.0  ;;  %v17308_v32 = vadd.f32 %v17044_v27, %v8475_v43 }
 0x720   :  { %18600 = vst [vmem:[#allocation29_spill] sm:$0xff] %v17276_v63  ;;  %v8575_v18 = vsel %vm38_vm0, %v17276_v63, 0.0  ;;  %v10447_v24 = vpop.f32.mrb[156].mxu0  ;;  %18602 = vst [vmem:[#allocation34_spill] sm:$0xff] %v17288_v47  ;;  %v8634_v1 = vadd.f32 %v8633_v19, %v8632_v58 }
 0x721   :  { %v8576_v30 = vadd.f32 %v8575_v18, %v8574_v37  ;;  %v8088_v7 = vpop.f32.mrb[157].mxu0  ;;  %v17293_v52 = vadd.f32 %v10447_v24, %v17044_v27  ;;  %v8635_v18 = vsel %vm38_vm0, %v17285_v53, 0.0  ;;  %v17305_v24 = vadd.f32 %v10488_v38, %v17044_v27  ;;  %18606 = vst [vmem:[#allocation24_spill] sm:$0xff] %v17308_v32  ;;  %v10491_v19 = vpop.f32.mrb[152].mxu1 }
 0x722   :  { %v17296_v11 = vadd.f32 %v17044_v27, %v8088_v7  ;;  %v8636_v47 = vadd.f32 %v8635_v18, %v8634_v1  ;;  %v8485_v43 = vpop.f32.mrb[153].mxu1 }
 0x723   :  { %18603 = vst [vmem:[#allocation23_spill] sm:$0xff] %v17293_v52  ;;  %v8578_v57 = vadd.f32 %v8577_v33, %v8576_v30  ;;  %18605 = vst [vmem:[#allocation4_spill] sm:$0xff] %v17305_v24  ;;  %v8581_v58 = vsel %vm38_vm0, %v17293_v52, 0.0  ;;  %v8637_v33 = vsel %vm38_vm0, %v17308_v32, 0.0  ;;  %v8639_v1 = vsel %vm38_vm0, %v17305_v24, 0.0 }
 0x724   :  { %18604 = vst [vmem:[#allocation3_spill] sm:$0xff] %v17296_v11  ;;  %v8579_v37 = vsel %vm38_vm0, %v17296_v11, 0.0  ;;  %v10450_v13 = vpop.f32.mrb[158].mxu0  ;;  %v8638_v11 = vadd.f32 %v8637_v33, %v8636_v47 }
 0x725   :  { %v8580_v7 = vadd.f32 %v8579_v37, %v8578_v57  ;;  %v8098_v20 = vpop.f32.mrb[159].mxu0  ;;  %v17318_v53 = vadd.f32 %v10450_v13, %v17044_v27  ;;  %v17325_v37 = vadd.f32 %v10491_v19, %v17044_v27 }
 0x726   :  { %v17313_v30 = vadd.f32 %v17044_v27, %v8098_v20  ;;  %v17328_v20 = vadd.f32 %v17044_v27, %v8485_v43  ;;  %v8640_v32 = vadd.f32 %v8639_v1, %v8638_v11 }
 0x727   :  { %18608 = vst [vmem:[#allocation43_spill] sm:$0xff] %v17318_v53  ;;  %v8582_v38 = vadd.f32 %v8581_v58, %v8580_v7  ;;  %18609 = vst [vmem:[#allocation44_spill] sm:$0xff] %v17325_v37  ;;  %v10494_v7 = vpop.f32.mrb[154].mxu1  ;;  %v8585_v47 = vsel %vm38_vm0, %v17318_v53, 0.0  ;;  %v8643_v24 = vsel %vm38_vm0, %v17325_v37, 0.0 }
 0x728   :  { %18607 = vst [vmem:[#allocation5_spill] sm:$0xff] %v17313_v30  ;;  %v8583_v57 = vsel %vm38_vm0, %v17313_v30, 0.0  ;;  %18610 = vst [vmem:[#allocation47_spill] sm:$0xff] %v17328_v20  ;;  %v8641_v13 = vsel %vm38_vm0, %v17328_v20, 0.0  ;;  %v8495_v33 = vpop.f32.mrb[155].mxu1  ;;  %v17337_v19 = vadd.f32 %v10494_v7, %v17044_v27 }
 0x729   :  { %v8584_v18 = vadd.f32 %v8583_v57, %v8582_v38  ;;  %v8642_v58 = vadd.f32 %v8641_v13, %v8640_v32  ;;  %v17340_v43 = vadd.f32 %v17044_v27, %v8495_v33  ;;  %v10497_v57 = vpop.f32.mrb[156].mxu1 }
 0x72a   :  { %18611 = vst [vmem:[#allocation45_spill] sm:$0xff] %v17337_v19  ;;  %v8505_v20 = vpop.f32.mrb[157].mxu1  ;;  %v8647_v32 = vsel %vm38_vm0, %v17337_v19, 0.0 }
 0x72b   :  { %v8586_v30 = vadd.f32 %v8585_v47, %v8584_v18  ;;  %18612 = vst [vmem:[#allocation46_spill] sm:$0xff] %v17340_v43  ;;  %v8644_v11 = vadd.f32 %v8643_v24, %v8642_v58  ;;  %v8645_v38 = vsel %vm38_vm0, %v17340_v43, 0.0  ;;  %v17347_v18 = vadd.f32 %v10497_v57, %v17044_v27 }
 0x72c   :  { %v17350_v13 = vadd.f32 %v17044_v27, %v8505_v20 }
 0x72d   :  { %v8646_v1 = vadd.f32 %v8645_v38, %v8644_v11  ;;  %v8587_v53 = vrot.slane %v8586_v30, 4  ;;  %18613 = vst [vmem:[#allocation48_spill] sm:$0xff] %v17347_v18  ;;  %v10500_v47 = vpop.f32.mrb[158].mxu1  ;;  %v8651_v11 = vsel %vm38_vm0, %v17347_v18, 0.0 }
 0x72e   :  { %18614 = vst [vmem:[#allocation49_spill] sm:$0xff] %v17350_v13  ;;  %v8649_v24 = vsel %vm38_vm0, %v17350_v13, 0.0  ;;  %v8515_v43 = vpop.f32.mrb[159].mxu1  ;;  %v17357_v38 = vadd.f32 %v10500_v47, %v17044_v27 }
 0x72f   :  { %v8648_v7 = vadd.f32 %v8647_v32, %v8646_v1  ;;  %v8588_v33 = vadd.f32 %v8587_v53, %v8586_v30  ;;  %v17360_v57 = vadd.f32 %v17044_v27, %v8515_v43 }
 0x730   :  { %18615 = vst [vmem:[#allocation9_spill] sm:$0xff] %v17357_v38 }
 0x731   :  { %v8650_v58 = vadd.f32 %v8649_v24, %v8648_v7  ;;  %v8653_v20 = vsel %vm38_vm0, %v17360_v57, 0.0  ;;  %v8589_v1 = vrot.slane %v8588_v33, 2  ;;  %v8655_v7 = vsel %vm38_vm0, %v17357_v38, 0.0 }
 0x733   :  { %v8652_v19 = vadd.f32 %v8651_v11, %v8650_v58  ;;  %v8590_v24 = vadd.f32 %v8589_v1, %v8588_v33 }
 0x735   :  { %v8654_v32 = vadd.f32 %v8653_v20, %v8652_v19  ;;  %v8591_v37 = vrot.slane %v8590_v24, 1 }
 0x737   :  { %v8656_v53 = vadd.f32 %v8655_v7, %v8654_v32  ;;  %v8592_v52 = vadd.f32 %v8591_v37, %v8590_v24 }
 0x739   :  { %v8657_v30 = vrot.slane %v8656_v53, 4 }
 0x73b   :  { %v8658_v13 = vadd.f32 %v8657_v30, %v8656_v53  ;;  %v18616_v53 = vld [vmem:[#allocation50_spill] sm:$0xff] }
 0x73d   :  { %v8659_v18 = vrot.slane %v8658_v13, 2 }
 0x73f   :  { %v8660_v47 = vadd.f32 %v8659_v18, %v8658_v13 }
 0x741   :  { %v8661_v63 = vrot.slane %v8660_v47, 1 }
 0x743   :  { %v8662_v27 = vadd.f32 %v8661_v63, %v8660_v47 }
 0x745   :  { %v8663_v43 = vadd.f32 %v8662_v27, %v8592_v52 }
 0x747   :  { %8670 = vrot.lane.b32.xlu0 %v8663_v43, %s12974_s6  ;;  %8666 = vrot.lane.b32.xlu1 %v8663_v43, %s12975_s25 }
 0x74b   :  { %8674 = vrot.lane.b32.xlu1 %v8663_v43, %s12976_s26 }
 0x7b9   :  { %v8667_v19 = vpop.permute.xlu1 %8666  ;;  %v8671_v33 = vpop.permute.xlu0 %8670 }
 0x7ba   :  { %v8669_v58 = vadd.f32 %v8667_v19, %v8663_v43 }
 0x7bc   :  { %v8673_v11 = vadd.f32 %v8671_v33, %v8669_v58 }
 0x7bd   :  { %v8675_v20 = vpop.permute.xlu1 %8674 }
 0x7be   :  { %v8677_v1 = vadd.f32 %v8675_v20, %v8673_v11 }
 0x7c0   :  { %v17369_v18 = vmul.f32 0.00048828125, %v8677_v1 }
 0x7c2   :  { %8684 = vrot.lane.b32.xlu1 %v17369_v18, %s12977_s27  ;;  %8681 = vrot.lane.b32.xlu0 %v17369_v18, %s12978_s2 }
 0x7c6   :  { %8687 = vrot.lane.b32.xlu0 %v17369_v18, %s12979_s29 }
 0x834   :  { %v8682_v63 = vpop.permute.xlu0 %8681  ;;  %v8685_v52 = vpop.permute.xlu1 %8684 }
 0x835   :  { %v8690_v37 = vsel %vm7247_vm8, %v17369_v18, %v8682_v63 }
 0x836   :  { %v8692_v32 = vsel %vm8691_vm10, %v8690_v37, %v8685_v52 }
 0x838   :  { %v8688_v13 = vpop.permute.xlu0 %8687 }
 0x839   :  { %v8694_v7 = vsel %vm8693_vm11, %v8692_v32, %v8688_v13 }
 0x83a   :  { %v17382_v30 = vrot.slane %v8694_v7, %v18616_v53 }
 0x83c   :  { %v8699_v24 = vsub.f32 %v17050_v28, %v17382_v30  ;;  %v8700_v47 = vsub.f32 %v17047_v29, %v17382_v30  ;;  %v8701_v27 = vsub.f32 %v17060_v62, %v17382_v30  ;;  %v8702_v43 = vsub.f32 %v17057_v54, %v17382_v30 }
 0x83d   :  { %v8703_v33 = vsub.f32 %v17070_v4, %v17382_v30  ;;  %v8704_v20 = vsub.f32 %v17067_v3, %v17382_v30  ;;  %v8705_v13 = vsub.f32 %v17080_v40, %v17382_v30 }
 0x83e   :  { %v8731_v19 = vmul.f32 %v8699_v24, %v8699_v24  ;;  %v8732_v58 = vmul.f32 %v8700_v47, %v8700_v47  ;;  %v8733_v11 = vmul.f32 %v8701_v27, %v8701_v27  ;;  %v8734_v1 = vmul.f32 %v8702_v43, %v8702_v43 }
 0x83f   :  { %v8735_v32 = vmul.f32 %v8703_v33, %v8703_v33  ;;  %v8706_v47 = vsub.f32 %v17077_v45, %v17382_v30  ;;  %v8736_v27 = vmul.f32 %v8704_v20, %v8704_v20  ;;  %v8707_v43 = vsub.f32 %v17096_v55, %v17382_v30 }
 0x840   :  { %v8763_v63 = vsel %vm38_vm0, %v8731_v19, 0.0  ;;  %v8764_v52 = vsel %vm38_vm0, %v8732_v58, 0.0  ;;  %v8766_v7 = vsel %vm38_vm0, %v8733_v11, 0.0  ;;  %v8768_v4 = vsel %vm38_vm0, %v8734_v1, 0.0 }
 0x841   :  { %v8765_v37 = vadd.f32 %v8764_v52, %v8763_v63  ;;  %v8737_v19 = vmul.f32 %v8705_v13, %v8705_v13  ;;  %v8770_v58 = vsel %vm38_vm0, %v8735_v32, 0.0  ;;  %v8708_v33 = vsub.f32 %v17093_v2, %v17382_v30 }
 0x842   :  { %v8738_v52 = vmul.f32 %v8706_v47, %v8706_v47  ;;  %v8772_v11 = vsel %vm38_vm0, %v8736_v27, 0.0  ;;  %v8834_v1 = vsub.f32 %v17083_v42, %v17382_v30  ;;  %v8739_v13 = vmul.f32 %v8707_v43, %v8707_v43 }
 0x843   :  { %v8767_v24 = vadd.f32 %v8766_v7, %v8765_v37  ;;  %v8709_v37 = vsub.f32 %v17116_v25, %v17382_v30  ;;  %v8774_v32 = vsel %vm38_vm0, %v8737_v19, 0.0  ;;  %v8710_v7 = vsub.f32 %v17113_v26, %v17382_v30 }
 0x844   :  { %v8740_v47 = vmul.f32 %v8708_v33, %v8708_v33  ;;  %v8776_v27 = vsel %vm38_vm0, %v8738_v52, 0.0  ;;  %v8778_v19 = vsel %vm38_vm0, %v8739_v13, 0.0  ;;  %v8712_v26 = vsub.f32 %v17133_v61, %v17382_v30 }
 0x845   :  { %v8769_v3 = vadd.f32 %v8768_v4, %v8767_v24  ;;  %v8833_v4 = vsub.f32 %v17088_v48, %v17382_v30  ;;  %v8835_v24 = vsub.f32 %v17108_v41, %v17382_v30  ;;  %v8741_v43 = vmul.f32 %v8709_v37, %v8709_v37 }
 0x846   :  { %v8837_v33 = vsub.f32 %v17128_v39, %v17382_v30  ;;  %v8742_v52 = vmul.f32 %v8710_v7, %v8710_v7  ;;  %v8780_v2 = vsel %vm38_vm0, %v8740_v47, 0.0  ;;  %v8713_v55 = vsub.f32 %v17156_v44, %v17382_v30 }
 0x847   :  { %v8771_v63 = vadd.f32 %v8770_v58, %v8769_v3  ;;  %v8711_v58 = vsub.f32 %v17136_v46, %v17382_v30  ;;  %v8867_v46 = vmul.f32 %v8835_v24, %v8835_v24  ;;  %v8838_v37 = vsub.f32 %v17125_v51, %v17382_v30 }
 0x848   :  { %v8714_v7 = vsub.f32 %v17153_v50, %v17382_v30  ;;  %v8839_v24 = vsub.f32 %v17148_v35, %v17382_v30  ;;  %v8744_v44 = vmul.f32 %v8712_v26, %v8712_v26  ;;  %v8784_v61 = vsel %vm38_vm0, %v8742_v52, 0.0 }
 0x849   :  { %v8773_v20 = vadd.f32 %v8772_v11, %v8771_v63  ;;  %v8836_v63 = vsub.f32 %v17105_v10, %v17382_v30  ;;  %v8743_v13 = vmul.f32 %v8711_v58, %v8711_v58  ;;  %v8869_v58 = vmul.f32 %v8837_v33, %v8837_v33 }
 0x84a   :  { %v8870_v45 = vmul.f32 %v8838_v37, %v8838_v37  ;;  %v8716_v26 = vsub.f32 %v17173_v12, %v17382_v30  ;;  %v8842_v37 = vsub.f32 %v17165_v16, %v17382_v30 }
 0x84b   :  { %v8775_v3 = vadd.f32 %v8774_v32, %v8773_v20  ;;  %v8865_v20 = vmul.f32 %v8833_v4, %v8833_v4  ;;  %v8866_v32 = vmul.f32 %v8834_v1, %v8834_v1  ;;  %v8782_v1 = vsel %vm38_vm0, %v8741_v43, 0.0 }
 0x84c   :  { %v8786_v50 = vsel %vm38_vm0, %v8743_v13, 0.0 }
 0x84d   :  { %v8777_v11 = vadd.f32 %v8776_v27, %v8775_v3  ;;  %v8868_v3 = vmul.f32 %v8836_v63, %v8836_v63  ;;  %v8897_v27 = vsel %vm38_vm0, %v8865_v20, 0.0  ;;  %v8840_v63 = vsub.f32 %v17145_v56, %v17382_v30 }
 0x84f   :  { %v8779_v25 = vadd.f32 %v8778_v19, %v8777_v11  ;;  %v8898_v11 = vsel %vm38_vm0, %v8866_v32, 0.0  ;;  %v8745_v32 = vmul.f32 %v8713_v55, %v8713_v55  ;;  %v8717_v55 = vsub.f32 %v17196_v5, %v17382_v30 }
 0x850   :  { %v8899_v19 = vadd.f32 %v8898_v11, %v8897_v27  ;;  %v8788_v27 = vsel %vm38_vm0, %v8744_v44, 0.0  ;;  %v8871_v11 = vmul.f32 %v8839_v24, %v8839_v24  ;;  %v8718_v44 = vsub.f32 %v17193_v60, %v17382_v30 }
 0x851   :  { %v8781_v4 = vadd.f32 %v8780_v2, %v8779_v25  ;;  %v8900_v2 = vsel %vm38_vm0, %v8867_v46, 0.0  ;;  %v8715_v25 = vsub.f32 %v17176_v6, %v17382_v30  ;;  %v8841_v46 = vsub.f32 %v17168_v0, %v17382_v30 }
 0x852   :  { %v8901_v20 = vadd.f32 %v8900_v2, %v8899_v19  ;;  %v8790_v19 = vsel %vm38_vm0, %v8745_v32, 0.0  ;;  %v8872_v2 = vmul.f32 %v8840_v63, %v8840_v63 }
 0x853   :  { %v8783_v47 = vadd.f32 %v8782_v1, %v8781_v4  ;;  %v8902_v4 = vsel %vm38_vm0, %v8868_v3, 0.0  ;;  %v8746_v1 = vmul.f32 %v8714_v7, %v8714_v7  ;;  %v8843_v7 = vsub.f32 %v17188_v49, %v17382_v30 }
 0x854   :  { %v8903_v52 = vadd.f32 %v8902_v4, %v8901_v20  ;;  %v8873_v4 = vmul.f32 %v8841_v46, %v8841_v46  ;;  %v8845_v46 = vsub.f32 %v17208_v59, %v17382_v30 }
 0x855   :  { %v8785_v43 = vadd.f32 %v8784_v61, %v8783_v47  ;;  %v8904_v61 = vsel %vm38_vm0, %v8869_v58, 0.0  ;;  %v8747_v47 = vmul.f32 %v8715_v25, %v8715_v25  ;;  %v8792_v20 = vsel %vm38_vm0, %v8746_v1, 0.0 }
 0x856   :  { %v8905_v3 = vadd.f32 %v8904_v61, %v8903_v52  ;;  %v8719_v25 = vsub.f32 %v17216_v8, %v17382_v30  ;;  %v8749_v52 = vmul.f32 %v8717_v55, %v8717_v55  ;;  %v8874_v61 = vmul.f32 %v8842_v37, %v8842_v37 }
 0x857   :  { %v8787_v33 = vadd.f32 %v8786_v50, %v8785_v43  ;;  %v8906_v50 = vsel %vm38_vm0, %v8870_v45, 0.0  ;;  %v8748_v43 = vmul.f32 %v8716_v26, %v8716_v26  ;;  %v8844_v45 = vsub.f32 %v17185_v14, %v17382_v30 }
 0x858   :  { %v8907_v58 = vadd.f32 %v8906_v50, %v8905_v3  ;;  %v8720_v26 = vsub.f32 %v17213_v15, %v17382_v30  ;;  %v8750_v3 = vmul.f32 %v8718_v44, %v8718_v44  ;;  %v8875_v50 = vmul.f32 %v8843_v7, %v8843_v7 }
 0x859   :  { %v8789_v13 = vadd.f32 %v8788_v27, %v8787_v33  ;;  %v8908_v33 = vsel %vm38_vm0, %v8871_v11, 0.0  ;;  %v8794_v27 = vsel %vm38_vm0, %v8747_v47, 0.0  ;;  %v8721_v55 = vsub.f32 %v17236_v17, %v17382_v30 }
 0x85a   :  { %v8909_v32 = vadd.f32 %v8908_v33, %v8907_v58  ;;  %v8846_v37 = vsub.f32 %v17205_v31, %v17382_v30  ;;  %v8751_v58 = vmul.f32 %v8719_v25, %v8719_v25  ;;  %v8876_v33 = vmul.f32 %v8844_v45, %v8844_v45 }
 0x85b   :  { %v8791_v24 = vadd.f32 %v8790_v19, %v8789_v13  ;;  %v8910_v13 = vsel %vm38_vm0, %v8872_v2, 0.0  ;;  %v8796_v19 = vsel %vm38_vm0, %v8748_v43, 0.0  ;;  %v8722_v44 = vsub.f32 %v17233_v34, %v17382_v30 }
 0x85c   :  { %v8911_v11 = vadd.f32 %v8910_v13, %v8909_v32  ;;  %v8847_v7 = vsub.f32 %v17228_v21, %v17382_v30  ;;  %v8752_v32 = vmul.f32 %v8720_v26, %v8720_v26  ;;  %v8877_v13 = vmul.f32 %v8845_v46, %v8845_v46 }
 0x85d   :  { %v8793_v63 = vadd.f32 %v8792_v20, %v8791_v24  ;;  %v8912_v24 = vsel %vm38_vm0, %v8873_v4, 0.0  ;;  %v8798_v20 = vsel %vm38_vm0, %v8749_v52, 0.0  ;;  %v8723_v25 = vsub.f32 %v17256_v9, %v17382_v30 }
 0x85e   :  { %v8913_v2 = vadd.f32 %v8912_v24, %v8911_v11  ;;  %v8848_v45 = vsub.f32 %v17225_v36, %v17382_v30  ;;  %v8753_v11 = vmul.f32 %v8721_v55, %v8721_v55  ;;  %v8878_v24 = vmul.f32 %v8846_v37, %v8846_v37  ;;  %v18617_v55 = vld [vmem:[#allocation29_spill] sm:$0xff]  ;;  %v18618_v37 = vld [vmem:[#allocation11_spill] sm:$0xff] }
 0x85f   :  { %v8795_v1 = vadd.f32 %v8794_v27, %v8793_v63  ;;  %v8914_v63 = vsel %vm38_vm0, %v8874_v61, 0.0  ;;  %v8800_v27 = vsel %vm38_vm0, %v8750_v3, 0.0  ;;  %v8724_v26 = vsub.f32 %v17253_v23, %v17382_v30 }
 0x860   :  { %v8915_v4 = vadd.f32 %v8914_v63, %v8913_v2  ;;  %v8849_v46 = vsub.f32 %v17248_v22, %v17382_v30  ;;  %v8754_v2 = vmul.f32 %v8722_v44, %v8722_v44  ;;  %v8879_v63 = vmul.f32 %v8847_v7, %v8847_v7  ;;  %v18619_v44 = vld [vmem:[#allocation20_spill] sm:$0xff]  ;;  %v18620_v7 = vld [vmem:[#allocation22_spill] sm:$0xff] }
 0x861   :  { %v8797_v47 = vadd.f32 %v8796_v19, %v8795_v1  ;;  %v8916_v1 = vsel %vm38_vm0, %v8875_v50, 0.0  ;;  %v8802_v19 = vsel %vm38_vm0, %v8751_v58, 0.0  ;;  %v8725_v58 = vsub.f32 %v18617_v55, %v17382_v30 }
 0x862   :  { %v8917_v61 = vadd.f32 %v8916_v1, %v8915_v4  ;;  %v8755_v1 = vmul.f32 %v8723_v25, %v8723_v25  ;;  %v8806_v23 = vsel %vm38_vm0, %v8753_v11, 0.0  ;;  %v8880_v9 = vmul.f32 %v8848_v45, %v8848_v45  ;;  %v18621_v25 = vld [vmem:[#allocation3_spill] sm:$0xff]  ;;  %v18622_v45 = vld [vmem:[#allocation16_spill] sm:$0xff] }
 0x863   :  { %v8799_v43 = vadd.f32 %v8798_v20, %v8797_v47  ;;  %v8918_v47 = vsel %vm38_vm0, %v8876_v33, 0.0  ;;  %v8804_v20 = vsel %vm38_vm0, %v8752_v32, 0.0  ;;  %v8850_v33 = vsub.f32 %v18618_v37, %v17382_v30 }
 0x864   :  { %v8919_v50 = vadd.f32 %v8918_v47, %v8917_v61  ;;  %v8726_v32 = vsub.f32 %v18619_v44, %v17382_v30  ;;  %v8756_v47 = vmul.f32 %v8724_v26, %v8724_v26  ;;  %v8808_v55 = vsel %vm38_vm0, %v8754_v2, 0.0  ;;  %v18623_v26 = vld [vmem:[#allocation23_spill] sm:$0xff] }
 0x865   :  { %v8801_v52 = vadd.f32 %v8800_v27, %v8799_v43  ;;  %v8920_v43 = vsel %vm38_vm0, %v8877_v13, 0.0  ;;  %v8851_v13 = vsub.f32 %v18620_v7, %v17382_v30  ;;  %v8881_v34 = vmul.f32 %v8849_v46, %v8849_v46  ;;  %v18624_v46 = vld [vmem:[#allocation34_spill] sm:$0xff] }
 0x866   :  { %v8921_v27 = vadd.f32 %v8920_v43, %v8919_v50  ;;  %v8727_v11 = vsub.f32 %v18621_v25, %v17382_v30  ;;  %v8757_v43 = vmul.f32 %v8725_v58, %v8725_v58  ;;  %v8810_v44 = vsel %vm38_vm0, %v8755_v1, 0.0  ;;  %v18625_v58 = vld [vmem:[#allocation27_spill] sm:$0xff] }
 0x867   :  { %v8803_v3 = vadd.f32 %v8802_v19, %v8801_v52  ;;  %v8922_v52 = vsel %vm38_vm0, %v8878_v24, 0.0  ;;  %v8852_v24 = vsub.f32 %v18622_v45, %v17382_v30  ;;  %v8882_v17 = vmul.f32 %v8850_v33, %v8850_v33 }
 0x868   :  { %v8923_v19 = vadd.f32 %v8922_v52, %v8921_v27  ;;  %v8728_v2 = vsub.f32 %v18623_v26, %v17382_v30  ;;  %v8758_v52 = vmul.f32 %v8726_v32, %v8726_v32  ;;  %v8812_v25 = vsel %vm38_vm0, %v8756_v47, 0.0  ;;  %v18627_v32 = vld [vmem:[#allocation24_spill] sm:$0xff] }
 0x869   :  { %v8805_v4 = vadd.f32 %v8804_v20, %v8803_v3  ;;  %v8924_v3 = vsel %vm38_vm0, %v8879_v63, 0.0  ;;  %v8853_v63 = vsub.f32 %v18624_v46, %v17382_v30  ;;  %v8883_v15 = vmul.f32 %v8851_v13, %v8851_v13 }
 0x86a   :  { %v8925_v20 = vadd.f32 %v8924_v3, %v8923_v19  ;;  %v8854_v1 = vsub.f32 %v18625_v58, %v17382_v30  ;;  %v8814_v19 = vsel %vm38_vm0, %v8757_v43, 0.0  ;;  %v8884_v3 = vmul.f32 %v8852_v24, %v8852_v24  ;;  %v18628_v24 = vld [vmem:[#allocation4_spill] sm:$0xff] }
 0x86b   :  { %v8807_v61 = vadd.f32 %v8806_v23, %v8805_v4  ;;  %v8926_v23 = vsel %vm38_vm0, %v8880_v9, 0.0  ;;  %v8759_v9 = vmul.f32 %v8727_v11, %v8727_v11  ;;  %v8930_v26 = vsel %vm38_vm0, %v8882_v17, 0.0 }
 0x86c   :  { %v8927_v27 = vadd.f32 %v8926_v23, %v8925_v20  ;;  %v8855_v47 = vsub.f32 %v18627_v32, %v17382_v30  ;;  %v8816_v23 = vsel %vm38_vm0, %v8758_v52, 0.0  ;;  %v8885_v58 = vmul.f32 %v8853_v63, %v8853_v63 }
 0x86d   :  { %v8809_v50 = vadd.f32 %v8808_v55, %v8807_v61  ;;  %v8928_v55 = vsel %vm38_vm0, %v8881_v34, 0.0  ;;  %v8760_v34 = vmul.f32 %v8728_v2, %v8728_v2  ;;  %v8856_v43 = vsub.f32 %v18628_v24, %v17382_v30 }
 0x86e   :  { %v8929_v61 = vadd.f32 %v8928_v55, %v8927_v27  ;;  %v8818_v17 = vsel %vm38_vm0, %v8759_v9, 0.0  ;;  %v8886_v27 = vmul.f32 %v8854_v1, %v8854_v1  ;;  %v8934_v55 = vsel %vm38_vm0, %v8884_v3, 0.0  ;;  %v18631_v1 = vld [vmem:[#allocation44_spill] sm:$0xff] }
 0x86f   :  { %v8811_v4 = vadd.f32 %v8810_v44, %v8809_v50  ;;  %v18626_v44 = vld [vmem:[#allocation5_spill] sm:$0xff]  ;;  %v8858_v9 = vsub.f32 %v18631_v1, %v17382_v30  ;;  %v8888_v3 = vmul.f32 %v8856_v43, %v8856_v43 }
 0x870   :  { %v8729_v50 = vsub.f32 %v18626_v44, %v17382_v30  ;;  %v8931_v20 = vadd.f32 %v8930_v26, %v8929_v61  ;;  %v18629_v44 = vld [vmem:[#allocation43_spill] sm:$0xff] }
 0x871   :  { %v8813_v33 = vadd.f32 %v8812_v25, %v8811_v4  ;;  %v8932_v25 = vsel %vm38_vm0, %v8883_v15, 0.0  ;;  %v18630_v26 = vld [vmem:[#allocation47_spill] sm:$0xff]  ;;  %v8820_v15 = vsel %vm38_vm0, %v8760_v34, 0.0  ;;  %v8942_v43 = vsel %vm38_vm0, %v8888_v3, 0.0 }
 0x872   :  { %v8933_v4 = vadd.f32 %v8932_v25, %v8931_v20  ;;  %v8857_v2 = vsub.f32 %v18630_v26, %v17382_v30  ;;  %v8761_v61 = vmul.f32 %v8729_v50, %v8729_v50  ;;  %v8938_v25 = vsel %vm38_vm0, %v8886_v27, 0.0  ;;  %v18634_v27 = vld [vmem:[#allocation49_spill] sm:$0xff] }
 0x873   :  { %v8815_v13 = vadd.f32 %v8814_v19, %v8813_v33  ;;  %v8730_v33 = vsub.f32 %v18629_v44, %v17382_v30  ;;  %v8887_v19 = vmul.f32 %v8855_v47, %v8855_v47  ;;  %v18632_v44 = vld [vmem:[#allocation46_spill] sm:$0xff]  ;;  %v8863_v3 = vsub.f32 %v17360_v57, %v17382_v30 }
 0x874   :  { %v8935_v63 = vadd.f32 %v8934_v55, %v8933_v4  ;;  %v8859_v24 = vsub.f32 %v18632_v44, %v17382_v30  ;;  %v8822_v50 = vsel %vm38_vm0, %v8761_v61, 0.0  ;;  %v8889_v4 = vmul.f32 %v8857_v2, %v8857_v2 }
 0x875   :  { %v8817_v11 = vadd.f32 %v8816_v23, %v8815_v13  ;;  %v8936_v13 = vsel %vm38_vm0, %v8885_v58, 0.0  ;;  %v8940_v47 = vsel %vm38_vm0, %v8887_v19, 0.0  ;;  %v18635_v19 = vld [vmem:[#allocation48_spill] sm:$0xff] }
 0x876   :  { %v8937_v23 = vadd.f32 %v8936_v13, %v8935_v63  ;;  %v8944_v61 = vsel %vm38_vm0, %v8889_v4, 0.0 }
 0x877   :  { %v8819_v52 = vadd.f32 %v8818_v17, %v8817_v11  ;;  %v8762_v11 = vmul.f32 %v8730_v33, %v8730_v33  ;;  %v18633_v17 = vld [vmem:[#allocation45_spill] sm:$0xff]  ;;  %v8891_v33 = vmul.f32 %v8859_v24, %v8859_v24  ;;  %v8864_v24 = vsub.f32 %v17357_v38, %v17382_v30 }
 0x878   :  { %v8939_v26 = vadd.f32 %v8938_v25, %v8937_v23  ;;  %v8860_v55 = vsub.f32 %v18633_v17, %v17382_v30 }
 0x879   :  { %v8821_v20 = vadd.f32 %v8820_v15, %v8819_v52  ;;  %v8890_v52 = vmul.f32 %v8858_v9, %v8858_v9  ;;  %v8861_v15 = vsub.f32 %v18634_v27, %v17382_v30  ;;  %v8824_v13 = vsel %vm38_vm0, %v8762_v11, 0.0 }
 0x87a   :  { %v8941_v58 = vadd.f32 %v8940_v47, %v8939_v26  ;;  %v8862_v26 = vsub.f32 %v18635_v19, %v17382_v30  ;;  %v8948_v47 = vsel %vm38_vm0, %v8891_v33, 0.0 }
 0x87b   :  { %v8823_v34 = vadd.f32 %v8822_v50, %v8821_v20  ;;  %v8892_v20 = vmul.f32 %v8860_v55, %v8860_v55  ;;  %v8946_v25 = vsel %vm38_vm0, %v8890_v52, 0.0  ;;  %v8893_v50 = vmul.f32 %v8861_v15, %v8861_v15 }
 0x87c   :  { %v8943_v63 = vadd.f32 %v8942_v43, %v8941_v58  ;;  %v8894_v4 = vmul.f32 %v8862_v26, %v8862_v26 }
 0x87d   :  { %v8825_v2 = vadd.f32 %v8824_v13, %v8823_v34  ;;  %v8950_v34 = vsel %vm38_vm0, %v8892_v20, 0.0  ;;  %v8952_v55 = vsel %vm38_vm0, %v8893_v50, 0.0 }
 0x87e   :  { %v8945_v23 = vadd.f32 %v8944_v61, %v8943_v63  ;;  %v8895_v63 = vmul.f32 %v8863_v3, %v8863_v3  ;;  %v8896_v61 = vmul.f32 %v8864_v24, %v8864_v24 }
 0x87f   :  { %v8826_v58 = vrot.slane %v8825_v2, 4 }
 0x880   :  { %v8947_v9 = vadd.f32 %v8946_v25, %v8945_v23  ;;  %v8954_v23 = vsel %vm38_vm0, %v8894_v4, 0.0  ;;  %v8956_v33 = vsel %vm38_vm0, %v8895_v63, 0.0  ;;  %v9023_v4 = vld [vmem:[%s18200_s9] sm:$0xff] }
 0x881   :  { %v8827_v52 = vadd.f32 %v8826_v58, %v8825_v2 }
 0x882   :  { %v8949_v11 = vadd.f32 %v8948_v47, %v8947_v9  ;;  %v8958_v47 = vsel %vm38_vm0, %v8896_v61, 0.0 }
 0x883   :  { %v8828_v25 = vrot.slane %v8827_v52, 2 }
 0x884   :  { %v8951_v43 = vadd.f32 %v8950_v34, %v8949_v11 }
 0x885   :  { %v8829_v26 = vadd.f32 %v8828_v25, %v8827_v52  ;;  %v8982_v25 = vld [vmem:[%s18201_s7] sm:$0x1] }
 0x886   :  { %v8953_v13 = vadd.f32 %v8952_v55, %v8951_v43 }
 0x887   :  { %v8830_v11 = vrot.slane %v8829_v26, 1 }
 0x888   :  { %v8955_v15 = vadd.f32 %v8954_v23, %v8953_v13 }
 0x889   :  { %v8831_v50 = vadd.f32 %v8830_v11, %v8829_v26 }
 0x88a   :  { %v8957_v9 = vadd.f32 %v8956_v33, %v8955_v15 }
 0x88c   :  { %v8959_v30 = vadd.f32 %v8958_v47, %v8957_v9 }
 0x88e   :  { %v8960_v38 = vrot.slane %v8959_v30, 4 }
 0x890   :  { %v8961_v20 = vadd.f32 %v8960_v38, %v8959_v30  ;;  %v9024_v38 = vld [vmem:[%s18200_s9 + $0x8] sm:$0xff]  ;;  %v8986_v30 = vld [vmem:[%s18202_s8] sm:$0x1] }
 0x891   :  { %v10713_v43 = vpack.c.bf16 %v9024_v38, %v9023_v4 }
 0x892   :  { %v8962_v3 = vrot.slane %v8961_v20, 2 }
 0x893   :  { %10714 = vmatprep.subr.bf16.mxu0 %v10713_v43  ;;  %10718 = vmatprep.subr.bf16.mxu1 %v10713_v43 }
 0x894   :  { %v8963_v34 = vadd.f32 %v8962_v3, %v8961_v20  ;;  %10716 = vmatpush3.bf16.msra.mxu0 %v10713_v43  ;;  %10720 = vmatpush3.bf16.msra.mxu1 %v10713_v43 }
 0x896   :  { %v8964_v2 = vrot.slane %v8963_v34, 1 }
 0x898   :  { %v8965_v58 = vadd.f32 %v8964_v2, %v8963_v34 }
 0x89a   :  { %v8966_v24 = vadd.f32 %v8965_v58, %v8831_v50 }
 0x89c   :  { %8973 = vrot.lane.b32.xlu0 %v8966_v24, %s12974_s6  ;;  %8969 = vrot.lane.b32.xlu1 %v8966_v24, %s12975_s25 }
 0x8a0   :  { %8977 = vrot.lane.b32.xlu1 %v8966_v24, %s12976_s26 }
 0x90e   :  { %v8970_v63 = vpop.permute.xlu1 %8969  ;;  %v8974_v52 = vpop.permute.xlu0 %8973 }
 0x90f   :  { %v8972_v55 = vadd.f32 %v8970_v63, %v8966_v24 }
 0x911   :  { %v8976_v13 = vadd.f32 %v8974_v52, %v8972_v55 }
 0x912   :  { %v8978_v61 = vpop.permute.xlu1 %8977 }
 0x913   :  { %v8980_v23 = vadd.f32 %v8978_v61, %v8976_v13 }
 0x915   :  { %v8981_v15 = vmul.f32 0.00048828125, %v8980_v23 }
 0x917   :  { %v8983_v33 = vadd.f32 1e-05, %v8981_v15 }
 0x919   :  { %12963 = vrsqrt.f32 %v8983_v33 }
 0x923   :  { %v12964_v9 = vpop.eup %12963 }
 0x924   :  { %v8985_v47 = vmul.f32 %v12964_v9, %v8982_v25 }
 0x926   :  { %v8993_v26 = vrot.slane %v8985_v47, %v18616_v53  ;;  %v8987_v20 = vmul.f32 %v8985_v47, %v17369_v18 }
 0x928   :  { %8997 = vrot.lane.b32.xlu1 %v8993_v26, %s12977_s27  ;;  %8994 = vrot.lane.b32.xlu0 %v8993_v26, %s12978_s2  ;;  %v8988_v11 = vsub.f32 %v8986_v30, %v8987_v20  ;;  %v18636_v20 = vld [vmem:[#allocation30_spill] sm:$0xff] }
 0x92a   :  { %v9010_v3 = vrot.slane %v8988_v11, %v18616_v53 }
 0x92c   :  { %9000 = vrot.lane.b32.xlu0 %v8993_v26, %s12979_s29  ;;  %9011 = vrot.lane.b32.xlu1 %v9010_v3, %s12978_s2 }
 0x930   :  { %9014 = vrot.lane.b32.xlu0 %v9010_v3, %s12977_s27  ;;  %9017 = vrot.lane.b32.xlu1 %v9010_v3, %s12979_s29 }
 0x99a   :  { %v8995_v34 = vpop.permute.xlu0 %8994  ;;  %v8998_v50 = vpop.permute.xlu1 %8997 }
 0x99b   :  { %v9003_v18 = vsel %vm7247_vm8, %v8985_v47, %v8995_v34 }
 0x99c   :  { %v9004_v38 = vsel %vm8691_vm10, %v9003_v18, %v8998_v50 }
 0x99e   :  { %v9001_v2 = vpop.permute.xlu0 %9000  ;;  %v9012_v58 = vpop.permute.xlu1 %9011 }
 0x99f   :  { %v9020_v4 = vsel %vm7247_vm8, %v8988_v11, %v9012_v58  ;;  %v9005_v55 = vsel %vm8693_vm11, %v9004_v38, %v9001_v2  ;;  %v18637_v38 = vld [vmem:[#allocation38_spill] sm:$0xff] }
 0x9a0   :  { %v17607_v13 = vrot.slane %v9005_v55, %v18616_v53 }
 0x9a2   :  { %v9015_v24 = vpop.permute.xlu0 %9014  ;;  %v9018_v63 = vpop.permute.xlu1 %9017  ;;  %v9030_v23 = vmul.f32 %v17607_v13, %v17050_v28  ;;  %v9031_v15 = vmul.f32 %v17607_v13, %v17047_v29  ;;  %v9489_v33 = vmul.f32 %v17607_v13, %v17088_v48  ;;  %v9490_v25 = vmul.f32 %v17607_v13, %v17083_v42 }
 0x9a3   :  { %v9021_v43 = vsel %vm8691_vm10, %v9020_v4, %v9015_v24  ;;  %v9032_v9 = vmul.f32 %v17607_v13, %v17060_v62  ;;  %v9491_v47 = vmul.f32 %v17607_v13, %v17108_v41  ;;  %v9033_v42 = vmul.f32 %v17607_v13, %v17057_v54 }
 0x9a4   :  { %v9022_v52 = vsel %vm8693_vm11, %v9021_v43, %v9018_v63  ;;  %v9034_v62 = vmul.f32 %v17607_v13, %v18636_v20  ;;  %v9492_v41 = vmul.f32 %v17607_v13, %v17105_v10  ;;  %v9493_v11 = vmul.f32 %v17607_v13, %v17128_v39 }
 0x9a5   :  { %v17610_v61 = vrot.slane %v9022_v52, %v18616_v53  ;;  %v9035_v39 = vmul.f32 %v17607_v13, %v18637_v38  ;;  %v9494_v43 = vmul.f32 %v17607_v13, %v17125_v51  ;;  %v9036_v63 = vmul.f32 %v17607_v13, %v17080_v40  ;;  %v18638_v40 = vld [vmem:[#allocation31_spill] sm:$0xff] }
 0x9a6   :  { %v9495_v55 = vmul.f32 %v17607_v13, %v17148_v35  ;;  %v9496_v35 = vmul.f32 %v17607_v13, %v17145_v56 }
 0x9a7   :  { %v9066_v53 = vadd.f32 %v17610_v61, %v9030_v23  ;;  %v9067_v30 = vadd.f32 %v17610_v61, %v9031_v15  ;;  %v9521_v28 = vadd.f32 %v9489_v33, %v17610_v61  ;;  %v9522_v29 = vadd.f32 %v9490_v25, %v17610_v61 }
 0x9a8   :  { %v9068_v26 = vadd.f32 %v17610_v61, %v9032_v9  ;;  %v9523_v48 = vadd.f32 %v9491_v47, %v17610_v61  ;;  %v9069_v58 = vadd.f32 %v17610_v61, %v9033_v42  ;;  %v9524_v18 = vadd.f32 %v9492_v41, %v17610_v61 }
 0x9a9   :  { %v9098_v3 = vmax.f32 %v9066_v53, 0.0  ;;  %v9099_v34 = vmax.f32 %v9067_v30, 0.0  ;;  %v9554_v50 = vmax.f32 %v9522_v29, 0.0  ;;  %v9553_v2 = vmax.f32 %v9521_v28, 0.0  ;;  %v18639_v30 = vld [vmem:[#allocation36_spill] sm:$0xff] }
 0x9aa   :  { %v9070_v24 = vadd.f32 %v17610_v61, %v9034_v62  ;;  %v9525_v54 = vadd.f32 %v9493_v11, %v17610_v61  ;;  %v9100_v10 = vmax.f32 %v9068_v26, 0.0  ;;  %v9555_v4 = vmax.f32 %v9523_v48, 0.0 }
 0x9ab   :  { %10505 = vmatprep.mubr.msk.f32.mxu0 %vm38_vm0, %v9098_v3  ;;  %10557 = vmatprep.mubr.msk.f32.mxu1 %vm38_vm0, %v9553_v2  ;;  %v9071_v52 = vadd.f32 %v17610_v61, %v9035_v39  ;;  %v9526_v23 = vadd.f32 %v9494_v43, %v17610_v61  ;;  %v9101_v15 = vmax.f32 %v9069_v58, 0.0  ;;  %v9556_v51 = vmax.f32 %v9524_v18, 0.0  ;;  %v18640_v3 = vld [vmem:[#allocation35_spill] sm:$0xff] }
 0x9ac   :  { %10506 = vmatmul.mubr.msk.f32.vlgmr.msra.gmra.mrb[160].mxu0 %vm38_vm0, %v9099_v34  ;;  %10558 = vmatmul.mubr.msk.f32.vlgmr.msra.gmra.mrb[160].mxu1 %vm38_vm0, %v9554_v50  ;;  %v9072_v33 = vadd.f32 %v17610_v61, %v9036_v63  ;;  %v9527_v25 = vadd.f32 %v9495_v55, %v17610_v61  ;;  %v9102_v9 = vmax.f32 %v9070_v24, 0.0  ;;  %v9557_v47 = vmax.f32 %v9525_v54, 0.0  ;;  %v18641_v50 = vld [vmem:[#allocation40_spill] sm:$0xff]  ;;  %v18642_v43 = vld [vmem:[#allocation39_spill] sm:$0xff] }
 0x9ad   :  { %10508 = vmatprep.mubr.msk.f32.mxu0 %vm38_vm0, %v9100_v10  ;;  %10560 = vmatprep.mubr.msk.f32.mxu1 %vm38_vm0, %v9555_v4  ;;  %v9037_v53 = vmul.f32 %v17607_v13, %v18638_v40  ;;  %v9038_v28 = vmul.f32 %v17607_v13, %v18639_v30  ;;  %v9497_v29 = vmul.f32 %v17607_v13, %v17168_v0  ;;  %v9103_v42 = vmax.f32 %v9071_v52, 0.0  ;;  %v18643_v55 = vld [vmem:[#allocation12_spill] sm:$0xff]  ;;  %v18645_v30 = vld [vmem:[#allocation6_spill] sm:$0xff] }
 0x9ae   :  { %v9528_v48 = vadd.f32 %v9496_v35, %v17610_v61  ;;  %v9558_v56 = vmax.f32 %v9526_v23, 0.0  ;;  %v9104_v41 = vmax.f32 %v9072_v33, 0.0  ;;  %v9559_v11 = vmax.f32 %v9527_v25, 0.0 }
 0x9af   :  { %v9073_v26 = vadd.f32 %v17610_v61, %v9037_v53  ;;  %v9074_v20 = vadd.f32 %v17610_v61, %v9038_v28  ;;  %v9529_v62 = vadd.f32 %v9497_v29, %v17610_v61  ;;  %v9039_v34 = vmul.f32 %v17607_v13, %v18640_v3  ;;  %v18644_v53 = vld [vmem:[#allocation8_spill] sm:$0xff] }
 0x9b0   :  { %10509 = vmatmul.mubr.msk.f32.gmra.mrb[162].mxu0 %vm38_vm0, %v9101_v15  ;;  %10561 = vmatmul.mubr.msk.f32.gmra.mrb[162].mxu1 %vm38_vm0, %v9556_v51  ;;  %v9498_v0 = vmul.f32 %v17607_v13, %v17165_v16  ;;  %v9040_v2 = vmul.f32 %v17607_v13, %v18641_v50  ;;  %v9499_v58 = vmul.f32 %v17607_v13, %v17188_v49  ;;  %v9560_v16 = vmax.f32 %v9528_v48, 0.0 }
 0x9b1   :  { %10511 = vmatprep.mubr.msk.f32.mxu0 %vm38_vm0, %v9102_v9  ;;  %10563 = vmatprep.mubr.msk.f32.mxu1 %vm38_vm0, %v9557_v47  ;;  %v9075_v18 = vadd.f32 %v17610_v61, %v9039_v34  ;;  %v9105_v54 = vmax.f32 %v9073_v26, 0.0  ;;  %v9106_v38 = vmax.f32 %v9074_v20, 0.0  ;;  %v9561_v39 = vmax.f32 %v9529_v62, 0.0 }
 0x9b2   :  { %v9530_v24 = vadd.f32 %v9498_v0, %v17610_v61  ;;  %v9076_v10 = vadd.f32 %v17610_v61, %v9040_v2  ;;  %v9531_v4 = vadd.f32 %v9499_v58, %v17610_v61  ;;  %v9041_v63 = vmul.f32 %v17607_v13, %v18642_v43 }
 0x9b3   :  { %v9500_v49 = vmul.f32 %v17607_v13, %v17185_v14  ;;  %v9042_v52 = vmul.f32 %v17607_v13, %v18643_v55  ;;  %v9501_v23 = vmul.f32 %v17607_v13, %v17208_v59  ;;  %v9107_v33 = vmax.f32 %v9075_v18, 0.0 }
 0x9b4   :  { %10512 = vmatmul.mubr.msk.f32.gmra.mrb[164].mxu0 %vm38_vm0, %v9103_v42  ;;  %10564 = vmatmul.mubr.msk.f32.gmra.mrb[164].mxu1 %vm38_vm0, %v9558_v56  ;;  %v9077_v15 = vadd.f32 %v17610_v61, %v9041_v63  ;;  %v9562_v14 = vmax.f32 %v9530_v24, 0.0  ;;  %v9108_v47 = vmax.f32 %v9076_v10, 0.0  ;;  %v9563_v40 = vmax.f32 %v9531_v4, 0.0 }
 0x9b5   :  { %10514 = vmatprep.mubr.msk.f32.mxu0 %vm38_vm0, %v9104_v41  ;;  %10566 = vmatprep.mubr.msk.f32.mxu1 %vm38_vm0, %v9559_v11  ;;  %v9532_v51 = vadd.f32 %v9500_v49, %v17610_v61  ;;  %v9078_v25 = vadd.f32 %v17610_v61, %v9042_v52  ;;  %v9533_v9 = vadd.f32 %v9501_v23, %v17610_v61  ;;  %v18646_v11 = vld [vmem:[#allocation10_spill] sm:$0xff] }
 0x9b6   :  { %v9043_v35 = vmul.f32 %v17607_v13, %v18644_v53  ;;  %v9502_v59 = vmul.f32 %v17607_v13, %v17205_v31  ;;  %v9044_v28 = vmul.f32 %v17607_v13, %v18645_v30  ;;  %v9503_v29 = vmul.f32 %v17607_v13, %v17228_v21  ;;  %v18649_v53 = vld [vmem:[#allocation7_spill] sm:$0xff] }
 0x9b7   :  { %v9109_v42 = vmax.f32 %v9077_v15, 0.0  ;;  %v9564_v31 = vmax.f32 %v9532_v51, 0.0  ;;  %v9110_v62 = vmax.f32 %v9078_v25, 0.0  ;;  %v9565_v41 = vmax.f32 %v9533_v9, 0.0 }
 0x9b8   :  { %10515 = vmatmul.mubr.msk.f32.gmra.mrb[166].mxu0 %vm38_vm0, %v9105_v54  ;;  %10567 = vmatmul.mubr.msk.f32.gmra.mrb[166].mxu1 %vm38_vm0, %v9560_v16  ;;  %v9079_v26 = vadd.f32 %v17610_v61, %v9043_v35  ;;  %v9534_v48 = vadd.f32 %v9502_v59, %v17610_v61  ;;  %v9080_v56 = vadd.f32 %v17610_v61, %v9044_v28 }
 0x9b9   :  { %10517 = vmatprep.mubr.msk.f32.mxu0 %vm38_vm0, %v9106_v38  ;;  %10569 = vmatprep.mubr.msk.f32.mxu1 %vm38_vm0, %v9561_v39  ;;  %v9535_v20 = vadd.f32 %v9503_v29, %v17610_v61  ;;  %v9045_v3 = vmul.f32 %v17607_v13, %v18646_v11  ;;  %v9504_v21 = vmul.f32 %v17607_v13, %v17225_v36  ;;  %v18652_v11 = vld [vmem:[#allocation15_spill] sm:$0xff] }
 0x9ba   :  { %v9046_v34 = vmul.f32 %v17607_v13, %v17176_v6  ;;  %v9505_v0 = vmul.f32 %v17607_v13, %v17248_v22  ;;  %v9111_v58 = vmax.f32 %v9079_v26, 0.0  ;;  %v9566_v36 = vmax.f32 %v9534_v48, 0.0 }
 0x9bb   :  { %v9081_v50 = vadd.f32 %v17610_v61, %v9045_v3  ;;  %v9536_v2 = vadd.f32 %v9504_v21, %v17610_v61  ;;  %v9112_v54 = vmax.f32 %v9080_v56, 0.0  ;;  %v9567_v16 = vmax.f32 %v9535_v20, 0.0  ;;  %v18650_v20 = vld [vmem:[#allocation42_spill] sm:$0xff]  ;;  %v18653_v21 = vld [vmem:[#allocation47_spill] sm:$0xff] }
 0x9bc   :  { %10518 = vmatmul.mubr.msk.f32.gmra.mrb[168].mxu0 %vm38_vm0, %v9107_v33  ;;  %10570 = vmatmul.mubr.msk.f32.gmra.mrb[168].mxu1 %vm38_vm0, %v9562_v14  ;;  %v9082_v18 = vadd.f32 %v17610_v61, %v9046_v34  ;;  %v9537_v24 = vadd.f32 %v9505_v0, %v17610_v61  ;;  %v9047_v6 = vmul.f32 %v17607_v13, %v17173_v12 }
 0x9bd   :  { %10520 = vmatprep.mubr.msk.f32.mxu0 %vm38_vm0, %v9108_v47  ;;  %10572 = vmatprep.mubr.msk.f32.mxu1 %vm38_vm0, %v9563_v40  ;;  %v9506_v22 = vmul.f32 %v17607_v13, %v18618_v37  ;;  %v9048_v10 = vmul.f32 %v17607_v13, %v17196_v5  ;;  %v9507_v4 = vmul.f32 %v17607_v13, %v18620_v7  ;;  %v9113_v39 = vmax.f32 %v9081_v50, 0.0 }
 0x9be   :  { %v9083_v38 = vadd.f32 %v17610_v61, %v9047_v6  ;;  %v9568_v37 = vmax.f32 %v9536_v2, 0.0  ;;  %v9114_v49 = vmax.f32 %v9082_v18, 0.0  ;;  %v9569_v55 = vmax.f32 %v9537_v24, 0.0 }
 0x9bf   :  { %v9538_v12 = vadd.f32 %v9506_v22, %v17610_v61  ;;  %v9084_v43 = vadd.f32 %v17610_v61, %v9048_v10  ;;  %v9539_v63 = vadd.f32 %v9507_v4, %v17610_v61  ;;  %v9049_v5 = vmul.f32 %v17607_v13, %v17193_v60  ;;  %v18655_v10 = vld [vmem:[#allocation29_spill] sm:$0xff] }
 0x9c0   :  { %10521 = vmatmul.mubr.msk.f32.gmra.mrb[170].mxu0 %vm38_vm0, %v9109_v42  ;;  %10573 = vmatmul.mubr.msk.f32.gmra.mrb[170].mxu1 %vm38_vm0, %v9564_v31  ;;  %v9508_v7 = vmul.f32 %v17607_v13, %v18622_v45  ;;  %v9050_v52 = vmul.f32 %v17607_v13, %v17216_v8  ;;  %v9509_v23 = vmul.f32 %v17607_v13, %v18624_v46  ;;  %v9115_v51 = vmax.f32 %v9083_v38, 0.0  ;;  %v18647_v8 = vld [vmem:[#allocation41_spill] sm:$0xff]  ;;  %v18648_v46 = vld [vmem:[#allocation27_spill] sm:$0xff] }
 0x9c1   :  { %10523 = vmatprep.mubr.msk.f32.mxu0 %vm38_vm0, %v9110_v62  ;;  %10575 = vmatprep.mubr.msk.f32.mxu1 %vm38_vm0, %v9565_v41  ;;  %v9085_v15 = vadd.f32 %v17610_v61, %v9049_v5  ;;  %v9570_v45 = vmax.f32 %v9538_v12, 0.0  ;;  %v9116_v25 = vmax.f32 %v9084_v43, 0.0  ;;  %v9571_v9 = vmax.f32 %v9539_v63, 0.0  ;;  %v18656_v5 = vld [vmem:[#allocation20_spill] sm:$0xff] }
 0x9c2   :  { %v9540_v60 = vadd.f32 %v9508_v7, %v17610_v61  ;;  %v9086_v33 = vadd.f32 %v17610_v61, %v9050_v52  ;;  %v9541_v14 = vadd.f32 %v9509_v23, %v17610_v61  ;;  %v9051_v47 = vmul.f32 %v17607_v13, %v18647_v8  ;;  %v18657_v52 = vld [vmem:[#allocation3_spill] sm:$0xff] }
 0x9c3   :  { %v9510_v40 = vmul.f32 %v17607_v13, %v18648_v46  ;;  %v9052_v35 = vmul.f32 %v17607_v13, %v18649_v53  ;;  %v9511_v59 = vmul.f32 %v17607_v13, %v18627_v32  ;;  %v9117_v29 = vmax.f32 %v9085_v15, 0.0  ;;  %v18651_v32 = vld [vmem:[#allocation4_spill] sm:$0xff]  ;;  %v18658_v8 = vld [vmem:[#allocation23_spill] sm:$0xff]  ;;  %v18659_v46 = vld [vmem:[#allocation5_spill] sm:$0xff] }
 0x9c4   :  { %10524 = vmatmul.mubr.msk.f32.gmra.mrb[172].mxu0 %vm38_vm0, %v9111_v58  ;;  %10576 = vmatmul.mubr.msk.f32.gmra.mrb[172].mxu1 %vm38_vm0, %v9566_v36  ;;  %v9087_v30 = vadd.f32 %v17610_v61, %v9051_v47  ;;  %v9572_v26 = vmax.f32 %v9540_v60, 0.0  ;;  %v9118_v31 = vmax.f32 %v9086_v33, 0.0  ;;  %v9573_v56 = vmax.f32 %v9541_v14, 0.0 }
 0x9c5   :  { %10526 = vmatprep.mubr.msk.f32.mxu0 %vm38_vm0, %v9112_v54  ;;  %10578 = vmatprep.mubr.msk.f32.mxu1 %vm38_vm0, %v9567_v16  ;;  %v9542_v28 = vadd.f32 %v9510_v40, %v17610_v61  ;;  %v9088_v48 = vadd.f32 %v17610_v61, %v9052_v35  ;;  %v9543_v42 = vadd.f32 %v9511_v59, %v17610_v61  ;;  %v18654_v16 = vld [vmem:[#allocation17_spill] sm:$0xff] }
 0x9c6   :  { %v9053_v62 = vmul.f32 %v17607_v13, %v18650_v20  ;;  %v9512_v41 = vmul.f32 %v17607_v13, %v18651_v32  ;;  %v9054_v3 = vmul.f32 %v17607_v13, %v18652_v11  ;;  %v9513_v34 = vmul.f32 %v17607_v13, %v18653_v21 }
 0x9c7   :  { %v9119_v2 = vmax.f32 %v9087_v30, 0.0  ;;  %v9574_v58 = vmax.f32 %v9542_v28, 0.0  ;;  %v9120_v24 = vmax.f32 %v9088_v48, 0.0  ;;  %v9575_v54 = vmax.f32 %v9543_v42, 0.0  ;;  %v18660_v42 = vld [vmem:[#allocation43_spill] sm:$0xff] }
 0x9c8   :  { %10527 = vmatmul.mubr.msk.f32.gmra.mrb[174].mxu0 %vm38_vm0, %v9113_v39  ;;  %10579 = vmatmul.mubr.msk.f32.gmra.mrb[174].mxu1 %vm38_vm0, %v9568_v37  ;;  %v9089_v0 = vadd.f32 %v17610_v61, %v9053_v62  ;;  %v9544_v50 = vadd.f32 %v9512_v41, %v17610_v61  ;;  %v9090_v36 = vadd.f32 %v17610_v61, %v9054_v3 }
 0x9c9   :  { %10529 = vmatprep.mubr.msk.f32.mxu0 %vm38_vm0, %v9114_v49  ;;  %10581 = vmatprep.mubr.msk.f32.mxu1 %vm38_vm0, %v9569_v55  ;;  %v9545_v18 = vadd.f32 %v9513_v34, %v17610_v61  ;;  %v9055_v6 = vmul.f32 %v17607_v13, %v18654_v16  ;;  %v9514_v22 = vmul.f32 %v17607_v13, %v18631_v1 }
 0x9ca   :  { %v9056_v4 = vmul.f32 %v17607_v13, %v18655_v10  ;;  %v9515_v38 = vmul.f32 %v17607_v13, %v18632_v44  ;;  %v9121_v37 = vmax.f32 %v9089_v0, 0.0  ;;  %v9576_v1 = vmax.f32 %v9544_v50, 0.0 }
 0x9cb   :  { %v9091_v12 = vadd.f32 %v17610_v61, %v9055_v6  ;;  %v9546_v39 = vadd.f32 %v9514_v22, %v17610_v61  ;;  %v9122_v49 = vmax.f32 %v9090_v36, 0.0  ;;  %v9577_v55 = vmax.f32 %v9545_v18, 0.0 }
 0x9cc   :  { %10530 = vmatmul.mubr.msk.f32.gmra.mrb[176].mxu0 %vm38_vm0, %v9115_v51  ;;  %10582 = vmatmul.mubr.msk.f32.gmra.mrb[176].mxu1 %vm38_vm0, %v9570_v45  ;;  %v9092_v43 = vadd.f32 %v17610_v61, %v9056_v4  ;;  %v9547_v63 = vadd.f32 %v9515_v38, %v17610_v61  ;;  %v9057_v7 = vmul.f32 %v17607_v13, %v18656_v5 }
 0x9cd   :  { %10532 = vmatprep.mubr.msk.f32.mxu0 %vm38_vm0, %v9116_v25  ;;  %10584 = vmatprep.mubr.msk.f32.mxu1 %vm38_vm0, %v9571_v9  ;;  %v9516_v44 = vmul.f32 %v17607_v13, %v18633_v17  ;;  %v9058_v23 = vmul.f32 %v17607_v13, %v18657_v52  ;;  %v9517_v15 = vmul.f32 %v17607_v13, %v18634_v27  ;;  %v9123_v45 = vmax.f32 %v9091_v12, 0.0 }
 0x9ce   :  { %v9093_v60 = vadd.f32 %v17610_v61, %v9057_v7  ;;  %v9578_v17 = vmax.f32 %v9546_v39, 0.0  ;;  %v9124_v25 = vmax.f32 %v9092_v43, 0.0  ;;  %v9579_v9 = vmax.f32 %v9547_v63, 0.0 }
 0x9cf   :  { %v9548_v51 = vadd.f32 %v9516_v44, %v17610_v61  ;;  %v9094_v33 = vadd.f32 %v17610_v61, %v9058_v23  ;;  %v9549_v14 = vadd.f32 %v9517_v15, %v17610_v61  ;;  %v9059_v47 = vmul.f32 %v17607_v13, %v18658_v8 }
 0x9d0   :  { %10533 = vmatmul.mubr.msk.f32.gmra.mrb[178].mxu0 %vm38_vm0, %v9117_v29  ;;  %10585 = vmatmul.mubr.msk.f32.gmra.mrb[178].mxu1 %vm38_vm0, %v9572_v26  ;;  %v9518_v27 = vmul.f32 %v17607_v13, %v18635_v19  ;;  %v9060_v40 = vmul.f32 %v17607_v13, %v18659_v46  ;;  %v9519_v53 = vmul.f32 %v17607_v13, %v17360_v57  ;;  %v9125_v30 = vmax.f32 %v9093_v60, 0.0  ;;  %v18661_v57 = vld [vmem:[#allocation9_spill] sm:$0xff] }
 0x9d1   :  { %10535 = vmatprep.mubr.msk.f32.mxu0 %vm38_vm0, %v9118_v31  ;;  %10587 = vmatprep.mubr.msk.f32.mxu1 %vm38_vm0, %v9573_v56  ;;  %v9095_v35 = vadd.f32 %v17610_v61, %v9059_v47  ;;  %v9580_v19 = vmax.f32 %v9548_v51, 0.0  ;;  %v9126_v26 = vmax.f32 %v9094_v33, 0.0  ;;  %v9581_v48 = vmax.f32 %v9549_v14, 0.0 }
 0x9d2   :  { %v9550_v59 = vadd.f32 %v9518_v27, %v17610_v61  ;;  %v9096_v28 = vadd.f32 %v17610_v61, %v9060_v40  ;;  %v9551_v29 = vadd.f32 %v9519_v53, %v17610_v61  ;;  %v9061_v31 = vmul.f32 %v17607_v13, %v18660_v42 }
 0x9d3   :  { %v9520_v56 = vmul.f32 %v17607_v13, %v18661_v57  ;;  %v9127_v32 = vmax.f32 %v9095_v35, 0.0 }
 0x9d4   :  { %10536 = vmatmul.mubr.msk.f32.gmra.mrb[180].mxu0 %vm38_vm0, %v9119_v2  ;;  %10588 = vmatmul.mubr.msk.f32.gmra.mrb[180].mxu1 %vm38_vm0, %v9574_v58  ;;  %v9097_v20 = vadd.f32 %v17610_v61, %v9061_v31  ;;  %v9582_v41 = vmax.f32 %v9550_v59, 0.0  ;;  %v9128_v11 = vmax.f32 %v9096_v28, 0.0  ;;  %v9583_v3 = vmax.f32 %v9551_v29, 0.0 }
 0x9d5   :  { %10538 = vmatprep.mubr.msk.f32.mxu0 %vm38_vm0, %v9120_v24  ;;  %10590 = vmatprep.mubr.msk.f32.mxu1 %vm38_vm0, %v9575_v54  ;;  %v9552_v62 = vadd.f32 %v9520_v56, %v17610_v61  ;;  %v17871_v61 = vld [vmem:[%s18203_s10] ss:$0 sm:$0xff] }
 0x9d6   :  { %v9129_v13 = vmax.f32 %v9097_v20, 0.0 }
 0x9d7   :  { %v9584_v21 = vmax.f32 %v9552_v62, 0.0 }
 0x9d8   :  { %10539 = vmatmul.mubr.msk.f32.gmra.mrb[182].mxu0 %vm38_vm0, %v9121_v37  ;;  %10591 = vmatmul.mubr.msk.f32.gmra.mrb[182].mxu1 %vm38_vm0, %v9576_v1 }
 0x9d9   :  { %10541 = vmatprep.mubr.msk.f32.mxu0 %vm38_vm0, %v9122_v49  ;;  %10593 = vmatprep.mubr.msk.f32.mxu1 %vm38_vm0, %v9577_v55 }
 0x9dc   :  { %10542 = vmatmul.mubr.msk.f32.gmra.mrb[184].mxu0 %vm38_vm0, %v9123_v45  ;;  %10594 = vmatmul.mubr.msk.f32.gmra.mrb[184].mxu1 %vm38_vm0, %v9578_v17 }
 0x9dd   :  { %10544 = vmatprep.mubr.msk.f32.mxu0 %vm38_vm0, %v9124_v25  ;;  %10596 = vmatprep.mubr.msk.f32.mxu1 %vm38_vm0, %v9579_v9 }
 0x9e0   :  { %10545 = vmatmul.mubr.msk.f32.gmra.mrb[186].mxu0 %vm38_vm0, %v9125_v30  ;;  %10597 = vmatmul.mubr.msk.f32.gmra.mrb[186].mxu1 %vm38_vm0, %v9580_v19 }
 0x9e1   :  { %10547 = vmatprep.mubr.msk.f32.mxu0 %vm38_vm0, %v9126_v26  ;;  %10599 = vmatprep.mubr.msk.f32.mxu1 %vm38_vm0, %v9581_v48 }
 0x9e4   :  { %10548 = vmatmul.mubr.msk.f32.gmra.mrb[188].mxu0 %vm38_vm0, %v9127_v32  ;;  %10600 = vmatmul.mubr.msk.f32.gmra.mrb[188].mxu1 %vm38_vm0, %v9582_v41 }
 0x9e5   :  { %10550 = vmatprep.mubr.msk.f32.mxu0 %vm38_vm0, %v9128_v11  ;;  %10602 = vmatprep.mubr.msk.f32.mxu1 %vm38_vm0, %v9583_v3 }
 0x9e8   :  { %10551 = vmatmul.mubr.msk.f32.gmra.mrb[190].mxu0 %vm38_vm0, %v9129_v13  ;;  %10603 = vmatmul.mubr.msk.f32.gmra.mrb[190].mxu1 %vm38_vm0, %v9584_v21 }
 0xa7f   :  { %v10507_v34 = vpop.f32.mrb[160].mxu0  ;;  %v10559_v0 = vpop.f32.mrb[160].mxu1 }
 0xa80   :  { %v9304_v50 = vadd.f32 %v10507_v34, %v17871_v61  ;;  %v9753_v2 = vadd.f32 %v10559_v0, %v17871_v61  ;;  %v9298_v58 = vpop.f32.mrb[161].mxu0  ;;  %v9747_v36 = vpop.f32.mrb[161].mxu1 }
 0xa81   :  { %v9299_v18 = vadd.f32 %v17871_v61, %v9298_v58  ;;  %v9748_v24 = vadd.f32 %v17871_v61, %v9747_v36 }
 0xa82   :  { %9458 = vst.msk [vmem:[%s18204_s11 + $0x8] sm:$0xff] %vm38_vm0, %v9304_v50  ;;  %10236 = vst.msk [vmem:[%s18204_s11 + $0x108] sm:$0xff] %vm38_vm0, %v9753_v2 }
 0xa83   :  { %9457 = vst.msk [vmem:[%s18204_s11] sm:$0xff] %vm38_vm0, %v9299_v18  ;;  %10235 = vst.msk [vmem:[%s18204_s11 + $0x100] sm:$0xff] %vm38_vm0, %v9748_v24  ;;  %v10510_v54 = vpop.f32.mrb[162].mxu0  ;;  %v10562_v16 = vpop.f32.mrb[162].mxu1 }
 0xa84   :  { %v9314_v6 = vadd.f32 %v10510_v54, %v17871_v61  ;;  %v9763_v22 = vadd.f32 %v10562_v16, %v17871_v61  ;;  %v9308_v10 = vpop.f32.mrb[163].mxu0  ;;  %v9757_v4 = vpop.f32.mrb[163].mxu1 }
 0xa85   :  { %v9309_v38 = vadd.f32 %v17871_v61, %v9308_v10  ;;  %v9758_v12 = vadd.f32 %v17871_v61, %v9757_v4 }
 0xa86   :  { %9460 = vst.msk [vmem:[%s18204_s11 + $0x18] sm:$0xff] %vm38_vm0, %v9314_v6  ;;  %10238 = vst.msk [vmem:[%s18204_s11 + $0x118] sm:$0xff] %vm38_vm0, %v9763_v22 }
 0xa87   :  { %9459 = vst.msk [vmem:[%s18204_s11 + $0x10] sm:$0xff] %vm38_vm0, %v9309_v38  ;;  %10237 = vst.msk [vmem:[%s18204_s11 + $0x110] sm:$0xff] %vm38_vm0, %v9758_v12  ;;  %v10513_v39 = vpop.f32.mrb[164].mxu0  ;;  %v10565_v37 = vpop.f32.mrb[164].mxu1 }
 0xa88   :  { %v9324_v1 = vadd.f32 %v10513_v39, %v17871_v61  ;;  %v9773_v43 = vadd.f32 %v10565_v37, %v17871_v61  ;;  %v9318_v63 = vpop.f32.mrb[165].mxu0  ;;  %v9767_v49 = vpop.f32.mrb[165].mxu1 }
 0xa89   :  { %v9319_v55 = vadd.f32 %v17871_v61, %v9318_v63  ;;  %v9768_v5 = vadd.f32 %v17871_v61, %v9767_v49 }
 0xa8a   :  { %9462 = vst.msk [vmem:[%s18204_s11 + $0x28] sm:$0xff] %vm38_vm0, %v9324_v1  ;;  %10240 = vst.msk [vmem:[%s18204_s11 + $0x128] sm:$0xff] %vm38_vm0, %v9773_v43 }
 0xa8b   :  { %9461 = vst.msk [vmem:[%s18204_s11 + $0x20] sm:$0xff] %vm38_vm0, %v9319_v55  ;;  %10239 = vst.msk [vmem:[%s18204_s11 + $0x120] sm:$0xff] %vm38_vm0, %v9768_v5  ;;  %v10516_v7 = vpop.f32.mrb[166].mxu0  ;;  %v10568_v44 = vpop.f32.mrb[166].mxu1 }
 0xa8c   :  { %v9334_v52 = vadd.f32 %v10516_v7, %v17871_v61  ;;  %v9783_v23 = vadd.f32 %v10568_v44, %v17871_v61  ;;  %v9328_v15 = vpop.f32.mrb[167].mxu0  ;;  %v9777_v60 = vpop.f32.mrb[167].mxu1 }
 0xa8d   :  { %v9329_v51 = vadd.f32 %v17871_v61, %v9328_v15  ;;  %v9778_v45 = vadd.f32 %v17871_v61, %v9777_v60 }
 0xa8e   :  { %9464 = vst.msk [vmem:[%s18204_s11 + $0x38] sm:$0xff] %vm38_vm0, %v9334_v52  ;;  %10242 = vst.msk [vmem:[%s18204_s11 + $0x138] sm:$0xff] %vm38_vm0, %v9783_v23 }
 0xa8f   :  { %9463 = vst.msk [vmem:[%s18204_s11 + $0x30] sm:$0xff] %vm38_vm0, %v9329_v51  ;;  %10241 = vst.msk [vmem:[%s18204_s11 + $0x130] sm:$0xff] %vm38_vm0, %v9778_v45  ;;  %v10519_v17 = vpop.f32.mrb[168].mxu0  ;;  %v10571_v33 = vpop.f32.mrb[168].mxu1 }
 0xa90   :  { %v9344_v14 = vadd.f32 %v10519_v17, %v17871_v61  ;;  %v9793_v25 = vadd.f32 %v10571_v33, %v17871_v61  ;;  %v9338_v9 = vpop.f32.mrb[169].mxu0  ;;  %v9787_v8 = vpop.f32.mrb[169].mxu1 }
 0xa91   :  { %v9339_v47 = vadd.f32 %v17871_v61, %v9338_v9  ;;  %v9788_v27 = vadd.f32 %v17871_v61, %v9787_v8 }
 0xa92   :  { %9466 = vst.msk [vmem:[%s18204_s11 + $0x48] sm:$0xff] %vm38_vm0, %v9344_v14  ;;  %10244 = vst.msk [vmem:[%s18204_s11 + $0x148] sm:$0xff] %vm38_vm0, %v9793_v25 }
 0xa93   :  { %9465 = vst.msk [vmem:[%s18204_s11 + $0x40] sm:$0xff] %vm38_vm0, %v9339_v47  ;;  %10243 = vst.msk [vmem:[%s18204_s11 + $0x140] sm:$0xff] %vm38_vm0, %v9788_v27  ;;  %v10522_v46 = vpop.f32.mrb[170].mxu0  ;;  %v10574_v40 = vpop.f32.mrb[170].mxu1 }
 0xa94   :  { %v9354_v53 = vadd.f32 %v10522_v46, %v17871_v61  ;;  %v9803_v35 = vadd.f32 %v10574_v40, %v17871_v61  ;;  %v9348_v59 = vpop.f32.mrb[171].mxu0  ;;  %v9797_v30 = vpop.f32.mrb[171].mxu1 }
 0xa95   :  { %v9349_v19 = vadd.f32 %v17871_v61, %v9348_v59  ;;  %v9798_v28 = vadd.f32 %v17871_v61, %v9797_v30 }
 0xa96   :  { %9468 = vst.msk [vmem:[%s18204_s11 + $0x58] sm:$0xff] %vm38_vm0, %v9354_v53  ;;  %10246 = vst.msk [vmem:[%s18204_s11 + $0x158] sm:$0xff] %vm38_vm0, %v9803_v35 }
 0xa97   :  { %9467 = vst.msk [vmem:[%s18204_s11 + $0x50] sm:$0xff] %vm38_vm0, %v9349_v19  ;;  %10245 = vst.msk [vmem:[%s18204_s11 + $0x150] sm:$0xff] %vm38_vm0, %v9798_v28  ;;  %v10525_v29 = vpop.f32.mrb[172].mxu0  ;;  %v10577_v26 = vpop.f32.mrb[172].mxu1 }
 0xa98   :  { %v9364_v48 = vadd.f32 %v10525_v29, %v17871_v61  ;;  %v9813_v42 = vadd.f32 %v10577_v26, %v17871_v61  ;;  %v9358_v31 = vpop.f32.mrb[173].mxu0  ;;  %v9807_v57 = vpop.f32.mrb[173].mxu1 }
 0xa99   :  { %v9359_v56 = vadd.f32 %v17871_v61, %v9358_v31  ;;  %v9808_v20 = vadd.f32 %v17871_v61, %v9807_v57 }
 0xa9a   :  { %9470 = vst.msk [vmem:[%s18204_s11 + $0x68] sm:$0xff] %vm38_vm0, %v9364_v48  ;;  %10248 = vst.msk [vmem:[%s18204_s11 + $0x168] sm:$0xff] %vm38_vm0, %v9813_v42 }
 0xa9b   :  { %9469 = vst.msk [vmem:[%s18204_s11 + $0x60] sm:$0xff] %vm38_vm0, %v9359_v56  ;;  %10247 = vst.msk [vmem:[%s18204_s11 + $0x160] sm:$0xff] %vm38_vm0, %v9808_v20  ;;  %v10528_v62 = vpop.f32.mrb[174].mxu0  ;;  %v10580_v32 = vpop.f32.mrb[174].mxu1 }
 0xa9c   :  { %v9374_v41 = vadd.f32 %v10528_v62, %v17871_v61  ;;  %v9823_v11 = vadd.f32 %v10580_v32, %v17871_v61  ;;  %v9368_v3 = vpop.f32.mrb[175].mxu0  ;;  %v9817_v13 = vpop.f32.mrb[175].mxu1 }
 0xa9d   :  { %v9369_v21 = vadd.f32 %v17871_v61, %v9368_v3  ;;  %v9818_v34 = vadd.f32 %v17871_v61, %v9817_v13 }
 0xa9e   :  { %9472 = vst.msk [vmem:[%s18204_s11 + $0x78] sm:$0xff] %vm38_vm0, %v9374_v41  ;;  %10250 = vst.msk [vmem:[%s18204_s11 + $0x178] sm:$0xff] %vm38_vm0, %v9823_v11 }
 0xa9f   :  { %9471 = vst.msk [vmem:[%s18204_s11 + $0x70] sm:$0xff] %vm38_vm0, %v9369_v21  ;;  %10249 = vst.msk [vmem:[%s18204_s11 + $0x170] sm:$0xff] %vm38_vm0, %v9818_v34  ;;  %v10531_v0 = vpop.f32.mrb[176].mxu0  ;;  %v10583_v50 = vpop.f32.mrb[176].mxu1 }
 0xaa0   :  { %v9384_v2 = vadd.f32 %v10531_v0, %v17871_v61  ;;  %v9833_v58 = vadd.f32 %v10583_v50, %v17871_v61  ;;  %v9378_v36 = vpop.f32.mrb[177].mxu0  ;;  %v9827_v18 = vpop.f32.mrb[177].mxu1 }
 0xaa1   :  { %v9379_v24 = vadd.f32 %v17871_v61, %v9378_v36  ;;  %v9828_v54 = vadd.f32 %v17871_v61, %v9827_v18 }
 0xaa2   :  { %9474 = vst.msk [vmem:[%s18204_s11 + $0x88] sm:$0xff] %vm38_vm0, %v9384_v2  ;;  %10252 = vst.msk [vmem:[%s18204_s11 + $0x188] sm:$0xff] %vm38_vm0, %v9833_v58 }
 0xaa3   :  { %9473 = vst.msk [vmem:[%s18204_s11 + $0x80] sm:$0xff] %vm38_vm0, %v9379_v24  ;;  %10251 = vst.msk [vmem:[%s18204_s11 + $0x180] sm:$0xff] %vm38_vm0, %v9828_v54  ;;  %v10534_v16 = vpop.f32.mrb[178].mxu0  ;;  %v10586_v6 = vpop.f32.mrb[178].mxu1 }
 0xaa4   :  { %v9394_v22 = vadd.f32 %v10534_v16, %v17871_v61  ;;  %v9843_v10 = vadd.f32 %v10586_v6, %v17871_v61  ;;  %v9388_v4 = vpop.f32.mrb[179].mxu0  ;;  %v9837_v38 = vpop.f32.mrb[179].mxu1 }
 0xaa5   :  { %v9389_v12 = vadd.f32 %v17871_v61, %v9388_v4  ;;  %v9838_v39 = vadd.f32 %v17871_v61, %v9837_v38 }
 0xaa6   :  { %9476 = vst.msk [vmem:[%s18204_s11 + $0x98] sm:$0xff] %vm38_vm0, %v9394_v22  ;;  %10254 = vst.msk [vmem:[%s18204_s11 + $0x198] sm:$0xff] %vm38_vm0, %v9843_v10 }
 0xaa7   :  { %9475 = vst.msk [vmem:[%s18204_s11 + $0x90] sm:$0xff] %vm38_vm0, %v9389_v12  ;;  %10253 = vst.msk [vmem:[%s18204_s11 + $0x190] sm:$0xff] %vm38_vm0, %v9838_v39  ;;  %v10537_v37 = vpop.f32.mrb[180].mxu0  ;;  %v10589_v1 = vpop.f32.mrb[180].mxu1 }
 0xaa8   :  { %v9404_v43 = vadd.f32 %v10537_v37, %v17871_v61  ;;  %v9853_v63 = vadd.f32 %v10589_v1, %v17871_v61  ;;  %v9398_v49 = vpop.f32.mrb[181].mxu0  ;;  %v9847_v55 = vpop.f32.mrb[181].mxu1 }
 0xaa9   :  { %v9399_v5 = vadd.f32 %v17871_v61, %v9398_v49  ;;  %v9848_v7 = vadd.f32 %v17871_v61, %v9847_v55 }
 0xaaa   :  { %9478 = vst.msk [vmem:[%s18204_s11 + $0xa8] sm:$0xff] %vm38_vm0, %v9404_v43  ;;  %10256 = vst.msk [vmem:[%s18204_s11 + $0x1a8] sm:$0xff] %vm38_vm0, %v9853_v63 }
 0xaab   :  { %9477 = vst.msk [vmem:[%s18204_s11 + $0xa0] sm:$0xff] %vm38_vm0, %v9399_v5  ;;  %10255 = vst.msk [vmem:[%s18204_s11 + $0x1a0] sm:$0xff] %vm38_vm0, %v9848_v7  ;;  %v10540_v44 = vpop.f32.mrb[182].mxu0  ;;  %v10592_v52 = vpop.f32.mrb[182].mxu1 }
 0xaac   :  { %v9414_v23 = vadd.f32 %v10540_v44, %v17871_v61  ;;  %v9863_v15 = vadd.f32 %v10592_v52, %v17871_v61  ;;  %v9408_v60 = vpop.f32.mrb[183].mxu0  ;;  %v9857_v51 = vpop.f32.mrb[183].mxu1 }
 0xaad   :  { %v9409_v45 = vadd.f32 %v17871_v61, %v9408_v60  ;;  %v9858_v17 = vadd.f32 %v17871_v61, %v9857_v51 }
 0xaae   :  { %9480 = vst.msk [vmem:[%s18204_s11 + $0xb8] sm:$0xff] %vm38_vm0, %v9414_v23  ;;  %10258 = vst.msk [vmem:[%s18204_s11 + $0x1b8] sm:$0xff] %vm38_vm0, %v9863_v15 }
 0xaaf   :  { %9479 = vst.msk [vmem:[%s18204_s11 + $0xb0] sm:$0xff] %vm38_vm0, %v9409_v45  ;;  %10257 = vst.msk [vmem:[%s18204_s11 + $0x1b0] sm:$0xff] %vm38_vm0, %v9858_v17  ;;  %v10543_v33 = vpop.f32.mrb[184].mxu0  ;;  %v10595_v14 = vpop.f32.mrb[184].mxu1 }
 0xab0   :  { %v9424_v25 = vadd.f32 %v10543_v33, %v17871_v61  ;;  %v9873_v9 = vadd.f32 %v10595_v14, %v17871_v61  ;;  %v9418_v8 = vpop.f32.mrb[185].mxu0  ;;  %v9867_v47 = vpop.f32.mrb[185].mxu1 }
 0xab1   :  { %v9419_v27 = vadd.f32 %v17871_v61, %v9418_v8  ;;  %v9868_v46 = vadd.f32 %v17871_v61, %v9867_v47 }
 0xab2   :  { %9482 = vst.msk [vmem:[%s18204_s11 + $0xc8] sm:$0xff] %vm38_vm0, %v9424_v25  ;;  %10260 = vst.msk [vmem:[%s18204_s11 + $0x1c8] sm:$0xff] %vm38_vm0, %v9873_v9 }
 0xab3   :  { %9481 = vst.msk [vmem:[%s18204_s11 + $0xc0] sm:$0xff] %vm38_vm0, %v9419_v27  ;;  %10259 = vst.msk [vmem:[%s18204_s11 + $0x1c0] sm:$0xff] %vm38_vm0, %v9868_v46  ;;  %v10546_v40 = vpop.f32.mrb[186].mxu0  ;;  %v10598_v53 = vpop.f32.mrb[186].mxu1 }
 0xab4   :  { %v9434_v35 = vadd.f32 %v10546_v40, %v17871_v61  ;;  %v9883_v59 = vadd.f32 %v10598_v53, %v17871_v61  ;;  %v9428_v30 = vpop.f32.mrb[187].mxu0  ;;  %v9877_v19 = vpop.f32.mrb[187].mxu1 }
 0xab5   :  { %v9429_v28 = vadd.f32 %v17871_v61, %v9428_v30  ;;  %v9878_v29 = vadd.f32 %v17871_v61, %v9877_v19 }
 0xab6   :  { %9484 = vst.msk [vmem:[%s18204_s11 + $0xd8] sm:$0xff] %vm38_vm0, %v9434_v35  ;;  %10262 = vst.msk [vmem:[%s18204_s11 + $0x1d8] sm:$0xff] %vm38_vm0, %v9883_v59 }
 0xab7   :  { %9483 = vst.msk [vmem:[%s18204_s11 + $0xd0] sm:$0xff] %vm38_vm0, %v9429_v28  ;;  %10261 = vst.msk [vmem:[%s18204_s11 + $0x1d0] sm:$0xff] %vm38_vm0, %v9878_v29  ;;  %v10549_v26 = vpop.f32.mrb[188].mxu0  ;;  %v10601_v48 = vpop.f32.mrb[188].mxu1 }
 0xab8   :  { %v9444_v42 = vadd.f32 %v10549_v26, %v17871_v61  ;;  %v9893_v31 = vadd.f32 %v10601_v48, %v17871_v61  ;;  %v9438_v57 = vpop.f32.mrb[189].mxu0  ;;  %v9887_v56 = vpop.f32.mrb[189].mxu1 }
 0xab9   :  { %v9439_v20 = vadd.f32 %v17871_v61, %v9438_v57  ;;  %v9888_v62 = vadd.f32 %v17871_v61, %v9887_v56 }
 0xaba   :  { %9486 = vst.msk [vmem:[%s18204_s11 + $0xe8] sm:$0xff] %vm38_vm0, %v9444_v42  ;;  %10264 = vst.msk [vmem:[%s18204_s11 + $0x1e8] sm:$0xff] %vm38_vm0, %v9893_v31 }
 0xabb   :  { %9485 = vst.msk [vmem:[%s18204_s11 + $0xe0] sm:$0xff] %vm38_vm0, %v9439_v20  ;;  %10263 = vst.msk [vmem:[%s18204_s11 + $0x1e0] sm:$0xff] %vm38_vm0, %v9888_v62  ;;  %v10552_v32 = vpop.f32.mrb[190].mxu0  ;;  %v10604_v41 = vpop.f32.mrb[190].mxu1 }
 0xabc   :  { %v9454_v11 = vadd.f32 %v10552_v32, %v17871_v61  ;;  %v9903_v3 = vadd.f32 %v10604_v41, %v17871_v61  ;;  %v9448_v13 = vpop.f32.mrb[191].mxu0  ;;  %v9897_v21 = vpop.f32.mrb[191].mxu1 }
 0xabd   :  { %v9449_v34 = vadd.f32 %v17871_v61, %v9448_v13  ;;  %v9898_v0 = vadd.f32 %v17871_v61, %v9897_v21 }
 0xabe   :  { %9488 = vst.msk [vmem:[%s18204_s11 + $0xf8] sm:$0xff] %vm38_vm0, %v9454_v11  ;;  %10266 = vst.msk [vmem:[%s18204_s11 + $0x1f8] sm:$0xff] %vm38_vm0, %v9903_v3 }
 0xabf   :  { %9487 = vst.msk [vmem:[%s18204_s11 + $0xf0] sm:$0xff] %vm38_vm0, %v9449_v34  ;;  %10265 = vst.msk [vmem:[%s18204_s11 + $0x1f0] sm:$0xff] %vm38_vm0, %v9898_v0 }

</bundles_post_ra>
